<compile_context>
chip_gen: v5e
topology: v5e:2x2
jax: 0.10.0
libtpu: 0.0.40
codegen_flags: <defaults>
</compile_context>

<pallas_src>
from functools import partial

import numpy as np
import jax
import jax.numpy as jnp
from jax.experimental import pallas as pl
from jax.experimental.pallas import tpu as pltpu


# --------------------------------- kernel ---------------------------------- #

_FUSED_ARG_ORDER = ("r1", "g1", "b1", "r2", "g2", "b2", "r3", "g3", "b3",
                    "s4", "f4", "b4", "w5", "b5")


def _fused_cnn_kernel(x_ref, r1_ref, g1_ref, b1_ref, r2_ref, g2_ref, b2_ref,
                      r3_ref, g3_ref, b3_ref, s4_ref, f4_ref, b4_ref,
                      w5_ref, b5_ref, o_ref):
    """Whole CnnModel forward in one kernel: 5 matmul/bias/ReLU stages."""

    def stage(x, sel_ref, tapw_ref, bias_ref, relu):
        # Y = act( sum_t (sel[t] @ x) @ tapw[t] + bias_row )
        acc = None
        for t in range(sel_ref.shape[0]):          # unrolled (3 or 5 taps)
            rows = jnp.dot(sel_ref[t], x, preferred_element_type=jnp.float32)
            part = jnp.dot(rows, tapw_ref[t], preferred_element_type=jnp.float32)
            acc = part if acc is None else acc + part
        acc = acc + bias_ref[...]                   # (1, N) broadcasts over rows
        return jnp.maximum(acc, 0.0) if relu else acc

    y = x_ref[...]                                    # (B*42, 42*Cin)
    y = stage(y, r1_ref, g1_ref, b1_ref, relu=True)   # conv1+ReLU  (B*20, 20*32)
    y = stage(y, r2_ref, g2_ref, b2_ref, relu=True)   # conv2+ReLU  (B*10, 10*32)
    y = stage(y, r3_ref, g3_ref, b3_ref, relu=True)   # conv3+ReLU  (B*5,  5*32)
    y = stage(y, s4_ref, f4_ref, b4_ref, relu=True)   # NCHW-flatten + fc4 + ReLU  (B, hidden)
    out = jnp.dot(y, w5_ref[...], preferred_element_type=jnp.float32) + b5_ref[...]
    # TODO(synk): dueling head (enable_dueling=True: V/A gather + avg/max/naive
    # combine) not implemented; this is the enable_dueling=False path.
    o_ref[...] = out.astype(o_ref.dtype)              # fc5 head  (B, action_dim)


def cnn_model_forward(x_nchw, fused, *, hist_len, state_shape):
    """x_nchw: (B, hist_len, S, S) -> (B, action_dim) via one fused pallas_call."""
    b = x_nchw.shape[0]
    # The only out-of-kernel glue: NCHW input -> row-flattened NHWC (B*H, W*C).
    x = x_nchw.reshape(b, hist_len, state_shape, state_shape)
    x = jnp.transpose(x, (0, 2, 3, 1)).reshape(b * state_shape,
                                               state_shape * hist_len)
    args = (x,) + tuple(fused[k] for k in _FUSED_ARG_ORDER)
    action_dim = fused["b5"].shape[-1]

    # Advisory cost hint for the XLA scheduler.
    flops = 0
    cols = x.shape[1]
    for sel_k, w_k in (("r1", "g1"), ("r2", "g2"), ("r3", "g3"), ("s4", "f4")):
        taps, m, k = fused[sel_k].shape
        n = fused[w_k].shape[2]
        flops += taps * 2 * (m * k * cols + m * cols * n)
        cols = n
    flops += 2 * b * cols * action_dim
    bytes_accessed = sum(int(a.size) * 4 for a in args) + b * action_dim * 4

    vmem = pl.BlockSpec(memory_space=pltpu.MemorySpace.VMEM)
    return pl.pallas_call(
        _fused_cnn_kernel,
        out_shape=jax.ShapeDtypeStruct((b, action_dim), jnp.float32),
        in_specs=[vmem] * len(args),
        out_specs=vmem,
        compiler_params=pltpu.CompilerParams(
            vmem_limit_bytes=32 * 1024 * 1024),
        cost_estimate=pl.CostEstimate(flops=int(flops), transcendentals=0,
                                      bytes_accessed=int(bytes_accessed)),
    )(*args)


# ------------------- host-side construction of tap matrices ----------------- #

def _conv_out_size(n, k, s, p):
    return (n + 2 * p - k) // s + 1


def _row_select_taps(batch, h_in, h_out, pad, stride, ksize):
    # R[ki] @ X picks, for every (b, ho), input row hi = stride*ho + ki - pad.
    # Out-of-range hi -> all-zero row == zero padding along H.
    r = np.zeros((ksize, batch * h_out, batch * h_in), np.float32)
    for ki in range(ksize):
        for b in range(batch):
            for ho in range(h_out):
                hi = stride * ho + ki - pad
                if 0 <= hi < h_in:
                    r[ki, b * h_out + ho, b * h_in + hi] = 1.0
    return r


def _col_weight_taps(w_hwio, w_in, w_out, pad, stride):
    # G[ki][wi*Cin+ci, wo*Cout+co] = W[ki, kj, ci, co] with kj = wi - stride*wo + pad.
    # Missing (out-of-range) wi rows implement the zero padding along W.
    kh, kw, cin, cout = w_hwio.shape
    g = np.zeros((kh, w_in * cin, w_out * cout), np.float32)
    for ki in range(kh):
        for wo in range(w_out):
            for kj in range(kw):
                wi = stride * wo + kj - pad
                if 0 <= wi < w_in:
                    g[ki, wi * cin:(wi + 1) * cin,
                      wo * cout:(wo + 1) * cout] = w_hwio[ki, kj]
    return g


def _fc4_taps(fc4_w, h_sp, w_sp, c, batch):
    # fc4 consumes the PyTorch NCHW flatten (idx = c*H*W + h*W + w) of conv3's
    # output.  Decompose it over the h rows: S[h] (B, B*H) row-selections and
    # F[h] (W*C, hidden) permuted fc4-weight slabs.
    hidden = fc4_w.shape[1]
    s = np.zeros((h_sp, batch, batch * h_sp), np.float32)
    f = np.zeros((h_sp, w_sp * c, hidden), np.float32)
    for h in range(h_sp):
        for b in range(batch):
            s[h, b, b * h_sp + h] = 1.0
        for w in range(w_sp):
            for ci in range(c):
                f[h, w * c + ci, :] = fc4_w[ci * h_sp * w_sp + h * w_sp + w, :]
    return s, f


def prepare_fused_params(params, *, batch, hist_len, state_shape):
    """Precompute (once, host side) the tap matrices consumed by the kernel."""
    del hist_len  # implicit in conv1_w's Cin
    w1 = np.asarray(params["conv1_w"]); b1 = np.asarray(params["conv1_b"])
    w2 = np.asarray(params["conv2_w"]); b2 = np.asarray(params["conv2_b"])
    w3 = np.asarray(params["conv3_w"]); b3 = np.asarray(params["conv3_b"])
    w4 = np.asarray(params["fc4_w"]);   b4 = np.asarray(params["fc4_b"])
    w5 = np.asarray(params["fc5_w"]);   b5 = np.asarray(params["fc5_b"])

    s1 = state_shape                      # 42
    s2 = _conv_out_size(s1, 3, 2, 0)      # conv1: 42 -> 20
    s3 = _conv_out_size(s2, 3, 2, 1)      # conv2: 20 -> 10
    s4 = _conv_out_size(s3, 3, 2, 1)      # conv3: 10 -> 5
    c_out = w3.shape[-1]
    assert w4.shape[0] == c_out * s4 * s4, (w4.shape, c_out, s4)

    fused = {
        "r1": _row_select_taps(batch, s1, s2, pad=0, stride=2, ksize=3),
        "g1": _col_weight_taps(w1, s1, s2, pad=0, stride=2),
        "b1": np.tile(b1, s2)[None, :],
        "r2": _row_select_taps(batch, s2, s3, pad=1, stride=2, ksize=3),
        "g2": _col_weight_taps(w2, s2, s3, pad=1, stride=2),
        "b2": np.tile(b2, s3)[None, :],
        "r3": _row_select_taps(batch, s3, s4, pad=1, stride=2, ksize=3),
        "g3": _col_weight_taps(w3, s3, s4, pad=1, stride=2),
        "b3": np.tile(b3, s4)[None, :],
        "b4": b4[None, :],
        "w5": w5,
        "b5": b5[None, :],
    }
    fused["s4"], fused["f4"] = _fc4_taps(w4, s4, s4, c_out, batch)
    return {k: jnp.asarray(v, jnp.float32) for k, v in fused.items()}


# ------------------------------ parameter init ------------------------------ #

def _normalized_columns(key, shape, std):
    # port of normalized_columns_initializer: per output unit L2-normalized.
    w = jax.random.normal(key, shape, jnp.float32)
    return w * std / jnp.sqrt(jnp.sum(jnp.square(w), axis=0, keepdims=True))


def init_params(key, hist_len, hidden_dim, action_dim):
    ks = jax.random.split(key, 8)
    p = {}
    p["conv1_w"] = 0.05 * jax.random.normal(ks[0], (3, 3, hist_len, 32), jnp.float32)
    p["conv1_b"] = 0.01 * jax.random.normal(ks[1], (32,), jnp.float32)
    p["conv2_w"] = 0.05 * jax.random.normal(ks[2], (3, 3, 32, 32), jnp.float32)
    p["conv2_b"] = 0.01 * jax.random.normal(ks[3], (32,), jnp.float32)
    p["conv3_w"] = 0.05 * jax.random.normal(ks[4], (3, 3, 32, 32), jnp.float32)
    p["conv3_b"] = 0.01 * jax.random.normal(ks[5], (32,), jnp.float32)
    p["fc4_w"] = _normalized_columns(ks[6], (32 * 5 * 5, hidden_dim), 0.0001)
    p["fc4_b"] = jnp.zeros((hidden_dim,), jnp.float32)
    p["fc5_w"] = _normalized_columns(ks[7], (hidden_dim, action_dim), 0.0001)
    p["fc5_b"] = jnp.zeros((action_dim,), jnp.float32)
    return p


# ----------------------------- plain-XLA reference -------------------------- #

def reference_forward(x_nchw, params):
    prec = jax.lax.Precision.HIGHEST

    def conv_relu(x, w_hwio, b, stride, pad):
        y = jax.lax.conv_general_dilated(
            x, w_hwio, window_strides=(stride, stride),
            padding=[(pad, pad), (pad, pad)],
            dimension_numbers=("NCHW", "HWIO", "NCHW"), precision=prec)
        return jax.nn.relu(y + b.reshape(1, -1, 1, 1))

    x = conv_relu(x_nchw, params["conv1_w"], params["conv1_b"], 2, 0)
    x = conv_relu(x, params["conv2_w"], params["conv2_b"], 2, 1)
    x = conv_relu(x, params["conv3_w"], params["conv3_b"], 2, 1)
    x = x.reshape(x.shape[0], -1)      # PyTorch NCHW flatten: (B, 32*5*5)
    x = jax.nn.relu(jnp.dot(x, params["fc4_w"], precision=prec) + params["fc4_b"])
    return jnp.dot(x, params["fc5_w"], precision=prec) + params["fc5_b"]


# ----------------------------------- main ----------------------------------- #

if __name__ == "__main__":
    # Geometry implied by fc4 = Linear(32*5*5, hidden): state_shape must be 42
    # (42 -conv1(s2,p0)-> 20 -conv2(s2,p1)-> 10 -conv3(s2,p1)-> 5).
    B, hist_len, S = 2, 4, 42
    hidden_dim, action_dim = 32, 6

    key = jax.random.PRNGKey(0)
    k_x, k_p = jax.random.split(key)
    x = jax.random.normal(k_x, (B, hist_len, S, S), jnp.float32)   # NCHW input
    params = init_params(k_p, hist_len, hidden_dim, action_dim)
    fused = prepare_fused_params(params, batch=B, hist_len=hist_len, state_shape=S)

    fwd = jax.jit(partial(cnn_model_forward, hist_len=hist_len, state_shape=S))
    out = fwd(x, fused)
    jax.block_until_ready(out)

    assert out.shape == (B, action_dim), out.shape
    assert bool(jnp.all(jnp.isfinite(out)))

    # Validate the fused kernel against the plain-XLA reference forward.
    ref = jax.jit(reference_forward)(x, params)
    max_err = float(jnp.max(jnp.abs(out - ref)))
    assert bool(jnp.allclose(out, ref, rtol=5e-2, atol=1e-9)), \
        f"kernel/reference mismatch, max |err| = {max_err}"

    print("KERNEL_OK")
</pallas_src>

<mosaic_0001>
module attributes {stable_mosaic.version = 11 : i64} {
  func.func @_fused_cnn_kernel(%arg0: memref<84x168xf32, #tpu.memory_space<vmem>>, %arg1: memref<3x40x84xf32, #tpu.memory_space<vmem>>, %arg2: memref<3x168x640xf32, #tpu.memory_space<vmem>>, %arg3: memref<1x640xf32, #tpu.memory_space<vmem>>, %arg4: memref<3x20x40xf32, #tpu.memory_space<vmem>>, %arg5: memref<3x640x320xf32, #tpu.memory_space<vmem>>, %arg6: memref<1x320xf32, #tpu.memory_space<vmem>>, %arg7: memref<3x10x20xf32, #tpu.memory_space<vmem>>, %arg8: memref<3x320x160xf32, #tpu.memory_space<vmem>>, %arg9: memref<1x160xf32, #tpu.memory_space<vmem>>, %arg10: memref<5x2x10xf32, #tpu.memory_space<vmem>>, %arg11: memref<5x160x32xf32, #tpu.memory_space<vmem>>, %arg12: memref<1x32xf32, #tpu.memory_space<vmem>>, %arg13: memref<32x6xf32, #tpu.memory_space<vmem>>, %arg14: memref<1x6xf32, #tpu.memory_space<vmem>>, %arg15: memref<2x6xf32, #tpu.memory_space<vmem>>) attributes {dimension_semantics = [], scalar_prefetch = 0 : i64, scratch_operands = 0 : i64, tpu.core_type = #tpu.core_type<tc>} {
    %c0 = arith.constant 0 : index
    %c0_0 = arith.constant 0 : index
    %0 = vector.load %arg0[%c0, %c0_0] : memref<84x168xf32, #tpu.memory_space<vmem>>, vector<84x168xf32>
    %c0_1 = arith.constant 0 : index
    %c0_2 = arith.constant 0 : index
    %c0_3 = arith.constant 0 : index
    %1 = vector.load %arg1[%c0_1, %c0_2, %c0_3] : memref<3x40x84xf32, #tpu.memory_space<vmem>>, vector<1x40x84xf32>
    %2 = vector.shape_cast %1 : vector<1x40x84xf32> to vector<40x84xf32>
    %cst = arith.constant dense<0.000000e+00> : vector<40x168xf32>
    %3 = tpu.matmul %2, %0, %cst {dimension_numbers = #tpu.dot_dimension_numbers<[1], [0], [0], [1], [0, 0, 1, 1], [], []>} : vector<40x84xf32>, vector<84x168xf32>, vector<40x168xf32> -> vector<40x168xf32>
    %c0_4 = arith.constant 0 : index
    %c0_5 = arith.constant 0 : index
    %c0_6 = arith.constant 0 : index
    %4 = vector.load %arg2[%c0_4, %c0_5, %c0_6] : memref<3x168x640xf32, #tpu.memory_space<vmem>>, vector<1x168x640xf32>
    %5 = vector.shape_cast %4 : vector<1x168x640xf32> to vector<168x640xf32>
    %cst_7 = arith.constant dense<0.000000e+00> : vector<40x640xf32>
    %6 = tpu.matmul %3, %5, %cst_7 {dimension_numbers = #tpu.dot_dimension_numbers<[1], [0], [0], [1], [0, 0, 1, 1], [], []>} : vector<40x168xf32>, vector<168x640xf32>, vector<40x640xf32> -> vector<40x640xf32>
    %c1 = arith.constant 1 : index
    %c0_8 = arith.constant 0 : index
    %c0_9 = arith.constant 0 : index
    %7 = vector.load %arg1[%c1, %c0_8, %c0_9] : memref<3x40x84xf32, #tpu.memory_space<vmem>>, vector<1x40x84xf32>
    %8 = vector.shape_cast %7 : vector<1x40x84xf32> to vector<40x84xf32>
    %cst_10 = arith.constant dense<0.000000e+00> : vector<40x168xf32>
    %9 = tpu.matmul %8, %0, %cst_10 {dimension_numbers = #tpu.dot_dimension_numbers<[1], [0], [0], [1], [0, 0, 1, 1], [], []>} : vector<40x84xf32>, vector<84x168xf32>, vector<40x168xf32> -> vector<40x168xf32>
    %c1_11 = arith.constant 1 : index
    %c0_12 = arith.constant 0 : index
    %c0_13 = arith.constant 0 : index
    %10 = vector.load %arg2[%c1_11, %c0_12, %c0_13] : memref<3x168x640xf32, #tpu.memory_space<vmem>>, vector<1x168x640xf32>
    %11 = vector.shape_cast %10 : vector<1x168x640xf32> to vector<168x640xf32>
    %cst_14 = arith.constant dense<0.000000e+00> : vector<40x640xf32>
    %12 = tpu.matmul %9, %11, %cst_14 {dimension_numbers = #tpu.dot_dimension_numbers<[1], [0], [0], [1], [0, 0, 1, 1], [], []>} : vector<40x168xf32>, vector<168x640xf32>, vector<40x640xf32> -> vector<40x640xf32>
    %13 = arith.addf %6, %12 : vector<40x640xf32>
    %c2 = arith.constant 2 : index
    %c0_15 = arith.constant 0 : index
    %c0_16 = arith.constant 0 : index
    %14 = vector.load %arg1[%c2, %c0_15, %c0_16] : memref<3x40x84xf32, #tpu.memory_space<vmem>>, vector<1x40x84xf32>
    %15 = vector.shape_cast %14 : vector<1x40x84xf32> to vector<40x84xf32>
    %cst_17 = arith.constant dense<0.000000e+00> : vector<40x168xf32>
    %16 = tpu.matmul %15, %0, %cst_17 {dimension_numbers = #tpu.dot_dimension_numbers<[1], [0], [0], [1], [0, 0, 1, 1], [], []>} : vector<40x84xf32>, vector<84x168xf32>, vector<40x168xf32> -> vector<40x168xf32>
    %c2_18 = arith.constant 2 : index
    %c0_19 = arith.constant 0 : index
    %c0_20 = arith.constant 0 : index
    %17 = vector.load %arg2[%c2_18, %c0_19, %c0_20] : memref<3x168x640xf32, #tpu.memory_space<vmem>>, vector<1x168x640xf32>
    %18 = vector.shape_cast %17 : vector<1x168x640xf32> to vector<168x640xf32>
    %cst_21 = arith.constant dense<0.000000e+00> : vector<40x640xf32>
    %19 = tpu.matmul %16, %18, %cst_21 {dimension_numbers = #tpu.dot_dimension_numbers<[1], [0], [0], [1], [0, 0, 1, 1], [], []>} : vector<40x168xf32>, vector<168x640xf32>, vector<40x640xf32> -> vector<40x640xf32>
    %20 = arith.addf %13, %19 : vector<40x640xf32>
    %c0_22 = arith.constant 0 : index
    %c0_23 = arith.constant 0 : index
    %21 = vector.load %arg3[%c0_22, %c0_23] : memref<1x640xf32, #tpu.memory_space<vmem>>, vector<1x640xf32>
    %22 = vector.broadcast %21 : vector<1x640xf32> to vector<40x640xf32>
    %23 = arith.addf %20, %22 : vector<40x640xf32>
    %cst_24 = arith.constant 0.000000e+00 : f32
    %24 = vector.broadcast %cst_24 : f32 to vector<40x640xf32>
    %25 = arith.maximumf %23, %24 : vector<40x640xf32>
    %c0_25 = arith.constant 0 : index
    %c0_26 = arith.constant 0 : index
    %c0_27 = arith.constant 0 : index
    %26 = vector.load %arg4[%c0_25, %c0_26, %c0_27] : memref<3x20x40xf32, #tpu.memory_space<vmem>>, vector<1x20x40xf32>
    %27 = vector.shape_cast %26 : vector<1x20x40xf32> to vector<20x40xf32>
    %cst_28 = arith.constant dense<0.000000e+00> : vector<20x640xf32>
    %28 = tpu.matmul %27, %25, %cst_28 {dimension_numbers = #tpu.dot_dimension_numbers<[1], [0], [0], [1], [0, 0, 1, 1], [], []>} : vector<20x40xf32>, vector<40x640xf32>, vector<20x640xf32> -> vector<20x640xf32>
    %c0_29 = arith.constant 0 : index
    %c0_30 = arith.constant 0 : index
    %c0_31 = arith.constant 0 : index
    %29 = vector.load %arg5[%c0_29, %c0_30, %c0_31] : memref<3x640x320xf32, #tpu.memory_space<vmem>>, vector<1x640x320xf32>
    %30 = vector.shape_cast %29 : vector<1x640x320xf32> to vector<640x320xf32>
    %cst_32 = arith.constant dense<0.000000e+00> : vector<20x320xf32>
    %31 = tpu.matmul %28, %30, %cst_32 {dimension_numbers = #tpu.dot_dimension_numbers<[1], [0], [0], [1], [0, 0, 1, 1], [], []>} : vector<20x640xf32>, vector<640x320xf32>, vector<20x320xf32> -> vector<20x320xf32>
    %c1_33 = arith.constant 1 : index
    %c0_34 = arith.constant 0 : index
    %c0_35 = arith.constant 0 : index
    %32 = vector.load %arg4[%c1_33, %c0_34, %c0_35] : memref<3x20x40xf32, #tpu.memory_space<vmem>>, vector<1x20x40xf32>
    %33 = vector.shape_cast %32 : vector<1x20x40xf32> to vector<20x40xf32>
    %cst_36 = arith.constant dense<0.000000e+00> : vector<20x640xf32>
    %34 = tpu.matmul %33, %25, %cst_36 {dimension_numbers = #tpu.dot_dimension_numbers<[1], [0], [0], [1], [0, 0, 1, 1], [], []>} : vector<20x40xf32>, vector<40x640xf32>, vector<20x640xf32> -> vector<20x640xf32>
    %c1_37 = arith.constant 1 : index
    %c0_38 = arith.constant 0 : index
    %c0_39 = arith.constant 0 : index
    %35 = vector.load %arg5[%c1_37, %c0_38, %c0_39] : memref<3x640x320xf32, #tpu.memory_space<vmem>>, vector<1x640x320xf32>
    %36 = vector.shape_cast %35 : vector<1x640x320xf32> to vector<640x320xf32>
    %cst_40 = arith.constant dense<0.000000e+00> : vector<20x320xf32>
    %37 = tpu.matmul %34, %36, %cst_40 {dimension_numbers = #tpu.dot_dimension_numbers<[1], [0], [0], [1], [0, 0, 1, 1], [], []>} : vector<20x640xf32>, vector<640x320xf32>, vector<20x320xf32> -> vector<20x320xf32>
    %38 = arith.addf %31, %37 : vector<20x320xf32>
    %c2_41 = arith.constant 2 : index
    %c0_42 = arith.constant 0 : index
    %c0_43 = arith.constant 0 : index
    %39 = vector.load %arg4[%c2_41, %c0_42, %c0_43] : memref<3x20x40xf32, #tpu.memory_space<vmem>>, vector<1x20x40xf32>
    %40 = vector.shape_cast %39 : vector<1x20x40xf32> to vector<20x40xf32>
    %cst_44 = arith.constant dense<0.000000e+00> : vector<20x640xf32>
    %41 = tpu.matmul %40, %25, %cst_44 {dimension_numbers = #tpu.dot_dimension_numbers<[1], [0], [0], [1], [0, 0, 1, 1], [], []>} : vector<20x40xf32>, vector<40x640xf32>, vector<20x640xf32> -> vector<20x640xf32>
    %c2_45 = arith.constant 2 : index
    %c0_46 = arith.constant 0 : index
    %c0_47 = arith.constant 0 : index
    %42 = vector.load %arg5[%c2_45, %c0_46, %c0_47] : memref<3x640x320xf32, #tpu.memory_space<vmem>>, vector<1x640x320xf32>
    %43 = vector.shape_cast %42 : vector<1x640x320xf32> to vector<640x320xf32>
    %cst_48 = arith.constant dense<0.000000e+00> : vector<20x320xf32>
    %44 = tpu.matmul %41, %43, %cst_48 {dimension_numbers = #tpu.dot_dimension_numbers<[1], [0], [0], [1], [0, 0, 1, 1], [], []>} : vector<20x640xf32>, vector<640x320xf32>, vector<20x320xf32> -> vector<20x320xf32>
    %45 = arith.addf %38, %44 : vector<20x320xf32>
    %c0_49 = arith.constant 0 : index
    %c0_50 = arith.constant 0 : index
    %46 = vector.load %arg6[%c0_49, %c0_50] : memref<1x320xf32, #tpu.memory_space<vmem>>, vector<1x320xf32>
    %47 = vector.broadcast %46 : vector<1x320xf32> to vector<20x320xf32>
    %48 = arith.addf %45, %47 : vector<20x320xf32>
    %cst_51 = arith.constant 0.000000e+00 : f32
    %49 = vector.broadcast %cst_51 : f32 to vector<20x320xf32>
    %50 = arith.maximumf %48, %49 : vector<20x320xf32>
    %c0_52 = arith.constant 0 : index
    %c0_53 = arith.constant 0 : index
    %c0_54 = arith.constant 0 : index
    %51 = vector.load %arg7[%c0_52, %c0_53, %c0_54] : memref<3x10x20xf32, #tpu.memory_space<vmem>>, vector<1x10x20xf32>
    %52 = vector.shape_cast %51 : vector<1x10x20xf32> to vector<10x20xf32>
    %cst_55 = arith.constant dense<0.000000e+00> : vector<10x320xf32>
    %53 = tpu.matmul %52, %50, %cst_55 {dimension_numbers = #tpu.dot_dimension_numbers<[1], [0], [0], [1], [0, 0, 1, 1], [], []>} : vector<10x20xf32>, vector<20x320xf32>, vector<10x320xf32> -> vector<10x320xf32>
    %c0_56 = arith.constant 0 : index
    %c0_57 = arith.constant 0 : index
    %c0_58 = arith.constant 0 : index
    %54 = vector.load %arg8[%c0_56, %c0_57, %c0_58] : memref<3x320x160xf32, #tpu.memory_space<vmem>>, vector<1x320x160xf32>
    %55 = vector.shape_cast %54 : vector<1x320x160xf32> to vector<320x160xf32>
    %cst_59 = arith.constant dense<0.000000e+00> : vector<10x160xf32>
    %56 = tpu.matmul %53, %55, %cst_59 {dimension_numbers = #tpu.dot_dimension_numbers<[1], [0], [0], [1], [0, 0, 1, 1], [], []>} : vector<10x320xf32>, vector<320x160xf32>, vector<10x160xf32> -> vector<10x160xf32>
    %c1_60 = arith.constant 1 : index
    %c0_61 = arith.constant 0 : index
    %c0_62 = arith.constant 0 : index
    %57 = vector.load %arg7[%c1_60, %c0_61, %c0_62] : memref<3x10x20xf32, #tpu.memory_space<vmem>>, vector<1x10x20xf32>
    %58 = vector.shape_cast %57 : vector<1x10x20xf32> to vector<10x20xf32>
    %cst_63 = arith.constant dense<0.000000e+00> : vector<10x320xf32>
    %59 = tpu.matmul %58, %50, %cst_63 {dimension_numbers = #tpu.dot_dimension_numbers<[1], [0], [0], [1], [0, 0, 1, 1], [], []>} : vector<10x20xf32>, vector<20x320xf32>, vector<10x320xf32> -> vector<10x320xf32>
    %c1_64 = arith.constant 1 : index
    %c0_65 = arith.constant 0 : index
    %c0_66 = arith.constant 0 : index
    %60 = vector.load %arg8[%c1_64, %c0_65, %c0_66] : memref<3x320x160xf32, #tpu.memory_space<vmem>>, vector<1x320x160xf32>
    %61 = vector.shape_cast %60 : vector<1x320x160xf32> to vector<320x160xf32>
    %cst_67 = arith.constant dense<0.000000e+00> : vector<10x160xf32>
    %62 = tpu.matmul %59, %61, %cst_67 {dimension_numbers = #tpu.dot_dimension_numbers<[1], [0], [0], [1], [0, 0, 1, 1], [], []>} : vector<10x320xf32>, vector<320x160xf32>, vector<10x160xf32> -> vector<10x160xf32>
    %63 = arith.addf %56, %62 : vector<10x160xf32>
    %c2_68 = arith.constant 2 : index
    %c0_69 = arith.constant 0 : index
    %c0_70 = arith.constant 0 : index
    %64 = vector.load %arg7[%c2_68, %c0_69, %c0_70] : memref<3x10x20xf32, #tpu.memory_space<vmem>>, vector<1x10x20xf32>
    %65 = vector.shape_cast %64 : vector<1x10x20xf32> to vector<10x20xf32>
    %cst_71 = arith.constant dense<0.000000e+00> : vector<10x320xf32>
    %66 = tpu.matmul %65, %50, %cst_71 {dimension_numbers = #tpu.dot_dimension_numbers<[1], [0], [0], [1], [0, 0, 1, 1], [], []>} : vector<10x20xf32>, vector<20x320xf32>, vector<10x320xf32> -> vector<10x320xf32>
    %c2_72 = arith.constant 2 : index
    %c0_73 = arith.constant 0 : index
    %c0_74 = arith.constant 0 : index
    %67 = vector.load %arg8[%c2_72, %c0_73, %c0_74] : memref<3x320x160xf32, #tpu.memory_space<vmem>>, vector<1x320x160xf32>
    %68 = vector.shape_cast %67 : vector<1x320x160xf32> to vector<320x160xf32>
    %cst_75 = arith.constant dense<0.000000e+00> : vector<10x160xf32>
    %69 = tpu.matmul %66, %68, %cst_75 {dimension_numbers = #tpu.dot_dimension_numbers<[1], [0], [0], [1], [0, 0, 1, 1], [], []>} : vector<10x320xf32>, vector<320x160xf32>, vector<10x160xf32> -> vector<10x160xf32>
    %70 = arith.addf %63, %69 : vector<10x160xf32>
    %c0_76 = arith.constant 0 : index
    %c0_77 = arith.constant 0 : index
    %71 = vector.load %arg9[%c0_76, %c0_77] : memref<1x160xf32, #tpu.memory_space<vmem>>, vector<1x160xf32>
    %72 = vector.broadcast %71 : vector<1x160xf32> to vector<10x160xf32>
    %73 = arith.addf %70, %72 : vector<10x160xf32>
    %cst_78 = arith.constant 0.000000e+00 : f32
    %74 = vector.broadcast %cst_78 : f32 to vector<10x160xf32>
    %75 = arith.maximumf %73, %74 : vector<10x160xf32>
    %c0_79 = arith.constant 0 : index
    %c0_80 = arith.constant 0 : index
    %c0_81 = arith.constant 0 : index
    %76 = vector.load %arg10[%c0_79, %c0_80, %c0_81] : memref<5x2x10xf32, #tpu.memory_space<vmem>>, vector<1x2x10xf32>
    %77 = vector.shape_cast %76 : vector<1x2x10xf32> to vector<2x10xf32>
    %cst_82 = arith.constant dense<0.000000e+00> : vector<2x160xf32>
    %78 = tpu.matmul %77, %75, %cst_82 {dimension_numbers = #tpu.dot_dimension_numbers<[1], [0], [0], [1], [0, 0, 1, 1], [], []>} : vector<2x10xf32>, vector<10x160xf32>, vector<2x160xf32> -> vector<2x160xf32>
    %c0_83 = arith.constant 0 : index
    %c0_84 = arith.constant 0 : index
    %c0_85 = arith.constant 0 : index
    %79 = vector.load %arg11[%c0_83, %c0_84, %c0_85] : memref<5x160x32xf32, #tpu.memory_space<vmem>>, vector<1x160x32xf32>
    %80 = vector.shape_cast %79 : vector<1x160x32xf32> to vector<160x32xf32>
    %cst_86 = arith.constant dense<0.000000e+00> : vector<2x32xf32>
    %81 = tpu.matmul %78, %80, %cst_86 {dimension_numbers = #tpu.dot_dimension_numbers<[1], [0], [0], [1], [0, 0, 1, 1], [], []>} : vector<2x160xf32>, vector<160x32xf32>, vector<2x32xf32> -> vector<2x32xf32>
    %c1_87 = arith.constant 1 : index
    %c0_88 = arith.constant 0 : index
    %c0_89 = arith.constant 0 : index
    %82 = vector.load %arg10[%c1_87, %c0_88, %c0_89] : memref<5x2x10xf32, #tpu.memory_space<vmem>>, vector<1x2x10xf32>
    %83 = vector.shape_cast %82 : vector<1x2x10xf32> to vector<2x10xf32>
    %cst_90 = arith.constant dense<0.000000e+00> : vector<2x160xf32>
    %84 = tpu.matmul %83, %75, %cst_90 {dimension_numbers = #tpu.dot_dimension_numbers<[1], [0], [0], [1], [0, 0, 1, 1], [], []>} : vector<2x10xf32>, vector<10x160xf32>, vector<2x160xf32> -> vector<2x160xf32>
    %c1_91 = arith.constant 1 : index
    %c0_92 = arith.constant 0 : index
    %c0_93 = arith.constant 0 : index
    %85 = vector.load %arg11[%c1_91, %c0_92, %c0_93] : memref<5x160x32xf32, #tpu.memory_space<vmem>>, vector<1x160x32xf32>
    %86 = vector.shape_cast %85 : vector<1x160x32xf32> to vector<160x32xf32>
    %cst_94 = arith.constant dense<0.000000e+00> : vector<2x32xf32>
    %87 = tpu.matmul %84, %86, %cst_94 {dimension_numbers = #tpu.dot_dimension_numbers<[1], [0], [0], [1], [0, 0, 1, 1], [], []>} : vector<2x160xf32>, vector<160x32xf32>, vector<2x32xf32> -> vector<2x32xf32>
    %88 = arith.addf %81, %87 : vector<2x32xf32>
    %c2_95 = arith.constant 2 : index
    %c0_96 = arith.constant 0 : index
    %c0_97 = arith.constant 0 : index
    %89 = vector.load %arg10[%c2_95, %c0_96, %c0_97] : memref<5x2x10xf32, #tpu.memory_space<vmem>>, vector<1x2x10xf32>
    %90 = vector.shape_cast %89 : vector<1x2x10xf32> to vector<2x10xf32>
    %cst_98 = arith.constant dense<0.000000e+00> : vector<2x160xf32>
    %91 = tpu.matmul %90, %75, %cst_98 {dimension_numbers = #tpu.dot_dimension_numbers<[1], [0], [0], [1], [0, 0, 1, 1], [], []>} : vector<2x10xf32>, vector<10x160xf32>, vector<2x160xf32> -> vector<2x160xf32>
    %c2_99 = arith.constant 2 : index
    %c0_100 = arith.constant 0 : index
    %c0_101 = arith.constant 0 : index
    %92 = vector.load %arg11[%c2_99, %c0_100, %c0_101] : memref<5x160x32xf32, #tpu.memory_space<vmem>>, vector<1x160x32xf32>
    %93 = vector.shape_cast %92 : vector<1x160x32xf32> to vector<160x32xf32>
    %cst_102 = arith.constant dense<0.000000e+00> : vector<2x32xf32>
    %94 = tpu.matmul %91, %93, %cst_102 {dimension_numbers = #tpu.dot_dimension_numbers<[1], [0], [0], [1], [0, 0, 1, 1], [], []>} : vector<2x160xf32>, vector<160x32xf32>, vector<2x32xf32> -> vector<2x32xf32>
    %95 = arith.addf %88, %94 : vector<2x32xf32>
    %c3 = arith.constant 3 : index
    %c0_103 = arith.constant 0 : index
    %c0_104 = arith.constant 0 : index
    %96 = vector.load %arg10[%c3, %c0_103, %c0_104] : memref<5x2x10xf32, #tpu.memory_space<vmem>>, vector<1x2x10xf32>
    %97 = vector.shape_cast %96 : vector<1x2x10xf32> to vector<2x10xf32>
    %cst_105 = arith.constant dense<0.000000e+00> : vector<2x160xf32>
    %98 = tpu.matmul %97, %75, %cst_105 {dimension_numbers = #tpu.dot_dimension_numbers<[1], [0], [0], [1], [0, 0, 1, 1], [], []>} : vector<2x10xf32>, vector<10x160xf32>, vector<2x160xf32> -> vector<2x160xf32>
    %c3_106 = arith.constant 3 : index
    %c0_107 = arith.constant 0 : index
    %c0_108 = arith.constant 0 : index
    %99 = vector.load %arg11[%c3_106, %c0_107, %c0_108] : memref<5x160x32xf32, #tpu.memory_space<vmem>>, vector<1x160x32xf32>
    %100 = vector.shape_cast %99 : vector<1x160x32xf32> to vector<160x32xf32>
    %cst_109 = arith.constant dense<0.000000e+00> : vector<2x32xf32>
    %101 = tpu.matmul %98, %100, %cst_109 {dimension_numbers = #tpu.dot_dimension_numbers<[1], [0], [0], [1], [0, 0, 1, 1], [], []>} : vector<2x160xf32>, vector<160x32xf32>, vector<2x32xf32> -> vector<2x32xf32>
    %102 = arith.addf %95, %101 : vector<2x32xf32>
    %c4 = arith.constant 4 : index
    %c0_110 = arith.constant 0 : index
    %c0_111 = arith.constant 0 : index
    %103 = vector.load %arg10[%c4, %c0_110, %c0_111] : memref<5x2x10xf32, #tpu.memory_space<vmem>>, vector<1x2x10xf32>
    %104 = vector.shape_cast %103 : vector<1x2x10xf32> to vector<2x10xf32>
    %cst_112 = arith.constant dense<0.000000e+00> : vector<2x160xf32>
    %105 = tpu.matmul %104, %75, %cst_112 {dimension_numbers = #tpu.dot_dimension_numbers<[1], [0], [0], [1], [0, 0, 1, 1], [], []>} : vector<2x10xf32>, vector<10x160xf32>, vector<2x160xf32> -> vector<2x160xf32>
    %c4_113 = arith.constant 4 : index
    %c0_114 = arith.constant 0 : index
    %c0_115 = arith.constant 0 : index
    %106 = vector.load %arg11[%c4_113, %c0_114, %c0_115] : memref<5x160x32xf32, #tpu.memory_space<vmem>>, vector<1x160x32xf32>
    %107 = vector.shape_cast %106 : vector<1x160x32xf32> to vector<160x32xf32>
    %cst_116 = arith.constant dense<0.000000e+00> : vector<2x32xf32>
    %108 = tpu.matmul %105, %107, %cst_116 {dimension_numbers = #tpu.dot_dimension_numbers<[1], [0], [0], [1], [0, 0, 1, 1], [], []>} : vector<2x160xf32>, vector<160x32xf32>, vector<2x32xf32> -> vector<2x32xf32>
    %109 = arith.addf %102, %108 : vector<2x32xf32>
    %c0_117 = arith.constant 0 : index
    %c0_118 = arith.constant 0 : index
    %110 = vector.load %arg12[%c0_117, %c0_118] : memref<1x32xf32, #tpu.memory_space<vmem>>, vector<1x32xf32>
    %111 = vector.broadcast %110 : vector<1x32xf32> to vector<2x32xf32>
    %112 = arith.addf %109, %111 : vector<2x32xf32>
    %cst_119 = arith.constant 0.000000e+00 : f32
    %113 = vector.broadcast %cst_119 : f32 to vector<2x32xf32>
    %114 = arith.maximumf %112, %113 : vector<2x32xf32>
    %c0_120 = arith.constant 0 : index
    %c0_121 = arith.constant 0 : index
    %115 = vector.load %arg13[%c0_120, %c0_121] : memref<32x6xf32, #tpu.memory_space<vmem>>, vector<32x6xf32>
    %cst_122 = arith.constant dense<0.000000e+00> : vector<2x6xf32>
    %116 = tpu.matmul %114, %115, %cst_122 {dimension_numbers = #tpu.dot_dimension_numbers<[1], [0], [0], [1], [0, 0, 1, 1], [], []>} : vector<2x32xf32>, vector<32x6xf32>, vector<2x6xf32> -> vector<2x6xf32>
    %c0_123 = arith.constant 0 : index
    %c0_124 = arith.constant 0 : index
    %117 = vector.load %arg14[%c0_123, %c0_124] : memref<1x6xf32, #tpu.memory_space<vmem>>, vector<1x6xf32>
    %118 = vector.broadcast %117 : vector<1x6xf32> to vector<2x6xf32>
    %119 = arith.addf %116, %118 : vector<2x6xf32>
    %c0_125 = arith.constant 0 : index
    %c0_126 = arith.constant 0 : index
    %120 = vector.load %arg15[%c0_125, %c0_126] : memref<2x6xf32, #tpu.memory_space<vmem>>, vector<2x6xf32>
    tpu.vector_store %arg15[%c0_125, %c0_126], %119 {strides = array<i32>} : memref<2x6xf32, #tpu.memory_space<vmem>>, vector<2x6xf32>,
    return
  }
}

</mosaic_0001>

<bundles_post_ra>
// kernel: cnn_model_forward.1
= control target key start
LH: loop header
LB: loop body
LE: loop exit
PB: predicated region body
PF: predicated region fallthrough
CT: control target
= control target key end

     0   :  { %vm94_vm0 = vcmask 1043456   ;;  %s13011_s0 = inlined_call_operand.vmem [shape: f32[84,168], index: 0, kind: input, shape index: {}]   ;;  %s13012_s1 = inlined_call_operand.vmem [shape: f32[3,40,84], index: 1, kind: input, shape index: {}]   ;;  %s13013_s2 = inlined_call_operand.vmem [shape: f32[3,168,640], index: 2, kind: input, shape index: {}]   ;;  %s13014_s3 = inlined_call_operand.vmem [shape: f32[1,640], index: 3, kind: input, shape index: {}]   ;;  %s13015_s4 = inlined_call_operand.vmem [shape: f32[3,20,40], index: 4, kind: input, shape index: {}]   ;;  %s13016_s5 = inlined_call_operand.vmem [shape: f32[3,640,320], index: 5, kind: input, shape index: {}]   ;;  %s13017_s6 = inlined_call_operand.vmem [shape: f32[1,320], index: 6, kind: input, shape index: {}]   ;;  %s13018_s7 = inlined_call_operand.vmem [shape: f32[3,10,20], index: 7, kind: input, shape index: {}]   ;;  %s13019_s8 = inlined_call_operand.vmem [shape: f32[3,320,160], index: 8, kind: input, shape index: {}]   ;;  %s13020_s9 = inlined_call_operand.vmem [shape: f32[1,160], index: 9, kind: input, shape index: {}]   ;;  %s13021_s10 = inlined_call_operand.vmem [shape: f32[5,2,10], index: 10, kind: input, shape index: {}]   ;;  %s13022_s11 = inlined_call_operand.vmem [shape: f32[5,160,32], index: 11, kind: input, shape index: {}]   ;;  %s13023_s12 = inlined_call_operand.vmem [shape: f32[1,32], index: 12, kind: input, shape index: {}]   ;;  %s13024_s13 = inlined_call_operand.vmem [shape: f32[32,6], index: 13, kind: input, shape index: {}]   ;;  %s13025_s14 = inlined_call_operand.vmem [shape: f32[1,6], index: 14, kind: input, shape index: {}]   ;;  %s13026_s15 = inlined_call_operand.hbm [shape: f32[2,6], index: 15, kind: output, shape index: {}]  }
   0x1   :  { %v71_v0 = vld [vmem:[%s13011_s0 + $0xa0] sm:$0xf]  ;;  %v72_v1 = vld [vmem:[%s13011_s0 + $0xa8] sm:$0xf]  ;;  %v69_v2 = vld [vmem:[%s13011_s0 + $0x90] sm:$0xff] }
   0x2   :  { %5663 = vmatpush.msk.msra.mxu2 %vm94_vm0, %v71_v0  ;;  %5669 = vmatpush.msk.msra.mxu3 %vm94_vm0, %v72_v1  ;;  %v70_v3 = vld [vmem:[%s13011_s0 + $0x98] sm:$0xff]  ;;  %v67_v4 = vld [vmem:[%s13011_s0 + $0x80] sm:$0xff]  ;;  %v68_v5 = vld [vmem:[%s13011_s0 + $0x88] sm:$0xff] }
   0x3   :  { %5646 = vmatpush.msk.msra.mxu0 %vm94_vm0, %v71_v0  ;;  %5652 = vmatpush.msk.msra.mxu1 %vm94_vm0, %v72_v1  ;;  %v65_v6 = vld [vmem:[%s13011_s0 + $0x70] sm:$0xff]  ;;  %v66_v7 = vld [vmem:[%s13011_s0 + $0x78] sm:$0xff]  ;;  %v63_v8 = vld [vmem:[%s13011_s0 + $0x60] sm:$0xff] }
   0x4   :  { %297 = vmatpush.msra.mxu2 %v69_v2  ;;  %329 = vmatpush.msra.mxu3 %v70_v3  ;;  %v64_v9 = vld [vmem:[%s13011_s0 + $0x68] sm:$0xff]  ;;  %v61_v10 = vld [vmem:[%s13011_s0 + $0x50] sm:$0xff]  ;;  %v62_v11 = vld [vmem:[%s13011_s0 + $0x58] sm:$0xff] }
   0x5   :  { %107 = vmatpush.msra.mxu0 %v69_v2  ;;  %139 = vmatpush.msra.mxu1 %v70_v3 }
   0x6   :  { %298 = vmatpush.msra.mxu2 %v67_v4  ;;  %330 = vmatpush.msra.mxu3 %v68_v5 }
   0x7   :  { %108 = vmatpush.msra.mxu0 %v67_v4  ;;  %140 = vmatpush.msra.mxu1 %v68_v5 }
   0x8   :  { %299 = vmatpush.msra.mxu2 %v65_v6  ;;  %331 = vmatpush.msra.mxu3 %v66_v7 }
   0x9   :  { %109 = vmatpush.msra.mxu0 %v65_v6  ;;  %141 = vmatpush.msra.mxu1 %v66_v7 }
   0xa   :  { %300 = vmatpush.msra.mxu2 %v63_v8  ;;  %332 = vmatpush.msra.mxu3 %v64_v9 }
   0xb   :  { %20 = vsyncpa [#allocation3], 0  ;;  %v59_v12 = vld [vmem:[%s13011_s0 + $0x40] sm:$0xff]  ;;  %v60_v13 = vld [vmem:[%s13011_s0 + $0x48] sm:$0xff]  ;;  %110 = vmatpush.msra.mxu0 %v63_v8  ;;  %142 = vmatpush.msra.mxu1 %v64_v9  ;;  %vm78_vm1 = vcmask 687104   ;;  %vm461_vm2 = vcmask 326656  }
   0xc   :  { %301 = vmatpush.msra.mxu2 %v61_v10  ;;  %333 = vmatpush.msra.mxu3 %v62_v11  ;;  %v57_v14 = vld [vmem:[%s13011_s0 + $0x30] sm:$0xff]  ;;  %v58_v15 = vld [vmem:[%s13011_s0 + $0x38] sm:$0xff]  ;;  %v55_v16 = vld [vmem:[%s13011_s0 + $0x20] sm:$0xff]  ;;  %vm4102_vm3 = vcmask 162816   ;;  %vm4426_vm4 = vcmask 523264   ;;  %vm5041_vm5 = vcmask 1041408  }
   0xd   :  { %111 = vmatpush.msra.mxu0 %v61_v10  ;;  %143 = vmatpush.msra.mxu1 %v62_v11  ;;  %v56_v17 = vld [vmem:[%s13011_s0 + $0x28] sm:$0xff]  ;;  %v53_v18 = vld [vmem:[%s13011_s0 + $0x10] sm:$0xff]  ;;  %v54_v19 = vld [vmem:[%s13011_s0 + $0x18] sm:$0xff]  ;;  %vm5037_vm6 = vcmask 80896   ;;  %vm5174_vm7 = vcmask 261120   ;;  %s5637_s27 = sshll.u32 %s13026_s15, 4  ;;  %s5638_s27 = int_to_ptr.hbm [resolvable:$true] %s5637_s27 }
   0xe   :  { %302 = vmatpush.msra.mxu2 %v59_v12  ;;  %334 = vmatpush.msra.mxu3 %v60_v13  ;;  %v51_v20 = vld [vmem:[%s13011_s0] sm:$0xff]  ;;  %v52_v21 = vld [vmem:[%s13011_s0 + $0x8] sm:$0xff]  ;;  %v5745_v26 = vld [vmem:[%s13013_s2 + $0x578] sm:$0xff]  ;;  %vm5628_vm8 = vcmask 41984  }
   0xf   :  { %112 = vmatpush.msra.mxu0 %v59_v12  ;;  %144 = vmatpush.msra.mxu1 %v60_v13  ;;  %v5658_v22 = vld [vmem:[%s13012_s1 + $0x28] sm:$0xff]  ;;  %v73_v23 = vld [vmem:[%s13012_s1] sm:$0xff]  ;;  %v5740_v28 = vld [vmem:[%s13013_s2 + $0x550] sm:$0xff] }
  0x10   :  { %303 = vmatpush.msra.mxu2 %v57_v14  ;;  %335 = vmatpush.msra.mxu3 %v58_v15  ;;  %v5750_v24 = vld [vmem:[%s13013_s2 + $0x5a0] sm:$0xff]  ;;  %v5751_v25 = vld [vmem:[%s13013_s2 + $0x5a8] sm:$0xff]  ;;  %v5741_v29 = vld [vmem:[%s13013_s2 + $0x558] sm:$0xff] }
  0x11   :  { %113 = vmatpush.msra.mxu0 %v57_v14  ;;  %145 = vmatpush.msra.mxu1 %v58_v15  ;;  %v5746_v27 = vld [vmem:[%s13013_s2 + $0x580] sm:$0xff]  ;;  %v5659_v30 = vld [vmem:[%s13012_s1 + $0x30] sm:$0xff]  ;;  %v5735_v31 = vld [vmem:[%s13013_s2 + $0x528] sm:$0xff] }
  0x12   :  { %304 = vmatpush.msra.mxu2 %v55_v16  ;;  %336 = vmatpush.msra.mxu3 %v56_v17  ;;  %v5736_v32 = vld [vmem:[%s13013_s2 + $0x530] sm:$0xff]  ;;  %v74_v33 = vld [vmem:[%s13012_s1 + $0x8] sm:$0xff]  ;;  %v5730_v34 = vld [vmem:[%s13013_s2 + $0x500] sm:$0xff] }
  0x13   :  { %114 = vmatpush.msra.mxu0 %v55_v16  ;;  %146 = vmatpush.msra.mxu1 %v56_v17  ;;  %v5731_v35 = vld [vmem:[%s13013_s2 + $0x508] sm:$0xff]  ;;  %v5725_v37 = vld [vmem:[%s13013_s2 + $0x4d8] sm:$0xff]  ;;  %v5726_v38 = vld [vmem:[%s13013_s2 + $0x4e0] sm:$0xff] }
  0x14   :  { %305 = vmatpush.msra.mxu2 %v53_v18  ;;  %337 = vmatpush.msra.mxu3 %v54_v19  ;;  %v5775_v36 = vld [vmem:[%s13013_s2 + $0x668] sm:$0xff]  ;;  %v5770_v39 = vld [vmem:[%s13013_s2 + $0x640] sm:$0xff]  ;;  %v5720_v40 = vld [vmem:[%s13013_s2 + $0x4b0] sm:$0xff] }
  0x15   :  { %115 = vmatpush.msra.mxu0 %v53_v18  ;;  %147 = vmatpush.msra.mxu1 %v54_v19  ;;  %v5721_v41 = vld [vmem:[%s13013_s2 + $0x4b8] sm:$0xff]  ;;  %v5715_v43 = vld [vmem:[%s13013_s2 + $0x488] sm:$0xff]  ;;  %v5716_v44 = vld [vmem:[%s13013_s2 + $0x490] sm:$0xff] }
  0x16   :  { %306 = vmatpush.msra.mxu2 %v51_v20  ;;  %338 = vmatpush.msra.mxu3 %v52_v21  ;;  %v5660_v42 = vld [vmem:[%s13012_s1 + $0x38] sm:$0xff]  ;;  %v75_v45 = vld [vmem:[%s13012_s1 + $0x10] sm:$0xff]  ;;  %v5710_v46 = vld [vmem:[%s13013_s2 + $0x460] sm:$0xff] }
  0x17   :  { %5664 = vmatmul.msk.f32.vlgmr.msra.gmra.mxu2 %vm78_vm1, %v5658_v22  ;;  %5670 = vmatmul.msk.f32.vlgmr.msra.gmra.mxu3 %vm78_vm1, %v5658_v22  ;;  %v5711_v47 = vld [vmem:[%s13013_s2 + $0x468] sm:$0xff]  ;;  %v5765_v48 = vld [vmem:[%s13013_s2 + $0x618] sm:$0xff]  ;;  %v5706_v50 = vld [vmem:[%s13013_s2 + $0x440] sm:$0xff] }
  0x18   :  { %116 = vmatpush.msra.mxu0 %v51_v20  ;;  %148 = vmatpush.msra.mxu1 %v52_v21  ;;  %v5705_v49 = vld [vmem:[%s13013_s2 + $0x438] sm:$0xff]  ;;  %v5760_v51 = vld [vmem:[%s13013_s2 + $0x5f0] sm:$0xff]  ;;  %v5661_v54 = vld [vmem:[%s13012_s1 + $0x40] sm:$0xff] }
  0x19   :  { %5647 = vmatmul.msk.f32.vlgmr.msra.gmra.mxu0 %vm78_vm1, %v73_v23  ;;  %5653 = vmatmul.msk.f32.vlgmr.msra.gmra.mxu1 %vm78_vm1, %v73_v23  ;;  %v5700_v52 = vld [vmem:[%s13013_s2 + $0x410] sm:$0xff]  ;;  %v5701_v53 = vld [vmem:[%s13013_s2 + $0x418] sm:$0xff]  ;;  %v5695_v55 = vld [vmem:[%s13013_s2 + $0x3e8] sm:$0xff] }
  0x1a   :  { %477 = vmatpush.msrb.mxu0 %v5750_v24  ;;  %541 = vmatpush.msrb.mxu2 %v5751_v25  ;;  %v5696_v56 = vld [vmem:[%s13013_s2 + $0x3f0] sm:$0xff]  ;;  %v76_v57 = vld [vmem:[%s13012_s1 + $0x18] sm:$0xff]  ;;  %v5690_v58 = vld [vmem:[%s13013_s2 + $0x3c0] sm:$0xff] }
  0x1b   :  { %6821 = vmatpush.msrb.mxu3 %v5751_v25  ;;  %520 = vmatpush.msrb.mxu1 %v5775_v36  ;;  %v5691_v59 = vld [vmem:[%s13013_s2 + $0x3c8] sm:$0xff]  ;;  %v5685_v60 = vld [vmem:[%s13013_s2 + $0x398] sm:$0xff]  ;;  %v5686_v61 = vld [vmem:[%s13013_s2 + $0x3a0] sm:$0xff] }
  0x1c   :  { %478 = vmatpush.msrb.mxu0 %v5745_v26  ;;  %542 = vmatpush.msrb.mxu2 %v5746_v27  ;;  %v5680_v62 = vld [vmem:[%s13013_s2 + $0x370] sm:$0xff]  ;;  %v5681_v63 = vld [vmem:[%s13013_s2 + $0x378] sm:$0xff]  ;;  %v5662_v0 = vld [vmem:[%s13012_s1 + $0x48] sm:$0xff] }
  0x1d   :  { %6822 = vmatpush.msrb.mxu3 %v5746_v27  ;;  %521 = vmatpush.msrb.mxu1 %v5770_v39  ;;  %v77_v1 = vld [vmem:[%s13012_s1 + $0x20] sm:$0xff]  ;;  %v5675_v2 = vld [vmem:[%s13013_s2 + $0x348] sm:$0xff]  ;;  %v5676_v4 = vld [vmem:[%s13013_s2 + $0x350] sm:$0xff] }
  0x1e   :  { %479 = vmatpush.msrb.mxu0 %v5740_v28  ;;  %543 = vmatpush.msrb.mxu2 %v5741_v29  ;;  %v5755_v3 = vld [vmem:[%s13013_s2 + $0x5c8] sm:$0xff]  ;;  %v5753_v5 = vld [vmem:[%s13013_s2 + $0x5b8] sm:$0xff]  ;;  %v5748_v6 = vld [vmem:[%s13013_s2 + $0x590] sm:$0xff] }
  0x1f   :  { %5665 = vmatmul.msk.f32.gmra.mxu2 %vm78_vm1, %v5659_v30  ;;  %5671 = vmatmul.msk.f32.gmra.mxu3 %vm78_vm1, %v5659_v30  ;;  %v5743_v7 = vld [vmem:[%s13013_s2 + $0x568] sm:$0xff]  ;;  %v5738_v8 = vld [vmem:[%s13013_s2 + $0x540] sm:$0xff]  ;;  %v5752_v9 = vld [vmem:[%s13013_s2 + $0x5b0] sm:$0xff] }
  0x20   :  { %480 = vmatpush.msrb.mxu0 %v5735_v31  ;;  %544 = vmatpush.msrb.mxu2 %v5736_v32  ;;  %v5733_v10 = vld [vmem:[%s13013_s2 + $0x518] sm:$0xff]  ;;  %v5747_v11 = vld [vmem:[%s13013_s2 + $0x588] sm:$0xff]  ;;  %v5728_v12 = vld [vmem:[%s13013_s2 + $0x4f0] sm:$0xff] }
  0x21   :  { %5648 = vmatmul.msk.f32.gmra.mxu0 %vm78_vm1, %v74_v33  ;;  %5654 = vmatmul.msk.f32.gmra.mxu1 %vm78_vm1, %v74_v33  ;;  %v5742_v13 = vld [vmem:[%s13013_s2 + $0x560] sm:$0xff]  ;;  %v5723_v14 = vld [vmem:[%s13013_s2 + $0x4c8] sm:$0xff]  ;;  %v5737_v15 = vld [vmem:[%s13013_s2 + $0x538] sm:$0xff] }
  0x22   :  { %481 = vmatpush.msrb.mxu0 %v5730_v34  ;;  %545 = vmatpush.msrb.mxu2 %v5731_v35  ;;  %v5718_v16 = vld [vmem:[%s13013_s2 + $0x4a0] sm:$0xff]  ;;  %v5732_v17 = vld [vmem:[%s13013_s2 + $0x510] sm:$0xff]  ;;  %v5713_v18 = vld [vmem:[%s13013_s2 + $0x478] sm:$0xff] }
  0x23   :  { %6823 = vmatpush.msrb.mxu3 %v5741_v29  ;;  %522 = vmatpush.msrb.mxu1 %v5765_v48  ;;  %v5727_v19 = vld [vmem:[%s13013_s2 + $0x4e8] sm:$0xff]  ;;  %v5708_v20 = vld [vmem:[%s13013_s2 + $0x450] sm:$0xff]  ;;  %v5722_v21 = vld [vmem:[%s13013_s2 + $0x4c0] sm:$0xff] }
  0x24   :  { %482 = vmatpush.msrb.mxu0 %v5725_v37  ;;  %546 = vmatpush.msrb.mxu2 %v5726_v38  ;;  %v5703_v22 = vld [vmem:[%s13013_s2 + $0x428] sm:$0xff]  ;;  %v5717_v23 = vld [vmem:[%s13013_s2 + $0x498] sm:$0xff]  ;;  %v5698_v24 = vld [vmem:[%s13013_s2 + $0x400] sm:$0xff] }
  0x25   :  { %6824 = vmatpush.msrb.mxu3 %v5736_v32  ;;  %523 = vmatpush.msrb.mxu1 %v5760_v51  ;;  %v5777_v25 = vld [vmem:[%s13013_s2 + $0x678] sm:$0xff]  ;;  %v5712_v26 = vld [vmem:[%s13013_s2 + $0x470] sm:$0xff]  ;;  %v5707_v28 = vld [vmem:[%s13013_s2 + $0x448] sm:$0xff] }
  0x26   :  { %483 = vmatpush.msrb.mxu0 %v5720_v40  ;;  %547 = vmatpush.msrb.mxu2 %v5721_v41  ;;  %v5693_v27 = vld [vmem:[%s13013_s2 + $0x3d8] sm:$0xff]  ;;  %v5688_v29 = vld [vmem:[%s13013_s2 + $0x3b0] sm:$0xff]  ;;  %v5702_v30 = vld [vmem:[%s13013_s2 + $0x420] sm:$0xff] }
  0x27   :  { %5666 = vmatmul.msk.f32.gmra.mxu2 %vm78_vm1, %v5660_v42  ;;  %5672 = vmatmul.msk.f32.gmra.mxu3 %vm78_vm1, %v5660_v42  ;;  %v5683_v31 = vld [vmem:[%s13013_s2 + $0x388] sm:$0xff]  ;;  %v5776_v34 = vld [vmem:[%s13013_s2 + $0x670] sm:$0xff]  ;;  %v5678_v36 = vld [vmem:[%s13013_s2 + $0x360] sm:$0xff] }
  0x28   :  { %484 = vmatpush.msrb.mxu0 %v5715_v43  ;;  %548 = vmatpush.msrb.mxu2 %v5716_v44  ;;  %v5772_v37 = vld [vmem:[%s13013_s2 + $0x650] sm:$0xff]  ;;  %v5766_v40 = vld [vmem:[%s13013_s2 + $0x620] sm:$0xff]  ;;  %v5687_v42 = vld [vmem:[%s13013_s2 + $0x3a8] sm:$0xff] }
  0x29   :  { %5649 = vmatmul.msk.f32.gmra.mxu0 %vm78_vm1, %v75_v45  ;;  %5655 = vmatmul.msk.f32.gmra.mxu1 %vm78_vm1, %v75_v45  ;;  %v5692_v39 = vld [vmem:[%s13013_s2 + $0x3d0] sm:$0xff]  ;;  %v5761_v43 = vld [vmem:[%s13013_s2 + $0x5f8] sm:$0xff]  ;;  %v5682_v45 = vld [vmem:[%s13013_s2 + $0x380] sm:$0xff] }
  0x2a   :  { %485 = vmatpush.msrb.mxu0 %v5710_v46  ;;  %549 = vmatpush.msrb.mxu2 %v5711_v47  ;;  %v5756_v48 = vld [vmem:[%s13013_s2 + $0x5d0] sm:$0xff]  ;;  %v240_v51 = vld [vmem:[%s13013_s2 + $0x258] sm:$0xff] }
  0x2b   :  { %6825 = vmatpush.msrb.mxu3 %v5731_v35  ;;  %524 = vmatpush.msrb.mxu1 %v5755_v3  ;;  %v5697_v35 = vld [vmem:[%s13013_s2 + $0x3f8] sm:$0xff]  ;;  %v5734_v3 = vld [vmem:[%s13013_s2 + $0x520] sm:$0xff] }
  0x2c   :  { %486 = vmatpush.msrb.mxu0 %v5705_v49  ;;  %550 = vmatpush.msrb.mxu2 %v5706_v50  ;;  %v5757_v49 = vld [vmem:[%s13013_s2 + $0x5d8] sm:$0xff] }
  0x2d   :  { %6826 = vmatpush.msrb.mxu3 %v5726_v38  ;;  %648 = vmatpush.msra.mxu1 %v5777_v25  ;;  %v5771_v38 = vld [vmem:[%s13013_s2 + $0x648] sm:$0xff] }
  0x2e   :  { %487 = vmatpush.msrb.mxu0 %v5700_v52  ;;  %551 = vmatpush.msrb.mxu2 %v5701_v53  ;;  %v235_v52 = vld [vmem:[%s13013_s2 + $0x230] sm:$0xff]  ;;  %v170_v25 = vld [vmem:[%s13013_s2 + $0x28] sm:$0xff] }
  0x2f   :  { %5667 = vmatmul.msk.f32.gmra.mxu2 %vm78_vm1, %v5661_v54  ;;  %5673 = vmatmul.msk.f32.gmra.mxu3 %vm78_vm1, %v5661_v54 }
  0x30   :  { %488 = vmatpush.msrb.mxu0 %v5695_v55  ;;  %552 = vmatpush.msrb.mxu2 %v5696_v56 }
  0x31   :  { %5650 = vmatmul.msk.f32.gmra.mxu0 %vm78_vm1, %v76_v57  ;;  %5656 = vmatmul.msk.f32.gmra.mxu1 %vm78_vm1, %v76_v57  ;;  %v5754_v57 = vld [vmem:[%s13013_s2 + $0x5c0] sm:$0xff] }
  0x32   :  { %489 = vmatpush.msrb.mxu0 %v5690_v58  ;;  %553 = vmatpush.msrb.mxu2 %v5691_v59  ;;  %v220_v58 = vld [vmem:[%s13013_s2 + $0x1b8] sm:$0xff] }
  0x33   :  { %6827 = vmatpush.msrb.mxu3 %v5721_v41  ;;  %v5767_v41 = vld [vmem:[%s13013_s2 + $0x628] sm:$0xff]  ;;  %649 = vmatpush.msra.mxu1 %v5772_v37 }
  0x34   :  { %490 = vmatpush.msrb.mxu0 %v5685_v60  ;;  %554 = vmatpush.msrb.mxu2 %v5686_v61  ;;  %v215_v60 = vld [vmem:[%s13013_s2 + $0x190] sm:$0xff]  ;;  %v5679_v37 = vld [vmem:[%s13013_s2 + $0x368] sm:$0xff] }
  0x35   :  { %6828 = vmatpush.msrb.mxu3 %v5716_v44  ;;  %v5762_v44 = vld [vmem:[%s13013_s2 + $0x600] sm:$0xff]  ;;  %650 = vmatpush.msra.mxu1 %v5767_v41 }
  0x36   :  { %491 = vmatpush.msrb.mxu0 %v5680_v62  ;;  %555 = vmatpush.msrb.mxu2 %v5681_v63  ;;  %v5739_v62 = vld [vmem:[%s13013_s2 + $0x548] sm:$0xff]  ;;  %v241_v41 = vld [vmem:[%s13013_s2 + $0x260] sm:$0xff] }
  0x37   :  { %5668 = vmatmul.msk.f32.gmra.mxu2 %vm78_vm1, %v5662_v0  ;;  %5674 = vmatmul.msk.f32.gmra.mxu3 %vm78_vm1, %v5662_v0 }
  0x38   :  { %6829 = vmatpush.msrb.mxu3 %v5711_v47  ;;  %492 = vmatpush.msrb.mxu0 %v5675_v2  ;;  %v205_v2 = vld [vmem:[%s13013_s2 + $0x140] sm:$0xff] }
  0x39   :  { %5651 = vmatmul.msk.f32.gmra.mxu0 %vm78_vm1, %v77_v1  ;;  %5657 = vmatmul.msk.f32.gmra.mxu1 %vm78_vm1, %v77_v1  ;;  %v210_v1 = vld [vmem:[%s13013_s2 + $0x168] sm:$0xff] }
  0x3a   :  { %6830 = vmatpush.msrb.mxu3 %v5706_v50  ;;  %556 = vmatpush.msrb.mxu2 %v5676_v4  ;;  %v5677_v50 = vld [vmem:[%s13013_s2 + $0x358] sm:$0xff] }
  0x3b   :  { %605 = vmatpush.msra.mxu0 %v5752_v9  ;;  %651 = vmatpush.msra.mxu1 %v5762_v44  ;;  %v195_v9 = vld [vmem:[%s13013_s2 + $0xf0] sm:$0xff] }
  0x3c   :  { %6831 = vmatpush.msrb.mxu3 %v5701_v53  ;;  %669 = vmatpush.msra.mxu2 %v5753_v5  ;;  %v230_v53 = vld [vmem:[%s13013_s2 + $0x208] sm:$0xff]  ;;  %v200_v5 = vld [vmem:[%s13013_s2 + $0x118] sm:$0xff]  ;;  %v231_v44 = vld [vmem:[%s13013_s2 + $0x210] sm:$0xff] }
  0x3d   :  { %606 = vmatpush.msra.mxu0 %v5747_v11  ;;  %652 = vmatpush.msra.mxu1 %v5757_v49  ;;  %v190_v11 = vld [vmem:[%s13013_s2 + $0xc8] sm:$0xff] }
  0x3e   :  { %6832 = vmatpush.msrb.mxu3 %v5696_v56  ;;  %670 = vmatpush.msra.mxu2 %v5748_v6  ;;  %v225_v56 = vld [vmem:[%s13013_s2 + $0x1e0] sm:$0xff]  ;;  %v5724_v6 = vld [vmem:[%s13013_s2 + $0x4d0] sm:$0xff]  ;;  %v226_v49 = vld [vmem:[%s13013_s2 + $0x1e8] sm:$0xff] }
  0x3f   :  { %607 = vmatpush.msra.mxu0 %v5742_v13  ;;  %v5714_v13 = vld [vmem:[%s13013_s2 + $0x480] sm:$0xff] }
  0x40   :  { %6833 = vmatpush.msrb.mxu3 %v5691_v59  ;;  %671 = vmatpush.msra.mxu2 %v5743_v7  ;;  %v5749_v59 = vld [vmem:[%s13013_s2 + $0x598] sm:$0xff] }
  0x41   :  { %608 = vmatpush.msra.mxu0 %v5737_v15  ;;  %v5709_v15 = vld [vmem:[%s13013_s2 + $0x458] sm:$0xff] }
  0x42   :  { %6834 = vmatpush.msrb.mxu3 %v5686_v61  ;;  %672 = vmatpush.msra.mxu2 %v5738_v8  ;;  %v5744_v61 = vld [vmem:[%s13013_s2 + $0x570] sm:$0xff] }
  0x43   :  { %609 = vmatpush.msra.mxu0 %v5732_v17  ;;  %v180_v17 = vld [vmem:[%s13013_s2 + $0x78] sm:$0xff] }
  0x44   :  { %6835 = vmatpush.msrb.mxu3 %v5681_v63  ;;  %673 = vmatpush.msra.mxu2 %v5733_v10  ;;  %v5719_v10 = vld [vmem:[%s13013_s2 + $0x4a8] sm:$0xff] }
  0x45   :  { %610 = vmatpush.msra.mxu0 %v5727_v19  ;;  %v175_v19 = vld [vmem:[%s13013_s2 + $0x50] sm:$0xff] }
  0x46   :  { %6836 = vmatpush.msrb.mxu3 %v5676_v4  ;;  %674 = vmatpush.msra.mxu2 %v5728_v12  ;;  %v5729_v4 = vld [vmem:[%s13013_s2 + $0x4f8] sm:$0xff]  ;;  %v5779_v12 = vld [vmem:[%s13013_s2 + $0x688] sm:$0xff] }
  0x47   :  { %611 = vmatpush.msra.mxu0 %v5722_v21  ;;  %v5774_v21 = vld [vmem:[%s13013_s2 + $0x660] sm:$0xff] }
  0x48   :  { %675 = vmatpush.msra.mxu2 %v5723_v14  ;;  %584 = vmatpush.msra.mxu3 %v5776_v34  ;;  %v185_v14 = vld [vmem:[%s13013_s2 + $0xa0] sm:$0xff]  ;;  %v5759_v34 = vld [vmem:[%s13013_s2 + $0x5e8] sm:$0xff] }
  0x49   :  { %612 = vmatpush.msra.mxu0 %v5717_v23  ;;  %v5768_v23 = vld [vmem:[%s13013_s2 + $0x630] sm:$0xff] }
  0x4a   :  { %676 = vmatpush.msra.mxu2 %v5718_v16  ;;  %585 = vmatpush.msra.mxu3 %v5771_v38  ;;  %v5778_v16 = vld [vmem:[%s13013_s2 + $0x680] sm:$0xff] }
  0x4b   :  { %613 = vmatpush.msra.mxu0 %v5712_v26  ;;  %v5694_v26 = vld [vmem:[%s13013_s2 + $0x3e0] sm:$0xff] }
  0x4c   :  { %677 = vmatpush.msra.mxu2 %v5713_v18  ;;  %586 = vmatpush.msra.mxu3 %v5766_v40  ;;  %v5704_v18 = vld [vmem:[%s13013_s2 + $0x430] sm:$0xff]  ;;  %v237_v38 = vld [vmem:[%s13013_s2 + $0x240] sm:$0xff] }
  0x4d   :  { %614 = vmatpush.msra.mxu0 %v5707_v28  ;;  %v5764_v28 = vld [vmem:[%s13013_s2 + $0x610] sm:$0xff] }
  0x4e   :  { %678 = vmatpush.msra.mxu2 %v5708_v20  ;;  %587 = vmatpush.msra.mxu3 %v5761_v43  ;;  %v5699_v20 = vld [vmem:[%s13013_s2 + $0x408] sm:$0xff]  ;;  %v227_v40 = vld [vmem:[%s13013_s2 + $0x1f0] sm:$0xff] }
  0x4f   :  { %615 = vmatpush.msra.mxu0 %v5702_v30  ;;  %v5689_v30 = vld [vmem:[%s13013_s2 + $0x3b8] sm:$0xff]  ;;  %v222_v43 = vld [vmem:[%s13013_s2 + $0x1c8] sm:$0xff] }
  0x50   :  { %679 = vmatpush.msra.mxu2 %v5703_v22  ;;  %588 = vmatpush.msra.mxu3 %v5756_v48  ;;  %v5773_v22 = vld [vmem:[%s13013_s2 + $0x658] sm:$0xff]  ;;  %v217_v48 = vld [vmem:[%s13013_s2 + $0x1a0] sm:$0xff] }
  0x51   :  { %616 = vmatpush.msra.mxu0 %v5697_v35  ;;  %v5684_v35 = vld [vmem:[%s13013_s2 + $0x390] sm:$0xff] }
  0x52   :  { %680 = vmatpush.msra.mxu2 %v5698_v24  ;;  %v5769_v24 = vld [vmem:[%s13013_s2 + $0x638] sm:$0xff] }
  0x53   :  { %617 = vmatpush.msra.mxu0 %v5692_v39  ;;  %v232_v39 = vld [vmem:[%s13013_s2 + $0x218] sm:$0xff] }
  0x54   :  { %681 = vmatpush.msra.mxu2 %v5693_v27  ;;  %v5763_v27 = vld [vmem:[%s13013_s2 + $0x608] sm:$0xff] }
  0x55   :  { %618 = vmatpush.msra.mxu0 %v5687_v42  ;;  %v236_v42 = vld [vmem:[%s13013_s2 + $0x238] sm:$0xff] }
  0x56   :  { %682 = vmatpush.msra.mxu2 %v5688_v29  ;;  %v165_v29 = vld [vmem:[%s13013_s2] sm:$0xff] }
  0x57   :  { %619 = vmatpush.msra.mxu0 %v5682_v45 }
  0x58   :  { %683 = vmatpush.msra.mxu2 %v5683_v31  ;;  %v5758_v31 = vld [vmem:[%s13013_s2 + $0x5e0] sm:$0xff] }
  0x59   :  { %620 = vmatpush.msra.mxu0 %v5677_v50  ;;  %v212_v50 = vld [vmem:[%s13013_s2 + $0x178] sm:$0xff] }
  0x5a   :  { %684 = vmatpush.msra.mxu2 %v5678_v36  ;;  %v242_v36 = vld [vmem:[%s13013_s2 + $0x268] sm:$0xff] }
  0x96   :  { %v7535_v45 = vpop.f32.mrf.mxu0 }
  0x9a   :  { %v7281_v32 = vpop.f32.mrf.mxu2  ;;  %v7283_v33 = vpop.f32.mrf.mxu3 }
  0x9b   :  { %493 = vmatmul.f32.vlgmr.msrb.gmra.mxu0 %v7281_v32  ;;  %5780 = vmatmul.msk.f32.vlgmr.msrb.gmra.mxu1 %vm461_vm2, %v7283_v33 }
  0x9c   :  { %557 = vmatmul.f32.vlgmr.msrb.gmra.mxu2 %v7281_v32  ;;  %733 = vmatpush.msrb.mxu0 %v5754_v57  ;;  %v211_v57 = vld [vmem:[%s13013_s2 + $0x170] sm:$0xff] }
  0x9d   :  { %812 = vmatpush.msrb.mxu2 %v240_v51  ;;  %776 = vmatpush.msrb.mxu1 %v5779_v12  ;;  %v221_v51 = vld [vmem:[%s13013_s2 + $0x1c0] sm:$0xff]  ;;  %v256_v12 = vld [vmem:[%s13013_s2 + $0x2d8] sm:$0xff] }
  0x9e   :  { %734 = vmatpush.msrb.mxu0 %v5749_v59  ;;  %v197_v59 = vld [vmem:[%s13013_s2 + $0x100] sm:$0xff] }
  0x9f   :  { %813 = vmatpush.msrb.mxu2 %v235_v52  ;;  %777 = vmatpush.msrb.mxu1 %v5774_v21  ;;  %v207_v52 = vld [vmem:[%s13013_s2 + $0x150] sm:$0xff]  ;;  %v246_v21 = vld [vmem:[%s13013_s2 + $0x288] sm:$0xff] }
  0xa0   :  { %735 = vmatpush.msrb.mxu0 %v5744_v61  ;;  %v266_v61 = vld [vmem:[%s13013_s2 + $0x328] sm:$0xff] }
  0xa1   :  { %814 = vmatpush.msrb.mxu2 %v230_v53  ;;  %778 = vmatpush.msrb.mxu1 %v5769_v24  ;;  %v216_v53 = vld [vmem:[%s13013_s2 + $0x198] sm:$0xff] }
  0xa2   :  { %v7325_v46 = vpop.f32.mrf.mxu2  ;;  %v7327_v47 = vpop.f32.mrf.mxu3  ;;  %736 = vmatpush.msrb.mxu0 %v5739_v62 }
  0xa3   :  { %496 = vmatmul.f32.gmra.mxu0 %v7325_v46  ;;  %5781 = vmatmul.msk.f32.gmra.mxu1 %vm461_vm2, %v7327_v47  ;;  %v7584_v62 = vpop.f32.mrf.mxu1 }
  0xa4   :  { %560 = vmatmul.f32.gmra.mxu2 %v7325_v46  ;;  %737 = vmatpush.msrb.mxu0 %v5734_v3  ;;  %v265_v3 = vld [vmem:[%s13013_s2 + $0x320] sm:$0xff] }
  0xa5   :  { %815 = vmatpush.msrb.mxu2 %v225_v56  ;;  %779 = vmatpush.msrb.mxu1 %v5764_v28  ;;  %v202_v56 = vld [vmem:[%s13013_s2 + $0x128] sm:$0xff] }
  0xa6   :  { %738 = vmatpush.msrb.mxu0 %v5729_v4  ;;  %v187_v4 = vld [vmem:[%s13013_s2 + $0xb0] sm:$0xff]  ;;  %v234_v28 = vld [vmem:[%s13013_s2 + $0x228] sm:$0xff] }
  0xa7   :  { %816 = vmatpush.msrb.mxu2 %v220_v58  ;;  %780 = vmatpush.msrb.mxu1 %v5759_v34  ;;  %v7570_v58 = vpop.f32.mrf.mxu0 }
  0xa8   :  { %739 = vmatpush.msrb.mxu0 %v5724_v6  ;;  %v182_v6 = vld [vmem:[%s13013_s2 + $0x88] sm:$0xff] }
  0xa9   :  { %817 = vmatpush.msrb.mxu2 %v215_v60  ;;  %v206_v60 = vld [vmem:[%s13013_s2 + $0x148] sm:$0xff] }
  0xaa   :  { %v7351_v54 = vpop.f32.mrf.mxu2  ;;  %v7353_v55 = vpop.f32.mrf.mxu3  ;;  %740 = vmatpush.msrb.mxu0 %v5719_v10  ;;  %v260_v10 = vld [vmem:[%s13013_s2 + $0x2f8] sm:$0xff] }
  0xab   :  { %499 = vmatmul.f32.gmra.mxu0 %v7351_v54  ;;  %5782 = vmatmul.msk.f32.gmra.mxu1 %vm461_vm2, %v7353_v55 }
  0xac   :  { %563 = vmatmul.f32.gmra.mxu2 %v7351_v54  ;;  %741 = vmatpush.msrb.mxu0 %v5714_v13  ;;  %v177_v13 = vld [vmem:[%s13013_s2 + $0x60] sm:$0xff] }
  0xad   :  { %818 = vmatpush.msrb.mxu2 %v210_v1  ;;  %v192_v1 = vld [vmem:[%s13013_s2 + $0xd8] sm:$0xff] }
  0xae   :  { %742 = vmatpush.msrb.mxu0 %v5709_v15  ;;  %v250_v15 = vld [vmem:[%s13013_s2 + $0x2a8] sm:$0xff] }
  0xaf   :  { %819 = vmatpush.msrb.mxu2 %v205_v2  ;;  %v201_v2 = vld [vmem:[%s13013_s2 + $0x120] sm:$0xff] }
  0xb0   :  { %743 = vmatpush.msrb.mxu0 %v5704_v18  ;;  %v172_v18 = vld [vmem:[%s13013_s2 + $0x38] sm:$0xff] }
  0xb1   :  { %820 = vmatpush.msrb.mxu2 %v200_v5  ;;  %v196_v5 = vld [vmem:[%s13013_s2 + $0xf8] sm:$0xff] }
  0xb2   :  { %v7380_v63 = vpop.f32.mrf.mxu2  ;;  %v7382_v0 = vpop.f32.mrf.mxu3  ;;  %744 = vmatpush.msrb.mxu0 %v5699_v20  ;;  %v245_v20 = vld [vmem:[%s13013_s2 + $0x280] sm:$0xff] }
  0xb3   :  { %502 = vmatmul.f32.gmra.mxu0 %v7380_v63  ;;  %5783 = vmatmul.msk.f32.gmra.mxu1 %vm461_vm2, %v7382_v0 }
  0xb4   :  { %566 = vmatmul.f32.gmra.mxu2 %v7380_v63  ;;  %745 = vmatpush.msrb.mxu0 %v5694_v26 }
  0xb5   :  { %821 = vmatpush.msrb.mxu2 %v195_v9  ;;  %v191_v9 = vld [vmem:[%s13013_s2 + $0xd0] sm:$0xff] }
  0xb6   :  { %746 = vmatpush.msrb.mxu0 %v5689_v30  ;;  %v243_v30 = vld [vmem:[%s13013_s2 + $0x270] sm:$0xff] }
  0xb7   :  { %822 = vmatpush.msrb.mxu2 %v190_v11  ;;  %v7619_v11 = vpop.f32.mrf.mxu0 }
  0xb8   :  { %747 = vmatpush.msrb.mxu0 %v5684_v35  ;;  %v219_v35 = vld [vmem:[%s13013_s2 + $0x1b0] sm:$0xff] }
  0xb9   :  { %823 = vmatpush.msrb.mxu2 %v185_v14  ;;  %v186_v14 = vld [vmem:[%s13013_s2 + $0xa8] sm:$0xff] }
  0xba   :  { %v7406_v7 = vpop.f32.mrf.mxu2  ;;  %v7408_v8 = vpop.f32.mrf.mxu3  ;;  %748 = vmatpush.msrb.mxu0 %v5679_v37 }
  0xbb   :  { %505 = vmatmul.f32.gmra.mxu0 %v7406_v7  ;;  %5784 = vmatmul.msk.f32.gmra.mxu1 %vm461_vm2, %v7408_v8 }
  0xbc   :  { %569 = vmatmul.f32.vlgmr.msrb.gmra.mxu3 %v7406_v7  ;;  %685 = vmatmul.f32.vlgmr.msra.gmra.mxu2 %v7281_v32 }
  0xbd   :  { %712 = vmatpush.msrb.mxu3 %v5778_v16  ;;  %824 = vmatpush.msrb.mxu2 %v180_v17  ;;  %v251_v16 = vld [vmem:[%s13013_s2 + $0x2b0] sm:$0xff]  ;;  %v7639_v17 = vpop.f32.mrf.mxu1 }
  0xbf   :  { %713 = vmatpush.msrb.mxu3 %v5773_v22  ;;  %825 = vmatpush.msrb.mxu2 %v175_v19  ;;  %v181_v19 = vld [vmem:[%s13013_s2 + $0x80] sm:$0xff]  ;;  %v176_v22 = vld [vmem:[%s13013_s2 + $0x58] sm:$0xff]  ;;  %v7671_v24 = vpop.f32.mrf.mxu0 }
  0xc1   :  { %714 = vmatpush.msrb.mxu3 %v5768_v23  ;;  %826 = vmatpush.msrb.mxu2 %v170_v25  ;;  %v244_v23 = vld [vmem:[%s13013_s2 + $0x278] sm:$0xff]  ;;  %v239_v25 = vld [vmem:[%s13013_s2 + $0x250] sm:$0xff] }
  0xc3   :  { %621 = vmatmul.f32.vlgmr.msra.gmra.mxu0 %v7281_v32  ;;  %5790 = vmatmul.msk.f32.vlgmr.msra.gmra.mxu1 %vm461_vm2, %v7283_v33 }
  0xc4   :  { %5785 = vmatmul.msk.f32.vlgmr.msra.gmra.mxu3 %vm461_vm2, %v7283_v33  ;;  %688 = vmatmul.f32.gmra.mxu2 %v7325_v46 }
  0xc5   :  { %715 = vmatpush.msrb.mxu3 %v5763_v27  ;;  %827 = vmatpush.msrb.mxu2 %v165_v29  ;;  %v7676_v26 = vpop.f32.mrf.mxu1  ;;  %v166_v27 = vld [vmem:[%s13013_s2 + $0x8] sm:$0xff]  ;;  %v229_v29 = vld [vmem:[%s13013_s2 + $0x200] sm:$0xff] }
  0xc6   :  { %876 = vmatpush.msra.mxu0 %v241_v41  ;;  %919 = vmatpush.msra.mxu1 %v266_v61  ;;  %v213_v41 = vld [vmem:[%s13013_s2 + $0x180] sm:$0xff] }
  0xc7   :  { %716 = vmatpush.msrb.mxu3 %v5758_v31  ;;  %940 = vmatpush.msra.mxu2 %v242_v36  ;;  %v233_v31 = vld [vmem:[%s13013_s2 + $0x220] sm:$0xff]  ;;  %v7705_v34 = vpop.f32.mrf.mxu0  ;;  %v228_v36 = vld [vmem:[%s13013_s2 + $0x1f8] sm:$0xff] }
  0xc8   :  { %877 = vmatpush.msra.mxu0 %v236_v42  ;;  %v199_v42 = vld [vmem:[%s13013_s2 + $0x110] sm:$0xff]  ;;  %v257_v61 = vld [vmem:[%s13013_s2 + $0x2e0] sm:$0xff] }
  0xc9   :  { %941 = vmatpush.msra.mxu2 %v237_v38  ;;  %855 = vmatpush.msra.mxu3 %v265_v3  ;;  %v214_v38 = vld [vmem:[%s13013_s2 + $0x188] sm:$0xff] }
  0xca   :  { %878 = vmatpush.msra.mxu0 %v231_v44 }
  0xcb   :  { %624 = vmatmul.f32.gmra.mxu0 %v7325_v46  ;;  %5791 = vmatmul.msk.f32.gmra.mxu1 %vm461_vm2, %v7327_v47 }
  0xcc   :  { %5786 = vmatmul.msk.f32.gmra.mxu3 %vm461_vm2, %v7327_v47  ;;  %691 = vmatmul.f32.gmra.mxu2 %v7351_v54 }
  0xcd   :  { %942 = vmatpush.msra.mxu2 %v232_v39  ;;  %879 = vmatpush.msra.mxu0 %v226_v49  ;;  %v7719_v37 = vpop.f32.mrf.mxu1  ;;  %v223_v39 = vld [vmem:[%s13013_s2 + $0x1d0] sm:$0xff] }
  0xce   :  { %856 = vmatpush.msra.mxu3 %v260_v10  ;;  %v267_v49 = vld [vmem:[%s13013_s2 + $0x330] sm:$0xff]  ;;  %v248_v10 = vld [vmem:[%s13013_s2 + $0x298] sm:$0xff] }
  0xcf   :  { %943 = vmatpush.msra.mxu2 %v227_v40  ;;  %880 = vmatpush.msra.mxu0 %v221_v51  ;;  %v204_v40 = vld [vmem:[%s13013_s2 + $0x138] sm:$0xff]  ;;  %v198_v51 = vld [vmem:[%s13013_s2 + $0x108] sm:$0xff] }
  0xd1   :  { %944 = vmatpush.msra.mxu2 %v222_v43  ;;  %881 = vmatpush.msra.mxu0 %v216_v53  ;;  %v208_v43 = vld [vmem:[%s13013_s2 + $0x158] sm:$0xff]  ;;  %v193_v53 = vld [vmem:[%s13013_s2 + $0xe0] sm:$0xff] }
  0xd3   :  { %627 = vmatmul.f32.gmra.mxu0 %v7351_v54  ;;  %5792 = vmatmul.msk.f32.gmra.mxu1 %vm461_vm2, %v7353_v55 }
  0xd4   :  { %5787 = vmatmul.msk.f32.gmra.mxu3 %vm461_vm2, %v7353_v55  ;;  %694 = vmatmul.f32.gmra.mxu2 %v7380_v63 }
  0xd5   :  { %945 = vmatpush.msra.mxu2 %v217_v48  ;;  %882 = vmatpush.msra.mxu0 %v211_v57  ;;  %v7754_v44 = vpop.f32.mrf.mxu1  ;;  %v203_v48 = vld [vmem:[%s13013_s2 + $0x130] sm:$0xff]  ;;  %v262_v57 = vld [vmem:[%s13013_s2 + $0x308] sm:$0xff] }
  0xd7   :  { %946 = vmatpush.msra.mxu2 %v212_v50  ;;  %883 = vmatpush.msra.mxu0 %v206_v60  ;;  %v189_v50 = vld [vmem:[%s13013_s2 + $0xc0] sm:$0xff]  ;;  %v188_v60 = vld [vmem:[%s13013_s2 + $0xb8] sm:$0xff] }
  0xd9   :  { %947 = vmatpush.msra.mxu2 %v207_v52  ;;  %884 = vmatpush.msra.mxu0 %v201_v2  ;;  %v184_v52 = vld [vmem:[%s13013_s2 + $0x98] sm:$0xff] }
  0xdb   :  { %630 = vmatmul.f32.gmra.mxu0 %v7380_v63  ;;  %5793 = vmatmul.msk.f32.gmra.mxu1 %vm461_vm2, %v7382_v0 }
  0xdc   :  { %5788 = vmatmul.msk.f32.gmra.mxu3 %vm461_vm2, %v7382_v0  ;;  %697 = vmatmul.f32.gmra.mxu2 %v7406_v7 }
  0xdd   :  { %948 = vmatpush.msra.mxu2 %v202_v56  ;;  %885 = vmatpush.msra.mxu0 %v196_v5  ;;  %v263_v56 = vld [vmem:[%s13013_s2 + $0x310] sm:$0xff]  ;;  %v253_v5 = vld [vmem:[%s13013_s2 + $0x2c0] sm:$0xff] }
  0xdf   :  { %949 = vmatpush.msra.mxu2 %v197_v59  ;;  %886 = vmatpush.msra.mxu0 %v191_v9  ;;  %v179_v59 = vld [vmem:[%s13013_s2 + $0x70] sm:$0xff] }
  0xe0   :  { %v183_v9 = vld [vmem:[%s13013_s2 + $0x90] sm:$0xff] }
  0xe1   :  { %950 = vmatpush.msra.mxu2 %v192_v1  ;;  %887 = vmatpush.msra.mxu0 %v186_v14  ;;  %v258_v1 = vld [vmem:[%s13013_s2 + $0x2e8] sm:$0xff] }
  0xe3   :  { %633 = vmatmul.f32.gmra.mxu0 %v7406_v7  ;;  %5794 = vmatmul.msk.f32.gmra.mxu1 %vm461_vm2, %v7408_v8 }
  0xe4   :  { %5789 = vmatmul.msk.f32.gmra.mxu3 %vm461_vm2, %v7408_v8  ;;  %828 = vmatmul.f32.vlgmr.msrb.gmra.mxu2 %v7535_v45 }
  0xe5   :  { %951 = vmatpush.msra.mxu2 %v187_v4  ;;  %888 = vmatpush.msra.mxu0 %v181_v19  ;;  %v252_v4 = vld [vmem:[%s13013_s2 + $0x2b8] sm:$0xff] }
  0xe6   :  { %v6841_v19 = vld [vmem:[%s13011_s0 + $0x98] sm:$0xff] }
  0xe7   :  { %952 = vmatpush.msra.mxu2 %v182_v6  ;;  %889 = vmatpush.msra.mxu0 %v176_v22  ;;  %v174_v6 = vld [vmem:[%s13013_s2 + $0x48] sm:$0xff] }
  0xe9   :  { %953 = vmatpush.msra.mxu2 %v177_v13  ;;  %v173_v13 = vld [vmem:[%s13013_s2 + $0x40] sm:$0xff] }
  0xeb   :  { %749 = vmatmul.f32.vlgmr.msrb.gmra.mxu0 %v7281_v32  ;;  %5800 = vmatmul.msk.f32.vlgmr.msrb.gmra.mxu1 %vm461_vm2, %v7283_v33  ;;  %v261_v32 = vld [vmem:[%s13013_s2 + $0x300] sm:$0xff] }
  0xec   :  { %5795 = vmatmul.msk.f32.vlgmr.msrb.gmra.mxu3 %vm461_vm2, %v7283_v33  ;;  %831 = vmatmul.f32.gmra.mxu2 %v7570_v58  ;;  %v255_v33 = vld [vmem:[%s13013_s2 + $0x2d0] sm:$0xff] }
  0xed   :  { %920 = vmatpush.msra.mxu1 %v261_v32  ;;  %857 = vmatpush.msra.mxu3 %v255_v33  ;;  %v247_v32 = vld [vmem:[%s13013_s2 + $0x290] sm:$0xff]  ;;  %v169_v33 = vld [vmem:[%s13013_s2 + $0x20] sm:$0xff] }
  0xee   :  { %954 = vmatpush.msra.mxu2 %v172_v18  ;;  %v168_v18 = vld [vmem:[%s13013_s2 + $0x18] sm:$0xff] }
  0xef   :  { %921 = vmatpush.msra.mxu1 %v256_v12  ;;  %858 = vmatpush.msra.mxu3 %v250_v15  ;;  %v178_v12 = vld [vmem:[%s13013_s2 + $0x68] sm:$0xff] }
  0xf1   :  { %922 = vmatpush.msra.mxu1 %v251_v16  ;;  %859 = vmatpush.msra.mxu3 %v245_v20  ;;  %v6840_v16 = vld [vmem:[%s13011_s0 + $0xa8] sm:$0xf] }
  0xf2   :  { %v6842_v20 = vld [vmem:[%s13011_s0 + $0x88] sm:$0xff] }
  0xf3   :  { %752 = vmatmul.f32.gmra.mxu0 %v7325_v46  ;;  %5801 = vmatmul.msk.f32.gmra.mxu1 %vm461_vm2, %v7327_v47  ;;  %v167_v46 = vld [vmem:[%s13013_s2 + $0x10] sm:$0xff] }
  0xf4   :  { %5796 = vmatmul.msk.f32.gmra.mxu3 %vm461_vm2, %v7327_v47  ;;  %834 = vmatmul.f32.gmra.mxu2 %v7619_v11  ;;  %v171_v47 = vld [vmem:[%s13013_s2 + $0x30] sm:$0xff] }
  0xf5   :  { %923 = vmatpush.msra.mxu1 %v246_v21  ;;  %955 = vmatpush.msra.mxu2 %v167_v46  ;;  %v6843_v21 = vld [vmem:[%s13011_s0 + $0xa0] sm:$0xf]  ;;  %v6844_v46 = vld [vmem:[%s13011_s0 + $0x78] sm:$0xff] }
  0xf6   :  { %890 = vmatpush.msra.mxu0 %v171_v47  ;;  %983 = vmatpush.msrb.mxu3 %v267_v49  ;;  %v6845_v47 = vld [vmem:[%s13011_s0 + $0x90] sm:$0xff]  ;;  %v6861_v49 = vld [vmem:[%s13011_s0] sm:$0xff] }
  0xf7   :  { %1068 = vmatpush.msrb.mxu2 %v244_v23 }
  0xf8   :  { %891 = vmatpush.msra.mxu0 %v166_v27  ;;  %984 = vmatpush.msrb.mxu3 %v262_v57  ;;  %v6847_v27 = vld [vmem:[%s13011_s0 + $0x80] sm:$0xff] }
  0xf9   :  { %1069 = vmatpush.msrb.mxu2 %v239_v25  ;;  %v6846_v25 = vld [vmem:[%s13011_s0 + $0x68] sm:$0xff] }
  0xfa   :  { %1004 = vmatpush.msrb.mxu0 %v243_v30  ;;  %985 = vmatpush.msrb.mxu3 %v257_v61  ;;  %v6850_v30 = vld [vmem:[%s13011_s0 + $0x60] sm:$0xff] }
  0xfb   :  { %755 = vmatmul.f32.gmra.mxu0 %v7351_v54  ;;  %5802 = vmatmul.msk.f32.gmra.mxu1 %vm461_vm2, %v7353_v55  ;;  %v224_v54 = vld [vmem:[%s13013_s2 + $0x1d8] sm:$0xff] }
  0xfc   :  { %5797 = vmatmul.msk.f32.gmra.mxu3 %vm461_vm2, %v7353_v55  ;;  %837 = vmatmul.f32.gmra.mxu2 %v7671_v24  ;;  %v238_v55 = vld [vmem:[%s13013_s2 + $0x248] sm:$0xff] }
  0xfd   :  { %1070 = vmatpush.msrb.mxu2 %v234_v28  ;;  %1005 = vmatpush.msrb.mxu0 %v238_v55  ;;  %v6848_v28 = vld [vmem:[%s13011_s0 + $0x70] sm:$0xff] }
  0xfe   :  { %986 = vmatpush.msrb.mxu3 %v252_v4 }
  0xff   :  { %1071 = vmatpush.msrb.mxu2 %v229_v29  ;;  %1006 = vmatpush.msrb.mxu0 %v233_v31  ;;  %v6849_v29 = vld [vmem:[%s13011_s0 + $0x58] sm:$0xff] }
 0x100   :  { %987 = vmatpush.msrb.mxu3 %v247_v32 }
 0x101   :  { %1072 = vmatpush.msrb.mxu2 %v224_v54  ;;  %1007 = vmatpush.msrb.mxu0 %v228_v36  ;;  %v6851_v54 = vld [vmem:[%s13011_s0 + $0x48] sm:$0xff]  ;;  %v6853_v36 = vld [vmem:[%s13011_s0 + $0x38] sm:$0xff] }
 0x103   :  { %758 = vmatmul.f32.gmra.mxu0 %v7380_v63  ;;  %5803 = vmatmul.msk.f32.gmra.mxu1 %vm461_vm2, %v7382_v0  ;;  %v209_v63 = vld [vmem:[%s13013_s2 + $0x160] sm:$0xff] }
 0x104   :  { %5798 = vmatmul.msk.f32.gmra.mxu3 %vm461_vm2, %v7382_v0  ;;  %840 = vmatmul.f32.gmra.mxu2 %v7705_v34  ;;  %v218_v0 = vld [vmem:[%s13013_s2 + $0x1a8] sm:$0xff] }
 0x105   :  { %1073 = vmatpush.msrb.mxu2 %v219_v35  ;;  %1008 = vmatpush.msrb.mxu0 %v223_v39  ;;  %v6852_v35 = vld [vmem:[%s13011_s0 + $0x50] sm:$0xff]  ;;  %v6855_v39 = vld [vmem:[%s13011_s0 + $0x28] sm:$0xff] }
 0x107   :  { %1074 = vmatpush.msrb.mxu2 %v214_v38  ;;  %1009 = vmatpush.msrb.mxu0 %v218_v0  ;;  %v6854_v38 = vld [vmem:[%s13011_s0 + $0x40] sm:$0xff]  ;;  %v6857_v0 = vld [vmem:[%s13011_s0 + $0x18] sm:$0xff] }
 0x109   :  { %1075 = vmatpush.msrb.mxu2 %v209_v63  ;;  %1010 = vmatpush.msrb.mxu0 %v213_v41  ;;  %v6856_v63 = vld [vmem:[%s13011_s0 + $0x30] sm:$0xff] }
 0x10b   :  { %761 = vmatmul.f32.gmra.mxu0 %v7406_v7  ;;  %5804 = vmatmul.msk.f32.gmra.mxu1 %vm461_vm2, %v7408_v8  ;;  %v268_v7 = vld [vmem:[%s13013_s2 + $0x338] sm:$0xff] }
 0x10c   :  { %5799 = vmatmul.msk.f32.gmra.mxu3 %vm461_vm2, %v7408_v8  ;;  %956 = vmatmul.f32.vlgmr.msra.gmra.mxu2 %v7535_v45  ;;  %v194_v8 = vld [vmem:[%s13013_s2 + $0xe8] sm:$0xff] }
 0x10d   :  { %1076 = vmatpush.msrb.mxu2 %v204_v40  ;;  %1047 = vmatpush.msrb.mxu1 %v268_v7  ;;  %v6859_v7 = vld [vmem:[%s13011_s0 + $0x8] sm:$0xff] }
 0x10e   :  { %1011 = vmatpush.msrb.mxu0 %v208_v43  ;;  %v6858_v43 = vld [vmem:[%s13011_s0 + $0x20] sm:$0xff] }
 0x10f   :  { %1077 = vmatpush.msrb.mxu2 %v199_v42  ;;  %1048 = vmatpush.msrb.mxu1 %v263_v56  ;;  %v269_v42 = vld [vmem:[%s13013_s2 + $0x340] sm:$0xff] }
 0x110   :  { %1012 = vmatpush.msrb.mxu0 %v203_v48  ;;  %v6860_v48 = vld [vmem:[%s13011_s0 + $0x10] sm:$0xff] }
 0x111   :  { %1078 = vmatpush.msrb.mxu2 %v194_v8  ;;  %1049 = vmatpush.msrb.mxu1 %v258_v1  ;;  %v264_v8 = vld [vmem:[%s13013_s2 + $0x318] sm:$0xff]  ;;  %v5830_v1 = vld [vmem:[%s13012_s1 + $0x50] sm:$0xff] }
 0x112   :  { %1013 = vmatpush.msrb.mxu0 %v198_v51 }
 0x113   :  { %892 = vmatmul.f32.vlgmr.msra.gmra.mxu0 %v7535_v45  ;;  %5810 = vmatmul.msk.f32.vlgmr.msra.gmra.mxu1 %vm461_vm2, %v7584_v62 }
 0x114   :  { %5805 = vmatmul.msk.f32.vlgmr.msra.gmra.mxu3 %vm461_vm2, %v7584_v62  ;;  %959 = vmatmul.f32.gmra.mxu2 %v7570_v58 }
 0x115   :  { %1079 = vmatpush.msrb.mxu2 %v189_v50  ;;  %1014 = vmatpush.msrb.mxu0 %v193_v53  ;;  %v249_v53 = vld [vmem:[%s13013_s2 + $0x2a0] sm:$0xff] }
 0x116   :  { %1050 = vmatpush.msrb.mxu1 %v253_v5  ;;  %1111 = vmatpush.msra.mxu3 %v269_v42  ;;  %v5917_v42 = vld [vmem:[%s13013_s2 + $0x8c0] sm:$0xff] }
 0x117   :  { %1080 = vmatpush.msrb.mxu2 %v184_v52  ;;  %1015 = vmatpush.msrb.mxu0 %v188_v60  ;;  %v254_v52 = vld [vmem:[%s13013_s2 + $0x2c8] sm:$0xff] }
 0x118   :  { %v7801_v2 = vpop.f32.mrf.mxu0  ;;  %v7803_v3 = vpop.f32.mrf.mxu1  ;;  %1051 = vmatpush.msrb.mxu1 %v248_v10  ;;  %1112 = vmatpush.msra.mxu3 %v264_v8  ;;  %v5832_v10 = vld [vmem:[%s13012_s1 + $0x60] sm:$0xff] }
 0x119   :  { %1081 = vmatpush.msrb.mxu2 %v179_v59  ;;  %1016 = vmatpush.msrb.mxu0 %v183_v9  ;;  %v5913_v8 = vld [vmem:[%s13013_s2 + $0x8a0] sm:$0xff] }
 0x11a   :  { %5841 = vmatpush.msk.msra.mxu1 %vm94_vm0, %v6840_v16  ;;  %v5833_v16 = vld [vmem:[%s13012_s1 + $0x68] sm:$0xff] }
 0x11b   :  { %895 = vmatmul.f32.gmra.mxu0 %v7570_v58  ;;  %5811 = vmatmul.msk.f32.gmra.mxu1 %vm461_vm2, %v7639_v17 }
 0x11c   :  { %5806 = vmatmul.msk.f32.gmra.mxu3 %vm461_vm2, %v7639_v17  ;;  %962 = vmatmul.f32.gmra.mxu2 %v7619_v11 }
 0x11d   :  { %1082 = vmatpush.msrb.mxu2 %v174_v6  ;;  %1017 = vmatpush.msrb.mxu0 %v178_v12  ;;  %v5831_v6 = vld [vmem:[%s13012_s1 + $0x58] sm:$0xff] }
 0x11e   :  { %1191 = vmatpush.msra.mxu1 %v6841_v19 }
 0x11f   :  { %1083 = vmatpush.msrb.mxu2 %v169_v33  ;;  %1018 = vmatpush.msrb.mxu0 %v173_v13  ;;  %v8040_v33 = vpop.f32.mrf.mxu2 }
 0x120   :  { %v7838_v14 = vpop.f32.mrf.mxu0  ;;  %v7840_v15 = vpop.f32.mrf.mxu1  ;;  %1192 = vmatpush.msra.mxu1 %v6842_v20 }
 0x121   :  { %1019 = vmatpush.msrb.mxu0 %v168_v18 }
 0x122   :  { %1193 = vmatpush.msra.mxu1 %v6844_v46 }
 0x123   :  { %898 = vmatmul.f32.gmra.mxu0 %v7619_v11  ;;  %5812 = vmatmul.msk.f32.gmra.mxu1 %vm461_vm2, %v7676_v26 }
 0x124   :  { %5807 = vmatmul.msk.f32.gmra.mxu3 %vm461_vm2, %v7676_v26  ;;  %965 = vmatmul.f32.gmra.mxu2 %v7671_v24 }
 0x125   :  { %5835 = vmatpush.msk.msra.mxu0 %vm94_vm0, %v6843_v21  ;;  %1194 = vmatpush.msra.mxu1 %v6846_v25  ;;  %v5834_v21 = vld [vmem:[%s13012_s1 + $0x70] sm:$0xff] }
 0x127   :  { %1159 = vmatpush.msra.mxu0 %v6845_v47  ;;  %1195 = vmatpush.msra.mxu1 %v6849_v29 }
 0x128   :  { %v7868_v22 = vpop.f32.mrf.mxu0  ;;  %v7870_v23 = vpop.f32.mrf.mxu1 }
 0x129   :  { %1160 = vmatpush.msra.mxu0 %v6847_v27  ;;  %1196 = vmatpush.msra.mxu1 %v6851_v54 }
 0x12b   :  { %901 = vmatmul.f32.gmra.mxu0 %v7671_v24  ;;  %5813 = vmatmul.msk.f32.gmra.mxu1 %vm461_vm2, %v7719_v37 }
 0x12c   :  { %5808 = vmatmul.msk.f32.gmra.mxu3 %vm461_vm2, %v7719_v37  ;;  %968 = vmatmul.f32.gmra.mxu2 %v7705_v34 }
 0x12d   :  { %1161 = vmatpush.msra.mxu0 %v6848_v28  ;;  %1197 = vmatpush.msra.mxu1 %v6853_v36 }
 0x12f   :  { %1162 = vmatpush.msra.mxu0 %v6850_v30  ;;  %1198 = vmatpush.msra.mxu1 %v6855_v39 }
 0x130   :  { %v7899_v55 = vpop.f32.mrf.mxu0  ;;  %v7901_v31 = vpop.f32.mrf.mxu1 }
 0x131   :  { %1163 = vmatpush.msra.mxu0 %v6852_v35  ;;  %1199 = vmatpush.msra.mxu1 %v6857_v0  ;;  %v5923_v0 = vld [vmem:[%s13013_s2 + $0x8f0] sm:$0xff] }
 0x133   :  { %904 = vmatmul.f32.gmra.mxu0 %v7705_v34  ;;  %5814 = vmatmul.msk.f32.gmra.mxu1 %vm461_vm2, %v7754_v44 }
 0x134   :  { %5809 = vmatmul.msk.f32.gmra.mxu3 %vm461_vm2, %v7754_v44  ;;  %1084 = vmatmul.f32.vlgmr.msrb.gmra.mxu2 %v7535_v45 }
 0x135   :  { %1164 = vmatpush.msra.mxu0 %v6854_v38  ;;  %1200 = vmatpush.msra.mxu1 %v6859_v7  ;;  %v5912_v7 = vld [vmem:[%s13013_s2 + $0x898] sm:$0xff] }
 0x137   :  { %1165 = vmatpush.msra.mxu0 %v6856_v63  ;;  %v5922_v63 = vld [vmem:[%s13013_s2 + $0x8e8] sm:$0xff] }
 0x138   :  { %v7927_v40 = vpop.f32.mrf.mxu0  ;;  %v7929_v41 = vpop.f32.mrf.mxu1  ;;  %1338 = vmatpush.msra.mxu2 %v5922_v63  ;;  %v5892_v63 = vld [vmem:[%s13013_s2 + $0x7f8] sm:$0xff] }
 0x139   :  { %1166 = vmatpush.msra.mxu0 %v6858_v43  ;;  %v5918_v43 = vld [vmem:[%s13013_s2 + $0x8c8] sm:$0xff] }
 0x13a   :  { %1339 = vmatpush.msra.mxu2 %v5917_v42 }
 0x13b   :  { %1020 = vmatmul.f32.vlgmr.msrb.gmra.mxu0 %v7535_v45  ;;  %5820 = vmatmul.msk.f32.vlgmr.msrb.gmra.mxu1 %vm461_vm2, %v7584_v62  ;;  %v259_v45 = vld [vmem:[%s13013_s2 + $0x2f0] sm:$0xff] }
 0x13c   :  { %5815 = vmatmul.msk.f32.vlgmr.msrb.gmra.mxu3 %vm461_vm2, %v7584_v62  ;;  %1087 = vmatmul.f32.gmra.mxu2 %v7570_v58 }
 0x13d   :  { %1167 = vmatpush.msra.mxu0 %v6860_v48  ;;  %1113 = vmatpush.msra.mxu3 %v259_v45 }
 0x13e   :  { %1340 = vmatpush.msra.mxu2 %v5912_v7  ;;  %v5887_v7 = vld [vmem:[%s13013_s2 + $0x7d0] sm:$0xff] }
 0x13f   :  { %1168 = vmatpush.msra.mxu0 %v6861_v49  ;;  %1114 = vmatpush.msra.mxu3 %v254_v52  ;;  %v8010_v4 = vpop.f32.mrf.mxu3 }
 0x140   :  { %v7958_v50 = vpop.f32.mrf.mxu0  ;;  %v7960_v51 = vpop.f32.mrf.mxu1 }
 0x141   :  { %13027 = vst [vmem:[#allocation5_spill] sm:$0xff] %v7958_v50  ;;  %1115 = vmatpush.msra.mxu3 %v249_v53  ;;  %1402 = vmatpush.msrb.mxu0 %v5923_v0  ;;  %v5907_v53 = vld [vmem:[%s13013_s2 + $0x870] sm:$0xff]  ;;  %v5893_v0 = vld [vmem:[%s13013_s2 + $0x800] sm:$0xff]  ;;  %v5896_v50 = vld [vmem:[%s13013_s2 + $0x818] sm:$0xff] }
 0x142   :  { %13028 = vst [vmem:[#allocation6_spill] sm:$0xff] %v7960_v51  ;;  %1341 = vmatpush.msra.mxu2 %v5907_v53 }
 0x143   :  { %1023 = vmatmul.f32.gmra.mxu0 %v7570_v58  ;;  %5821 = vmatmul.msk.f32.gmra.mxu1 %vm461_vm2, %v7639_v17 }
 0x144   :  { %5816 = vmatmul.msk.f32.gmra.mxu3 %vm461_vm2, %v7639_v17  ;;  %1090 = vmatmul.f32.gmra.mxu2 %v7619_v11 }
 0x145   :  { %1403 = vmatpush.msrb.mxu0 %v5918_v43 }
 0x147   :  { %v8023_v9 = vpop.f32.mrf.mxu3  ;;  %1404 = vmatpush.msrb.mxu0 %v5913_v8  ;;  %v5888_v8 = vld [vmem:[%s13013_s2 + $0x7d8] sm:$0xff] }
 0x148   :  { %v7974_v56 = vpop.f32.mrf.mxu0  ;;  %v7976_v57 = vpop.f32.mrf.mxu1 }
 0x149   :  { %13029 = vst [vmem:[#allocation7_spill] sm:$0xff] %v7974_v56 }
 0x14a   :  { %13030 = vst [vmem:[#allocation8_spill] sm:$0xff] %v7976_v57 }
 0x14b   :  { %1026 = vmatmul.f32.gmra.mxu0 %v7619_v11  ;;  %5822 = vmatmul.msk.f32.gmra.mxu1 %vm461_vm2, %v7676_v26 }
 0x14c   :  { %5817 = vmatmul.msk.f32.gmra.mxu3 %vm461_vm2, %v7676_v26  ;;  %1093 = vmatmul.f32.gmra.mxu2 %v7671_v24 }
 0x14f   :  { %v8042_v12 = vpop.f32.mrf.mxu3 }
 0x150   :  { %v7984_v58 = vpop.f32.mrf.mxu0  ;;  %v7986_v59 = vpop.f32.mrf.mxu1 }
 0x151   :  { %13031 = vst [vmem:[#allocation9_spill] sm:$0xff] %v7984_v58 }
 0x152   :  { %13032 = vst [vmem:[#allocation10_spill] sm:$0xff] %v7986_v59  ;;  %v5860_v59 = vld [vmem:[%s13013_s2 + $0x6f8] sm:$0xff] }
 0x153   :  { %1029 = vmatmul.f32.gmra.mxu0 %v7671_v24  ;;  %5823 = vmatmul.msk.f32.gmra.mxu1 %vm461_vm2, %v7719_v37 }
 0x154   :  { %5818 = vmatmul.msk.f32.gmra.mxu3 %vm461_vm2, %v7719_v37  ;;  %1096 = vmatmul.f32.gmra.mxu2 %v7705_v34 }
 0x157   :  { %v8057_v18 = vpop.f32.mrf.mxu3 }
 0x158   :  { %v7994_v11 = vpop.f32.mrf.mxu0  ;;  %v7996_v60 = vpop.f32.mrf.mxu1 }
 0x159   :  { %13033 = vst [vmem:[#allocation11_spill] sm:$0xff] %v7994_v11 }
 0x15a   :  { %13034 = vst [vmem:[#allocation12_spill] sm:$0xff] %v7996_v60 }
 0x15b   :  { %1032 = vmatmul.f32.gmra.mxu0 %v7705_v34  ;;  %5824 = vmatmul.msk.f32.gmra.mxu1 %vm461_vm2, %v7754_v44 }
 0x15c   :  { %5819 = vmatmul.msk.f32.gmra.mxu3 %vm461_vm2, %v7754_v44 }
 0x15f   :  { %v8076_v25 = vpop.f32.mrf.mxu3 }
 0x160   :  { %v8003_v24 = vpop.f32.mrf.mxu0  ;;  %v8005_v61 = vpop.f32.mrf.mxu1 }
 0x161   :  { %13035 = vst [vmem:[#allocation13_spill] sm:$0xff] %v8003_v24  ;;  %v5865_v24 = vld [vmem:[%s13013_s2 + $0x720] sm:$0xff] }
 0x162   :  { %13036 = vst [vmem:[#allocation14_spill] sm:$0xff] %v8005_v61 }
 0x163   :  { %5836 = vmatmul.msk.f32.vlgmr.msra.gmra.mxu0 %vm78_vm1, %v5830_v1  ;;  %5842 = vmatmul.msk.f32.vlgmr.msra.gmra.mxu1 %vm78_vm1, %v5830_v1  ;;  %v5908_v1 = vld [vmem:[%s13013_s2 + $0x878] sm:$0xff] }
 0x164   :  { %5825 = vmatmul.msk.f32.vlgmr.msra.gmra.mxu3 %vm461_vm2, %v7584_v62  ;;  %1405 = vmatpush.msrb.mxu0 %v5908_v1 }
 0x167   :  { %v8084_v30 = vpop.f32.mrf.mxu3 }
 0x168   :  { %v8016_v34 = vpop.f32.mrf.mxu0  ;;  %v8018_v5 = vpop.f32.mrf.mxu1 }
 0x169   :  { %13037 = vst [vmem:[#allocation15_spill] sm:$0xff] %v8016_v34 }
 0x16a   :  { %13038 = vst [vmem:[#allocation16_spill] sm:$0xff] %v8018_v5 }
 0x16b   :  { %5837 = vmatmul.msk.f32.gmra.mxu0 %vm78_vm1, %v5831_v6  ;;  %5843 = vmatmul.msk.f32.gmra.mxu1 %vm78_vm1, %v5831_v6  ;;  %v5902_v6 = vld [vmem:[%s13013_s2 + $0x848] sm:$0xff] }
 0x16c   :  { %5826 = vmatmul.msk.f32.gmra.mxu3 %vm461_vm2, %v7639_v17  ;;  %1342 = vmatpush.msra.mxu2 %v5902_v6  ;;  %v5882_v6 = vld [vmem:[%s13013_s2 + $0x7a8] sm:$0xff] }
 0x16f   :  { %v8092_v36 = vpop.f32.mrf.mxu3 }
 0x170   :  { %v8029_v32 = vpop.f32.mrf.mxu0  ;;  %v8031_v62 = vpop.f32.mrf.mxu1  ;;  %13048 = vst [vmem:[#allocation26_spill] sm:$0xff] %v8092_v36  ;;  %v5939_v36 = vld [vmem:[%s13013_s2 + $0x970] sm:$0xff] }
 0x171   :  { %13039 = vst [vmem:[#allocation17_spill] sm:$0xff] %v8029_v32  ;;  %v5927_v32 = vld [vmem:[%s13013_s2 + $0x910] sm:$0xff] }
 0x172   :  { %13040 = vst [vmem:[#allocation18_spill] sm:$0xff] %v8031_v62  ;;  %v5858_v62 = vld [vmem:[%s13013_s2 + $0x6e8] sm:$0xff] }
 0x173   :  { %5838 = vmatmul.msk.f32.gmra.mxu0 %vm78_vm1, %v5832_v10  ;;  %5844 = vmatmul.msk.f32.gmra.mxu1 %vm78_vm1, %v5832_v10  ;;  %v5903_v10 = vld [vmem:[%s13013_s2 + $0x850] sm:$0xff] }
 0x174   :  { %5827 = vmatmul.msk.f32.gmra.mxu3 %vm461_vm2, %v7676_v26  ;;  %v8055_v26 = vpop.f32.mrf.mxu2  ;;  %1406 = vmatpush.msrb.mxu0 %v5903_v10  ;;  %v5883_v10 = vld [vmem:[%s13013_s2 + $0x7b0] sm:$0xff] }
 0x177   :  { %v8118_v45 = vpop.f32.mrf.mxu3 }
 0x178   :  { %v8044_v17 = vpop.f32.mrf.mxu0  ;;  %v8046_v13 = vpop.f32.mrf.mxu1  ;;  %13050 = vst [vmem:[#allocation28_spill] sm:$0xff] %v8118_v45 }
 0x179   :  { %13041 = vst [vmem:[#allocation19_spill] sm:$0xff] %v8044_v17  ;;  %v5915_v17 = vld [vmem:[%s13013_s2 + $0x8b0] sm:$0xff] }
 0x17a   :  { %13042 = vst [vmem:[#allocation20_spill] sm:$0xff] %v8046_v13  ;;  %v5924_v13 = vld [vmem:[%s13013_s2 + $0x8f8] sm:$0xff] }
 0x17b   :  { %5839 = vmatmul.msk.f32.gmra.mxu0 %vm78_vm1, %v5833_v16  ;;  %5845 = vmatmul.msk.f32.gmra.mxu1 %vm78_vm1, %v5833_v16  ;;  %v5897_v16 = vld [vmem:[%s13013_s2 + $0x820] sm:$0xff] }
 0x17c   :  { %5828 = vmatmul.msk.f32.gmra.mxu3 %vm461_vm2, %v7719_v37  ;;  %v8074_v47 = vpop.f32.mrf.mxu2  ;;  %1343 = vmatpush.msra.mxu2 %v5897_v16  ;;  %v5947_v16 = vld [vmem:[%s13013_s2 + $0x9b0] sm:$0xff] }
 0x17d   :  { %1381 = vmatpush.msrb.mxu3 %v5947_v16  ;;  %v5868_v16 = vld [vmem:[%s13013_s2 + $0x738] sm:$0xff] }
 0x17e   :  { %1344 = vmatpush.msra.mxu2 %v5892_v63  ;;  %v5878_v63 = vld [vmem:[%s13013_s2 + $0x788] sm:$0xff] }
 0x17f   :  { %v8160_v1 = vpop.f32.mrf.mxu3 }
 0x180   :  { %v8059_v19 = vpop.f32.mrf.mxu0  ;;  %v8061_v20 = vpop.f32.mrf.mxu1  ;;  %13052 = vst [vmem:[#allocation30_spill] sm:$0xff] %v8160_v1  ;;  %1345 = vmatpush.msra.mxu2 %v5887_v7  ;;  %v5873_v7 = vld [vmem:[%s13013_s2 + $0x760] sm:$0xff]  ;;  %v527_v1 = vadd.f32 %v7803_v3, %v7801_v2  ;;  %v539_v2 = vadd.f32 %v7929_v41, %v7927_v40 }
 0x181   :  { %13043 = vst [vmem:[#allocation21_spill] sm:$0xff] %v8059_v19 }
 0x182   :  { %13044 = vst [vmem:[#allocation22_spill] sm:$0xff] %v8061_v20  ;;  %1346 = vmatpush.msra.mxu2 %v5882_v6 }
 0x183   :  { %5840 = vmatmul.msk.f32.gmra.mxu0 %vm78_vm1, %v5834_v21  ;;  %5846 = vmatmul.msk.f32.gmra.mxu1 %vm78_vm1, %v5834_v21  ;;  %v5898_v21 = vld [vmem:[%s13013_s2 + $0x828] sm:$0xff] }
 0x184   :  { %5829 = vmatmul.msk.f32.gmra.mxu3 %vm461_vm2, %v7754_v44  ;;  %v8082_v29 = vpop.f32.mrf.mxu2  ;;  %1407 = vmatpush.msrb.mxu0 %v5898_v21  ;;  %v5877_v21 = vld [vmem:[%s13013_s2 + $0x780] sm:$0xff] }
 0x185   :  { %1347 = vmatpush.msra.mxu2 %v5877_v21  ;;  %v5948_v21 = vld [vmem:[%s13013_s2 + $0x9b8] sm:$0xff] }
 0x186   :  { %1408 = vmatpush.msrb.mxu0 %v5893_v0  ;;  %v5872_v0 = vld [vmem:[%s13013_s2 + $0x758] sm:$0xff]  ;;  %1445 = vmatpush.msrb.mxu1 %v5948_v21  ;;  %v5937_v21 = vld [vmem:[%s13013_s2 + $0x960] sm:$0xff] }
 0x187   :  { %1348 = vmatpush.msra.mxu2 %v5872_v0  ;;  %v5862_v0 = vld [vmem:[%s13013_s2 + $0x708] sm:$0xff]  ;;  %v8207_v34 = vpop.f32.mrf.mxu3 }
 0x188   :  { %v8070_v37 = vpop.f32.mrf.mxu0  ;;  %v8072_v46 = vpop.f32.mrf.mxu1  ;;  %1409 = vmatpush.msrb.mxu0 %v5888_v8  ;;  %13055 = vst [vmem:[#allocation33_spill] sm:$0xff] %v8207_v34 }
 0x189   :  { %13045 = vst [vmem:[#allocation23_spill] sm:$0xff] %v8070_v37 }
 0x18a   :  { %13046 = vst [vmem:[#allocation24_spill] sm:$0xff] %v8072_v46  ;;  %1410 = vmatpush.msrb.mxu0 %v5883_v10  ;;  %v5867_v10 = vld [vmem:[%s13013_s2 + $0x730] sm:$0xff] }
 0x18b   :  { %1349 = vmatpush.msra.mxu2 %v5867_v10  ;;  %v5943_v10 = vld [vmem:[%s13013_s2 + $0x990] sm:$0xff] }
 0x18c   :  { %v8090_v44 = vpop.f32.mrf.mxu2  ;;  %1411 = vmatpush.msrb.mxu0 %v5878_v63  ;;  %v5942_v63 = vld [vmem:[%s13013_s2 + $0x988] sm:$0xff]  ;;  %1446 = vmatpush.msrb.mxu1 %v5943_v10  ;;  %v5853_v10 = vld [vmem:[%s13013_s2 + $0x6c0] sm:$0xff] }
 0x18d   :  { %13047 = vst [vmem:[#allocation25_spill] sm:$0xff] %v8090_v44  ;;  %1382 = vmatpush.msrb.mxu3 %v5942_v63  ;;  %1350 = vmatpush.msra.mxu2 %v5862_v0  ;;  %v5938_v63 = vld [vmem:[%s13013_s2 + $0x968] sm:$0xff]  ;;  %v5852_v0 = vld [vmem:[%s13013_s2 + $0x6b8] sm:$0xff]  ;;  %v5859_v44 = vld [vmem:[%s13013_s2 + $0x6f0] sm:$0xff] }
 0x18e   :  { %1412 = vmatpush.msrb.mxu0 %v5873_v7  ;;  %v5863_v7 = vld [vmem:[%s13013_s2 + $0x710] sm:$0xff]  ;;  %1447 = vmatpush.msrb.mxu1 %v5938_v63 }
 0x18f   :  { %1383 = vmatpush.msrb.mxu3 %v5937_v21  ;;  %v5847_v63 = vld [vmem:[%s13013_s2 + $0x690] sm:$0xff] }
 0x190   :  { %v8078_v27 = vpop.f32.mrf.mxu0  ;;  %v8080_v28 = vpop.f32.mrf.mxu1  ;;  %1413 = vmatpush.msrb.mxu0 %v5868_v16  ;;  %v5857_v16 = vld [vmem:[%s13013_s2 + $0x6e0] sm:$0xff] }
 0x191   :  { %1351 = vmatpush.msra.mxu2 %v5857_v16  ;;  %v5933_v16 = vld [vmem:[%s13013_s2 + $0x940] sm:$0xff] }
 0x192   :  { %1414 = vmatpush.msrb.mxu0 %v5863_v7  ;;  %v5932_v7 = vld [vmem:[%s13013_s2 + $0x938] sm:$0xff]  ;;  %1448 = vmatpush.msrb.mxu1 %v5933_v16  ;;  %v8254_v16 = vpop.f32.mrf.mxu3 }
 0x193   :  { %1352 = vmatpush.msra.mxu2 %v5852_v0  ;;  %1384 = vmatpush.msrb.mxu3 %v5932_v7  ;;  %v5848_v0 = vld [vmem:[%s13013_s2 + $0x698] sm:$0xff]  ;;  %13059 = vst [vmem:[#allocation37_spill] sm:$0xff] %v8254_v16  ;;  %v594_v16 = vadd.f32 %v8042_v12, %v8055_v26  ;;  %v536_v26 = vadd.f32 %v7901_v31, %v7899_v55  ;;  %v8648_v55 = vld [vmem:[%s13014_s3] sm:$0x1f] }
 0x194   :  { %v8116_v48 = vpop.f32.mrf.mxu2  ;;  %1415 = vmatpush.msrb.mxu0 %v5858_v62  ;;  %v5928_v7 = vld [vmem:[%s13013_s2 + $0x918] sm:$0xff] }
 0x195   :  { %13049 = vst [vmem:[#allocation27_spill] sm:$0xff] %v8116_v48  ;;  %1353 = vmatpush.msra.mxu2 %v5847_v63  ;;  %1385 = vmatpush.msrb.mxu3 %v5927_v32  ;;  %v5925_v32 = vld [vmem:[%s13013_s2 + $0x900] sm:$0xff]  ;;  %v5919_v63 = vld [vmem:[%s13013_s2 + $0x8d0] sm:$0xff] }
 0x196   :  { %1416 = vmatpush.msrb.mxu0 %v5853_v10  ;;  %1449 = vmatpush.msrb.mxu1 %v5928_v7  ;;  %v5914_v7 = vld [vmem:[%s13013_s2 + $0x8a8] sm:$0xff]  ;;  %v5871_v48 = vld [vmem:[%s13013_s2 + $0x750] sm:$0xff] }
 0x197   :  { %1466 = vmatpush.msrb.mxu2 %v5924_v13 }
 0x198   :  { %v8086_v54 = vpop.f32.mrf.mxu0  ;;  %v8088_v35 = vpop.f32.mrf.mxu1  ;;  %1417 = vmatpush.msrb.mxu0 %v5848_v0  ;;  %v5920_v0 = vld [vmem:[%s13013_s2 + $0x8d8] sm:$0xff] }
 0x199   :  { %1467 = vmatpush.msrb.mxu2 %v5919_v63  ;;  %v5909_v63 = vld [vmem:[%s13013_s2 + $0x880] sm:$0xff]  ;;  %v897_v12 = vadd.f32 %v8086_v54, %v594_v16 }
 0x19a   :  { %1530 = vmatpush.msra.mxu0 %v5925_v32  ;;  %v8280_v19 = vpop.f32.mrf.mxu3 }
 0x19b   :  { %1468 = vmatpush.msrb.mxu2 %v5914_v7  ;;  %v5899_v7 = vld [vmem:[%s13013_s2 + $0x830] sm:$0xff] }
 0x19c   :  { %v8158_v53 = vpop.f32.mrf.mxu2  ;;  %1531 = vmatpush.msra.mxu0 %v5920_v0  ;;  %v5910_v0 = vld [vmem:[%s13013_s2 + $0x888] sm:$0xff] }
 0x19d   :  { %13051 = vst [vmem:[#allocation29_spill] sm:$0xff] %v8158_v53  ;;  %1469 = vmatpush.msrb.mxu2 %v5909_v63  ;;  %v5894_v63 = vld [vmem:[%s13013_s2 + $0x808] sm:$0xff] }
 0x19e   :  { %1532 = vmatpush.msra.mxu0 %v5915_v17  ;;  %v5905_v17 = vld [vmem:[%s13013_s2 + $0x860] sm:$0xff] }
 0x1a0   :  { %v8094_v38 = vpop.f32.mrf.mxu0  ;;  %v8096_v39 = vpop.f32.mrf.mxu1  ;;  %1533 = vmatpush.msra.mxu0 %v5910_v0  ;;  %v5895_v0 = vld [vmem:[%s13013_s2 + $0x810] sm:$0xff] }
 0x1a2   :  { %1534 = vmatpush.msra.mxu0 %v5905_v17  ;;  %v5889_v17 = vld [vmem:[%s13013_s2 + $0x7e0] sm:$0xff] }
 0x1a4   :  { %v8205_v5 = vpop.f32.mrf.mxu2 }
 0x1a8   :  { %v8120_v49 = vpop.f32.mrf.mxu0  ;;  %v8122_v52 = vpop.f32.mrf.mxu1 }
 0x1ac   :  { %v8252_v10 = vpop.f32.mrf.mxu2 }
 0x1ad   :  { %13058 = vst [vmem:[#allocation36_spill] sm:$0xff] %v8252_v10 }
 0x1b0   :  { %v8148_v42 = vpop.f32.mrf.mxu0  ;;  %v8150_v43 = vpop.f32.mrf.mxu1 }
 0x1b4   :  { %v8278_v20 = vpop.f32.mrf.mxu2 }
 0x1b8   :  { %v8183_v8 = vpop.f32.mrf.mxu0  ;;  %v8185_v6 = vpop.f32.mrf.mxu1 }
 0x1b9   :  { %13053 = vst [vmem:[#allocation31_spill] sm:$0xff] %v8183_v8  ;;  %v8322_v8 = vpop.f32.mrf.mxu3 }
 0x1ba   :  { %13054 = vst [vmem:[#allocation32_spill] sm:$0xff] %v8185_v6  ;;  %v5904_v6 = vld [vmem:[%s13013_s2 + $0x858] sm:$0xff] }
 0x1bb   :  { %1470 = vmatpush.msrb.mxu2 %v5904_v6 }
 0x1bd   :  { %1471 = vmatpush.msrb.mxu2 %v5899_v7  ;;  %v8320_v7 = vpop.f32.mrf.mxu2 }
 0x1bf   :  { %1472 = vmatpush.msrb.mxu2 %v5894_v63  ;;  %v5949_v63 = vld [vmem:[%s13013_s2 + $0x9c0] sm:$0xff] }
 0x1c0   :  { %v8236_v62 = vpop.f32.mrf.mxu0  ;;  %v8238_v21 = vpop.f32.mrf.mxu1  ;;  %1509 = vmatpush.msra.mxu3 %v5949_v63  ;;  %v5875_v63 = vld [vmem:[%s13013_s2 + $0x770] sm:$0xff] }
 0x1c1   :  { %13056 = vst [vmem:[#allocation34_spill] sm:$0xff] %v8236_v62  ;;  %1473 = vmatpush.msrb.mxu2 %v5889_v17  ;;  %v5880_v17 = vld [vmem:[%s13013_s2 + $0x798] sm:$0xff]  ;;  %v8375_v11 = vpop.f32.mrf.mxu3  ;;  %v5945_v62 = vld [vmem:[%s13013_s2 + $0x9a0] sm:$0xff] }
 0x1c2   :  { %13057 = vst [vmem:[#allocation35_spill] sm:$0xff] %v8238_v21  ;;  %v5900_v21 = vld [vmem:[%s13013_s2 + $0x838] sm:$0xff] }
 0x1c3   :  { %1535 = vmatpush.msra.mxu0 %v5900_v21  ;;  %v5890_v21 = vld [vmem:[%s13013_s2 + $0x7e8] sm:$0xff] }
 0x1c5   :  { %1536 = vmatpush.msra.mxu0 %v5895_v0  ;;  %v5884_v0 = vld [vmem:[%s13013_s2 + $0x7b8] sm:$0xff]  ;;  %v8373_v60 = vpop.f32.mrf.mxu2 }
 0x1c6   :  { %1474 = vmatpush.msrb.mxu2 %v5884_v0 }
 0x1c7   :  { %1537 = vmatpush.msra.mxu0 %v5890_v21  ;;  %v5874_v21 = vld [vmem:[%s13013_s2 + $0x768] sm:$0xff] }
 0x1c8   :  { %v8256_v46 = vpop.f32.mrf.mxu0  ;;  %v8258_v37 = vpop.f32.mrf.mxu1 }
 0x1c9   :  { %13060 = vst [vmem:[#allocation38_spill] sm:$0xff] %v8256_v46  ;;  %v8428_v58 = vpop.f32.mrf.mxu3 }
 0x1ca   :  { %13061 = vst [vmem:[#allocation39_spill] sm:$0xff] %v8258_v37 }
 0x1d0   :  { %v8282_v13 = vpop.f32.mrf.mxu0  ;;  %v8284_v32 = vpop.f32.mrf.mxu1 }
 0x1d1   :  { %13062 = vst [vmem:[#allocation40_spill] sm:$0xff] %v8282_v13  ;;  %v5936_v13 = vld [vmem:[%s13013_s2 + $0x958] sm:$0xff] }
 0x1d2   :  { %13063 = vst [vmem:[#allocation41_spill] sm:$0xff] %v8284_v32  ;;  %v5879_v32 = vld [vmem:[%s13013_s2 + $0x790] sm:$0xff] }
 0x1d3   :  { %1475 = vmatpush.msrb.mxu2 %v5879_v32  ;;  %v5870_v32 = vld [vmem:[%s13013_s2 + $0x748] sm:$0xff] }
 0x1d5   :  { %1476 = vmatpush.msrb.mxu2 %v5874_v21  ;;  %v5944_v21 = vld [vmem:[%s13013_s2 + $0x998] sm:$0xff] }
 0x1d6   :  { %1510 = vmatpush.msra.mxu3 %v5944_v21 }
 0x1d8   :  { %v8310_v37 = vpop.f32.mrf.mxu0  ;;  %v8312_v6 = vpop.f32.mrf.mxu1  ;;  %1511 = vmatpush.msra.mxu3 %v5939_v36  ;;  %v5855_v36 = vld [vmem:[%s13013_s2 + $0x6d0] sm:$0xff] }
 0x1d9   :  { %13064 = vst [vmem:[#allocation42_spill] sm:$0xff] %v8310_v37  ;;  %v5911_v37 = vld [vmem:[%s13013_s2 + $0x890] sm:$0xff] }
 0x1da   :  { %13065 = vst [vmem:[#allocation43_spill] sm:$0xff] %v8312_v6  ;;  %v5885_v6 = vld [vmem:[%s13013_s2 + $0x7c0] sm:$0xff] }
 0x1db   :  { %1538 = vmatpush.msra.mxu0 %v5885_v6  ;;  %v5869_v6 = vld [vmem:[%s13013_s2 + $0x740] sm:$0xff] }
 0x1dc   :  { %1477 = vmatpush.msrb.mxu2 %v5869_v6  ;;  %v5940_v6 = vld [vmem:[%s13013_s2 + $0x978] sm:$0xff] }
 0x1dd   :  { %1539 = vmatpush.msra.mxu0 %v5880_v17  ;;  %v5950_v17 = vld [vmem:[%s13013_s2 + $0x9c8] sm:$0xff] }
 0x1de   :  { %1573 = vmatpush.msra.mxu1 %v5950_v17 }
 0x1df   :  { %1540 = vmatpush.msra.mxu0 %v5875_v63  ;;  %v5864_v63 = vld [vmem:[%s13013_s2 + $0x718] sm:$0xff] }
 0x1e0   :  { %v8345_v0 = vpop.f32.mrf.mxu0  ;;  %v8347_v61 = vpop.f32.mrf.mxu1  ;;  %1478 = vmatpush.msrb.mxu2 %v5864_v63  ;;  %1574 = vmatpush.msra.mxu1 %v5945_v62  ;;  %v5849_v62 = vld [vmem:[%s13013_s2 + $0x6a0] sm:$0xff]  ;;  %v5850_v63 = vld [vmem:[%s13013_s2 + $0x6a8] sm:$0xff] }
 0x1e1   :  { %1354 = vmatmul.f32.vlgmr.msra.gmra.mxu2 %v8345_v0  ;;  %5952 = vmatmul.msk.f32.vlgmr.msrb.gmra.mxu3 %vm461_vm2, %v8347_v61 }
 0x1e2   :  { %1418 = vmatmul.f32.vlgmr.msrb.gmra.mxu0 %v8345_v0  ;;  %5957 = vmatmul.msk.f32.vlgmr.msrb.gmra.mxu1 %vm461_vm2, %v8347_v61 }
 0x1e3   :  { %1541 = vmatpush.msra.mxu0 %v5870_v32  ;;  %v5934_v32 = vld [vmem:[%s13013_s2 + $0x948] sm:$0xff]  ;;  %1479 = vmatpush.msrb.mxu2 %v5859_v44  ;;  %v5929_v44 = vld [vmem:[%s13013_s2 + $0x920] sm:$0xff] }
 0x1e4   :  { %1575 = vmatpush.msra.mxu1 %v5940_v6  ;;  %1512 = vmatpush.msra.mxu3 %v5934_v32  ;;  %v5930_v6 = vld [vmem:[%s13013_s2 + $0x928] sm:$0xff]  ;;  %v8426_v32 = vpop.f32.mrf.mxu2 }
 0x1e5   :  { %1542 = vmatpush.msra.mxu0 %v5865_v24  ;;  %v5854_v24 = vld [vmem:[%s13013_s2 + $0x6c8] sm:$0xff]  ;;  %v839_v54 = vadd.f32 %v8426_v32, %v536_v26 }
 0x1e6   :  { %1480 = vmatpush.msrb.mxu2 %v5854_v24  ;;  %1513 = vmatpush.msra.mxu3 %v5929_v44  ;;  %v5926_v24 = vld [vmem:[%s13013_s2 + $0x908] sm:$0xff] }
 0x1e7   :  { %1543 = vmatpush.msra.mxu0 %v5860_v59  ;;  %v5935_v59 = vld [vmem:[%s13013_s2 + $0x950] sm:$0xff] }
 0x1e8   :  { %v8395_v17 = vpop.f32.mrf.mxu0  ;;  %v8397_v21 = vpop.f32.mrf.mxu1  ;;  %1576 = vmatpush.msra.mxu1 %v5935_v59  ;;  %1481 = vmatpush.msrb.mxu2 %v5849_v62  ;;  %v5916_v59 = vld [vmem:[%s13013_s2 + $0x8b8] sm:$0xff] }
 0x1e9   :  { %1357 = vmatmul.f32.gmra.mxu2 %v8395_v17  ;;  %5953 = vmatmul.msk.f32.gmra.mxu3 %vm461_vm2, %v8397_v21  ;;  %v8451_v62 = vpop.f32.mrf.mxu3 }
 0x1ea   :  { %1421 = vmatmul.f32.gmra.mxu0 %v8395_v17  ;;  %5958 = vmatmul.msk.f32.gmra.mxu1 %vm461_vm2, %v8397_v21 }
 0x1eb   :  { %1544 = vmatpush.msra.mxu0 %v5855_v36  ;;  %1577 = vmatpush.msra.mxu1 %v5930_v6  ;;  %v5921_v36 = vld [vmem:[%s13013_s2 + $0x8e0] sm:$0xff] }
 0x1ec   :  { %1594 = vmatpush.msra.mxu2 %v5926_v24  ;;  %v8449_v44 = vpop.f32.mrf.mxu2  ;;  %v5906_v24 = vld [vmem:[%s13013_s2 + $0x868] sm:$0xff] }
 0x1ed   :  { %1545 = vmatpush.msra.mxu0 %v5850_v63 }
 0x1ee   :  { %1595 = vmatpush.msra.mxu2 %v5921_v36  ;;  %v5901_v36 = vld [vmem:[%s13013_s2 + $0x840] sm:$0xff] }
 0x1f0   :  { %v8430_v57 = vpop.f32.mrf.mxu0  ;;  %v8432_v56 = vpop.f32.mrf.mxu1  ;;  %1596 = vmatpush.msra.mxu2 %v5916_v59 }
 0x1f1   :  { %1360 = vmatmul.f32.gmra.mxu2 %v8430_v57  ;;  %5954 = vmatmul.msk.f32.gmra.mxu3 %vm461_vm2, %v8432_v56  ;;  %v8484_v46 = vpop.f32.mrf.mxu3 }
 0x1f2   :  { %1424 = vmatmul.f32.gmra.mxu0 %v8430_v57  ;;  %5959 = vmatmul.msk.f32.gmra.mxu1 %vm461_vm2, %v8432_v56  ;;  %13067 = vst [vmem:[#allocation45_spill] sm:$0xff] %v8484_v46  ;;  %v5881_v46 = vld [vmem:[%s13013_s2 + $0x7a0] sm:$0xff] }
 0x1f3   :  { %1597 = vmatpush.msra.mxu2 %v5911_v37 }
 0x1f4   :  { %v8482_v37 = vpop.f32.mrf.mxu2 }
 0x1f5   :  { %1598 = vmatpush.msra.mxu2 %v5906_v24  ;;  %13066 = vst [vmem:[#allocation44_spill] sm:$0xff] %v8482_v37  ;;  %v5891_v24 = vld [vmem:[%s13013_s2 + $0x7f0] sm:$0xff]  ;;  %v5886_v37 = vld [vmem:[%s13013_s2 + $0x7c8] sm:$0xff] }
 0x1f7   :  { %1599 = vmatpush.msra.mxu2 %v5901_v36  ;;  %v5951_v36 = vld [vmem:[%s13013_s2 + $0x9d0] sm:$0xff] }
 0x1f8   :  { %v8453_v63 = vpop.f32.mrf.mxu0  ;;  %v8455_v6 = vpop.f32.mrf.mxu1  ;;  %1637 = vmatpush.msrb.mxu3 %v5951_v36 }
 0x1f9   :  { %1363 = vmatmul.f32.gmra.mxu2 %v8453_v63  ;;  %5955 = vmatmul.msk.f32.gmra.mxu3 %vm461_vm2, %v8455_v6  ;;  %v8518_v45 = vpop.f32.mrf.mxu3 }
 0x1fa   :  { %1427 = vmatmul.f32.gmra.mxu0 %v8453_v63  ;;  %5960 = vmatmul.msk.f32.gmra.mxu1 %vm461_vm2, %v8455_v6  ;;  %13069 = vst [vmem:[#allocation47_spill] sm:$0xff] %v8518_v45  ;;  %v5851_v45 = vld [vmem:[%s13013_s2 + $0x6b0] sm:$0xff] }
 0x1fb   :  { %1600 = vmatpush.msra.mxu2 %v5896_v50  ;;  %v5876_v50 = vld [vmem:[%s13013_s2 + $0x778] sm:$0xff] }
 0x1fc   :  { %v8516_v36 = vpop.f32.mrf.mxu2 }
 0x1fd   :  { %1601 = vmatpush.msra.mxu2 %v5891_v24  ;;  %v5941_v24 = vld [vmem:[%s13013_s2 + $0x980] sm:$0xff]  ;;  %13068 = vst [vmem:[#allocation46_spill] sm:$0xff] %v8516_v36 }
 0x1ff   :  { %1602 = vmatpush.msra.mxu2 %v5886_v37  ;;  %v5946_v37 = vld [vmem:[%s13013_s2 + $0x9a8] sm:$0xff] }
 0x200   :  { %v8472_v59 = vpop.f32.mrf.mxu0  ;;  %v8474_v51 = vpop.f32.mrf.mxu1  ;;  %1638 = vmatpush.msrb.mxu3 %v5946_v37  ;;  %v5931_v37 = vld [vmem:[%s13013_s2 + $0x930] sm:$0xff] }
 0x201   :  { %1366 = vmatmul.f32.gmra.mxu2 %v8472_v59  ;;  %5956 = vmatmul.msk.f32.gmra.mxu3 %vm461_vm2, %v8474_v51 }
 0x202   :  { %1430 = vmatmul.f32.gmra.mxu0 %v8472_v59  ;;  %5961 = vmatmul.msk.f32.gmra.mxu1 %vm461_vm2, %v8474_v51 }
 0x203   :  { %1603 = vmatpush.msra.mxu2 %v5881_v46  ;;  %1639 = vmatpush.msrb.mxu3 %v5941_v24  ;;  %v5866_v46 = vld [vmem:[%s13013_s2 + $0x728] sm:$0xff]  ;;  %v8546_v24 = vpop.f32.mrf.mxu3 }
 0x204   :  { %13071 = vst [vmem:[#allocation49_spill] sm:$0xff] %v8546_v24 }
 0x205   :  { %1604 = vmatpush.msra.mxu2 %v5876_v50  ;;  %1640 = vmatpush.msrb.mxu3 %v5936_v13  ;;  %v5856_v13 = vld [vmem:[%s13013_s2 + $0x6d8] sm:$0xff]  ;;  %v8544_v50 = vpop.f32.mrf.mxu2 }
 0x206   :  { %13070 = vst [vmem:[#allocation48_spill] sm:$0xff] %v8544_v50  ;;  %v603_v50 = vadd.f32 %v8084_v30, %v8010_v4  ;;  %v533_v4 = vadd.f32 %v7870_v23, %v7868_v22 }
 0x207   :  { %1605 = vmatpush.msra.mxu2 %v5871_v48  ;;  %v5861_v48 = vld [vmem:[%s13013_s2 + $0x700] sm:$0xff]  ;;  %1641 = vmatpush.msrb.mxu3 %v5931_v37 }
 0x208   :  { %v906_v53 = vadd.f32 %v8148_v42, %v603_v50 }
 0x209   :  { %1482 = vmatmul.f32.vlgmr.msrb.gmra.mxu2 %v8345_v0  ;;  %5962 = vmatmul.msk.f32.vlgmr.msra.gmra.mxu3 %vm461_vm2, %v8347_v61 }
 0x20a   :  { %1546 = vmatmul.f32.vlgmr.msra.gmra.mxu0 %v8345_v0  ;;  %5967 = vmatmul.msk.f32.vlgmr.msra.gmra.mxu1 %vm461_vm2, %v8347_v61  ;;  %v938_v31 = vadd.f32 %v8150_v43, %v906_v53  ;;  %v871_v43 = vadd.f32 %v8428_v58, %v839_v54 }
 0x20b   :  { %1606 = vmatpush.msra.mxu2 %v5866_v46  ;;  %v8559_v37 = vpop.f32.mrf.mxu3 }
 0x20c   :  { %13073 = vst [vmem:[#allocation51_spill] sm:$0xff] %v8559_v37 }
 0x20d   :  { %1607 = vmatpush.msra.mxu2 %v5861_v48  ;;  %v8557_v46 = vpop.f32.mrf.mxu2 }
 0x20e   :  { %13072 = vst [vmem:[#allocation50_spill] sm:$0xff] %v8557_v46 }
 0x20f   :  { %1608 = vmatpush.msra.mxu2 %v5856_v13 }
 0x211   :  { %1485 = vmatmul.f32.gmra.mxu2 %v8395_v17  ;;  %5963 = vmatmul.msk.f32.gmra.mxu3 %vm461_vm2, %v8397_v21 }
 0x212   :  { %1549 = vmatmul.f32.gmra.mxu0 %v8395_v17  ;;  %5968 = vmatmul.msk.f32.gmra.mxu1 %vm461_vm2, %v8397_v21 }
 0x213   :  { %1609 = vmatpush.msra.mxu2 %v5851_v45  ;;  %v8572_v48 = vpop.f32.mrf.mxu3 }
 0x214   :  { %13075 = vst [vmem:[#allocation53_spill] sm:$0xff] %v8572_v48 }
 0x215   :  { %v8570_v45 = vpop.f32.mrf.mxu2 }
 0x216   :  { %13074 = vst [vmem:[#allocation52_spill] sm:$0xff] %v8570_v45 }
 0x219   :  { %1488 = vmatmul.f32.gmra.mxu2 %v8430_v57  ;;  %5964 = vmatmul.msk.f32.gmra.mxu3 %vm461_vm2, %v8432_v56 }
 0x21a   :  { %1552 = vmatmul.f32.gmra.mxu0 %v8430_v57  ;;  %5969 = vmatmul.msk.f32.gmra.mxu1 %vm461_vm2, %v8432_v56 }
 0x21b   :  { %v8582_v24 = vpop.f32.mrf.mxu3 }
 0x21c   :  { %13077 = vst [vmem:[#allocation55_spill] sm:$0xff] %v8582_v24 }
 0x21d   :  { %v8580_v13 = vpop.f32.mrf.mxu2 }
 0x21e   :  { %13076 = vst [vmem:[#allocation54_spill] sm:$0xff] %v8580_v13 }
 0x221   :  { %1491 = vmatmul.f32.gmra.mxu2 %v8453_v63  ;;  %5965 = vmatmul.msk.f32.gmra.mxu3 %vm461_vm2, %v8455_v6 }
 0x222   :  { %1555 = vmatmul.f32.gmra.mxu0 %v8453_v63  ;;  %5970 = vmatmul.msk.f32.gmra.mxu1 %vm461_vm2, %v8455_v6 }
 0x223   :  { %v8589_v37 = vpop.f32.mrf.mxu3 }
 0x224   :  { %13079 = vst [vmem:[#allocation57_spill] sm:$0xff] %v8589_v37 }
 0x225   :  { %v8587_v48 = vpop.f32.mrf.mxu2 }
 0x226   :  { %13078 = vst [vmem:[#allocation56_spill] sm:$0xff] %v8587_v48 }
 0x229   :  { %1494 = vmatmul.f32.gmra.mxu2 %v8472_v59  ;;  %5966 = vmatmul.msk.f32.gmra.mxu3 %vm461_vm2, %v8474_v51 }
 0x22a   :  { %1558 = vmatmul.f32.gmra.mxu0 %v8472_v59  ;;  %5971 = vmatmul.msk.f32.gmra.mxu1 %vm461_vm2, %v8474_v51 }
 0x231   :  { %1610 = vmatmul.f32.vlgmr.msra.gmra.mxu2 %v8345_v0  ;;  %5972 = vmatmul.msk.f32.vlgmr.msrb.gmra.mxu3 %vm461_vm2, %v8347_v61  ;;  %v8594_v0 = vpop.f32.mrf.mxu2  ;;  %v8596_v61 = vpop.f32.mrf.mxu3 }
 0x232   :  { %13080 = vst [vmem:[#allocation58_spill] sm:$0xff] %v8594_v0 }
 0x233   :  { %13081 = vst [vmem:[#allocation59_spill] sm:$0xff] %v8596_v61 }
 0x239   :  { %1613 = vmatmul.f32.gmra.mxu2 %v8395_v17  ;;  %5973 = vmatmul.msk.f32.gmra.mxu3 %vm461_vm2, %v8397_v21  ;;  %v8604_v17 = vpop.f32.mrf.mxu2 }
 0x23a   :  { %13082 = vst [vmem:[#allocation60_spill] sm:$0xff] %v8604_v17 }
 0x241   :  { %1616 = vmatmul.f32.gmra.mxu2 %v8430_v57  ;;  %5974 = vmatmul.msk.f32.gmra.mxu3 %vm461_vm2, %v8432_v56  ;;  %v8606_v57 = vpop.f32.mrf.mxu3  ;;  %v8608_v21 = vpop.f32.mrf.mxu2 }
 0x242   :  { %13083 = vst [vmem:[#allocation61_spill] sm:$0xff] %v8606_v57 }
 0x243   :  { %13084 = vst [vmem:[#allocation62_spill] sm:$0xff] %v8608_v21  ;;  %v600_v21 = vadd.f32 %v8076_v25, %v8082_v29 }
 0x245   :  { %v903_v36 = vadd.f32 %v8120_v49, %v600_v21 }
 0x247   :  { %v935_v3 = vadd.f32 %v8122_v52, %v903_v36 }
 0x249   :  { %1619 = vmatmul.f32.gmra.mxu2 %v8453_v63  ;;  %5975 = vmatmul.msk.f32.gmra.mxu3 %vm461_vm2, %v8455_v6  ;;  %v8610_v56 = vpop.f32.mrf.mxu3 }
 0x24a   :  { %13085 = vst [vmem:[#allocation63_spill] sm:$0xff] %v8610_v56  ;;  %v597_v56 = vadd.f32 %v8057_v18, %v8074_v47  ;;  %v530_v18 = vadd.f32 %v7840_v15, %v7838_v14  ;;  %v591_v47 = vadd.f32 %v8023_v9, %v8040_v33 }
 0x24c   :  { %v900_v10 = vadd.f32 %v8094_v38, %v597_v56  ;;  %v830_v38 = vadd.f32 %v8278_v20, %v527_v1  ;;  %v833_v14 = vadd.f32 %v8320_v7, %v530_v18  ;;  %v894_v15 = vadd.f32 %v8078_v27, %v591_v47 }
 0x24d   :  { %v836_v20 = vadd.f32 %v8373_v60, %v533_v4  ;;  %v929_v27 = vadd.f32 %v8088_v35, %v897_v12  ;;  %v1686_v1 = vperm.slane %v8648_v55, 1 }
 0x24e   :  { %v932_v22 = vadd.f32 %v8096_v39, %v900_v10  ;;  %v842_v10 = vadd.f32 %v8449_v44, %v539_v2  ;;  %v926_v16 = vadd.f32 %v8080_v28, %v894_v15 }
 0x24f   :  { %v868_v53 = vadd.f32 %v8375_v11, %v836_v20 }
 0x250   :  { %v874_v50 = vadd.f32 %v8451_v62, %v842_v10 }
 0x251   :  { %1622 = vmatmul.f32.gmra.mxu2 %v8472_v59  ;;  %5976 = vmatmul.msk.f32.gmra.mxu3 %vm461_vm2, %v8474_v51 }
 0x25f   :  { %v1419_v24 = vpop.f32.mrf.mxu0  ;;  %v1451_v37 = vpop.f32.mrf.mxu1 }
 0x260   :  { %v1452_v39 = vadd.f32 %v1451_v37, %v1419_v24 }
 0x262   :  { %v1659_v44 = vadd.f32 %v1452_v39, %v926_v16  ;;  %v13089_v16 = vld [vmem:[#allocation36_spill] sm:$0xff] }
 0x264   :  { %v8612_v13 = vpop.f32.mrf.mxu2  ;;  %v8614_v63 = vpop.f32.mrf.mxu3 }
 0x265   :  { %v1388_v58 = vadd.f32 %v8614_v63, %v8612_v13  ;;  %v1696_v63 = vadd.f32 %v1686_v1, %v1659_v44 }
 0x267   :  { %v1422_v6 = vpop.f32.mrf.mxu0  ;;  %v1454_v61 = vpop.f32.mrf.mxu1  ;;  %v8690_v26 = vmax.f32 %v1696_v63, 0.0 }
 0x268   :  { %v1455_v40 = vadd.f32 %v1454_v61, %v1422_v6 }
 0x26a   :  { %v1664_v60 = vadd.f32 %v1455_v40, %v929_v27 }
 0x26c   :  { %v1358_v59 = vpop.f32.mrf.mxu2  ;;  %v1390_v48 = vpop.f32.mrf.mxu3 }
 0x26d   :  { %v1391_v24 = vadd.f32 %v1390_v48, %v1358_v59  ;;  %v862_v48 = vadd.f32 %v8280_v19, %v830_v38 }
 0x26f   :  { %v1425_v0 = vpop.f32.mrf.mxu0  ;;  %v1457_v51 = vpop.f32.mrf.mxu1 }
 0x270   :  { %v1458_v30 = vadd.f32 %v1457_v51, %v1425_v0  ;;  %v865_v0 = vadd.f32 %v8322_v8, %v833_v14  ;;  %v1701_v8 = vadd.f32 %v1686_v1, %v1664_v60  ;;  %v1658_v51 = vadd.f32 %v1388_v58, %v862_v48  ;;  %v8698_v14 = vld [vmem:[%s13015_s4] sm:$0xff]  ;;  %v13101_v48 = vld [vmem:[#allocation10_spill] sm:$0xff] }
 0x272   :  { %v1669_v52 = vadd.f32 %v1458_v30, %v932_v22  ;;  %v1663_v56 = vadd.f32 %v1391_v24, %v865_v0  ;;  %v8684_v47 = vmax.f32 %v1701_v8, 0.0  ;;  %v13096_v24 = vld [vmem:[#allocation6_spill] sm:$0xff]  ;;  %v13100_v8 = vld [vmem:[#allocation9_spill] sm:$0xff] }
 0x274   :  { %v1361_v45 = vpop.f32.mrf.mxu2  ;;  %v1393_v17 = vpop.f32.mrf.mxu3  ;;  %v1706_v28 = vadd.f32 %v1686_v1, %v1669_v52  ;;  %v8735_v52 = vld [vmem:[%s13015_s4 + $0x10] sm:$0xf] }
 0x276   :  { %v8675_v13 = vmax.f32 %v1706_v28, 0.0 }
 0x277   :  { %v1428_v46 = vpop.f32.mrf.mxu0  ;;  %v1460_v57 = vpop.f32.mrf.mxu1 }
 0x278   :  { %v1461_v34 = vadd.f32 %v1460_v57, %v1428_v46 }
 0x27a   :  { %v1674_v41 = vadd.f32 %v1461_v34, %v935_v3  ;;  %v1394_v34 = vadd.f32 %v1393_v17, %v1361_v45  ;;  %v1685_v17 = vperm.slane %v8648_v55, 0 }
 0x27c   :  { %v1364_v25 = vpop.f32.mrf.mxu2  ;;  %v1396_v29 = vpop.f32.mrf.mxu3  ;;  %v1711_v35 = vadd.f32 %v1686_v1, %v1674_v41  ;;  %v1668_v11 = vadd.f32 %v1394_v34, %v868_v53  ;;  %v1700_v12 = vadd.f32 %v1685_v17, %v1663_v56  ;;  %v1695_v38 = vadd.f32 %v1685_v17, %v1658_v51  ;;  %v8723_v41 = vld [vmem:[%s13015_s4 + $0x8] sm:$0xff]  ;;  %v13091_v53 = vld [vmem:[#allocation40_spill] sm:$0xff] }
 0x27d   :  { %v1397_v49 = vadd.f32 %v1396_v29, %v1364_v25  ;;  %v661_v56 = vadd.f32 %v13101_v48, %v13100_v8  ;;  %v13104_v51 = vld [vmem:[#allocation34_spill] sm:$0xff]  ;;  %v13115_v8 = vld [vmem:[#allocation48_spill] sm:$0xff] }
 0x27e   :  { %v8671_v62 = vmax.f32 %v1711_v35, 0.0  ;;  %v1705_v29 = vadd.f32 %v1685_v17, %v1668_v11  ;;  %v8703_v15 = vmax.f32 %v1700_v12, 0.0  ;;  %v8709_v22 = vmax.f32 %v1695_v38, 0.0  ;;  %v13098_v11 = vld [vmem:[#allocation7_spill] sm:$0xff]  ;;  %v13106_v38 = vld [vmem:[#allocation12_spill] sm:$0xff]  ;;  %v13116_v48 = vld [vmem:[#allocation50_spill] sm:$0xff] }
 0x27f   :  { %v1431_v23 = vpop.f32.mrf.mxu0  ;;  %v1463_v9 = vpop.f32.mrf.mxu1  ;;  %v1673_v46 = vadd.f32 %v1397_v49, %v871_v43  ;;  %v13086_v49 = vld [vmem:[#allocation33_spill] sm:$0xff]  ;;  %v13105_v12 = vld [vmem:[#allocation11_spill] sm:$0xff] }
 0x280   :  { %v1464_v33 = vadd.f32 %v1463_v9, %v1431_v23  ;;  %v8693_v30 = vmax.f32 %v1705_v29, 0.0  ;;  %v728_v39 = vadd.f32 %v13086_v49, %v8205_v5  ;;  %v13090_v43 = vld [vmem:[#allocation37_spill] sm:$0xff]  ;;  %v13094_v5 = vld [vmem:[#allocation38_spill] sm:$0xff]  ;;  %v664_v49 = vadd.f32 %v13106_v38, %v13105_v12 }
 0x281   :  { %v1710_v59 = vadd.f32 %v1685_v17, %v1673_v46  ;;  %v731_v34 = vadd.f32 %v13090_v43, %v13089_v16  ;;  %v13110_v16 = vld [vmem:[#allocation44_spill] sm:$0xff]  ;;  %v1688_v38 = vperm.slane %v8648_v55, 3 }
 0x282   :  { %v1679_v42 = vadd.f32 %v1464_v33, %v938_v31  ;;  %v1031_v60 = vadd.f32 %v13091_v53, %v728_v39  ;;  %v13107_v39 = vld [vmem:[#allocation13_spill] sm:$0xff] }
 0x283   :  { %v8687_v19 = vmax.f32 %v1710_v59, 0.0  ;;  %v13103_v59 = vld [vmem:[#allocation26_spill] sm:$0xff] }
 0x284   :  { %v1716_v7 = vadd.f32 %v1686_v1, %v1679_v42  ;;  %v1367_v32 = vpop.f32.mrf.mxu2  ;;  %v1399_v36 = vpop.f32.mrf.mxu3  ;;  %v13087_v42 = vld [vmem:[#allocation29_spill] sm:$0xff]  ;;  %v13088_v1 = vld [vmem:[#allocation30_spill] sm:$0xff] }
 0x285   :  { %v1400_v37 = vadd.f32 %v1399_v36, %v1367_v32  ;;  %v725_v10 = vadd.f32 %v13088_v1, %v13087_v42  ;;  %v13093_v32 = vld [vmem:[#allocation28_spill] sm:$0xff]  ;;  %v13108_v42 = vld [vmem:[#allocation14_spill] sm:$0xff] }
 0x286   :  { %v8661_v61 = vmax.f32 %v1716_v7, 0.0  ;;  %v13092_v7 = vld [vmem:[#allocation27_spill] sm:$0xff]  ;;  %v667_v1 = vadd.f32 %v13108_v42, %v13107_v39  ;;  %v13121_v42 = vld [vmem:[#allocation49_spill] sm:$0xff] }
 0x287   :  { %v1678_v45 = vadd.f32 %v1400_v37, %v874_v50  ;;  %v8666_v57 = vpop.f32.mrf.mxu0  ;;  %v8668_v21 = vpop.f32.mrf.mxu1  ;;  %v722_v36 = vadd.f32 %v13093_v32, %v13092_v7  ;;  %v1028_v35 = vadd.f32 %v13094_v5, %v725_v10  ;;  %v13095_v50 = vld [vmem:[#allocation5_spill] sm:$0xff]  ;;  %v13097_v37 = vld [vmem:[#allocation42_spill] sm:$0xff]  ;;  %v13112_v7 = vld [vmem:[#allocation31_spill] sm:$0xff] }
 0x288   :  { %1794 = vmatpush.msrb.mxu1 %v8661_v61  ;;  %v655_v46 = vadd.f32 %v13096_v24, %v13095_v50  ;;  %v1034_v0 = vadd.f32 %v13097_v37, %v731_v34  ;;  %v13111_v34 = vld [vmem:[#allocation46_spill] sm:$0xff]  ;;  %v13113_v5 = vld [vmem:[#allocation39_spill] sm:$0xff] }
 0x289   :  { %v1715_v6 = vadd.f32 %v1685_v17, %v1678_v45  ;;  %v13099_v45 = vld [vmem:[#allocation8_spill] sm:$0xff]  ;;  %v1025_v29 = vadd.f32 %v13104_v51, %v722_v36  ;;  %v1060_v36 = vadd.f32 %v13113_v5, %v1028_v35  ;;  %v1580_v35 = vadd.f32 %v8668_v21, %v8666_v57 }
 0x28a   :  { %1795 = vmatpush.msrb.mxu1 %v8671_v62  ;;  %v658_v17 = vadd.f32 %v13099_v45, %v13098_v11  ;;  %v958_v43 = vadd.f32 %v13110_v16, %v655_v46  ;;  %v8771_v37 = vld [vmem:[%s13015_s4 + $0x18] sm:$0xff]  ;;  %v964_v46 = vadd.f32 %v13115_v8, %v661_v56 }
 0x28b   :  { %v8677_v25 = vmax.f32 %v1715_v6, 0.0  ;;  %v13102_v6 = vld [vmem:[#allocation25_spill] sm:$0xff]  ;;  %v13120_v56 = vld [vmem:[#allocation51_spill] sm:$0xff] }
 0x28c   :  { %1796 = vmatpush.msrb.mxu1 %v8675_v13  ;;  %v8680_v18 = vpop.f32.mrf.mxu2  ;;  %v8682_v4 = vpop.f32.mrf.mxu3  ;;  %v719_v63 = vadd.f32 %v13103_v59, %v13102_v6  ;;  %v961_v53 = vadd.f32 %v13111_v34, %v658_v17  ;;  %v967_v17 = vadd.f32 %v13116_v48, %v664_v49  ;;  %v13117_v6 = vld [vmem:[#allocation35_spill] sm:$0xff] }
 0x28d   :  { %1768 = vmatpush.msrb.mxu0 %v8677_v25  ;;  %v1057_v59 = vadd.f32 %v13117_v6, %v1025_v29  ;;  %v996_v29 = vadd.f32 %v13121_v42, %v964_v46 }
 0x28e   :  { %1797 = vmatpush.msrb.mxu1 %v8684_v47  ;;  %v1022_v32 = vadd.f32 %v13112_v7, %v719_v63  ;;  %v999_v39 = vadd.f32 %v13120_v56, %v967_v17  ;;  %v8842_v56 = vld [vmem:[%s13015_s4 + $0x28] sm:$0xf] }
 0x28f   :  { %v1550_v2 = vpop.f32.mrf.mxu0  ;;  %v1582_v3 = vpop.f32.mrf.mxu1  ;;  %1769 = vmatpush.msrb.mxu0 %v8687_v19 }
 0x290   :  { %1798 = vmatpush.msrb.mxu1 %v8690_v26 }
 0x291   :  { %1770 = vmatpush.msrb.mxu0 %v8693_v30  ;;  %5980 = vmatmul.msk.f32.vlgmr.msrb.gmra.mxu1 %vm461_vm2, %v8698_v14 }
 0x292   :  { %2151 = vmatpush.msra.mxu1 %v8677_v25 }
 0x293   :  { %1771 = vmatpush.msrb.mxu0 %v8703_v15 }
 0x294   :  { %2152 = vmatpush.msra.mxu1 %v8687_v19  ;;  %v8711_v23 = vpop.f32.mrf.mxu2  ;;  %v8713_v9 = vpop.f32.mrf.mxu3 }
 0x295   :  { %1772 = vmatpush.msrb.mxu0 %v8709_v22  ;;  %v1519_v16 = vadd.f32 %v8713_v9, %v8711_v23  ;;  %v13124_v9 = vld [vmem:[#allocation45_spill] sm:$0xff] }
 0x296   :  { %2153 = vmatpush.msra.mxu1 %v8693_v30  ;;  %5977 = vmatmul.msk.f32.vlgmr.msrb.gmra.mxu0 %vm461_vm2, %v8698_v14 }
 0x297   :  { %v1553_v31 = vpop.f32.mrf.mxu0  ;;  %v1585_v40 = vpop.f32.mrf.mxu1 }
 0x298   :  { %2154 = vmatpush.msra.mxu1 %v8703_v15  ;;  %v1586_v10 = vadd.f32 %v1585_v40, %v1553_v31  ;;  %v1583_v40 = vadd.f32 %v1582_v3, %v1550_v2  ;;  %v13118_v2 = vld [vmem:[#allocation52_spill] sm:$0xff] }
 0x299   :  { %5981 = vmatmul.msk.f32.gmra.mxu1 %vm461_vm2, %v8723_v41  ;;  %v970_v3 = vadd.f32 %v13118_v2, %v667_v1  ;;  %v13123_v1 = vld [vmem:[#allocation47_spill] sm:$0xff] }
 0x29a   :  { %2155 = vmatpush.msra.mxu1 %v8709_v22  ;;  %v1671_v51 = vadd.f32 %v1586_v10, %v1060_v36  ;;  %v993_v5 = vadd.f32 %v13123_v1, %v961_v53 }
 0x29c   :  { %v1489_v33 = vpop.f32.mrf.mxu2  ;;  %v1521_v20 = vpop.f32.mrf.mxu3 }
 0x29d   :  { %v1522_v49 = vadd.f32 %v1521_v20, %v1489_v33  ;;  %v1708_v33 = vadd.f32 %v1688_v38, %v1671_v51  ;;  %v1516_v20 = vadd.f32 %v8682_v4, %v8680_v18 }
 0x29e   :  { %5978 = vmatmul.msk.f32.gmra.mxu0 %vm461_vm2, %v8723_v41 }
 0x29f   :  { %v1556_v54 = vpop.f32.mrf.mxu0  ;;  %v1588_v27 = vpop.f32.mrf.mxu1  ;;  %v8800_v8 = vmax.f32 %v1708_v33, 0.0  ;;  %v13133_v33 = vld [vmem:[#allocation18_spill] sm:$0xff] }
 0x2a0   :  { %v1589_v44 = vadd.f32 %v1588_v27, %v1556_v54  ;;  %v13109_v54 = vld [vmem:[#allocation41_spill] sm:$0xff] }
 0x2a1   :  { %5982 = vmatmul.msk.f32.gmra.mxu1 %vm461_vm2, %v8735_v52  ;;  %v1063_v27 = vadd.f32 %v13109_v54, %v1031_v60  ;;  %v13114_v60 = vld [vmem:[#allocation43_spill] sm:$0xff] }
 0x2a2   :  { %v1066_v31 = vadd.f32 %v13114_v60, %v1034_v0  ;;  %v13119_v0 = vld [vmem:[#allocation32_spill] sm:$0xff]  ;;  %v1687_v60 = vperm.slane %v8648_v55, 2 }
 0x2a3   :  { %v1676_v11 = vadd.f32 %v1589_v44, %v1063_v27  ;;  %v1054_v44 = vadd.f32 %v13119_v0, %v1022_v32  ;;  %v13122_v27 = vld [vmem:[#allocation53_spill] sm:$0xff] }
 0x2a4   :  { %v1492_v28 = vpop.f32.mrf.mxu2  ;;  %v1524_v58 = vpop.f32.mrf.mxu3  ;;  %v1002_v10 = vadd.f32 %v13122_v27, %v970_v3 }
 0x2a5   :  { %v1525_v63 = vadd.f32 %v1524_v58, %v1492_v28  ;;  %v1666_v28 = vadd.f32 %v1583_v40, %v1057_v59  ;;  %v1713_v21 = vadd.f32 %v1688_v38, %v1676_v11  ;;  %v1661_v32 = vadd.f32 %v1580_v35, %v1054_v44 }
 0x2a6   :  { %5979 = vmatmul.msk.f32.gmra.mxu0 %vm461_vm2, %v8735_v52  ;;  %v990_v40 = vadd.f32 %v13124_v9, %v958_v43  ;;  %v1665_v11 = vadd.f32 %v1519_v16, %v993_v5  ;;  %v13130_v16 = vld [vmem:[#allocation24_spill] sm:$0xff]  ;;  %v13136_v9 = vld [vmem:[#allocation61_spill] sm:$0xff] }
 0x2a7   :  { %v1559_v50 = vpop.f32.mrf.mxu0  ;;  %v1591_v24 = vpop.f32.mrf.mxu1  ;;  %v1675_v34 = vadd.f32 %v1525_v63, %v999_v39  ;;  %v1703_v23 = vadd.f32 %v1688_v38, %v1666_v28  ;;  %v1698_v46 = vadd.f32 %v1688_v38, %v1661_v32  ;;  %v13125_v28 = vld [vmem:[#allocation21_spill] sm:$0xff] }
 0x2a8   :  { %v1592_v45 = vadd.f32 %v1591_v24, %v1559_v50  ;;  %v1670_v50 = vadd.f32 %v1522_v49, %v996_v29  ;;  %v1660_v18 = vadd.f32 %v1516_v20, %v990_v40  ;;  %v1702_v63 = vadd.f32 %v1687_v60, %v1665_v11  ;;  %v13132_v32 = vld [vmem:[#allocation17_spill] sm:$0xff] }
 0x2a9   :  { %5995 = vmatmul.msk.f32.vlgmr.msra.gmra.mxu1 %vm461_vm2, %v8771_v37  ;;  %v8809_v59 = vmax.f32 %v1703_v23, 0.0  ;;  %v8815_v35 = vmax.f32 %v1698_v46, 0.0  ;;  %v786_v20 = vadd.f32 %v13133_v33, %v13132_v32  ;;  %v13144_v32 = vld [vmem:[#allocation55_spill] sm:$0xff] }
 0x2aa   :  { %v1681_v12 = vadd.f32 %v1592_v45, %v1066_v31  ;;  %v8796_v31 = vmax.f32 %v1713_v21, 0.0  ;;  %v1712_v45 = vadd.f32 %v1687_v60, %v1675_v34  ;;  %v1707_v48 = vadd.f32 %v1687_v60, %v1670_v50  ;;  %v13128_v21 = vld [vmem:[#allocation20_spill] sm:$0xff]  ;;  %v13134_v50 = vld [vmem:[#allocation58_spill] sm:$0xff] }
 0x2ab   :  { %v8831_v2 = vmax.f32 %v1702_v63, 0.0  ;;  %v13140_v63 = vld [vmem:[#allocation59_spill] sm:$0xff] }
 0x2ac   :  { %v1718_v58 = vadd.f32 %v1688_v38, %v1681_v12  ;;  %v1495_v54 = vpop.f32.mrf.mxu2  ;;  %v1527_v57 = vpop.f32.mrf.mxu3  ;;  %v8812_v43 = vmax.f32 %v1712_v45, 0.0  ;;  %v8818_v51 = vmax.f32 %v1707_v48, 0.0  ;;  %v1697_v12 = vadd.f32 %v1687_v60, %v1660_v18  ;;  %v8823_v38 = vld [vmem:[%s13015_s4 + $0x20] sm:$0xff] }
 0x2ad   :  { %v1528_v7 = vadd.f32 %v1527_v57, %v1495_v54  ;;  %v13127_v57 = vld [vmem:[#allocation19_spill] sm:$0xff]  ;;  %v13138_v45 = vld [vmem:[#allocation16_spill] sm:$0xff] }
 0x2ae   :  { %v8790_v36 = vmax.f32 %v1718_v58, 0.0  ;;  %v8835_v3 = vmax.f32 %v1697_v12, 0.0  ;;  %v13126_v58 = vld [vmem:[#allocation22_spill] sm:$0xff]  ;;  %v789_v27 = vadd.f32 %v13128_v21, %v13127_v57  ;;  %v13139_v18 = vld [vmem:[#allocation56_spill] sm:$0xff] }
 0x2af   :  { %v1680_v24 = vadd.f32 %v1528_v7, %v1002_v10  ;;  %v792_v54 = vadd.f32 %v13126_v58, %v13125_v28  ;;  %v13129_v10 = vld [vmem:[#allocation23_spill] sm:$0xff]  ;;  %v13131_v7 = vld [vmem:[#allocation60_spill] sm:$0xff]  ;;  %v1089_v48 = vadd.f32 %v13139_v18, %v786_v20  ;;  %v6151_v18 = vld [vmem:[%s13016_s5 + $0xbe8] sm:$0xff] }
 0x2b0   :  { %1846 = vmatpush.msra.mxu3 %v8790_v36  ;;  %v795_v34 = vadd.f32 %v13130_v16, %v13129_v10  ;;  %v13141_v28 = vld [vmem:[#allocation63_spill] sm:$0xff]  ;;  %v13143_v16 = vld [vmem:[#allocation57_spill] sm:$0xff] }
 0x2b1   :  { %v1717_v53 = vadd.f32 %v1687_v60, %v1680_v24  ;;  %5996 = vmatmul.msk.f32.gmra.mxu1 %vm461_vm2, %v8823_v38  ;;  %v1095_v1 = vadd.f32 %v13131_v7, %v792_v54  ;;  %v1092_v24 = vadd.f32 %v13134_v50, %v789_v27  ;;  %v13135_v60 = vld [vmem:[#allocation62_spill] sm:$0xff] }
 0x2b2   :  { %1847 = vmatpush.msra.mxu3 %v8796_v31  ;;  %v1098_v23 = vadd.f32 %v13135_v60, %v795_v34  ;;  %v13142_v27 = vld [vmem:[#allocation54_spill] sm:$0xff]  ;;  %v1121_v34 = vadd.f32 %v13143_v16, %v1089_v48  ;;  %v6037_v48 = vld [vmem:[%s13016_s5 + $0x858] sm:$0xff] }
 0x2b3   :  { %v8802_v4 = vmax.f32 %v1717_v53, 0.0  ;;  %v1127_v40 = vadd.f32 %v13136_v9, %v1095_v1  ;;  %v13137_v53 = vld [vmem:[#allocation15_spill] sm:$0xff]  ;;  %v1124_v12 = vadd.f32 %v13140_v63, %v1092_v24  ;;  %v1689_v1 = vperm.slane %v8648_v55, 4  ;;  %v6103_v63 = vld [vmem:[%s13016_s5 + $0xa68] sm:$0xff] }
 0x2b4   :  { %1848 = vmatpush.msra.mxu3 %v8800_v8  ;;  %v8805_v17 = vpop.f32.mrf.mxu2  ;;  %v8807_v6 = vpop.f32.mrf.mxu3  ;;  %v783_v46 = vadd.f32 %v13138_v45, %v13137_v53  ;;  %v1130_v58 = vadd.f32 %v13141_v28, %v1098_v23  ;;  %v6046_v53 = vld [vmem:[%s13016_s5 + $0x8a0] sm:$0xff]  ;;  %v6043_v45 = vld [vmem:[%s13016_s5 + $0x888] sm:$0xff]  ;;  %v6025_v16 = vld [vmem:[%s13016_s5 + $0x7f8] sm:$0xff] }
 0x2b5   :  { %1820 = vmatpush.msrb.mxu2 %v8802_v4  ;;  %v6142_v28 = vld [vmem:[%s13016_s5 + $0xba0] sm:$0xff] }
 0x2b6   :  { %1849 = vmatpush.msra.mxu3 %v8809_v59  ;;  %v1086_v10 = vadd.f32 %v13142_v27, %v783_v46  ;;  %v6040_v46 = vld [vmem:[%s13016_s5 + $0x870] sm:$0xff] }
 0x2b7   :  { %1821 = vmatpush.msrb.mxu2 %v8812_v43  ;;  %v6028_v27 = vld [vmem:[%s13016_s5 + $0x810] sm:$0xff] }
 0x2b8   :  { %1850 = vmatpush.msra.mxu3 %v8815_v35  ;;  %v1118_v33 = vadd.f32 %v13144_v32, %v1086_v10  ;;  %v6091_v10 = vld [vmem:[%s13016_s5 + $0xa08] sm:$0xff] }
 0x2b9   :  { %5986 = vmatmul.msk.f32.vlgmr.msra.gmra.mxu3 %vm461_vm2, %v8698_v14  ;;  %1822 = vmatpush.msrb.mxu2 %v8818_v51  ;;  %v6019_v32 = vld [vmem:[%s13016_s5 + $0x7c8] sm:$0xff] }
 0x2ba   :  { %2203 = vmatpush.msrb.mxu3 %v8802_v4  ;;  %5997 = vmatmul.msk.f32.gmra.mxu1 %vm461_vm2, %v8842_v56 }
 0x2bb   :  { %1823 = vmatpush.msrb.mxu2 %v8831_v2 }
 0x2bc   :  { %2204 = vmatpush.msrb.mxu3 %v8812_v43  ;;  %v1614_v0 = vpop.f32.mrf.mxu2  ;;  %v1646_v44 = vpop.f32.mrf.mxu3 }
 0x2bd   :  { %1824 = vmatpush.msrb.mxu2 %v8835_v3  ;;  %v1647_v54 = vadd.f32 %v1646_v44, %v1614_v0 }
 0x2be   :  { %2205 = vmatpush.msrb.mxu3 %v8818_v51  ;;  %5983 = vmatmul.msk.f32.vlgmr.msrb.gmra.mxu2 %vm461_vm2, %v8698_v14 }
 0x2bf   :  { %2177 = vmatpush.msra.mxu2 %v8661_v61  ;;  %v1667_v20 = vadd.f32 %v1647_v54, %v1121_v34  ;;  %v6031_v54 = vld [vmem:[%s13016_s5 + $0x828] sm:$0xff]  ;;  %v6133_v34 = vld [vmem:[%s13016_s5 + $0xb58] sm:$0xff] }
 0x2c0   :  { %2206 = vmatpush.msrb.mxu3 %v8831_v2 }
 0x2c1   :  { %5987 = vmatmul.msk.f32.gmra.mxu3 %vm461_vm2, %v8723_v41  ;;  %2178 = vmatpush.msra.mxu2 %v8671_v62 }
 0x2c2   :  { %2207 = vmatpush.msrb.mxu3 %v8835_v3 }
 0x2c3   :  { %2179 = vmatpush.msra.mxu2 %v8675_v13 }
 0x2c4   :  { %v1617_v39 = vpop.f32.mrf.mxu2  ;;  %v1649_v49 = vpop.f32.mrf.mxu3  ;;  %2537 = vmatpush.msra.mxu3 %v6103_v63  ;;  %v6109_v63 = vld [vmem:[%s13016_s5 + $0xa98] sm:$0xff] }
 0x2c5   :  { %2180 = vmatpush.msra.mxu2 %v8684_v47  ;;  %v1650_v11 = vadd.f32 %v1649_v49, %v1617_v39  ;;  %v1644_v39 = vadd.f32 %v8807_v6, %v8805_v17  ;;  %v1704_v6 = vadd.f32 %v1689_v1, %v1667_v20  ;;  %v6082_v20 = vld [vmem:[%s13016_s5 + $0x9c0] sm:$0xff] }
 0x2c6   :  { %5984 = vmatmul.msk.f32.gmra.mxu2 %vm461_vm2, %v8723_v41 }
 0x2c7   :  { %2181 = vmatpush.msra.mxu2 %v8690_v26  ;;  %v1672_v49 = vadd.f32 %v1650_v11, %v1124_v12  ;;  %v8908_v23 = vmax.f32 %v1704_v6, 0.0  ;;  %v6052_v11 = vld [vmem:[%s13016_s5 + $0x8d0] sm:$0xff]  ;;  %v6145_v12 = vld [vmem:[%s13016_s5 + $0xbb8] sm:$0xff] }
 0x2c8   :  { %v6076_v6 = vld [vmem:[%s13016_s5 + $0x990] sm:$0xff] }
 0x2c9   :  { %5988 = vmatmul.msk.f32.gmra.mxu3 %vm461_vm2, %v8735_v52  ;;  %v1709_v24 = vadd.f32 %v1689_v1, %v1672_v49  ;;  %v6022_v49 = vld [vmem:[%s13016_s5 + $0x7e0] sm:$0xff] }
 0x2cb   :  { %v8903_v55 = vmax.f32 %v1709_v24, 0.0  ;;  %v6121_v24 = vld [vmem:[%s13016_s5 + $0xaf8] sm:$0xff] }
 0x2cc   :  { %v1620_v42 = vpop.f32.mrf.mxu2  ;;  %v1652_v29 = vpop.f32.mrf.mxu3 }
 0x2cd   :  { %v1653_v5 = vadd.f32 %v1652_v29, %v1620_v42 }
 0x2ce   :  { %5985 = vmatmul.msk.f32.gmra.mxu2 %vm461_vm2, %v8735_v52 }
 0x2cf   :  { %v1677_v57 = vadd.f32 %v1653_v5, %v1127_v40  ;;  %v1662_v5 = vadd.f32 %v1644_v39, %v1118_v33  ;;  %v6055_v40 = vld [vmem:[%s13016_s5 + $0x8e8] sm:$0xff]  ;;  %v6088_v39 = vld [vmem:[%s13016_s5 + $0x9f0] sm:$0xff] }
 0x2d0   :  { %2511 = vmatpush.msrb.mxu2 %v6055_v40  ;;  %v6127_v33 = vld [vmem:[%s13016_s5 + $0xb28] sm:$0xff] }
 0x2d1   :  { %6001 = vmatmul.msk.f32.vlgmr.msrb.gmra.mxu3 %vm461_vm2, %v8771_v37  ;;  %v1714_v44 = vadd.f32 %v1689_v1, %v1677_v57  ;;  %v1699_v60 = vadd.f32 %v1689_v1, %v1662_v5  ;;  %v6139_v57 = vld [vmem:[%s13016_s5 + $0xb88] sm:$0xff]  ;;  %v6013_v5 = vld [vmem:[%s13016_s5 + $0x798] sm:$0xff] }
 0x2d2   :  { %2512 = vmatpush.msrb.mxu2 %v6052_v11  ;;  %v6247_v40 = vld [vmem:[%s13016_s5 + $0xee8] sm:$0xff]  ;;  %v6118_v11 = vld [vmem:[%s13016_s5 + $0xae0] sm:$0xff] }
 0x2d3   :  { %v8897_v17 = vmax.f32 %v1714_v44, 0.0  ;;  %v8912_v9 = vmax.f32 %v1699_v60, 0.0  ;;  %v6079_v44 = vld [vmem:[%s13016_s5 + $0x9a8] sm:$0xff]  ;;  %v6010_v60 = vld [vmem:[%s13016_s5 + $0x780] sm:$0xff] }
 0x2d4   :  { %v1623_v42 = vpop.f32.mrf.mxu2  ;;  %v1655_v29 = vpop.f32.mrf.mxu3 }
 0x2d5   :  { %v1656_v21 = vadd.f32 %v1655_v29, %v1623_v42  ;;  %v6100_v42 = vld [vmem:[%s13016_s5 + $0xa50] sm:$0xff]  ;;  %v6034_v29 = vld [vmem:[%s13016_s5 + $0x840] sm:$0xff] }
 0x2d6   :  { %5998 = vmatmul.msk.f32.vlgmr.msra.gmra.mxu2 %vm461_vm2, %v8771_v37  ;;  %2538 = vmatpush.msra.mxu3 %v6100_v42  ;;  %v6235_v42 = vld [vmem:[%s13016_s5 + $0xe88] sm:$0xff] }
 0x2d7   :  { %v1682_v7 = vadd.f32 %v1656_v21, %v1130_v58  ;;  %v6097_v58 = vld [vmem:[%s13016_s5 + $0xa38] sm:$0xff]  ;;  %v6094_v21 = vld [vmem:[%s13016_s5 + $0xa20] sm:$0xff] }
 0x2d8   :  { %2539 = vmatpush.msra.mxu3 %v6097_v58  ;;  %v6061_v58 = vld [vmem:[%s13016_s5 + $0x918] sm:$0xff] }
 0x2d9   :  { %v1719_v0 = vadd.f32 %v1689_v1, %v1682_v7  ;;  %6002 = vmatmul.msk.f32.gmra.mxu3 %vm461_vm2, %v8823_v38  ;;  %v6130_v7 = vld [vmem:[%s13016_s5 + $0xb40] sm:$0xff]  ;;  %v6085_v1 = vld [vmem:[%s13016_s5 + $0x9d8] sm:$0xff] }
 0x2da   :  { %2540 = vmatpush.msra.mxu3 %v6094_v21  ;;  %v6101_v21 = vld [vmem:[%s13016_s5 + $0xa58] sm:$0xff] }
 0x2db   :  { %v8893_v50 = vmax.f32 %v1719_v0, 0.0  ;;  %v6016_v0 = vld [vmem:[%s13016_s5 + $0x7b0] sm:$0xff] }
 0x2dc   :  { %2541 = vmatpush.msra.mxu3 %v6091_v10  ;;  %v6226_v10 = vld [vmem:[%s13016_s5 + $0xe40] sm:$0xff] }
 0x2dd   :  { %1872 = vmatpush.msra.mxu0 %v8893_v50  ;;  %2255 = vmatpush.msrb.mxu1 %v8893_v50 }
 0x2de   :  { %5999 = vmatmul.msk.f32.gmra.mxu2 %vm461_vm2, %v8823_v38  ;;  %2542 = vmatpush.msra.mxu3 %v6088_v39 }
 0x2df   :  { %1873 = vmatpush.msra.mxu0 %v8897_v17  ;;  %2256 = vmatpush.msrb.mxu1 %v8897_v17 }
 0x2e0   :  { %2543 = vmatpush.msra.mxu3 %v6085_v1  ;;  %v6095_v1 = vld [vmem:[%s13016_s5 + $0xa28] sm:$0xff] }
 0x2e1   :  { %6003 = vmatmul.msk.f32.gmra.mxu3 %vm461_vm2, %v8842_v56  ;;  %1874 = vmatpush.msra.mxu0 %v8903_v55 }
 0x2e2   :  { %2257 = vmatpush.msrb.mxu1 %v8903_v55  ;;  %2544 = vmatpush.msra.mxu3 %v6082_v20  ;;  %v6092_v20 = vld [vmem:[%s13016_s5 + $0xa10] sm:$0xff] }
 0x2e3   :  { %1875 = vmatpush.msra.mxu0 %v8908_v23 }
 0x2e4   :  { %2258 = vmatpush.msrb.mxu1 %v8908_v23  ;;  %2545 = vmatpush.msra.mxu3 %v6079_v44  ;;  %v6050_v44 = vld [vmem:[%s13016_s5 + $0x8c0] sm:$0xff] }
 0x2e5   :  { %1876 = vmatpush.msra.mxu0 %v8912_v9 }
 0x2e6   :  { %2259 = vmatpush.msrb.mxu1 %v8912_v9  ;;  %5989 = vmatmul.msk.f32.vlgmr.msra.gmra.mxu0 %vm461_vm2, %v8698_v14  ;;  %v6049_v14 = vld [vmem:[%s13016_s5 + $0x8b8] sm:$0xff] }
 0x2e7   :  { %6000 = vmatmul.msk.f32.gmra.mxu2 %vm461_vm2, %v8842_v56  ;;  %2229 = vmatpush.msrb.mxu0 %v8790_v36 }
 0x2e8   :  { %6007 = vmatmul.msk.f32.vlgmr.msrb.gmra.mxu1 %vm461_vm2, %v8771_v37  ;;  %2513 = vmatpush.msrb.mxu2 %v6049_v14  ;;  %v6073_v14 = vld [vmem:[%s13016_s5 + $0x978] sm:$0xff] }
 0x2e9   :  { %2230 = vmatpush.msrb.mxu0 %v8796_v31  ;;  %2546 = vmatpush.msra.mxu3 %v6076_v6  ;;  %v6196_v6 = vld [vmem:[%s13016_s5 + $0xd50] sm:$0xff] }
 0x2ea   :  { %2514 = vmatpush.msrb.mxu2 %v6046_v53  ;;  %v6244_v53 = vld [vmem:[%s13016_s5 + $0xed0] sm:$0xff] }
 0x2eb   :  { %2231 = vmatpush.msrb.mxu0 %v8800_v8  ;;  %2547 = vmatpush.msra.mxu3 %v6073_v14  ;;  %v6193_v14 = vld [vmem:[%s13016_s5 + $0xd38] sm:$0xff] }
 0x2ec   :  { %2515 = vmatpush.msrb.mxu2 %v6043_v45  ;;  %v6115_v45 = vld [vmem:[%s13016_s5 + $0xac8] sm:$0xff] }
 0x2ed   :  { %2232 = vmatpush.msrb.mxu0 %v8809_v59 }
 0x2ee   :  { %5990 = vmatmul.msk.f32.gmra.mxu0 %vm461_vm2, %v8723_v41  ;;  %v6148_v41 = vld [vmem:[%s13016_s5 + $0xbd0] sm:$0xff]  ;;  %2516 = vmatpush.msrb.mxu2 %v6040_v46  ;;  %v6070_v46 = vld [vmem:[%s13016_s5 + $0x960] sm:$0xff] }
 0x2ef   :  { %2233 = vmatpush.msrb.mxu0 %v8815_v35  ;;  %2548 = vmatpush.msra.mxu3 %v6070_v46  ;;  %v6083_v46 = vld [vmem:[%s13016_s5 + $0x9c8] sm:$0xff] }
 0x2f0   :  { %6008 = vmatmul.msk.f32.gmra.mxu1 %vm461_vm2, %v8823_v38  ;;  %2517 = vmatpush.msrb.mxu2 %v6037_v48  ;;  %v6238_v48 = vld [vmem:[%s13016_s5 + $0xea0] sm:$0xff] }
 0x2f1   :  { %2563 = vmatpush.msra.mxu0 %v6151_v18  ;;  %v6241_v18 = vld [vmem:[%s13016_s5 + $0xeb8] sm:$0xff] }
 0x2f2   :  { %2518 = vmatpush.msrb.mxu2 %v6034_v29  ;;  %v6106_v29 = vld [vmem:[%s13016_s5 + $0xa80] sm:$0xff] }
 0x2f3   :  { %2564 = vmatpush.msra.mxu0 %v6148_v41  ;;  %v6067_v41 = vld [vmem:[%s13016_s5 + $0x948] sm:$0xff] }
 0x2f4   :  { %2519 = vmatpush.msrb.mxu2 %v6031_v54  ;;  %2549 = vmatpush.msra.mxu3 %v6067_v41  ;;  %v6232_v54 = vld [vmem:[%s13016_s5 + $0xe70] sm:$0xff]  ;;  %v6041_v41 = vld [vmem:[%s13016_s5 + $0x878] sm:$0xff] }
 0x2f5   :  { %2565 = vmatpush.msra.mxu0 %v6145_v12  ;;  %v6064_v12 = vld [vmem:[%s13016_s5 + $0x930] sm:$0xff] }
 0x2f6   :  { %5991 = vmatmul.msk.f32.gmra.mxu0 %vm461_vm2, %v8735_v52  ;;  %v6136_v52 = vld [vmem:[%s13016_s5 + $0xb70] sm:$0xff]  ;;  %2520 = vmatpush.msrb.mxu2 %v6028_v27  ;;  %v6058_v27 = vld [vmem:[%s13016_s5 + $0x900] sm:$0xff] }
 0x2f7   :  { %2566 = vmatpush.msra.mxu0 %v6142_v28  ;;  %v6104_v28 = vld [vmem:[%s13016_s5 + $0xa70] sm:$0xff]  ;;  %2550 = vmatpush.msra.mxu3 %v6064_v12  ;;  %v6187_v12 = vld [vmem:[%s13016_s5 + $0xd08] sm:$0xff] }
 0x2f8   :  { %6009 = vmatmul.msk.f32.gmra.mxu1 %vm461_vm2, %v8842_v56  ;;  %2521 = vmatpush.msrb.mxu2 %v6025_v16  ;;  %v6223_v16 = vld [vmem:[%s13016_s5 + $0xe28] sm:$0xff] }
 0x2f9   :  { %2567 = vmatpush.msra.mxu0 %v6139_v57  ;;  %2551 = vmatpush.msra.mxu3 %v6061_v58  ;;  %v6184_v58 = vld [vmem:[%s13016_s5 + $0xcf0] sm:$0xff] }
 0x2fa   :  { %2522 = vmatpush.msrb.mxu2 %v6022_v49  ;;  %v6217_v49 = vld [vmem:[%s13016_s5 + $0xdf8] sm:$0xff] }
 0x2fb   :  { %2568 = vmatpush.msra.mxu0 %v6136_v52  ;;  %v6098_v52 = vld [vmem:[%s13016_s5 + $0xa40] sm:$0xff]  ;;  %2552 = vmatpush.msra.mxu3 %v6058_v27 }
 0x2fc   :  { %2523 = vmatpush.msrb.mxu2 %v6019_v32  ;;  %v6214_v32 = vld [vmem:[%s13016_s5 + $0xde0] sm:$0xff] }
 0x2fd   :  { %2569 = vmatpush.msra.mxu0 %v6133_v34  ;;  %v6220_v34 = vld [vmem:[%s13016_s5 + $0xe10] sm:$0xff]  ;;  %v6074_v27 = vld [vmem:[%s13016_s5 + $0x980] sm:$0xff] }
 0x2fe   :  { %6004 = vmatmul.msk.f32.vlgmr.msrb.gmra.mxu0 %vm461_vm2, %v8771_v37  ;;  %v6124_v37 = vld [vmem:[%s13016_s5 + $0xb10] sm:$0xff]  ;;  %2524 = vmatpush.msrb.mxu2 %v6016_v0  ;;  %v6199_v0 = vld [vmem:[%s13016_s5 + $0xd68] sm:$0xff] }
 0x2ff   :  { %2570 = vmatpush.msra.mxu0 %v6130_v7  ;;  %v6056_v7 = vld [vmem:[%s13016_s5 + $0x8f0] sm:$0xff]  ;;  %2589 = vmatpush.msra.mxu1 %v6199_v0  ;;  %v6065_v0 = vld [vmem:[%s13016_s5 + $0x938] sm:$0xff] }
 0x300   :  { %2525 = vmatpush.msrb.mxu2 %v6013_v5  ;;  %2641 = vmatpush.msrb.mxu3 %v6056_v7  ;;  %v6089_v5 = vld [vmem:[%s13016_s5 + $0x9f8] sm:$0xff] }
 0x301   :  { %2571 = vmatpush.msra.mxu0 %v6127_v33  ;;  %v6053_v33 = vld [vmem:[%s13016_s5 + $0x8d8] sm:$0xff]  ;;  %2590 = vmatpush.msra.mxu1 %v6196_v6  ;;  %v6062_v6 = vld [vmem:[%s13016_s5 + $0x920] sm:$0xff] }
 0x302   :  { %2526 = vmatpush.msrb.mxu2 %v6010_v60  ;;  %2642 = vmatpush.msrb.mxu3 %v6053_v33  ;;  %v6208_v60 = vld [vmem:[%s13016_s5 + $0xdb0] sm:$0xff]  ;;  %v6029_v7 = vld [vmem:[%s13016_s5 + $0x818] sm:$0xff]  ;;  %v6175_v33 = vld [vmem:[%s13016_s5 + $0xca8] sm:$0xff] }
 0x303   :  { %2572 = vmatpush.msra.mxu0 %v6124_v37  ;;  %v6211_v37 = vld [vmem:[%s13016_s5 + $0xdc8] sm:$0xff]  ;;  %2591 = vmatpush.msra.mxu1 %v6193_v14 }
 0x304   :  { %2615 = vmatpush.msra.mxu2 %v6247_v40  ;;  %2643 = vmatpush.msrb.mxu3 %v6050_v44  ;;  %v6047_v40 = vld [vmem:[%s13016_s5 + $0x8a8] sm:$0xff]  ;;  %v6185_v44 = vld [vmem:[%s13016_s5 + $0xcf8] sm:$0xff] }
 0x305   :  { %2573 = vmatpush.msra.mxu0 %v6121_v24  ;;  %v6059_v14 = vld [vmem:[%s13016_s5 + $0x908] sm:$0xff] }
 0x306   :  { %6005 = vmatmul.msk.f32.gmra.mxu0 %vm461_vm2, %v8823_v38  ;;  %v6112_v38 = vld [vmem:[%s13016_s5 + $0xab0] sm:$0xff]  ;;  %2616 = vmatpush.msra.mxu2 %v6244_v53  ;;  %v6205_v53 = vld [vmem:[%s13016_s5 + $0xd98] sm:$0xff] }
 0x307   :  { %2574 = vmatpush.msra.mxu0 %v6118_v11  ;;  %v6086_v11 = vld [vmem:[%s13016_s5 + $0x9e0] sm:$0xff]  ;;  %2644 = vmatpush.msrb.mxu3 %v6047_v40  ;;  %v6169_v40 = vld [vmem:[%s13016_s5 + $0xc78] sm:$0xff] }
 0x308   :  { %2617 = vmatpush.msra.mxu2 %v6241_v18  ;;  %v6190_v18 = vld [vmem:[%s13016_s5 + $0xd20] sm:$0xff] }
 0x309   :  { %2575 = vmatpush.msra.mxu0 %v6115_v45  ;;  %v6044_v45 = vld [vmem:[%s13016_s5 + $0x890] sm:$0xff]  ;;  %2592 = vmatpush.msra.mxu1 %v6190_v18  ;;  %v6017_v18 = vld [vmem:[%s13016_s5 + $0x7b8] sm:$0xff] }
 0x30a   :  { %2618 = vmatpush.msra.mxu2 %v6238_v48  ;;  %2645 = vmatpush.msrb.mxu3 %v6044_v45  ;;  %v6080_v48 = vld [vmem:[%s13016_s5 + $0x9b0] sm:$0xff] }
 0x30b   :  { %2576 = vmatpush.msra.mxu0 %v6112_v38  ;;  %v6202_v38 = vld [vmem:[%s13016_s5 + $0xd80] sm:$0xff]  ;;  %2593 = vmatpush.msra.mxu1 %v6187_v12  ;;  %v6160_v12 = vld [vmem:[%s13016_s5 + $0xc30] sm:$0xff] }
 0x30c   :  { %2619 = vmatpush.msra.mxu2 %v6235_v42  ;;  %v6038_v42 = vld [vmem:[%s13016_s5 + $0x860] sm:$0xff]  ;;  %2646 = vmatpush.msrb.mxu3 %v6041_v41  ;;  %v6163_v41 = vld [vmem:[%s13016_s5 + $0xc48] sm:$0xff] }
 0x30d   :  { %2577 = vmatpush.msra.mxu0 %v6109_v63  ;;  %v6200_v63 = vld [vmem:[%s13016_s5 + $0xd70] sm:$0xff]  ;;  %2594 = vmatpush.msra.mxu1 %v6184_v58  ;;  %v6157_v58 = vld [vmem:[%s13016_s5 + $0xc18] sm:$0xff] }
 0x30e   :  { %6006 = vmatmul.msk.f32.gmra.mxu0 %vm461_vm2, %v8842_v56  ;;  %v9104_v57 = vpop.f32.mrf.mxu1  ;;  %v6229_v56 = vld [vmem:[%s13016_s5 + $0xe58] sm:$0xff]  ;;  %2620 = vmatpush.msra.mxu2 %v6232_v54 }
 0x30f   :  { %2578 = vmatpush.msra.mxu0 %v6106_v29  ;;  %v6197_v54 = vld [vmem:[%s13016_s5 + $0xd58] sm:$0xff]  ;;  %2647 = vmatpush.msrb.mxu3 %v6038_v42  ;;  %v6011_v42 = vld [vmem:[%s13016_s5 + $0x788] sm:$0xff] }
 0x310   :  { %2621 = vmatpush.msra.mxu2 %v6229_v56  ;;  %v6194_v56 = vld [vmem:[%s13016_s5 + $0xd40] sm:$0xff] }
 0x311   :  { %2667 = vmatpush.msrb.mxu0 %v6104_v28  ;;  %v6077_v28 = vld [vmem:[%s13016_s5 + $0x998] sm:$0xff] }
 0x312   :  { %2622 = vmatpush.msra.mxu2 %v6226_v10  ;;  %v6032_v10 = vld [vmem:[%s13016_s5 + $0x830] sm:$0xff] }
 0x313   :  { %2668 = vmatpush.msrb.mxu0 %v6101_v21  ;;  %v6035_v21 = vld [vmem:[%s13016_s5 + $0x848] sm:$0xff] }
 0x314   :  { %2623 = vmatpush.msra.mxu2 %v6223_v16  ;;  %2648 = vmatpush.msrb.mxu3 %v6035_v21  ;;  %v6071_v16 = vld [vmem:[%s13016_s5 + $0x968] sm:$0xff] }
 0x315   :  { %2669 = vmatpush.msrb.mxu0 %v6098_v52  ;;  %v6181_v52 = vld [vmem:[%s13016_s5 + $0xcd8] sm:$0xff]  ;;  %v6167_v21 = vld [vmem:[%s13016_s5 + $0xc68] sm:$0xff] }
 0x316   :  { %v9127_v39 = vpop.f32.mrf.mxu1  ;;  %2624 = vmatpush.msra.mxu2 %v6220_v34  ;;  %2595 = vmatpush.msra.mxu1 %v6181_v52  ;;  %v6191_v34 = vld [vmem:[%s13016_s5 + $0xd28] sm:$0xff]  ;;  %v6152_v52 = vld [vmem:[%s13016_s5 + $0xbf0] sm:$0xff] }
 0x317   :  { %2670 = vmatpush.msrb.mxu0 %v6095_v1  ;;  %2649 = vmatpush.msrb.mxu3 %v6032_v10  ;;  %v6068_v1 = vld [vmem:[%s13016_s5 + $0x950] sm:$0xff] }
 0x318   :  { %2625 = vmatpush.msra.mxu2 %v6217_v49  ;;  %v6178_v49 = vld [vmem:[%s13016_s5 + $0xcc0] sm:$0xff]  ;;  %v6164_v10 = vld [vmem:[%s13016_s5 + $0xc50] sm:$0xff] }
 0x319   :  { %2671 = vmatpush.msrb.mxu0 %v6092_v20  ;;  %2596 = vmatpush.msra.mxu1 %v6178_v49  ;;  %v6026_v20 = vld [vmem:[%s13016_s5 + $0x800] sm:$0xff] }
 0x31a   :  { %2626 = vmatpush.msra.mxu2 %v6214_v32  ;;  %v6188_v32 = vld [vmem:[%s13016_s5 + $0xd10] sm:$0xff]  ;;  %2650 = vmatpush.msrb.mxu3 %v6029_v7  ;;  %v6146_v7 = vld [vmem:[%s13016_s5 + $0xbc0] sm:$0xff] }
 0x31b   :  { %2672 = vmatpush.msrb.mxu0 %v6089_v5  ;;  %2597 = vmatpush.msra.mxu1 %v6175_v33  ;;  %v6023_v5 = vld [vmem:[%s13016_s5 + $0x7e8] sm:$0xff] }
 0x31c   :  { %2627 = vmatpush.msra.mxu2 %v6211_v37  ;;  %v6172_v37 = vld [vmem:[%s13016_s5 + $0xc90] sm:$0xff]  ;;  %2651 = vmatpush.msrb.mxu3 %v6026_v20  ;;  %v6143_v33 = vld [vmem:[%s13016_s5 + $0xba8] sm:$0xff] }
 0x31d   :  { %2673 = vmatpush.msrb.mxu0 %v6086_v11  ;;  %2598 = vmatpush.msra.mxu1 %v6172_v37  ;;  %v6020_v11 = vld [vmem:[%s13016_s5 + $0x7d0] sm:$0xff]  ;;  %v6155_v20 = vld [vmem:[%s13016_s5 + $0xc08] sm:$0xff] }
 0x31e   :  { %v9159_v24 = vpop.f32.mrf.mxu1  ;;  %2628 = vmatpush.msra.mxu2 %v6208_v60  ;;  %v6182_v60 = vld [vmem:[%s13016_s5 + $0xce0] sm:$0xff]  ;;  %2652 = vmatpush.msrb.mxu3 %v6023_v5  ;;  %v6140_v37 = vld [vmem:[%s13016_s5 + $0xb90] sm:$0xff]  ;;  %v6137_v5 = vld [vmem:[%s13016_s5 + $0xb78] sm:$0xff] }
 0x31f   :  { %2674 = vmatpush.msrb.mxu0 %v6083_v46  ;;  %2599 = vmatpush.msra.mxu1 %v6169_v40  ;;  %v6166_v46 = vld [vmem:[%s13016_s5 + $0xc60] sm:$0xff]  ;;  %v6131_v40 = vld [vmem:[%s13016_s5 + $0xb48] sm:$0xff] }
 0x320   :  { %2629 = vmatpush.msra.mxu2 %v6205_v53  ;;  %v6179_v53 = vld [vmem:[%s13016_s5 + $0xcc8] sm:$0xff]  ;;  %2653 = vmatpush.msrb.mxu3 %v6020_v11 }
 0x321   :  { %2675 = vmatpush.msrb.mxu0 %v6080_v48  ;;  %2600 = vmatpush.msra.mxu1 %v6166_v46  ;;  %v6014_v48 = vld [vmem:[%s13016_s5 + $0x7a0] sm:$0xff]  ;;  %v6125_v46 = vld [vmem:[%s13016_s5 + $0xb18] sm:$0xff] }
 0x322   :  { %2630 = vmatpush.msra.mxu2 %v6202_v38  ;;  %v6176_v38 = vld [vmem:[%s13016_s5 + $0xcb0] sm:$0xff]  ;;  %2654 = vmatpush.msrb.mxu3 %v6017_v18  ;;  %v6057_v18 = vld [vmem:[%s13016_s5 + $0x8f8] sm:$0xff] }
 0x323   :  { %2676 = vmatpush.msrb.mxu0 %v6077_v28  ;;  %2601 = vmatpush.msra.mxu1 %v6163_v41  ;;  %v6170_v28 = vld [vmem:[%s13016_s5 + $0xc80] sm:$0xff] }
 0x324   :  { %2655 = vmatpush.msrb.mxu3 %v6014_v48  ;;  %v6054_v48 = vld [vmem:[%s13016_s5 + $0x8e0] sm:$0xff] }
 0x325   :  { %2677 = vmatpush.msrb.mxu0 %v6074_v27  ;;  %2602 = vmatpush.msra.mxu1 %v6160_v12  ;;  %v6051_v12 = vld [vmem:[%s13016_s5 + $0x8c8] sm:$0xff] }
 0x326   :  { %v9206_v29 = vpop.f32.mrf.mxu1  ;;  %2656 = vmatpush.msrb.mxu3 %v6011_v42  ;;  %v6248_v42 = vld [vmem:[%s13016_s5 + $0xef0] sm:$0xff] }
 0x327   :  { %2527 = vmatmul.f32.vlgmr.msrb.gmra.mxu2 %v9206_v29  ;;  %2678 = vmatpush.msrb.mxu0 %v6071_v16  ;;  %v6149_v16 = vld [vmem:[%s13016_s5 + $0xbd8] sm:$0xff] }
 0x328   :  { %2719 = vmatpush.msrb.mxu2 %v6200_v63  ;;  %v6173_v63 = vld [vmem:[%s13016_s5 + $0xc98] sm:$0xff]  ;;  %2603 = vmatpush.msra.mxu1 %v6157_v58 }
 0x329   :  { %2679 = vmatpush.msrb.mxu0 %v6068_v1  ;;  %v6158_v1 = vld [vmem:[%s13016_s5 + $0xc20] sm:$0xff] }
 0x32a   :  { %2720 = vmatpush.msrb.mxu2 %v6197_v54 }
 0x32b   :  { %2680 = vmatpush.msrb.mxu0 %v6065_v0  ;;  %v9359_v0 = vpop.f32.mrf.mxu0 }
 0x32c   :  { %2721 = vmatpush.msrb.mxu2 %v6194_v56  ;;  %v6154_v56 = vld [vmem:[%s13016_s5 + $0xc00] sm:$0xff] }
 0x32d   :  { %2681 = vmatpush.msrb.mxu0 %v6062_v6  ;;  %2604 = vmatpush.msra.mxu1 %v6154_v56  ;;  %v6134_v6 = vld [vmem:[%s13016_s5 + $0xb60] sm:$0xff] }
 0x32e   :  { %2722 = vmatpush.msrb.mxu2 %v6191_v34  ;;  %v9287_v45 = vpop.f32.mrf.mxu1  ;;  %v6161_v34 = vld [vmem:[%s13016_s5 + $0xc38] sm:$0xff] }
 0x32f   :  { %2682 = vmatpush.msrb.mxu0 %v6059_v14  ;;  %2530 = vmatmul.f32.gmra.mxu2 %v9287_v45  ;;  %v6128_v14 = vld [vmem:[%s13016_s5 + $0xb30] sm:$0xff] }
 0x330   :  { %2723 = vmatpush.msrb.mxu2 %v6188_v32  ;;  %2693 = vmatpush.msrb.mxu1 %v6152_v52  ;;  %v6245_v52 = vld [vmem:[%s13016_s5 + $0xed8] sm:$0xff] }
 0x332   :  { %2724 = vmatpush.msrb.mxu2 %v6185_v44  ;;  %2694 = vmatpush.msrb.mxu1 %v6149_v16  ;;  %v6045_v16 = vld [vmem:[%s13016_s5 + $0x898] sm:$0xff] }
 0x333   :  { %v9377_v11 = vpop.f32.mrf.mxu0 }
 0x334   :  { %2725 = vmatpush.msrb.mxu2 %v6182_v60  ;;  %2695 = vmatpush.msrb.mxu1 %v6146_v7  ;;  %v6242_v7 = vld [vmem:[%s13016_s5 + $0xec0] sm:$0xff] }
 0x336   :  { %2726 = vmatpush.msrb.mxu2 %v6179_v53  ;;  %2696 = vmatpush.msrb.mxu1 %v6143_v33  ;;  %v6042_v33 = vld [vmem:[%s13016_s5 + $0x880] sm:$0xff] }
 0x337   :  { %v9325_v27 = vpop.f32.mrf.mxu1 }
 0x338   :  { %2727 = vmatpush.msrb.mxu2 %v6176_v38  ;;  %2697 = vmatpush.msrb.mxu1 %v6140_v37  ;;  %v6122_v38 = vld [vmem:[%s13016_s5 + $0xb00] sm:$0xff]  ;;  %v6107_v37 = vld [vmem:[%s13016_s5 + $0xa88] sm:$0xff] }
 0x339   :  { %2533 = vmatmul.f32.gmra.mxu2 %v9325_v27 }
 0x33a   :  { %2728 = vmatpush.msrb.mxu2 %v6173_v63  ;;  %2698 = vmatpush.msrb.mxu1 %v6137_v5  ;;  %v6119_v63 = vld [vmem:[%s13016_s5 + $0xae8] sm:$0xff] }
 0x33b   :  { %v9416_v56 = vpop.f32.mrf.mxu0  ;;  %v6039_v5 = vld [vmem:[%s13016_s5 + $0x868] sm:$0xff] }
 0x33c   :  { %v9320_v54 = vpop.f32.mrf.mxu3  ;;  %2729 = vmatpush.msrb.mxu2 %v6170_v28  ;;  %2699 = vmatpush.msrb.mxu1 %v6134_v6  ;;  %v6116_v28 = vld [vmem:[%s13016_s5 + $0xad0] sm:$0xff] }
 0x33d   :  { %v6236_v6 = vld [vmem:[%s13016_s5 + $0xe90] sm:$0xff] }
 0x33e   :  { %2730 = vmatpush.msrb.mxu2 %v6167_v21  ;;  %2700 = vmatpush.msrb.mxu1 %v6131_v40  ;;  %v6048_v21 = vld [vmem:[%s13016_s5 + $0x8b0] sm:$0xff] }
 0x340   :  { %2731 = vmatpush.msrb.mxu2 %v6164_v10  ;;  %2701 = vmatpush.msrb.mxu1 %v6128_v14  ;;  %v6113_v10 = vld [vmem:[%s13016_s5 + $0xab8] sm:$0xff]  ;;  %v6036_v14 = vld [vmem:[%s13016_s5 + $0x850] sm:$0xff] }
 0x341   :  { %v9343_v49 = vpop.f32.mrf.mxu2 }
 0x342   :  { %2732 = vmatpush.msrb.mxu2 %v6161_v34  ;;  %2702 = vmatpush.msrb.mxu1 %v6125_v46  ;;  %v6233_v46 = vld [vmem:[%s13016_s5 + $0xe78] sm:$0xff] }
 0x344   :  { %v9351_v32 = vpop.f32.mrf.mxu3  ;;  %2733 = vmatpush.msrb.mxu2 %v6158_v1  ;;  %2703 = vmatpush.msrb.mxu1 %v6122_v38  ;;  %v6110_v1 = vld [vmem:[%s13016_s5 + $0xaa0] sm:$0xff]  ;;  %v6033_v38 = vld [vmem:[%s13016_s5 + $0x838] sm:$0xff] }
 0x346   :  { %2734 = vmatpush.msrb.mxu2 %v6155_v20  ;;  %2704 = vmatpush.msrb.mxu1 %v6119_v63  ;;  %v6239_v20 = vld [vmem:[%s13016_s5 + $0xea8] sm:$0xff]  ;;  %v6153_v63 = vld [vmem:[%s13016_s5 + $0xbf8] sm:$0xff] }
 0x348   :  { %2705 = vmatpush.msrb.mxu1 %v6116_v28  ;;  %v6030_v28 = vld [vmem:[%s13016_s5 + $0x820] sm:$0xff] }
 0x349   :  { %v9364_v44 = vpop.f32.mrf.mxu2 }
 0x34a   :  { %2706 = vmatpush.msrb.mxu1 %v6113_v10  ;;  %v6027_v10 = vld [vmem:[%s13016_s5 + $0x808] sm:$0xff] }
 0x34c   :  { %v9372_v60 = vpop.f32.mrf.mxu3  ;;  %2707 = vmatpush.msrb.mxu1 %v6110_v1  ;;  %v6024_v1 = vld [vmem:[%s13016_s5 + $0x7f0] sm:$0xff] }
 0x34e   :  { %2708 = vmatpush.msrb.mxu1 %v6107_v37 }
 0x351   :  { %v9382_v53 = vpop.f32.mrf.mxu2 }
 0x354   :  { %v9393_v41 = vpop.f32.mrf.mxu3 }
 0x355   :  { %2579 = vmatmul.f32.vlgmr.msra.gmra.mxu0 %v9393_v41 }
 0x356   :  { %2771 = vmatpush.msra.mxu0 %v6057_v18 }
 0x358   :  { %2772 = vmatpush.msra.mxu0 %v6054_v48 }
 0x359   :  { %v9411_v58 = vpop.f32.mrf.mxu2 }
 0x35a   :  { %2773 = vmatpush.msra.mxu0 %v6051_v12  ;;  %2553 = vmatmul.f32.vlgmr.msra.gmra.mxu3 %v9411_v58  ;;  %v6230_v12 = vld [vmem:[%s13016_s5 + $0xe60] sm:$0xff] }
 0x35b   :  { %2745 = vmatpush.msra.mxu3 %v6248_v42 }
 0x35c   :  { %2774 = vmatpush.msra.mxu0 %v6048_v21  ;;  %v9428_v34 = vpop.f32.mrf.mxu3  ;;  %v6150_v21 = vld [vmem:[%s13016_s5 + $0xbe0] sm:$0xff] }
 0x35d   :  { %2582 = vmatmul.f32.gmra.mxu0 %v9428_v34  ;;  %2746 = vmatpush.msra.mxu3 %v6245_v52  ;;  %v6227_v52 = vld [vmem:[%s13016_s5 + $0xe48] sm:$0xff] }
 0x35e   :  { %2775 = vmatpush.msra.mxu0 %v6045_v16  ;;  %v6147_v16 = vld [vmem:[%s13016_s5 + $0xbc8] sm:$0xff] }
 0x35f   :  { %2747 = vmatpush.msra.mxu3 %v6242_v7  ;;  %v6224_v7 = vld [vmem:[%s13016_s5 + $0xe30] sm:$0xff] }
 0x360   :  { %2776 = vmatpush.msra.mxu0 %v6042_v33 }
 0x361   :  { %2748 = vmatpush.msra.mxu3 %v6239_v20  ;;  %v9452_v40 = vpop.f32.mrf.mxu2  ;;  %v6144_v20 = vld [vmem:[%s13016_s5 + $0xbb0] sm:$0xff] }
 0x362   :  { %2777 = vmatpush.msra.mxu0 %v6039_v5  ;;  %2556 = vmatmul.f32.gmra.mxu3 %v9452_v40  ;;  %v6221_v5 = vld [vmem:[%s13016_s5 + $0xe18] sm:$0xff] }
 0x363   :  { %2749 = vmatpush.msra.mxu3 %v6236_v6  ;;  %v9461_v18 = vpop.f32.mrf.mxu0  ;;  %v6021_v6 = vld [vmem:[%s13016_s5 + $0x7d8] sm:$0xff] }
 0x364   :  { %2778 = vmatpush.msra.mxu0 %v6036_v14  ;;  %v9466_v48 = vpop.f32.mrf.mxu3  ;;  %v6141_v14 = vld [vmem:[%s13016_s5 + $0xb98] sm:$0xff] }
 0x365   :  { %v9474_v42 = vpop.f32.mrf.mxu1  ;;  %2585 = vmatmul.f32.gmra.mxu0 %v9466_v48  ;;  %2750 = vmatpush.msra.mxu3 %v6233_v46 }
 0x366   :  { %2631 = vmatmul.f32.vlgmr.msra.gmra.mxu2 %v9474_v42  ;;  %2779 = vmatpush.msra.mxu0 %v6033_v38  ;;  %v6218_v38 = vld [vmem:[%s13016_s5 + $0xe00] sm:$0xff] }
 0x367   :  { %2823 = vmatpush.msra.mxu2 %v6153_v63  ;;  %2751 = vmatpush.msra.mxu3 %v6230_v12  ;;  %v6018_v63 = vld [vmem:[%s13016_s5 + $0x7c0] sm:$0xff] }
 0x368   :  { %2780 = vmatpush.msra.mxu0 %v6030_v28  ;;  %v6138_v12 = vld [vmem:[%s13016_s5 + $0xb80] sm:$0xff]  ;;  %v6215_v28 = vld [vmem:[%s13016_s5 + $0xde8] sm:$0xff] }
 0x369   :  { %2824 = vmatpush.msra.mxu2 %v6150_v21  ;;  %2752 = vmatpush.msra.mxu3 %v6227_v52  ;;  %v6015_v21 = vld [vmem:[%s13016_s5 + $0x7a8] sm:$0xff] }
 0x36a   :  { %2781 = vmatpush.msra.mxu0 %v6027_v10  ;;  %v9499_v33 = vpop.f32.mrf.mxu2  ;;  %v6135_v52 = vld [vmem:[%s13016_s5 + $0xb68] sm:$0xff]  ;;  %v6212_v10 = vld [vmem:[%s13016_s5 + $0xdd0] sm:$0xff] }
 0x36b   :  { %2825 = vmatpush.msra.mxu2 %v6147_v16  ;;  %2559 = vmatmul.f32.gmra.mxu3 %v9499_v33  ;;  %v9505_v37 = vpop.f32.mrf.mxu0  ;;  %v6012_v16 = vld [vmem:[%s13016_s5 + $0x790] sm:$0xff] }
 0x36c   :  { %2753 = vmatpush.msra.mxu3 %v6224_v7  ;;  %2782 = vmatpush.msra.mxu0 %v6024_v1  ;;  %v6132_v7 = vld [vmem:[%s13016_s5 + $0xb50] sm:$0xff] }
 0x36d   :  { %2826 = vmatpush.msra.mxu2 %v6144_v20  ;;  %v9516_v46 = vpop.f32.mrf.mxu1  ;;  %2683 = vmatmul.f32.vlgmr.msrb.gmra.mxu0 %v9411_v58  ;;  %v6249_v20 = vld [vmem:[%s13016_s5 + $0xef8] sm:$0xff] }
 0x36e   :  { %2634 = vmatmul.f32.gmra.mxu2 %v9516_v46  ;;  %2754 = vmatpush.msra.mxu3 %v6221_v5 }
 0x36f   :  { %2783 = vmatpush.msra.mxu0 %v6021_v6  ;;  %2827 = vmatpush.msra.mxu2 %v6141_v14  ;;  %v6209_v6 = vld [vmem:[%s13016_s5 + $0xdb8] sm:$0xff] }
 0x370   :  { %2755 = vmatpush.msra.mxu3 %v6218_v38  ;;  %v6129_v14 = vld [vmem:[%s13016_s5 + $0xb38] sm:$0xff]  ;;  %v6246_v38 = vld [vmem:[%s13016_s5 + $0xee0] sm:$0xff] }
 0x371   :  { %2784 = vmatpush.msra.mxu0 %v6018_v63  ;;  %2828 = vmatpush.msra.mxu2 %v6138_v12  ;;  %v6206_v63 = vld [vmem:[%s13016_s5 + $0xda0] sm:$0xff] }
 0x372   :  { %2756 = vmatpush.msra.mxu3 %v6215_v28  ;;  %v6126_v12 = vld [vmem:[%s13016_s5 + $0xb20] sm:$0xff]  ;;  %v6243_v28 = vld [vmem:[%s13016_s5 + $0xec8] sm:$0xff] }
 0x373   :  { %2785 = vmatpush.msra.mxu0 %v6015_v21  ;;  %2829 = vmatpush.msra.mxu2 %v6135_v52  ;;  %v9547_v1 = vpop.f32.mrf.mxu0  ;;  %v6203_v21 = vld [vmem:[%s13016_s5 + $0xd88] sm:$0xff] }
 0x374   :  { %2657 = vmatmul.f32.vlgmr.msrb.gmra.mxu3 %v9206_v29  ;;  %v6123_v52 = vld [vmem:[%s13016_s5 + $0xb08] sm:$0xff] }
 0x375   :  { %2757 = vmatpush.msra.mxu3 %v6212_v10  ;;  %2786 = vmatpush.msra.mxu0 %v6012_v16  ;;  %v9553_v5 = vpop.f32.mrf.mxu1  ;;  %v6201_v10 = vld [vmem:[%s13016_s5 + $0xd78] sm:$0xff]  ;;  %v6240_v16 = vld [vmem:[%s13016_s5 + $0xeb0] sm:$0xff] }
 0x376   :  { %2830 = vmatpush.msra.mxu2 %v6132_v7  ;;  %2686 = vmatmul.f32.gmra.mxu0 %v9452_v40  ;;  %v6120_v7 = vld [vmem:[%s13016_s5 + $0xaf0] sm:$0xff] }
 0x377   :  { %2875 = vmatpush.msrb.mxu0 %v6249_v20  ;;  %2637 = vmatmul.f32.gmra.mxu2 %v9553_v5  ;;  %v6198_v20 = vld [vmem:[%s13016_s5 + $0xd60] sm:$0xff] }
 0x378   :  { %2758 = vmatpush.msra.mxu3 %v6209_v6  ;;  %2831 = vmatpush.msra.mxu2 %v6129_v14  ;;  %v6237_v6 = vld [vmem:[%s13016_s5 + $0xe98] sm:$0xff] }
 0x379   :  { %2876 = vmatpush.msrb.mxu0 %v6246_v38  ;;  %v6105_v38 = vld [vmem:[%s13016_s5 + $0xa78] sm:$0xff] }
 0x37a   :  { %2759 = vmatpush.msra.mxu3 %v6206_v63  ;;  %2832 = vmatpush.msra.mxu2 %v6126_v12  ;;  %v6117_v63 = vld [vmem:[%s13016_s5 + $0xad8] sm:$0xff]  ;;  %v6195_v12 = vld [vmem:[%s13016_s5 + $0xd48] sm:$0xff] }
 0x37b   :  { %2877 = vmatpush.msrb.mxu0 %v6243_v28  ;;  %v9596_v14 = vpop.f32.mrf.mxu0  ;;  %v6234_v28 = vld [vmem:[%s13016_s5 + $0xe80] sm:$0xff] }
 0x37c   :  { %2760 = vmatpush.msra.mxu3 %v6203_v21  ;;  %2833 = vmatpush.msra.mxu2 %v6123_v52  ;;  %v6102_v21 = vld [vmem:[%s13016_s5 + $0xa60] sm:$0xff] }
 0x37d   :  { %2878 = vmatpush.msrb.mxu0 %v6240_v16  ;;  %2660 = vmatmul.f32.gmra.mxu3 %v9287_v45  ;;  %v6114_v52 = vld [vmem:[%s13016_s5 + $0xac0] sm:$0xff]  ;;  %v6231_v16 = vld [vmem:[%s13016_s5 + $0xe68] sm:$0xff] }
 0x37e   :  { %2849 = vmatpush.msrb.mxu3 %v6201_v10  ;;  %2834 = vmatpush.msra.mxu2 %v6120_v7  ;;  %v6192_v10 = vld [vmem:[%s13016_s5 + $0xd30] sm:$0xff]  ;;  %v6099_v7 = vld [vmem:[%s13016_s5 + $0xa48] sm:$0xff] }
 0x37f   :  { %2879 = vmatpush.msrb.mxu0 %v6237_v6  ;;  %2605 = vmatmul.f32.vlgmr.msra.gmra.mxu1 %v9596_v14  ;;  %v6189_v6 = vld [vmem:[%s13016_s5 + $0xd18] sm:$0xff] }
 0x380   :  { %2850 = vmatpush.msrb.mxu3 %v6198_v20  ;;  %2689 = vmatmul.f32.gmra.mxu0 %v9499_v33  ;;  %v6111_v20 = vld [vmem:[%s13016_s5 + $0xaa8] sm:$0xff] }
 0x381   :  { %2735 = vmatmul.f32.vlgmr.msrb.gmra.mxu2 %v9596_v14  ;;  %2797 = vmatpush.msra.mxu1 %v6105_v38  ;;  %v6228_v38 = vld [vmem:[%s13016_s5 + $0xe50] sm:$0xff] }
 0x382   :  { %2835 = vmatpush.msra.mxu2 %v6117_v63  ;;  %2851 = vmatpush.msrb.mxu3 %v6195_v12  ;;  %v6096_v63 = vld [vmem:[%s13016_s5 + $0xa30] sm:$0xff] }
 0x383   :  { %2880 = vmatpush.msrb.mxu0 %v6234_v28  ;;  %2798 = vmatpush.msra.mxu1 %v6102_v21  ;;  %v6108_v12 = vld [vmem:[%s13016_s5 + $0xa90] sm:$0xff]  ;;  %v6186_v28 = vld [vmem:[%s13016_s5 + $0xd00] sm:$0xff]  ;;  %v6225_v21 = vld [vmem:[%s13016_s5 + $0xe38] sm:$0xff] }
 0x384   :  { %2836 = vmatpush.msra.mxu2 %v6114_v52  ;;  %2852 = vmatpush.msrb.mxu3 %v6192_v10  ;;  %v9651_v52 = vpop.f32.mrf.mxu0  ;;  %v1980_v10 = vld [vmem:[%s13016_s5 + $0x2e8] sm:$0xff] }
 0x385   :  { %2881 = vmatpush.msrb.mxu0 %v6231_v16  ;;  %2799 = vmatpush.msra.mxu1 %v6099_v7  ;;  %v6093_v16 = vld [vmem:[%s13016_s5 + $0xa18] sm:$0xff]  ;;  %v6183_v7 = vld [vmem:[%s13016_s5 + $0xce8] sm:$0xff] }
 0x386   :  { %2837 = vmatpush.msra.mxu2 %v6111_v20  ;;  %2853 = vmatpush.msrb.mxu3 %v6189_v6  ;;  %v6222_v20 = vld [vmem:[%s13016_s5 + $0xe20] sm:$0xff]  ;;  %v1977_v6 = vld [vmem:[%s13016_s5 + $0x2d0] sm:$0xff] }
 0x387   :  { %2882 = vmatpush.msrb.mxu0 %v6228_v38  ;;  %2663 = vmatmul.f32.gmra.mxu3 %v9325_v27  ;;  %v6090_v38 = vld [vmem:[%s13016_s5 + $0xa00] sm:$0xff] }
 0x388   :  { %2800 = vmatpush.msra.mxu1 %v6096_v63  ;;  %2838 = vmatpush.msra.mxu2 %v6108_v12  ;;  %v6180_v63 = vld [vmem:[%s13016_s5 + $0xcd0] sm:$0xff]  ;;  %v6219_v12 = vld [vmem:[%s13016_s5 + $0xe08] sm:$0xff] }
 0x389   :  { %2854 = vmatpush.msrb.mxu3 %v6186_v28  ;;  %2883 = vmatpush.msrb.mxu0 %v6225_v21  ;;  %v1974_v28 = vld [vmem:[%s13016_s5 + $0x2b8] sm:$0xff] }
 0x38a   :  { %2927 = vmatpush.msrb.mxu2 %v1980_v10  ;;  %2608 = vmatmul.f32.gmra.mxu1 %v9651_v52  ;;  %v6177_v21 = vld [vmem:[%s13016_s5 + $0xcb8] sm:$0xff]  ;;  %v6216_v10 = vld [vmem:[%s13016_s5 + $0xdf0] sm:$0xff] }
 0x38b   :  { %2738 = vmatmul.f32.gmra.mxu2 %v9651_v52  ;;  %2787 = vmatmul.f32.vlgmr.msra.gmra.mxu0 %v9206_v29  ;;  %v6087_v29 = vld [vmem:[%s13016_s5 + $0x9e8] sm:$0xff] }
 0x38c   :  { %2801 = vmatpush.msra.mxu1 %v6093_v16  ;;  %2855 = vmatpush.msrb.mxu3 %v6183_v7  ;;  %v1971_v16 = vld [vmem:[%s13016_s5 + $0x2a0] sm:$0xff]  ;;  %v6084_v7 = vld [vmem:[%s13016_s5 + $0x9d0] sm:$0xff] }
 0x38d   :  { %2884 = vmatpush.msrb.mxu0 %v6222_v20  ;;  %2928 = vmatpush.msrb.mxu2 %v1977_v6  ;;  %v6174_v20 = vld [vmem:[%s13016_s5 + $0xca0] sm:$0xff]  ;;  %v6213_v6 = vld [vmem:[%s13016_s5 + $0xdd8] sm:$0xff] }
 0x38e   :  { %2802 = vmatpush.msra.mxu1 %v6090_v38  ;;  %2856 = vmatpush.msrb.mxu3 %v6180_v63  ;;  %v9704_v38 = vpop.f32.mrf.mxu0  ;;  %v1968_v63 = vld [vmem:[%s13016_s5 + $0x288] sm:$0xff] }
 0x38f   :  { %2885 = vmatpush.msrb.mxu0 %v6219_v12  ;;  %2929 = vmatpush.msrb.mxu2 %v1974_v28  ;;  %v6081_v12 = vld [vmem:[%s13016_s5 + $0x9b8] sm:$0xff]  ;;  %v6171_v28 = vld [vmem:[%s13016_s5 + $0xc88] sm:$0xff] }
 0x390   :  { %2803 = vmatpush.msra.mxu1 %v6087_v29  ;;  %2857 = vmatpush.msrb.mxu3 %v6177_v21  ;;  %v6210_v29 = vld [vmem:[%s13016_s5 + $0xdc0] sm:$0xff]  ;;  %v1965_v21 = vld [vmem:[%s13016_s5 + $0x270] sm:$0xff] }
 0x391   :  { %2886 = vmatpush.msrb.mxu0 %v6216_v10  ;;  %2930 = vmatpush.msrb.mxu2 %v1971_v16  ;;  %v6078_v10 = vld [vmem:[%s13016_s5 + $0x9a0] sm:$0xff]  ;;  %v6168_v16 = vld [vmem:[%s13016_s5 + $0xc70] sm:$0xff] }
 0x392   :  { %2761 = vmatmul.f32.vlgmr.msra.gmra.mxu3 %v9474_v42  ;;  %2804 = vmatpush.msra.mxu1 %v6084_v7  ;;  %v6207_v7 = vld [vmem:[%s13016_s5 + $0xda8] sm:$0xff] }
 0x393   :  { %2858 = vmatpush.msrb.mxu3 %v6174_v20  ;;  %2887 = vmatpush.msrb.mxu0 %v6213_v6  ;;  %v1962_v20 = vld [vmem:[%s13016_s5 + $0x258] sm:$0xff] }
 0x394   :  { %2931 = vmatpush.msrb.mxu2 %v1968_v63  ;;  %2611 = vmatmul.f32.gmra.mxu1 %v9704_v38  ;;  %v6165_v6 = vld [vmem:[%s13016_s5 + $0xc58] sm:$0xff]  ;;  %v6204_v63 = vld [vmem:[%s13016_s5 + $0xd90] sm:$0xff] }
 0x395   :  { %2741 = vmatmul.f32.gmra.mxu2 %v9704_v38  ;;  %2790 = vmatmul.f32.gmra.mxu0 %v9287_v45  ;;  %v6075_v45 = vld [vmem:[%s13016_s5 + $0x988] sm:$0xff] }
 0x396   :  { %2805 = vmatpush.msra.mxu1 %v6081_v12  ;;  %2859 = vmatpush.msrb.mxu3 %v6171_v28  ;;  %v1959_v12 = vld [vmem:[%s13016_s5 + $0x240] sm:$0xff]  ;;  %v6072_v28 = vld [vmem:[%s13016_s5 + $0x970] sm:$0xff] }
 0x397   :  { %2888 = vmatpush.msrb.mxu0 %v6210_v29  ;;  %2932 = vmatpush.msrb.mxu2 %v1965_v21  ;;  %v2076_v29 = vld [vmem:[%s13016_s5 + $0x5e8] sm:$0xff]  ;;  %v6162_v21 = vld [vmem:[%s13016_s5 + $0xc40] sm:$0xff] }
 0x398   :  { %2806 = vmatpush.msra.mxu1 %v6078_v10  ;;  %2860 = vmatpush.msrb.mxu3 %v6168_v16  ;;  %v1956_v10 = vld [vmem:[%s13016_s5 + $0x228] sm:$0xff]  ;;  %v6069_v16 = vld [vmem:[%s13016_s5 + $0x958] sm:$0xff] }
 0x399   :  { %2889 = vmatpush.msrb.mxu0 %v6207_v7  ;;  %2933 = vmatpush.msrb.mxu2 %v1962_v20  ;;  %v2073_v7 = vld [vmem:[%s13016_s5 + $0x5d0] sm:$0xff]  ;;  %v6159_v20 = vld [vmem:[%s13016_s5 + $0xc28] sm:$0xff] }
 0x39a   :  { %2807 = vmatpush.msra.mxu1 %v6075_v45  ;;  %2861 = vmatpush.msrb.mxu3 %v6165_v6  ;;  %v1953_v45 = vld [vmem:[%s13016_s5 + $0x210] sm:$0xff]  ;;  %v6066_v6 = vld [vmem:[%s13016_s5 + $0x940] sm:$0xff] }
 0x39b   :  { %2890 = vmatpush.msrb.mxu0 %v6204_v63  ;;  %2934 = vmatpush.msrb.mxu2 %v1959_v12  ;;  %v2070_v63 = vld [vmem:[%s13016_s5 + $0x5b8] sm:$0xff]  ;;  %v6156_v12 = vld [vmem:[%s13016_s5 + $0xc10] sm:$0xff] }
 0x39c   :  { %2764 = vmatmul.f32.gmra.mxu3 %v9516_v46  ;;  %2808 = vmatpush.msra.mxu1 %v6072_v28  ;;  %v6063_v28 = vld [vmem:[%s13016_s5 + $0x928] sm:$0xff] }
 0x39d   :  { %2979 = vmatpush.msra.mxu0 %v2076_v29  ;;  %2862 = vmatpush.msrb.mxu3 %v6162_v21  ;;  %v2028_v29 = vld [vmem:[%s13016_s5 + $0x468] sm:$0xff]  ;;  %v1947_v21 = vld [vmem:[%s13016_s5 + $0x1e0] sm:$0xff] }
 0x39e   :  { %2935 = vmatpush.msrb.mxu2 %v1956_v10  ;;  %2709 = vmatmul.f32.vlgmr.msrb.gmra.mxu1 %v9393_v41  ;;  %v6060_v10 = vld [vmem:[%s13016_s5 + $0x910] sm:$0xff] }
 0x39f   :  { %2793 = vmatmul.f32.gmra.mxu0 %v9325_v27  ;;  %2809 = vmatpush.msra.mxu1 %v6069_v16  ;;  %v1950_v27 = vld [vmem:[%s13016_s5 + $0x1f8] sm:$0xff]  ;;  %v2025_v16 = vld [vmem:[%s13016_s5 + $0x450] sm:$0xff] }
 0x3a0   :  { %2839 = vmatmul.f32.vlgmr.msra.gmra.mxu2 %v9393_v41  ;;  %2980 = vmatpush.msra.mxu0 %v2073_v7  ;;  %v2067_v41 = vld [vmem:[%s13016_s5 + $0x5a0] sm:$0xff]  ;;  %v2064_v7 = vld [vmem:[%s13016_s5 + $0x588] sm:$0xff] }
 0x3a1   :  { %2863 = vmatpush.msrb.mxu3 %v6159_v20  ;;  %2936 = vmatpush.msrb.mxu2 %v1953_v45  ;;  %v1932_v20 = vld [vmem:[%s13016_s5 + $0x168] sm:$0xff] }
 0x3a2   :  { %2810 = vmatpush.msra.mxu1 %v6066_v6  ;;  %2981 = vmatpush.msra.mxu0 %v2070_v63  ;;  %v1944_v45 = vld [vmem:[%s13016_s5 + $0x1c8] sm:$0xff]  ;;  %v2022_v6 = vld [vmem:[%s13016_s5 + $0x438] sm:$0xff]  ;;  %v2061_v63 = vld [vmem:[%s13016_s5 + $0x570] sm:$0xff] }
 0x3a3   :  { %2864 = vmatpush.msrb.mxu3 %v6156_v12  ;;  %2937 = vmatpush.msrb.mxu2 %v1950_v27  ;;  %v1929_v12 = vld [vmem:[%s13016_s5 + $0x150] sm:$0xff] }
 0x3a4   :  { %2811 = vmatpush.msra.mxu1 %v6063_v28  ;;  %2982 = vmatpush.msra.mxu0 %v2067_v41  ;;  %v1941_v27 = vld [vmem:[%s13016_s5 + $0x1b0] sm:$0xff]  ;;  %v2019_v28 = vld [vmem:[%s13016_s5 + $0x420] sm:$0xff]  ;;  %v1926_v41 = vld [vmem:[%s13016_s5 + $0x138] sm:$0xff] }
 0x3a5   :  { %2953 = vmatpush.msra.mxu3 %v2028_v29  ;;  %2938 = vmatpush.msrb.mxu2 %v1947_v21  ;;  %v2058_v29 = vld [vmem:[%s13016_s5 + $0x558] sm:$0xff]  ;;  %v2016_v21 = vld [vmem:[%s13016_s5 + $0x408] sm:$0xff] }
 0x3a6   :  { %2767 = vmatmul.f32.gmra.mxu3 %v9553_v5  ;;  %2812 = vmatpush.msra.mxu1 %v6060_v10  ;;  %v1923_v10 = vld [vmem:[%s13016_s5 + $0x120] sm:$0xff] }
 0x3a7   :  { %2954 = vmatpush.msra.mxu3 %v2025_v16  ;;  %2983 = vmatpush.msra.mxu0 %v2064_v7  ;;  %v1935_v16 = vld [vmem:[%s13016_s5 + $0x180] sm:$0xff]  ;;  %v2013_v7 = vld [vmem:[%s13016_s5 + $0x3f0] sm:$0xff] }
 0x3a8   :  { %2901 = vmatpush.msrb.mxu1 %v1932_v20  ;;  %2939 = vmatpush.msrb.mxu2 %v1944_v45  ;;  %v2052_v20 = vld [vmem:[%s13016_s5 + $0x528] sm:$0xff]  ;;  %v1933_v45 = vld [vmem:[%s13016_s5 + $0x170] sm:$0xff] }
 0x3a9   :  { %2712 = vmatmul.f32.gmra.mxu1 %v9428_v34  ;;  %2842 = vmatmul.f32.gmra.mxu2 %v9428_v34  ;;  %v1938_v34 = vld [vmem:[%s13016_s5 + $0x198] sm:$0xff] }
 0x3aa   :  { %2891 = vmatmul.f32.vlgmr.msrb.gmra.mxu0 %v9474_v42  ;;  %2955 = vmatpush.msra.mxu3 %v2022_v6  ;;  %v2055_v42 = vld [vmem:[%s13016_s5 + $0x540] sm:$0xff]  ;;  %v1920_v6 = vld [vmem:[%s13016_s5 + $0x108] sm:$0xff] }
 0x3ab   :  { %2984 = vmatpush.msra.mxu0 %v2061_v63  ;;  %2902 = vmatpush.msrb.mxu1 %v1929_v12  ;;  %v2010_v63 = vld [vmem:[%s13016_s5 + $0x3d8] sm:$0xff]  ;;  %v2049_v12 = vld [vmem:[%s13016_s5 + $0x510] sm:$0xff] }
 0x3ac   :  { %2940 = vmatpush.msrb.mxu2 %v1941_v27  ;;  %2956 = vmatpush.msra.mxu3 %v2019_v28  ;;  %v1930_v27 = vld [vmem:[%s13016_s5 + $0x158] sm:$0xff]  ;;  %v2007_v28 = vld [vmem:[%s13016_s5 + $0x3c0] sm:$0xff] }
 0x3ad   :  { %2985 = vmatpush.msra.mxu0 %v2058_v29  ;;  %2903 = vmatpush.msrb.mxu1 %v1926_v41  ;;  %v2046_v29 = vld [vmem:[%s13016_s5 + $0x4f8] sm:$0xff]  ;;  %v1927_v41 = vld [vmem:[%s13016_s5 + $0x140] sm:$0xff] }
 0x3ae   :  { %2941 = vmatpush.msrb.mxu2 %v1938_v34  ;;  %2957 = vmatpush.msra.mxu3 %v2016_v21  ;;  %v2004_v34 = vld [vmem:[%s13016_s5 + $0x3a8] sm:$0xff] }
 0x3af   :  { %2986 = vmatpush.msra.mxu0 %v2055_v42  ;;  %2904 = vmatpush.msrb.mxu1 %v1923_v10  ;;  %v1924_v21 = vld [vmem:[%s13016_s5 + $0x128] sm:$0xff]  ;;  %v1911_v42 = vld [vmem:[%s13016_s5 + $0xc0] sm:$0xff]  ;;  %v2001_v10 = vld [vmem:[%s13016_s5 + $0x390] sm:$0xff] }
 0x3b0   :  { %2942 = vmatpush.msrb.mxu2 %v1935_v16  ;;  %2865 = vmatmul.f32.vlgmr.msrb.gmra.mxu3 %v9596_v14  ;;  %v1917_v14 = vld [vmem:[%s13016_s5 + $0xf0] sm:$0xff]  ;;  %v2040_v16 = vld [vmem:[%s13016_s5 + $0x4c8] sm:$0xff] }
 0x3b1   :  { %2958 = vmatpush.msra.mxu3 %v2013_v7  ;;  %2987 = vmatpush.msra.mxu0 %v2052_v20  ;;  %v1921_v7 = vld [vmem:[%s13016_s5 + $0x110] sm:$0xff]  ;;  %v1908_v20 = vld [vmem:[%s13016_s5 + $0xa8] sm:$0xff] }
 0x3b2   :  { %3031 = vmatpush.msra.mxu2 %v1933_v45  ;;  %2905 = vmatpush.msrb.mxu1 %v1920_v6  ;;  %v1998_v45 = vld [vmem:[%s13016_s5 + $0x378] sm:$0xff]  ;;  %v2037_v6 = vld [vmem:[%s13016_s5 + $0x4b0] sm:$0xff] }
 0x3b3   :  { %2715 = vmatmul.f32.gmra.mxu1 %v9466_v48  ;;  %2845 = vmatmul.f32.gmra.mxu2 %v9466_v48  ;;  %v1914_v48 = vld [vmem:[%s13016_s5 + $0xd8] sm:$0xff] }
 0x3b4   :  { %2894 = vmatmul.f32.gmra.mxu0 %v9516_v46  ;;  %2959 = vmatpush.msra.mxu3 %v2010_v63  ;;  %v2043_v46 = vld [vmem:[%s13016_s5 + $0x4e0] sm:$0xff]  ;;  %v1918_v63 = vld [vmem:[%s13016_s5 + $0xf8] sm:$0xff] }
 0x3b5   :  { %2988 = vmatpush.msra.mxu0 %v2049_v12  ;;  %3032 = vmatpush.msra.mxu2 %v1930_v27  ;;  %v1995_v12 = vld [vmem:[%s13016_s5 + $0x360] sm:$0xff]  ;;  %v2034_v27 = vld [vmem:[%s13016_s5 + $0x498] sm:$0xff] }
 0x3b6   :  { %2906 = vmatpush.msrb.mxu1 %v1917_v14  ;;  %2960 = vmatpush.msra.mxu3 %v2007_v28  ;;  %v1992_v14 = vld [vmem:[%s13016_s5 + $0x348] sm:$0xff]  ;;  %v2031_v28 = vld [vmem:[%s13016_s5 + $0x480] sm:$0xff] }
 0x3b7   :  { %2989 = vmatpush.msra.mxu0 %v2046_v29  ;;  %3033 = vmatpush.msra.mxu2 %v1927_v41  ;;  %v1912_v29 = vld [vmem:[%s13016_s5 + $0xc8] sm:$0xff]  ;;  %v1899_v41 = vld [vmem:[%s13016_s5 + $0x60] sm:$0xff] }
 0x3b8   :  { %2907 = vmatpush.msrb.mxu1 %v1914_v48  ;;  %2961 = vmatpush.msra.mxu3 %v2004_v34  ;;  %v2029_v48 = vld [vmem:[%s13016_s5 + $0x470] sm:$0xff] }
 0x3b9   :  { %2990 = vmatpush.msra.mxu0 %v2043_v46  ;;  %3034 = vmatpush.msra.mxu2 %v1924_v21  ;;  %v1909_v34 = vld [vmem:[%s13016_s5 + $0xb0] sm:$0xff]  ;;  %v1896_v21 = vld [vmem:[%s13016_s5 + $0x48] sm:$0xff] }
 0x3ba   :  { %2908 = vmatpush.msrb.mxu1 %v1911_v42  ;;  %2868 = vmatmul.f32.gmra.mxu3 %v9651_v52  ;;  %v1905_v52 = vld [vmem:[%s13016_s5 + $0x90] sm:$0xff]  ;;  %v2026_v42 = vld [vmem:[%s13016_s5 + $0x458] sm:$0xff] }
 0x3bb   :  { %2962 = vmatpush.msra.mxu3 %v2001_v10  ;;  %2991 = vmatpush.msra.mxu0 %v2040_v16  ;;  %v1989_v46 = vld [vmem:[%s13016_s5 + $0x330] sm:$0xff]  ;;  %v1986_v10 = vld [vmem:[%s13016_s5 + $0x318] sm:$0xff] }
 0x3bc   :  { %3035 = vmatpush.msra.mxu2 %v1921_v7  ;;  %2909 = vmatpush.msrb.mxu1 %v1908_v20  ;;  %v1906_v16 = vld [vmem:[%s13016_s5 + $0x98] sm:$0xff]  ;;  %v1893_v7 = vld [vmem:[%s13016_s5 + $0x30] sm:$0xff]  ;;  %v1983_v20 = vld [vmem:[%s13016_s5 + $0x300] sm:$0xff] }
 0x3bd   :  { %2813 = vmatmul.f32.vlgmr.msra.gmra.mxu1 %v9411_v58  ;;  %2897 = vmatmul.f32.gmra.mxu0 %v9553_v5  ;;  %v1915_v58 = vld [vmem:[%s13016_s5 + $0xe0] sm:$0xff]  ;;  %v1902_v5 = vld [vmem:[%s13016_s5 + $0x78] sm:$0xff] }
 0x3be   :  { %2943 = vmatmul.f32.vlgmr.msrb.gmra.mxu2 %v9104_v57  ;;  %2963 = vmatpush.msra.mxu3 %v1998_v45  ;;  %v1903_v45 = vld [vmem:[%s13016_s5 + $0x80] sm:$0xff] }
 0x3bf   :  { %2992 = vmatpush.msra.mxu0 %v2037_v6  ;;  %3036 = vmatpush.msra.mxu2 %v1918_v63  ;;  %v1981_v6 = vld [vmem:[%s13016_s5 + $0x2f0] sm:$0xff]  ;;  %v2020_v63 = vld [vmem:[%s13016_s5 + $0x428] sm:$0xff] }
 0x3c0   :  { %2910 = vmatpush.msrb.mxu1 %v1905_v52  ;;  %2964 = vmatpush.msra.mxu3 %v1995_v12  ;;  %v1900_v52 = vld [vmem:[%s13016_s5 + $0x68] sm:$0xff]  ;;  %v1887_v12 = vld [vmem:[%s13016_s5] sm:$0xff] }
 0x3c1   :  { %2993 = vmatpush.msra.mxu0 %v2034_v27  ;;  %3037 = vmatpush.msra.mxu2 %v1915_v58  ;;  %v1978_v27 = vld [vmem:[%s13016_s5 + $0x2d8] sm:$0xff]  ;;  %v2017_v58 = vld [vmem:[%s13016_s5 + $0x410] sm:$0xff] }
 0x3c2   :  { %2911 = vmatpush.msrb.mxu1 %v1902_v5  ;;  %2965 = vmatpush.msra.mxu3 %v1992_v14  ;;  %v2124_v5 = vld [vmem:[%s13016_s5 + $0x768] sm:$0xff]  ;;  %v1897_v14 = vld [vmem:[%s13016_s5 + $0x50] sm:$0xff] }
 0x3c3   :  { %2994 = vmatpush.msra.mxu0 %v2031_v28  ;;  %3038 = vmatpush.msra.mxu2 %v1912_v29  ;;  %v1975_v28 = vld [vmem:[%s13016_s5 + $0x2c0] sm:$0xff]  ;;  %v2014_v29 = vld [vmem:[%s13016_s5 + $0x3f8] sm:$0xff] }
 0x3c4   :  { %2912 = vmatpush.msrb.mxu1 %v1899_v41  ;;  %2871 = vmatmul.f32.gmra.mxu3 %v9704_v38  ;;  %v2023_v38 = vld [vmem:[%s13016_s5 + $0x440] sm:$0xff]  ;;  %v2121_v41 = vld [vmem:[%s13016_s5 + $0x750] sm:$0xff] }
 0x3c5   :  { %3083 = vmatpush.msrb.mxu0 %v2029_v48  ;;  %3039 = vmatpush.msra.mxu2 %v1909_v34  ;;  %v1894_v48 = vld [vmem:[%s13016_s5 + $0x38] sm:$0xff]  ;;  %v1972_v34 = vld [vmem:[%s13016_s5 + $0x2a8] sm:$0xff] }
 0x3c6   :  { %2966 = vmatpush.msra.mxu3 %v1989_v46  ;;  %2913 = vmatpush.msrb.mxu1 %v1896_v21  ;;  %v2011_v46 = vld [vmem:[%s13016_s5 + $0x3e0] sm:$0xff]  ;;  %v2118_v21 = vld [vmem:[%s13016_s5 + $0x738] sm:$0xff] }
 0x3c7   :  { %3084 = vmatpush.msrb.mxu0 %v2026_v42  ;;  %2816 = vmatmul.f32.gmra.mxu1 %v9452_v40  ;;  %v1890_v40 = vld [vmem:[%s13016_s5 + $0x18] sm:$0xff]  ;;  %v1891_v42 = vld [vmem:[%s13016_s5 + $0x20] sm:$0xff] }
 0x3c8   :  { %2946 = vmatmul.f32.gmra.mxu2 %v9127_v39  ;;  %2967 = vmatpush.msra.mxu3 %v1986_v10  ;;  %v2008_v10 = vld [vmem:[%s13016_s5 + $0x3c8] sm:$0xff] }
 0x3c9   :  { %2995 = vmatmul.f32.vlgmr.msra.gmra.mxu0 %v9320_v54  ;;  %3040 = vmatpush.msra.mxu2 %v1906_v16  ;;  %v2115_v16 = vld [vmem:[%s13016_s5 + $0x720] sm:$0xff] }
 0x3ca   :  { %2914 = vmatpush.msrb.mxu1 %v1893_v7  ;;  %3085 = vmatpush.msrb.mxu0 %v2023_v38  ;;  %v1888_v7 = vld [vmem:[%s13016_s5 + $0x8] sm:$0xff]  ;;  %v1966_v38 = vld [vmem:[%s13016_s5 + $0x278] sm:$0xff] }
 0x3cb   :  { %2968 = vmatpush.msra.mxu3 %v1983_v20  ;;  %3041 = vmatpush.msra.mxu2 %v1903_v45  ;;  %v2005_v20 = vld [vmem:[%s13016_s5 + $0x3b0] sm:$0xff] }
 0x3cc   :  { %2915 = vmatpush.msrb.mxu1 %v1890_v40  ;;  %3086 = vmatpush.msrb.mxu0 %v2020_v63  ;;  %v2125_v45 = vld [vmem:[%s13016_s5 + $0x770] sm:$0xff]  ;;  %v2112_v40 = vld [vmem:[%s13016_s5 + $0x708] sm:$0xff]  ;;  %v2002_v63 = vld [vmem:[%s13016_s5 + $0x398] sm:$0xff] }
 0x3cd   :  { %3057 = vmatpush.msrb.mxu3 %v1981_v6  ;;  %3042 = vmatpush.msra.mxu2 %v1900_v52  ;;  %v1963_v6 = vld [vmem:[%s13016_s5 + $0x260] sm:$0xff]  ;;  %v2122_v52 = vld [vmem:[%s13016_s5 + $0x758] sm:$0xff] }
 0x3ce   :  { %2916 = vmatpush.msrb.mxu1 %v1887_v12  ;;  %3087 = vmatpush.msrb.mxu0 %v2017_v58  ;;  %v2109_v12 = vld [vmem:[%s13016_s5 + $0x6f0] sm:$0xff]  ;;  %v10092_v58 = vpop.f32.mrf.mxu2 }
 0x3cf   :  { %3058 = vmatpush.msrb.mxu3 %v1978_v27  ;;  %3043 = vmatpush.msra.mxu2 %v1897_v14  ;;  %v1960_v27 = vld [vmem:[%s13016_s5 + $0x248] sm:$0xff]  ;;  %v2119_v14 = vld [vmem:[%s13016_s5 + $0x740] sm:$0xff] }
 0x3d0   :  { %2969 = vmatmul.f32.vlgmr.msra.gmra.mxu3 %v9343_v49  ;;  %3005 = vmatpush.msra.mxu1 %v2124_v5  ;;  %v1999_v5 = vld [vmem:[%s13016_s5 + $0x380] sm:$0xff] }
 0x3d1   :  { %3059 = vmatpush.msrb.mxu3 %v1975_v28  ;;  %3088 = vmatpush.msrb.mxu0 %v2014_v29  ;;  %v2106_v28 = vld [vmem:[%s13016_s5 + $0x6d8] sm:$0xff]  ;;  %v1957_v29 = vld [vmem:[%s13016_s5 + $0x230] sm:$0xff] }
 0x3d2   :  { %2819 = vmatmul.f32.gmra.mxu1 %v9499_v33  ;;  %2949 = vmatmul.f32.gmra.mxu2 %v9159_v24  ;;  %v1969_v33 = vld [vmem:[%s13016_s5 + $0x290] sm:$0xff] }
 0x3d3   :  { %2998 = vmatmul.f32.gmra.mxu0 %v9351_v32  ;;  %3006 = vmatpush.msra.mxu1 %v2121_v41  ;;  %v1996_v41 = vld [vmem:[%s13016_s5 + $0x368] sm:$0xff] }
 0x3d4   :  { %3044 = vmatpush.msra.mxu2 %v1894_v48  ;;  %3060 = vmatpush.msrb.mxu3 %v1972_v34  ;;  %v2116_v48 = vld [vmem:[%s13016_s5 + $0x728] sm:$0xff]  ;;  %v2103_v34 = vld [vmem:[%s13016_s5 + $0x6c0] sm:$0xff] }
 0x3d5   :  { %3089 = vmatpush.msrb.mxu0 %v2011_v46  ;;  %3007 = vmatpush.msra.mxu1 %v2118_v21  ;;  %v1954_v46 = vld [vmem:[%s13016_s5 + $0x218] sm:$0xff]  ;;  %v10121_v21 = vpop.f32.mrf.mxu0 }
 0x3d6   :  { %3045 = vmatpush.msra.mxu2 %v1891_v42  ;;  %3061 = vmatpush.msrb.mxu3 %v1969_v33  ;;  %v1993_v42 = vld [vmem:[%s13016_s5 + $0x350] sm:$0xff] }
 0x3d7   :  { %3090 = vmatpush.msrb.mxu0 %v2008_v10  ;;  %3008 = vmatpush.msra.mxu1 %v2115_v16  ;;  %v2113_v33 = vld [vmem:[%s13016_s5 + $0x710] sm:$0xff]  ;;  %v2100_v10 = vld [vmem:[%s13016_s5 + $0x6a8] sm:$0xff]  ;;  %v1951_v16 = vld [vmem:[%s13016_s5 + $0x200] sm:$0xff] }
 0x3d8   :  { %3046 = vmatpush.msra.mxu2 %v1888_v7  ;;  %3062 = vmatpush.msrb.mxu3 %v1966_v38  ;;  %v1990_v7 = vld [vmem:[%s13016_s5 + $0x338] sm:$0xff] }
 0x3d9   :  { %3091 = vmatpush.msrb.mxu0 %v2005_v20  ;;  %2972 = vmatmul.f32.gmra.mxu3 %v9364_v44  ;;  %v2110_v38 = vld [vmem:[%s13016_s5 + $0x6f8] sm:$0xff]  ;;  %v2097_v20 = vld [vmem:[%s13016_s5 + $0x690] sm:$0xff] }
 0x3da   :  { %3135 = vmatpush.msrb.mxu2 %v2125_v45  ;;  %3009 = vmatpush.msra.mxu1 %v2112_v40  ;;  %v1948_v45 = vld [vmem:[%s13016_s5 + $0x1e8] sm:$0xff]  ;;  %v1987_v40 = vld [vmem:[%s13016_s5 + $0x320] sm:$0xff] }
 0x3db   :  { %3063 = vmatpush.msrb.mxu3 %v1963_v6  ;;  %3092 = vmatpush.msrb.mxu0 %v2002_v63  ;;  %v10151_v6 = vpop.f32.mrf.mxu2  ;;  %v2107_v63 = vld [vmem:[%s13016_s5 + $0x6e0] sm:$0xff] }
 0x3dc   :  { %3136 = vmatpush.msrb.mxu2 %v2122_v52  ;;  %2917 = vmatmul.f32.vlgmr.msrb.gmra.mxu1 %v9359_v0  ;;  %v2094_v52 = vld [vmem:[%s13016_s5 + $0x678] sm:$0xff] }
 0x3dd   :  { %3001 = vmatmul.f32.gmra.mxu0 %v9372_v60  ;;  %3010 = vmatpush.msra.mxu1 %v2109_v12  ;;  %v1945_v12 = vld [vmem:[%s13016_s5 + $0x1d0] sm:$0xff] }
 0x3de   :  { %3047 = vmatmul.f32.vlgmr.msra.gmra.mxu2 %v9359_v0  ;;  %3064 = vmatpush.msrb.mxu3 %v1960_v27  ;;  %v1984_v27 = vld [vmem:[%s13016_s5 + $0x308] sm:$0xff] }
 0x3df   :  { %3093 = vmatpush.msrb.mxu0 %v1999_v5  ;;  %3137 = vmatpush.msrb.mxu2 %v2119_v14  ;;  %v2104_v5 = vld [vmem:[%s13016_s5 + $0x6c8] sm:$0xff]  ;;  %v2091_v14 = vld [vmem:[%s13016_s5 + $0x660] sm:$0xff] }
 0x3e0   :  { %3011 = vmatpush.msra.mxu1 %v2106_v28  ;;  %3065 = vmatpush.msrb.mxu3 %v1957_v29  ;;  %v1942_v28 = vld [vmem:[%s13016_s5 + $0x1b8] sm:$0xff]  ;;  %v10176_v29 = vpop.f32.mrf.mxu0 }
 0x3e1   :  { %3094 = vmatpush.msrb.mxu0 %v1996_v41  ;;  %3138 = vmatpush.msrb.mxu2 %v2116_v48  ;;  %v1982_v41 = vld [vmem:[%s13016_s5 + $0x2f8] sm:$0xff]  ;;  %v2101_v48 = vld [vmem:[%s13016_s5 + $0x6b0] sm:$0xff] }
 0x3e2   :  { %3012 = vmatpush.msra.mxu1 %v2103_v34  ;;  %3066 = vmatpush.msrb.mxu3 %v1954_v46  ;;  %v2088_v34 = vld [vmem:[%s13016_s5 + $0x648] sm:$0xff]  ;;  %v1939_v46 = vld [vmem:[%s13016_s5 + $0x1a0] sm:$0xff] }
 0x3e3   :  { %3095 = vmatpush.msrb.mxu0 %v1993_v42  ;;  %3139 = vmatpush.msrb.mxu2 %v2113_v33  ;;  %v1979_v42 = vld [vmem:[%s13016_s5 + $0x2e0] sm:$0xff]  ;;  %v2098_v33 = vld [vmem:[%s13016_s5 + $0x698] sm:$0xff] }
 0x3e4   :  { %2975 = vmatmul.f32.gmra.mxu3 %v9382_v53  ;;  %3013 = vmatpush.msra.mxu1 %v2100_v10  ;;  %v2085_v10 = vld [vmem:[%s13016_s5 + $0x630] sm:$0xff] }
 0x3e5   :  { %3067 = vmatpush.msrb.mxu3 %v1951_v16  ;;  %3096 = vmatpush.msrb.mxu0 %v1990_v7  ;;  %v1976_v16 = vld [vmem:[%s13016_s5 + $0x2c8] sm:$0xff] }
 0x3e6   :  { %3140 = vmatpush.msrb.mxu2 %v2110_v38  ;;  %2920 = vmatmul.f32.gmra.mxu1 %v9377_v11  ;;  %v1936_v7 = vld [vmem:[%s13016_s5 + $0x188] sm:$0xff]  ;;  %v2095_v38 = vld [vmem:[%s13016_s5 + $0x680] sm:$0xff] }
 0x3e7   :  { %3014 = vmatpush.msra.mxu1 %v2097_v20  ;;  %3050 = vmatmul.f32.gmra.mxu2 %v9377_v11  ;;  %v10209_v20 = vpop.f32.mrf.mxu2 }
 0x3e8   :  { %3068 = vmatpush.msrb.mxu3 %v1948_v45  ;;  %3097 = vmatpush.msrb.mxu0 %v1987_v40  ;;  %v2082_v45 = vld [vmem:[%s13016_s5 + $0x618] sm:$0xff] }
 0x3e9   :  { %3141 = vmatpush.msrb.mxu2 %v2107_v63  ;;  %3015 = vmatpush.msra.mxu1 %v2094_v52  ;;  %v1934_v40 = vld [vmem:[%s13016_s5 + $0x178] sm:$0xff]  ;;  %v1973_v63 = vld [vmem:[%s13016_s5 + $0x2b0] sm:$0xff]  ;;  %v2092_v52 = vld [vmem:[%s13016_s5 + $0x668] sm:$0xff] }
 0x3ea   :  { %3069 = vmatpush.msrb.mxu3 %v1945_v12  ;;  %3098 = vmatpush.msrb.mxu0 %v1984_v27  ;;  %v2079_v12 = vld [vmem:[%s13016_s5 + $0x600] sm:$0xff] }
 0x3eb   :  { %3142 = vmatpush.msrb.mxu2 %v2104_v5  ;;  %3016 = vmatpush.msra.mxu1 %v2091_v14  ;;  %v1931_v27 = vld [vmem:[%s13016_s5 + $0x160] sm:$0xff]  ;;  %v10232_v5 = vpop.f32.mrf.mxu0  ;;  %v1970_v14 = vld [vmem:[%s13016_s5 + $0x298] sm:$0xff] }
 0x3ec   :  { %3099 = vmatmul.f32.vlgmr.msrb.gmra.mxu0 %v9343_v49  ;;  %3070 = vmatpush.msrb.mxu3 %v1942_v28  ;;  %v2077_v28 = vld [vmem:[%s13016_s5 + $0x5f0] sm:$0xff] }
 0x3ed   :  { %3187 = vmatpush.msra.mxu0 %v1982_v41  ;;  %3143 = vmatpush.msrb.mxu2 %v2101_v48  ;;  %v10240_v41 = vpop.f32.mrf.mxu3  ;;  %v2089_v48 = vld [vmem:[%s13016_s5 + $0x650] sm:$0xff] }
 0x3ee   :  { %3017 = vmatpush.msra.mxu1 %v2088_v34  ;;  %3071 = vmatpush.msrb.mxu3 %v1939_v46  ;;  %v1928_v34 = vld [vmem:[%s13016_s5 + $0x148] sm:$0xff]  ;;  %v1967_v46 = vld [vmem:[%s13016_s5 + $0x280] sm:$0xff] }
 0x3ef   :  { %3188 = vmatpush.msra.mxu0 %v1979_v42  ;;  %3144 = vmatpush.msrb.mxu2 %v2098_v33  ;;  %v2074_v42 = vld [vmem:[%s13016_s5 + $0x5d8] sm:$0xff] }
 0x3f0   :  { %2923 = vmatmul.f32.gmra.mxu1 %v9416_v56  ;;  %3053 = vmatmul.f32.gmra.mxu2 %v9416_v56  ;;  %v2086_v33 = vld [vmem:[%s13016_s5 + $0x638] sm:$0xff] }
 0x3f1   :  { %3018 = vmatpush.msra.mxu1 %v2085_v10  ;;  %3189 = vmatpush.msra.mxu0 %v1976_v16  ;;  %v1925_v10 = vld [vmem:[%s13016_s5 + $0x130] sm:$0xff]  ;;  %v1964_v16 = vld [vmem:[%s13016_s5 + $0x268] sm:$0xff] }
 0x3f2   :  { %3072 = vmatpush.msrb.mxu3 %v1936_v7  ;;  %3145 = vmatpush.msrb.mxu2 %v2095_v38  ;;  %v2071_v7 = vld [vmem:[%s13016_s5 + $0x5c0] sm:$0xff] }
 0x3f3   :  { %3019 = vmatpush.msra.mxu1 %v2082_v45  ;;  %3073 = vmatmul.f32.vlgmr.msrb.gmra.mxu3 %v9104_v57  ;;  %v2083_v38 = vld [vmem:[%s13016_s5 + $0x620] sm:$0xff]  ;;  %v10270_v45 = vpop.f32.mrf.mxu2 }
 0x3f4   :  { %3161 = vmatpush.msra.mxu3 %v1934_v40  ;;  %3190 = vmatpush.msra.mxu0 %v1973_v63  ;;  %v1961_v40 = vld [vmem:[%s13016_s5 + $0x250] sm:$0xff]  ;;  %v1922_v63 = vld [vmem:[%s13016_s5 + $0x118] sm:$0xff] }
 0x3f5   :  { %3146 = vmatpush.msrb.mxu2 %v2092_v52  ;;  %3020 = vmatpush.msra.mxu1 %v2079_v12  ;;  %v2068_v52 = vld [vmem:[%s13016_s5 + $0x5a8] sm:$0xff] }
 0x3f6   :  { %3102 = vmatmul.f32.gmra.mxu0 %v9364_v44  ;;  %3162 = vmatpush.msra.mxu3 %v1931_v27  ;;  %v2080_v12 = vld [vmem:[%s13016_s5 + $0x608] sm:$0xff]  ;;  %v1919_v27 = vld [vmem:[%s13016_s5 + $0x100] sm:$0xff] }
 0x3f7   :  { %3191 = vmatpush.msra.mxu0 %v1970_v14  ;;  %3109 = vmatpush.msrb.mxu1 %v2077_v28  ;;  %v10289_v14 = vpop.f32.mrf.mxu0  ;;  %v1958_v28 = vld [vmem:[%s13016_s5 + $0x238] sm:$0xff] }
 0x3f8   :  { %3147 = vmatpush.msrb.mxu2 %v2089_v48  ;;  %3163 = vmatpush.msra.mxu3 %v1928_v34  ;;  %13145 = vst [vmem:[#allocation33_spill] sm:$0xff] %v10289_v14  ;;  %v2078_v48 = vld [vmem:[%s13016_s5 + $0x5f8] sm:$0xff]  ;;  %v10297_v34 = vpop.f32.mrf.mxu3 }
 0x3f9   :  { %3192 = vmatpush.msra.mxu0 %v1967_v46  ;;  %3110 = vmatpush.msrb.mxu1 %v2074_v42  ;;  %v2065_v46 = vld [vmem:[%s13016_s5 + $0x590] sm:$0xff]  ;;  %v1916_v42 = vld [vmem:[%s13016_s5 + $0xe8] sm:$0xff] }
 0x3fa   :  { %3148 = vmatpush.msrb.mxu2 %v2086_v33  ;;  %3021 = vmatmul.f32.vlgmr.msra.gmra.mxu1 %v9461_v18  ;;  %v1955_v33 = vld [vmem:[%s13016_s5 + $0x220] sm:$0xff] }
 0x3fb   :  { %3164 = vmatpush.msra.mxu3 %v1925_v10  ;;  %3193 = vmatpush.msra.mxu0 %v1964_v16  ;;  %v2075_v10 = vld [vmem:[%s13016_s5 + $0x5e0] sm:$0xff]  ;;  %v2062_v16 = vld [vmem:[%s13016_s5 + $0x578] sm:$0xff] }
 0x3fc   :  { %3111 = vmatpush.msrb.mxu1 %v2071_v7  ;;  %3149 = vmatpush.msrb.mxu2 %v2083_v38  ;;  %v1913_v7 = vld [vmem:[%s13016_s5 + $0xd0] sm:$0xff]  ;;  %v1952_v38 = vld [vmem:[%s13016_s5 + $0x208] sm:$0xff] }
 0x3fd   :  { %3076 = vmatmul.f32.gmra.mxu3 %v9127_v39  ;;  %3194 = vmatpush.msra.mxu0 %v1961_v40  ;;  %v2072_v40 = vld [vmem:[%s13016_s5 + $0x5c8] sm:$0xff] }
 0x3fe   :  { %3165 = vmatpush.msra.mxu3 %v1922_v63  ;;  %3112 = vmatpush.msrb.mxu1 %v2068_v52  ;;  %v2059_v63 = vld [vmem:[%s13016_s5 + $0x560] sm:$0xff]  ;;  %v10328_v52 = vpop.f32.mrf.mxu2 }
 0x3ff   :  { %3150 = vmatpush.msrb.mxu2 %v2080_v12  ;;  %3105 = vmatmul.f32.gmra.mxu0 %v9382_v53  ;;  %v1949_v12 = vld [vmem:[%s13016_s5 + $0x1f0] sm:$0xff] }
 0x400   :  { %3151 = vmatmul.f32.vlgmr.msrb.gmra.mxu2 %v9461_v18  ;;  %3166 = vmatpush.msra.mxu3 %v1919_v27  ;;  %v1910_v27 = vld [vmem:[%s13016_s5 + $0xb8] sm:$0xff] }
 0x401   :  { %3195 = vmatpush.msra.mxu0 %v1958_v28  ;;  %3239 = vmatpush.msra.mxu2 %v2078_v48  ;;  %v2069_v28 = vld [vmem:[%s13016_s5 + $0x5b0] sm:$0xff]  ;;  %v2056_v48 = vld [vmem:[%s13016_s5 + $0x548] sm:$0xff] }
 0x402   :  { %3113 = vmatpush.msrb.mxu1 %v2065_v46  ;;  %3167 = vmatpush.msra.mxu3 %v1916_v42  ;;  %v1907_v46 = vld [vmem:[%s13016_s5 + $0xa0] sm:$0xff]  ;;  %v1946_v42 = vld [vmem:[%s13016_s5 + $0x1d8] sm:$0xff] }
 0x403   :  { %3196 = vmatpush.msra.mxu0 %v1955_v33  ;;  %3240 = vmatpush.msra.mxu2 %v2075_v10  ;;  %v10350_v33 = vpop.f32.mrf.mxu0  ;;  %v2066_v10 = vld [vmem:[%s13016_s5 + $0x598] sm:$0xff] }
 0x404   :  { %3114 = vmatpush.msrb.mxu1 %v2062_v16  ;;  %3168 = vmatpush.msra.mxu3 %v1913_v7  ;;  %v2053_v16 = vld [vmem:[%s13016_s5 + $0x530] sm:$0xff]  ;;  %v10358_v7 = vpop.f32.mrf.mxu3 }
 0x405   :  { %3024 = vmatmul.f32.gmra.mxu1 %v9505_v37  ;;  %3197 = vmatpush.msra.mxu0 %v1952_v38  ;;  %v1904_v38 = vld [vmem:[%s13016_s5 + $0x88] sm:$0xff] }
 0x406   :  { %3241 = vmatpush.msra.mxu2 %v2072_v40  ;;  %3115 = vmatpush.msrb.mxu1 %v2059_v63  ;;  %v1943_v40 = vld [vmem:[%s13016_s5 + $0x1c0] sm:$0xff] }
 0x407   :  { %3079 = vmatmul.f32.gmra.mxu3 %v9159_v24  ;;  %3198 = vmatpush.msra.mxu0 %v1949_v12  ;;  %v2063_v63 = vld [vmem:[%s13016_s5 + $0x580] sm:$0xff]  ;;  %v2050_v12 = vld [vmem:[%s13016_s5 + $0x518] sm:$0xff] }
 0x408   :  { %3169 = vmatpush.msra.mxu3 %v1910_v27  ;;  %3242 = vmatpush.msra.mxu2 %v2069_v28  ;;  %v1901_v27 = vld [vmem:[%s13016_s5 + $0x70] sm:$0xff]  ;;  %v1940_v28 = vld [vmem:[%s13016_s5 + $0x1a8] sm:$0xff] }
 0x409   :  { %3116 = vmatpush.msrb.mxu1 %v2056_v48  ;;  %3154 = vmatmul.f32.gmra.mxu2 %v9505_v37  ;;  %v2060_v48 = vld [vmem:[%s13016_s5 + $0x568] sm:$0xff] }
 0x40a   :  { %3170 = vmatpush.msra.mxu3 %v1907_v46  ;;  %3199 = vmatpush.msra.mxu0 %v1946_v42  ;;  %v2047_v46 = vld [vmem:[%s13016_s5 + $0x500] sm:$0xff]  ;;  %v1898_v42 = vld [vmem:[%s13016_s5 + $0x58] sm:$0xff] }
 0x40b   :  { %3243 = vmatpush.msra.mxu2 %v2066_v10  ;;  %3117 = vmatpush.msrb.mxu1 %v2053_v16  ;;  %v10388_v10 = vpop.f32.mrf.mxu2  ;;  %v1937_v16 = vld [vmem:[%s13016_s5 + $0x190] sm:$0xff]  ;;  %v10408_v14 = vpop.f32.mrf.mxu0 }
 0x40c   :  { %3171 = vmatpush.msra.mxu3 %v1904_v38  ;;  %3200 = vmatpush.msra.mxu0 %v1943_v40  ;;  %v2057_v38 = vld [vmem:[%s13016_s5 + $0x550] sm:$0xff]  ;;  %v10397_v40 = vpop.f32.mrf.mxu1 }
 0x40d   :  { %3244 = vmatpush.msra.mxu2 %v2063_v63  ;;  %3118 = vmatpush.msrb.mxu1 %v2050_v12  ;;  %v2044_v63 = vld [vmem:[%s13016_s5 + $0x4e8] sm:$0xff]  ;;  %v1895_v12 = vld [vmem:[%s13016_s5 + $0x40] sm:$0xff] }
 0x40e   :  { %3027 = vmatmul.f32.gmra.mxu1 %v9547_v1  ;;  %3172 = vmatpush.msra.mxu3 %v1901_v27  ;;  %v2054_v27 = vld [vmem:[%s13016_s5 + $0x538] sm:$0xff] }
 0x40f   :  { %3201 = vmatpush.msra.mxu0 %v1940_v28  ;;  %3245 = vmatpush.msra.mxu2 %v2060_v48  ;;  %v2041_v28 = vld [vmem:[%s13016_s5 + $0x4d0] sm:$0xff]  ;;  %v10414_v48 = vpop.f32.mrf.mxu3 }
 0x410   :  { %3119 = vmatpush.msrb.mxu1 %v2047_v46  ;;  %3173 = vmatpush.msra.mxu3 %v1898_v42  ;;  %v1892_v46 = vld [vmem:[%s13016_s5 + $0x28] sm:$0xff]  ;;  %v2051_v42 = vld [vmem:[%s13016_s5 + $0x520] sm:$0xff] }
 0x411   :  { %3202 = vmatpush.msra.mxu0 %v1937_v16  ;;  %3246 = vmatpush.msra.mxu2 %v2057_v38  ;;  %v2048_v16 = vld [vmem:[%s13016_s5 + $0x508] sm:$0xff]  ;;  %v2035_v38 = vld [vmem:[%s13016_s5 + $0x4a0] sm:$0xff] }
 0x412   :  { %3120 = vmatpush.msrb.mxu1 %v2044_v63  ;;  %3203 = vmatmul.f32.vlgmr.msra.gmra.mxu0 %v9104_v57  ;;  %v2038_v57 = vld [vmem:[%s13016_s5 + $0x4b8] sm:$0xff] }
 0x413   :  { %3315 = vmatpush.msrb.mxu0 %v8677_v25  ;;  %3157 = vmatmul.f32.gmra.mxu2 %v9547_v1  ;;  %v1889_v25 = vld [vmem:[%s13016_s5 + $0x10] sm:$0xff]  ;;  %v10441_v63 = vpop.f32.mrf.mxu2 }
 0x414   :  { %3174 = vmatpush.msra.mxu3 %v1895_v12  ;;  %3247 = vmatpush.msra.mxu2 %v2054_v27  ;;  %v2045_v12 = vld [vmem:[%s13016_s5 + $0x4f0] sm:$0xff]  ;;  %v2032_v27 = vld [vmem:[%s13016_s5 + $0x488] sm:$0xff] }
 0x415   :  { %3121 = vmatpush.msrb.mxu1 %v2041_v28  ;;  %3316 = vmatpush.msrb.mxu0 %v8687_v19  ;;  %v2126_v19 = vld [vmem:[%s13016_s5 + $0x778] sm:$0xff]  ;;  %v10449_v28 = vpop.f32.mrf.mxu1 }
 0x416   :  { %3175 = vmatpush.msra.mxu3 %v1892_v46  ;;  %3248 = vmatpush.msra.mxu2 %v2051_v42  ;;  %v2030_v46 = vld [vmem:[%s13016_s5 + $0x478] sm:$0xff] }
 0x417   :  { %3122 = vmatpush.msrb.mxu1 %v2038_v57  ;;  %3317 = vmatpush.msrb.mxu0 %v8693_v30  ;;  %v2123_v30 = vld [vmem:[%s13016_s5 + $0x760] sm:$0xff]  ;;  %v2042_v42 = vld [vmem:[%s13016_s5 + $0x4d8] sm:$0xff]  ;;  %v10462_v57 = vpop.f32.mrf.mxu0 }
 0x418   :  { %3176 = vmatpush.msra.mxu3 %v1889_v25  ;;  %3249 = vmatpush.msra.mxu2 %v2048_v16  ;;  %13146 = vst [vmem:[#allocation29_spill] sm:$0xff] %v10462_v57  ;;  %v2027_v25 = vld [vmem:[%s13016_s5 + $0x460] sm:$0xff] }
 0x419   :  { %3123 = vmatpush.msrb.mxu1 %v2035_v38  ;;  %3177 = vmatmul.f32.vlgmr.msra.gmra.mxu3 %v9359_v0  ;;  %v2120_v0 = vld [vmem:[%s13016_s5 + $0x748] sm:$0xff]  ;;  %v2039_v16 = vld [vmem:[%s13016_s5 + $0x4c0] sm:$0xff] }
 0x41a   :  { %3265 = vmatpush.msrb.mxu3 %v2126_v19  ;;  %3318 = vmatpush.msrb.mxu0 %v8703_v15  ;;  %v10468_v15 = vpop.f32.mrf.mxu3  ;;  %v2036_v38 = vld [vmem:[%s13016_s5 + $0x4a8] sm:$0xff]  ;;  %v2114_v19 = vld [vmem:[%s13016_s5 + $0x718] sm:$0xff] }
 0x41b   :  { %3250 = vmatpush.msra.mxu2 %v2045_v12  ;;  %3124 = vmatpush.msrb.mxu1 %v2032_v27  ;;  %v10495_v12 = vpop.f32.mrf.mxu2  ;;  %v2033_v27 = vld [vmem:[%s13016_s5 + $0x490] sm:$0xff] }
 0x41c   :  { %3206 = vmatmul.f32.gmra.mxu0 %v9127_v39  ;;  %3266 = vmatpush.msrb.mxu3 %v2123_v30  ;;  %v2117_v39 = vld [vmem:[%s13016_s5 + $0x730] sm:$0xff] }
 0x41d   :  { %3319 = vmatpush.msrb.mxu0 %v8709_v22  ;;  %3125 = vmatmul.f32.vlgmr.msrb.gmra.mxu1 %v9320_v54  ;;  %v2024_v22 = vld [vmem:[%s13016_s5 + $0x448] sm:$0xff]  ;;  %v10500_v30 = vpop.f32.mrf.mxu1 }
 0x41e   :  { %3213 = vmatpush.msra.mxu1 %v2030_v46  ;;  %3251 = vmatpush.msra.mxu2 %v2042_v42 }
 0x41f   :  { %3419 = vmatpush.msra.mxu0 %v8893_v50  ;;  %3267 = vmatpush.msrb.mxu3 %v2120_v0  ;;  %v2021_v50 = vld [vmem:[%s13016_s5 + $0x430] sm:$0xff]  ;;  %v10508_v46 = vpop.f32.mrf.mxu0 }
 0x420   :  { %3214 = vmatpush.msra.mxu1 %v2027_v25  ;;  %3252 = vmatpush.msra.mxu2 %v2039_v16  ;;  %13147 = vst [vmem:[#allocation30_spill] sm:$0xff] %v10508_v46  ;;  %v2099_v16 = vld [vmem:[%s13016_s5 + $0x6a0] sm:$0xff] }
 0x421   :  { %3420 = vmatpush.msra.mxu0 %v8897_v17  ;;  %3268 = vmatpush.msrb.mxu3 %v2117_v39  ;;  %v2111_v17 = vld [vmem:[%s13016_s5 + $0x700] sm:$0xff] }
 0x422   :  { %3215 = vmatpush.msra.mxu1 %v2024_v22  ;;  %3253 = vmatpush.msra.mxu2 %v2036_v38  ;;  %v10518_v42 = vpop.f32.mrf.mxu3  ;;  %v2093_v22 = vld [vmem:[%s13016_s5 + $0x670] sm:$0xff]  ;;  %v2000_v38 = vld [vmem:[%s13016_s5 + $0x388] sm:$0xff] }
 0x423   :  { %3421 = vmatpush.msra.mxu0 %v8903_v55  ;;  %3180 = vmatmul.f32.gmra.mxu3 %v9377_v11  ;;  %v2018_v55 = vld [vmem:[%s13016_s5 + $0x418] sm:$0xff]  ;;  %v2108_v11 = vld [vmem:[%s13016_s5 + $0x6e8] sm:$0xff]  ;;  %v10541_v0 = vpop.f32.mrf.mxu2 }
 0x424   :  { %3269 = vmatpush.msrb.mxu3 %v2114_v19  ;;  %3216 = vmatpush.msra.mxu1 %v2021_v50  ;;  %v10584_v19 = vld [vmem:[%s13015_s4 + $0x38] sm:$0xff]  ;;  %v1997_v50 = vld [vmem:[%s13016_s5 + $0x370] sm:$0xff] }
 0x425   :  { %3254 = vmatpush.msra.mxu2 %v2033_v27  ;;  %3422 = vmatpush.msra.mxu0 %v8908_v23  ;;  %v2015_v23 = vld [vmem:[%s13016_s5 + $0x400] sm:$0xff]  ;;  %v10548_v25 = vpop.f32.mrf.mxu1 }
 0x426   :  { %3209 = vmatmul.f32.gmra.mxu0 %v9159_v24  ;;  %3255 = vmatmul.f32.vlgmr.msra.gmra.mxu2 %v9320_v54  ;;  %v2105_v24 = vld [vmem:[%s13016_s5 + $0x6d0] sm:$0xff]  ;;  %v2087_v27 = vld [vmem:[%s13016_s5 + $0x640] sm:$0xff] }
 0x427   :  { %3270 = vmatpush.msrb.mxu3 %v2111_v17  ;;  %3367 = vmatpush.msrb.mxu2 %v8802_v4  ;;  %v2012_v4 = vld [vmem:[%s13016_s5 + $0x3e8] sm:$0xff]  ;;  %v10539_v54 = vld [vmem:[%s13015_s4 + $0x30] sm:$0xff]  ;;  %v10563_v39 = vpop.f32.mrf.mxu0 }
 0x428   :  { %3128 = vmatmul.f32.gmra.mxu1 %v9351_v32  ;;  %3423 = vmatpush.msra.mxu0 %v8912_v9  ;;  %v2102_v9 = vld [vmem:[%s13016_s5 + $0x6b8] sm:$0xff]  ;;  %13148 = vst [vmem:[#allocation36_spill] sm:$0xff] %v10563_v39  ;;  %v6445_v39 = vld [vmem:[%s13016_s5 + $0x1488] sm:$0xff] }
 0x429   :  { %3217 = vmatpush.msra.mxu1 %v2018_v55  ;;  %3271 = vmatpush.msrb.mxu3 %v2108_v11  ;;  %v1994_v11 = vld [vmem:[%s13016_s5 + $0x358] sm:$0xff] }
 0x42a   :  { %3368 = vmatpush.msrb.mxu2 %v8812_v43  ;;  %v2009_v43 = vld [vmem:[%s13016_s5 + $0x3d0] sm:$0xff] }
 0x42b   :  { %3218 = vmatpush.msra.mxu1 %v2015_v23  ;;  %3272 = vmatpush.msrb.mxu3 %v2105_v24  ;;  %v10592_v17 = vpop.f32.mrf.mxu2  ;;  %v2084_v23 = vld [vmem:[%s13016_s5 + $0x628] sm:$0xff]  ;;  %v1991_v24 = vld [vmem:[%s13016_s5 + $0x340] sm:$0xff] }
 0x42c   :  { %3369 = vmatpush.msrb.mxu2 %v8818_v51  ;;  %3183 = vmatmul.f32.gmra.mxu3 %v9416_v56  ;;  %v2006_v51 = vld [vmem:[%s13016_s5 + $0x3b8] sm:$0xff]  ;;  %v2096_v56 = vld [vmem:[%s13016_s5 + $0x688] sm:$0xff]  ;;  %13150 = vst [vmem:[#allocation40_spill] sm:$0xff] %v10592_v17 }
 0x42d   :  { %3219 = vmatpush.msra.mxu1 %v2012_v4  ;;  %3273 = vmatpush.msrb.mxu3 %v2102_v9  ;;  %v10594_v55 = vpop.f32.mrf.mxu1  ;;  %v6367_v17 = vld [vmem:[%s13016_s5 + $0x1218] sm:$0xff] }
 0x42e   :  { %3370 = vmatpush.msrb.mxu2 %v8831_v2  ;;  %6253 = vmatmul.msk.f32.vlgmr.msrb.gmra.mxu0 %vm461_vm2, %v10539_v54  ;;  %v10566_v2 = vpop.f32.mrf.mxu3 }
 0x42f   :  { %3220 = vmatpush.msra.mxu1 %v2009_v43  ;;  %3258 = vmatmul.f32.gmra.mxu2 %v9351_v32  ;;  %13149 = vst [vmem:[#allocation37_spill] sm:$0xff] %v10566_v2  ;;  %v2003_v32 = vld [vmem:[%s13016_s5 + $0x3a0] sm:$0xff]  ;;  %v10611_v4 = vpop.f32.mrf.mxu0  ;;  %v1988_v43 = vld [vmem:[%s13016_s5 + $0x328] sm:$0xff]  ;;  %v6375_v2 = vld [vmem:[%s13016_s5 + $0x1258] sm:$0xff] }
 0x430   :  { %3274 = vmatpush.msrb.mxu3 %v2099_v16  ;;  %3371 = vmatpush.msrb.mxu2 %v8835_v3  ;;  %v2090_v3 = vld [vmem:[%s13016_s5 + $0x658] sm:$0xff]  ;;  %13151 = vst [vmem:[#allocation27_spill] sm:$0xff] %v10611_v4  ;;  %v10621_v16 = vld [vmem:[%s13015_s4 + $0x40] sm:$0xf]  ;;  %v6490_v4 = vld [vmem:[%s13016_s5 + $0x15f0] sm:$0xff] }
 0x431   :  { %3131 = vmatmul.f32.gmra.mxu1 %v9372_v60 }
 0x432   :  { %3221 = vmatpush.msra.mxu1 %v2006_v51  ;;  %3275 = vmatpush.msrb.mxu3 %v2096_v56  ;;  %v1985_v51 = vld [vmem:[%s13016_s5 + $0x310] sm:$0xff] }
 0x433   :  { %v10632_v56 = vpop.f32.mrf.mxu2 }
 0x434   :  { %3222 = vmatpush.msra.mxu1 %v2003_v32  ;;  %3276 = vmatpush.msrb.mxu3 %v2093_v22  ;;  %13153 = vst [vmem:[#allocation38_spill] sm:$0xff] %v10632_v56  ;;  %v6295_v22 = vld [vmem:[%s13016_s5 + $0xfd8] sm:$0xff]  ;;  %v6457_v56 = vld [vmem:[%s13016_s5 + $0x14e8] sm:$0xff] }
 0x435   :  { %v10635_v32 = vpop.f32.mrf.mxu1  ;;  %3753 = vmatpush.msrb.mxu0 %v6457_v56  ;;  %v6362_v56 = vld [vmem:[%s13016_s5 + $0x11f0] sm:$0xff] }
 0x436   :  { %3223 = vmatpush.msra.mxu1 %v2000_v38  ;;  %3277 = vmatpush.msrb.mxu3 %v2090_v3  ;;  %v10613_v9 = vpop.f32.mrf.mxu3  ;;  %v6292_v3 = vld [vmem:[%s13016_s5 + $0xfc0] sm:$0xff] }
 0x437   :  { %3261 = vmatmul.f32.gmra.mxu2 %v9372_v60  ;;  %6254 = vmatmul.msk.f32.gmra.mxu0 %vm461_vm2, %v10584_v19  ;;  %v2081_v60 = vld [vmem:[%s13016_s5 + $0x610] sm:$0xff]  ;;  %13152 = vst [vmem:[#allocation28_spill] sm:$0xff] %v10613_v9 }
 0x438   :  { %3224 = vmatpush.msra.mxu1 %v1997_v50  ;;  %3278 = vmatpush.msrb.mxu3 %v2087_v27 }
 0x43a   :  { %3225 = vmatpush.msra.mxu1 %v1994_v11  ;;  %3279 = vmatpush.msrb.mxu3 %v2084_v23  ;;  %v6289_v11 = vld [vmem:[%s13016_s5 + $0xfa8] sm:$0xff]  ;;  %v6286_v23 = vld [vmem:[%s13016_s5 + $0xf90] sm:$0xff] }
 0x43c   :  { %3226 = vmatpush.msra.mxu1 %v1991_v24  ;;  %3280 = vmatpush.msrb.mxu3 %v2081_v60  ;;  %v6409_v24 = vld [vmem:[%s13016_s5 + $0x1368] sm:$0xff] }
 0x43d   :  { %3281 = vmatmul.f32.vlgmr.msrb.gmra.mxu3 %v9461_v18 }
 0x43e   :  { %3227 = vmatpush.msra.mxu1 %v1988_v43  ;;  %3393 = vmatpush.msra.mxu3 %v8790_v36  ;;  %v10640_v36 = vpop.f32.mrf.mxu0  ;;  %v10644_v18 = vpop.f32.mrf.mxu3  ;;  %v6280_v43 = vld [vmem:[%s13016_s5 + $0xf60] sm:$0xff] }
 0x43f   :  { %6255 = vmatmul.msk.f32.gmra.mxu0 %vm461_vm2, %v10621_v16  ;;  %6259 = vmatmul.msk.f32.vlgmr.msrb.gmra.mxu2 %vm461_vm2, %v10539_v54  ;;  %13154 = vst [vmem:[#allocation5_spill] sm:$0xff] %v10640_v36  ;;  %v6487_v36 = vld [vmem:[%s13016_s5 + $0x15d8] sm:$0xff] }
 0x440   :  { %3228 = vmatpush.msra.mxu1 %v1985_v51  ;;  %3394 = vmatpush.msra.mxu3 %v8796_v31  ;;  %13155 = vst [vmem:[#allocation6_spill] sm:$0xff] %v10644_v18  ;;  %v6494_v18 = vld [vmem:[%s13016_s5 + $0x1610] sm:$0xff] }
 0x441   :  { %3229 = vmatmul.f32.vlgmr.msra.gmra.mxu1 %v9343_v49  ;;  %v6304_v49 = vld [vmem:[%s13016_s5 + $0x1020] sm:$0xff] }
 0x442   :  { %3341 = vmatpush.msrb.mxu1 %v8661_v61  ;;  %3395 = vmatpush.msra.mxu3 %v8800_v8  ;;  %v10655_v61 = vpop.f32.mrf.mxu2 }
 0x443   :  { %13156 = vst [vmem:[#allocation42_spill] sm:$0xff] %v10655_v61  ;;  %v6478_v61 = vld [vmem:[%s13016_s5 + $0x1590] sm:$0xff] }
 0x444   :  { %3342 = vmatpush.msrb.mxu1 %v8671_v62  ;;  %3396 = vmatpush.msra.mxu3 %v8809_v59  ;;  %v10658_v62 = vpop.f32.mrf.mxu1  ;;  %v6307_v59 = vld [vmem:[%s13016_s5 + $0x1038] sm:$0xff] }
 0x445   :  { %3284 = vmatmul.f32.gmra.mxu3 %v9505_v37  ;;  %13157 = vst [vmem:[#allocation7_spill] sm:$0xff] %v10658_v62  ;;  %v6301_v37 = vld [vmem:[%s13016_s5 + $0x1008] sm:$0xff]  ;;  %v6331_v62 = vld [vmem:[%s13016_s5 + $0x10f8] sm:$0xff] }
 0x446   :  { %3343 = vmatpush.msrb.mxu1 %v8675_v13  ;;  %3397 = vmatpush.msra.mxu3 %v8815_v35  ;;  %v10661_v13 = vpop.f32.mrf.mxu0  ;;  %v10663_v31 = vpop.f32.mrf.mxu3 }
 0x447   :  { %6260 = vmatmul.msk.f32.gmra.mxu2 %vm461_vm2, %v10584_v19  ;;  %6265 = vmatmul.msk.f32.vlgmr.msra.gmra.mxu0 %vm461_vm2, %v10539_v54  ;;  %13158 = vst [vmem:[#allocation8_spill] sm:$0xff] %v10661_v13  ;;  %v6382_v13 = vld [vmem:[%s13016_s5 + $0x1290] sm:$0xff] }
 0x448   :  { %3344 = vmatpush.msrb.mxu1 %v8684_v47  ;;  %13159 = vst [vmem:[#allocation9_spill] sm:$0xff] %v10663_v31  ;;  %v6313_v47 = vld [vmem:[%s13016_s5 + $0x1068] sm:$0xff]  ;;  %3727 = vmatpush.msrb.mxu3 %v6409_v24 }
 0x449   :  { %3232 = vmatmul.f32.gmra.mxu1 %v9364_v44  ;;  %v6505_v24 = vld [vmem:[%s13016_s5 + $0x1668] sm:$0xff] }
 0x44a   :  { %3345 = vmatpush.msrb.mxu1 %v8690_v26  ;;  %v6310_v26 = vld [vmem:[%s13016_s5 + $0x1050] sm:$0xff]  ;;  %v10676_v8 = vpop.f32.mrf.mxu2 }
 0x44c   :  { %3675 = vmatpush.msra.mxu1 %v6313_v47  ;;  %v10681_v35 = vpop.f32.mrf.mxu1 }
 0x44d   :  { %3287 = vmatmul.f32.gmra.mxu3 %v9547_v1  ;;  %13160 = vst [vmem:[#allocation10_spill] sm:$0xff] %v10681_v35  ;;  %v6298_v1 = vld [vmem:[%s13016_s5 + $0xff0] sm:$0xff]  ;;  %v6452_v35 = vld [vmem:[%s13016_s5 + $0x14c0] sm:$0xff] }
 0x44e   :  { %3676 = vmatpush.msra.mxu1 %v6310_v26  ;;  %v10690_v44 = vpop.f32.mrf.mxu0 }
 0x44f   :  { %6261 = vmatmul.msk.f32.gmra.mxu2 %vm461_vm2, %v10621_v16  ;;  %6266 = vmatmul.msk.f32.gmra.mxu0 %vm461_vm2, %v10584_v19 }
 0x450   :  { %3677 = vmatpush.msra.mxu1 %v6307_v59  ;;  %v6277_v59 = vld [vmem:[%s13016_s5 + $0xf48] sm:$0xff] }
 0x451   :  { %3235 = vmatmul.f32.gmra.mxu1 %v9382_v53  ;;  %v10692_v53 = vpop.f32.mrf.mxu3 }
 0x452   :  { %13161 = vst [vmem:[#allocation25_spill] sm:$0xff] %v10692_v53  ;;  %3678 = vmatpush.msra.mxu1 %v6304_v49  ;;  %v10707_v38 = vpop.f32.mrf.mxu2  ;;  %v6406_v49 = vld [vmem:[%s13016_s5 + $0x1350] sm:$0xff] }
 0x453   :  { %3728 = vmatpush.msrb.mxu3 %v6406_v49  ;;  %v6502_v49 = vld [vmem:[%s13016_s5 + $0x1650] sm:$0xff] }
 0x454   :  { %3679 = vmatpush.msra.mxu1 %v6301_v37  ;;  %v6274_v37 = vld [vmem:[%s13016_s5 + $0xf30] sm:$0xff] }
 0x455   :  { %6262 = vmatmul.msk.f32.vlgmr.msra.gmra.mxu3 %vm461_vm2, %v10539_v54 }
 0x456   :  { %3680 = vmatpush.msra.mxu1 %v6298_v1  ;;  %v10716_v50 = vpop.f32.mrf.mxu0  ;;  %v6271_v1 = vld [vmem:[%s13016_s5 + $0xf18] sm:$0xff] }
 0x457   :  { %6267 = vmatmul.msk.f32.gmra.mxu0 %vm461_vm2, %v10621_v16 }
 0x458   :  { %3681 = vmatpush.msra.mxu1 %v6295_v22  ;;  %v6400_v22 = vld [vmem:[%s13016_s5 + $0x1320] sm:$0xff] }
 0x459   :  { %6256 = vmatmul.msk.f32.vlgmr.msrb.gmra.mxu1 %vm461_vm2, %v10539_v54  ;;  %v10712_v54 = vpop.f32.mrf.mxu1  ;;  %v10718_v27 = vpop.f32.mrf.mxu3 }
 0x45a   :  { %13162 = vst [vmem:[#allocation26_spill] sm:$0xff] %v10712_v54  ;;  %3682 = vmatpush.msra.mxu1 %v6292_v3  ;;  %v10734_v60 = vpop.f32.mrf.mxu2  ;;  %v6268_v3 = vld [vmem:[%s13016_s5 + $0xf00] sm:$0xff]  ;;  %v6343_v54 = vld [vmem:[%s13016_s5 + $0x1158] sm:$0xff] }
 0x45b   :  { %13163 = vst [vmem:[#allocation34_spill] sm:$0xff] %v10718_v27 }
 0x45c   :  { %3683 = vmatpush.msra.mxu1 %v6289_v11  ;;  %v6397_v11 = vld [vmem:[%s13016_s5 + $0x1308] sm:$0xff] }
 0x45d   :  { %6263 = vmatmul.msk.f32.gmra.mxu3 %vm461_vm2, %v10584_v19 }
 0x45e   :  { %3684 = vmatpush.msra.mxu1 %v6286_v23  ;;  %v10743_v47 = vpop.f32.mrf.mxu0 }
 0x461   :  { %6257 = vmatmul.msk.f32.gmra.mxu1 %vm461_vm2, %v10584_v19  ;;  %v6283_v19 = vld [vmem:[%s13016_s5 + $0xf78] sm:$0xff]  ;;  %v10739_v51 = vpop.f32.mrf.mxu1  ;;  %v10745_v26 = vpop.f32.mrf.mxu3 }
 0x462   :  { %3685 = vmatpush.msra.mxu1 %v6283_v19  ;;  %v10771_v23 = vpop.f32.mrf.mxu2 }
 0x463   :  { %13164 = vst [vmem:[#allocation11_spill] sm:$0xff] %v10771_v23  ;;  %v6282_v23 = vld [vmem:[%s13016_s5 + $0xf70] sm:$0xff] }
 0x464   :  { %3686 = vmatpush.msra.mxu1 %v6280_v43  ;;  %v6394_v43 = vld [vmem:[%s13016_s5 + $0x12f0] sm:$0xff] }
 0x465   :  { %6264 = vmatmul.msk.f32.gmra.mxu3 %vm461_vm2, %v10621_v16 }
 0x466   :  { %3687 = vmatpush.msra.mxu1 %v6277_v59 }
 0x468   :  { %3688 = vmatpush.msra.mxu1 %v6274_v37 }
 0x469   :  { %6258 = vmatmul.msk.f32.gmra.mxu1 %vm461_vm2, %v10621_v16  ;;  %v6403_v16 = vld [vmem:[%s13016_s5 + $0x1338] sm:$0xff]  ;;  %v10776_v19 = vpop.f32.mrf.mxu1  ;;  %v10781_v59 = vpop.f32.mrf.mxu0 }
 0x46a   :  { %3729 = vmatpush.msrb.mxu3 %v6403_v16  ;;  %3689 = vmatpush.msra.mxu1 %v6271_v1  ;;  %13165 = vst [vmem:[#allocation12_spill] sm:$0xff] %v10781_v59  ;;  %v10786_v37 = vpop.f32.mrf.mxu3  ;;  %v6391_v16 = vld [vmem:[%s13016_s5 + $0x12d8] sm:$0xff] }
 0x46b   :  { %v6499_v1 = vld [vmem:[%s13016_s5 + $0x1638] sm:$0xff] }
 0x46c   :  { %3730 = vmatpush.msrb.mxu3 %v6400_v22  ;;  %3690 = vmatpush.msra.mxu1 %v6268_v3  ;;  %v10794_v22 = vpop.f32.mrf.mxu2 }
 0x46d   :  { %13166 = vst [vmem:[#allocation13_spill] sm:$0xff] %v10794_v22 }
 0x46e   :  { %3731 = vmatpush.msrb.mxu3 %v6397_v11  ;;  %3779 = vmatpush.msrb.mxu1 %v6505_v24  ;;  %v6388_v24 = vld [vmem:[%s13016_s5 + $0x12c0] sm:$0xff] }
 0x470   :  { %3732 = vmatpush.msrb.mxu3 %v6394_v43  ;;  %3780 = vmatpush.msrb.mxu1 %v6502_v49  ;;  %v6496_v43 = vld [vmem:[%s13016_s5 + $0x1620] sm:$0xff]  ;;  %v6385_v49 = vld [vmem:[%s13016_s5 + $0x12a8] sm:$0xff] }
 0x471   :  { %v10796_v3 = vpop.f32.mrf.mxu1 }
 0x472   :  { %3733 = vmatpush.msrb.mxu3 %v6391_v16  ;;  %3781 = vmatpush.msrb.mxu1 %v6499_v1  ;;  %v6493_v16 = vld [vmem:[%s13016_s5 + $0x1608] sm:$0xff] }
 0x473   :  { %v10798_v11 = vpop.f32.mrf.mxu0  ;;  %v6361_v1 = vld [vmem:[%s13016_s5 + $0x11e8] sm:$0xff] }
 0x474   :  { %13167 = vst [vmem:[#allocation14_spill] sm:$0xff] %v10798_v11  ;;  %3734 = vmatpush.msrb.mxu3 %v6388_v24  ;;  %3782 = vmatpush.msrb.mxu1 %v6496_v43  ;;  %v6358_v24 = vld [vmem:[%s13016_s5 + $0x11d0] sm:$0xff]  ;;  %v10824_v43 = vpop.f32.mrf.mxu3  ;;  %v10832_v27 = vpop.f32.mrf.mxu2  ;;  %v6309_v11 = vld [vmem:[%s13016_s5 + $0x1048] sm:$0xff] }
 0x475   :  { %3701 = vmatpush.msra.mxu2 %v6361_v1  ;;  %v6379_v1 = vld [vmem:[%s13016_s5 + $0x1278] sm:$0xff]  ;;  %13168 = vst [vmem:[#allocation41_spill] sm:$0xff] %v10832_v27 }
 0x476   :  { %3735 = vmatpush.msrb.mxu3 %v6385_v49  ;;  %3783 = vmatpush.msrb.mxu1 %v6493_v16  ;;  %v6355_v49 = vld [vmem:[%s13016_s5 + $0x11b8] sm:$0xff]  ;;  %v6352_v16 = vld [vmem:[%s13016_s5 + $0x11a0] sm:$0xff] }
 0x477   :  { %3702 = vmatpush.msra.mxu2 %v6358_v24  ;;  %v6373_v24 = vld [vmem:[%s13016_s5 + $0x1248] sm:$0xff] }
 0x478   :  { %3736 = vmatpush.msrb.mxu3 %v6382_v13  ;;  %3784 = vmatpush.msrb.mxu1 %v6490_v4  ;;  %v6376_v4 = vld [vmem:[%s13016_s5 + $0x1260] sm:$0xff] }
 0x479   :  { %v10834_v31 = vpop.f32.mrf.mxu1  ;;  %3703 = vmatpush.msra.mxu2 %v6355_v49  ;;  %v6349_v49 = vld [vmem:[%s13016_s5 + $0x1188] sm:$0xff] }
 0x47a   :  { %3737 = vmatpush.msrb.mxu3 %v6379_v1  ;;  %3785 = vmatpush.msrb.mxu1 %v6487_v36  ;;  %v6484_v36 = vld [vmem:[%s13016_s5 + $0x15c0] sm:$0xff]  ;;  %v6481_v1 = vld [vmem:[%s13016_s5 + $0x15a8] sm:$0xff] }
 0x47b   :  { %3704 = vmatpush.msra.mxu2 %v6352_v16  ;;  %v6475_v16 = vld [vmem:[%s13016_s5 + $0x1578] sm:$0xff] }
 0x47c   :  { %v10836_v53 = vpop.f32.mrf.mxu0  ;;  %v10844_v13 = vpop.f32.mrf.mxu3  ;;  %3738 = vmatpush.msrb.mxu3 %v6376_v4  ;;  %3786 = vmatpush.msrb.mxu1 %v6484_v36  ;;  %v6370_v4 = vld [vmem:[%s13016_s5 + $0x1230] sm:$0xff] }
 0x47d   :  { %13169 = vst [vmem:[#allocation44_spill] sm:$0xff] %v10836_v53  ;;  %v6346_v36 = vld [vmem:[%s13016_s5 + $0x1170] sm:$0xff]  ;;  %3705 = vmatpush.msra.mxu2 %v6349_v49  ;;  %v6364_v49 = vld [vmem:[%s13016_s5 + $0x1200] sm:$0xff]  ;;  %v6317_v53 = vld [vmem:[%s13016_s5 + $0x1088] sm:$0xff] }
 0x47e   :  { %13170 = vst [vmem:[#allocation46_spill] sm:$0xff] %v10844_v13  ;;  %3739 = vmatpush.msrb.mxu3 %v6373_v24  ;;  %3787 = vmatpush.msrb.mxu1 %v6481_v1 }
 0x47f   :  { %3706 = vmatpush.msra.mxu2 %v6346_v36  ;;  %v6451_v36 = vld [vmem:[%s13016_s5 + $0x14b8] sm:$0xff] }
 0x480   :  { %3740 = vmatpush.msrb.mxu3 %v6370_v4  ;;  %3788 = vmatpush.msrb.mxu1 %v6478_v61  ;;  %v6454_v4 = vld [vmem:[%s13016_s5 + $0x14d0] sm:$0xff]  ;;  %v6340_v61 = vld [vmem:[%s13016_s5 + $0x1140] sm:$0xff] }
 0x481   :  { %3707 = vmatpush.msra.mxu2 %v6343_v54  ;;  %3754 = vmatpush.msrb.mxu0 %v6454_v4  ;;  %v6469_v54 = vld [vmem:[%s13016_s5 + $0x1548] sm:$0xff] }
 0x482   :  { %3741 = vmatpush.msrb.mxu3 %v6367_v17  ;;  %3789 = vmatpush.msrb.mxu1 %v6475_v16  ;;  %v6472_v17 = vld [vmem:[%s13016_s5 + $0x1560] sm:$0xff]  ;;  %v6337_v4 = vld [vmem:[%s13016_s5 + $0x1128] sm:$0xff] }
 0x483   :  { %v10879_v24 = vpop.f32.mrf.mxu2  ;;  %3708 = vmatpush.msra.mxu2 %v6340_v61  ;;  %3755 = vmatpush.msrb.mxu0 %v6451_v36  ;;  %v6334_v61 = vld [vmem:[%s13016_s5 + $0x1110] sm:$0xff]  ;;  %v6463_v36 = vld [vmem:[%s13016_s5 + $0x1518] sm:$0xff] }
 0x484   :  { %13171 = vst [vmem:[#allocation31_spill] sm:$0xff] %v10879_v24  ;;  %v10892_v24 = vpop.f32.mrf.mxu1  ;;  %3742 = vmatpush.msrb.mxu3 %v6364_v49  ;;  %3790 = vmatpush.msrb.mxu1 %v6472_v17  ;;  %v10909_v16 = vpop.f32.mrf.mxu3  ;;  %v6359_v49 = vld [vmem:[%s13016_s5 + $0x11d8] sm:$0xff]  ;;  %v6448_v17 = vld [vmem:[%s13016_s5 + $0x14a0] sm:$0xff] }
 0x485   :  { %13173 = vst [vmem:[#allocation43_spill] sm:$0xff] %v10909_v16  ;;  %3709 = vmatpush.msra.mxu2 %v6337_v4  ;;  %3756 = vmatpush.msrb.mxu0 %v6448_v17  ;;  %v6460_v4 = vld [vmem:[%s13016_s5 + $0x1500] sm:$0xff]  ;;  %v6285_v16 = vld [vmem:[%s13016_s5 + $0xf88] sm:$0xff] }
 0x486   :  { %3831 = vmatpush.msra.mxu3 %v6362_v56  ;;  %3791 = vmatpush.msrb.mxu1 %v6469_v54  ;;  %v6356_v56 = vld [vmem:[%s13016_s5 + $0x11c0] sm:$0xff]  ;;  %v6353_v54 = vld [vmem:[%s13016_s5 + $0x11a8] sm:$0xff] }
 0x487   :  { %3710 = vmatpush.msra.mxu2 %v6334_v61  ;;  %3757 = vmatpush.msrb.mxu0 %v6445_v39  ;;  %v6439_v61 = vld [vmem:[%s13016_s5 + $0x1458] sm:$0xff] }
 0x488   :  { %3832 = vmatpush.msra.mxu3 %v6359_v49  ;;  %v6442_v49 = vld [vmem:[%s13016_s5 + $0x1470] sm:$0xff]  ;;  %v6347_v39 = vld [vmem:[%s13016_s5 + $0x1178] sm:$0xff] }
 0x489   :  { %3711 = vmatpush.msra.mxu2 %v6331_v62  ;;  %3758 = vmatpush.msrb.mxu0 %v6442_v49  ;;  %v6436_v62 = vld [vmem:[%s13016_s5 + $0x1440] sm:$0xff]  ;;  %v6322_v49 = vld [vmem:[%s13016_s5 + $0x10b0] sm:$0xff] }
 0x48a   :  { %3833 = vmatpush.msra.mxu3 %v6356_v56  ;;  %v6328_v56 = vld [vmem:[%s13016_s5 + $0x10e0] sm:$0xff] }
 0x48b   :  { %3712 = vmatpush.msra.mxu2 %v6328_v56  ;;  %3759 = vmatpush.msrb.mxu0 %v6439_v61  ;;  %v6341_v56 = vld [vmem:[%s13016_s5 + $0x1148] sm:$0xff]  ;;  %v6319_v61 = vld [vmem:[%s13016_s5 + $0x1098] sm:$0xff] }
 0x48c   :  { %v10947_v17 = vpop.f32.mrf.mxu2  ;;  %3834 = vmatpush.msra.mxu3 %v6353_v54  ;;  %v6344_v54 = vld [vmem:[%s13016_s5 + $0x1160] sm:$0xff] }
 0x48d   :  { %13174 = vst [vmem:[#allocation48_spill] sm:$0xff] %v10947_v17  ;;  %v10966_v17 = vpop.f32.mrf.mxu1  ;;  %3760 = vmatpush.msrb.mxu0 %v6436_v62 }
 0x48f   :  { %v10881_v1 = vpop.f32.mrf.mxu0 }
 0x490   :  { %13172 = vst [vmem:[#allocation39_spill] sm:$0xff] %v10881_v1  ;;  %v6466_v1 = vld [vmem:[%s13016_s5 + $0x1530] sm:$0xff] }
 0x491   :  { %3792 = vmatpush.msrb.mxu1 %v6466_v1  ;;  %v6350_v1 = vld [vmem:[%s13016_s5 + $0x1190] sm:$0xff] }
 0x492   :  { %3835 = vmatpush.msra.mxu3 %v6350_v1  ;;  %v6433_v1 = vld [vmem:[%s13016_s5 + $0x1428] sm:$0xff] }
 0x493   :  { %3793 = vmatpush.msrb.mxu1 %v6463_v36  ;;  %v6325_v36 = vld [vmem:[%s13016_s5 + $0x10c8] sm:$0xff]  ;;  %3761 = vmatpush.msrb.mxu0 %v6433_v1 }
 0x494   :  { %3836 = vmatpush.msra.mxu3 %v6347_v39  ;;  %3713 = vmatpush.msra.mxu2 %v6325_v36  ;;  %v6430_v39 = vld [vmem:[%s13016_s5 + $0x1410] sm:$0xff] }
 0x495   :  { %3794 = vmatpush.msrb.mxu1 %v6460_v4  ;;  %v10977_v4 = vpop.f32.mrf.mxu3  ;;  %v6338_v36 = vld [vmem:[%s13016_s5 + $0x1130] sm:$0xff]  ;;  %3762 = vmatpush.msrb.mxu0 %v6430_v39 }
 0x496   :  { %13176 = vst [vmem:[#allocation35_spill] sm:$0xff] %v10977_v4  ;;  %3837 = vmatpush.msra.mxu3 %v6344_v54  ;;  %3714 = vmatpush.msra.mxu2 %v6322_v49  ;;  %v10994_v62 = vpop.f32.mrf.mxu2  ;;  %v6316_v54 = vld [vmem:[%s13016_s5 + $0x1080] sm:$0xff]  ;;  %v6427_v49 = vld [vmem:[%s13016_s5 + $0x13f8] sm:$0xff]  ;;  %v6306_v4 = vld [vmem:[%s13016_s5 + $0x1030] sm:$0xff] }
 0x497   :  { %13177 = vst [vmem:[#allocation52_spill] sm:$0xff] %v10994_v62  ;;  %3763 = vmatpush.msrb.mxu0 %v6427_v49  ;;  %v6332_v62 = vld [vmem:[%s13016_s5 + $0x1100] sm:$0xff]  ;;  %v6421_v49 = vld [vmem:[%s13016_s5 + $0x13c8] sm:$0xff] }
 0x498   :  { %3838 = vmatpush.msra.mxu3 %v6341_v56  ;;  %3715 = vmatpush.msra.mxu2 %v6319_v61  ;;  %v6314_v56 = vld [vmem:[%s13016_s5 + $0x1070] sm:$0xff]  ;;  %v6335_v61 = vld [vmem:[%s13016_s5 + $0x1118] sm:$0xff] }
 0x499   :  { %v10958_v57 = vpop.f32.mrf.mxu0 }
 0x49a   :  { %13175 = vst [vmem:[#allocation50_spill] sm:$0xff] %v10958_v57  ;;  %v11002_v1 = vpop.f32.mrf.mxu1  ;;  %3839 = vmatpush.msra.mxu3 %v6338_v36  ;;  %3716 = vmatpush.msra.mxu2 %v6316_v54  ;;  %v6424_v57 = vld [vmem:[%s13016_s5 + $0x13e0] sm:$0xff]  ;;  %v6311_v36 = vld [vmem:[%s13016_s5 + $0x1058] sm:$0xff] }
 0x49b   :  { %13178 = vst [vmem:[#allocation32_spill] sm:$0xff] %v11002_v1  ;;  %3764 = vmatpush.msrb.mxu0 %v6424_v57  ;;  %v6305_v57 = vld [vmem:[%s13016_s5 + $0x1028] sm:$0xff]  ;;  %v6455_v1 = vld [vmem:[%s13016_s5 + $0x14d8] sm:$0xff] }
 0x49c   :  { %3805 = vmatpush.msrb.mxu2 %v6314_v56  ;;  %3840 = vmatpush.msra.mxu3 %v6335_v61  ;;  %v6308_v56 = vld [vmem:[%s13016_s5 + $0x1040] sm:$0xff]  ;;  %v6418_v61 = vld [vmem:[%s13016_s5 + $0x13b0] sm:$0xff] }
 0x49d   :  { %v11018_v54 = vpop.f32.mrf.mxu3  ;;  %3765 = vmatpush.msrb.mxu0 %v6421_v49  ;;  %v6415_v49 = vld [vmem:[%s13016_s5 + $0x1398] sm:$0xff] }
 0x49e   :  { %13180 = vst [vmem:[#allocation49_spill] sm:$0xff] %v11018_v54  ;;  %3806 = vmatpush.msrb.mxu2 %v6311_v36  ;;  %3841 = vmatpush.msra.mxu3 %v6332_v62  ;;  %v6326_v62 = vld [vmem:[%s13016_s5 + $0x10d0] sm:$0xff]  ;;  %v6323_v54 = vld [vmem:[%s13016_s5 + $0x10b8] sm:$0xff] }
 0x49f   :  { %3766 = vmatpush.msrb.mxu0 %v6418_v61  ;;  %v6412_v61 = vld [vmem:[%s13016_s5 + $0x1380] sm:$0xff] }
 0x4a0   :  { %3807 = vmatpush.msrb.mxu2 %v6308_v56  ;;  %v6458_v56 = vld [vmem:[%s13016_s5 + $0x14f0] sm:$0xff] }
 0x4a1   :  { %3767 = vmatpush.msrb.mxu0 %v6415_v49  ;;  %v6320_v49 = vld [vmem:[%s13016_s5 + $0x10a0] sm:$0xff] }
 0x4a2   :  { %3808 = vmatpush.msrb.mxu2 %v6305_v57  ;;  %v6299_v57 = vld [vmem:[%s13016_s5 + $0xff8] sm:$0xff] }
 0x4a3   :  { %v11010_v39 = vpop.f32.mrf.mxu0  ;;  %3768 = vmatpush.msrb.mxu0 %v6412_v61  ;;  %v6293_v61 = vld [vmem:[%s13016_s5 + $0xfc8] sm:$0xff] }
 0x4a4   :  { %13179 = vst [vmem:[#allocation51_spill] sm:$0xff] %v11010_v39  ;;  %v6329_v39 = vld [vmem:[%s13016_s5 + $0x10e8] sm:$0xff] }
 0x4a5   :  { %3842 = vmatpush.msra.mxu3 %v6329_v39  ;;  %v6302_v39 = vld [vmem:[%s13016_s5 + $0x1010] sm:$0xff] }
 0x4a6   :  { %3809 = vmatpush.msrb.mxu2 %v6302_v39  ;;  %v6410_v39 = vld [vmem:[%s13016_s5 + $0x1370] sm:$0xff]  ;;  %v11078_v46 = vpop.f32.mrf.mxu3 }
 0x4a7   :  { %3843 = vmatpush.msra.mxu3 %v6326_v62  ;;  %v11063_v62 = vpop.f32.mrf.mxu1  ;;  %13183 = vst [vmem:[#allocation45_spill] sm:$0xff] %v11078_v46  ;;  %3857 = vmatpush.msra.mxu0 %v6410_v39  ;;  %v6401_v39 = vld [vmem:[%s13016_s5 + $0x1328] sm:$0xff] }
 0x4a8   :  { %13182 = vst [vmem:[#allocation47_spill] sm:$0xff] %v11063_v62  ;;  %3810 = vmatpush.msrb.mxu2 %v6299_v57  ;;  %v6449_v57 = vld [vmem:[%s13016_s5 + $0x14a8] sm:$0xff] }
 0x4a9   :  { %v11041_v36 = vpop.f32.mrf.mxu2  ;;  %3844 = vmatpush.msra.mxu3 %v6323_v54  ;;  %v6296_v54 = vld [vmem:[%s13016_s5 + $0xfe0] sm:$0xff] }
 0x4aa   :  { %13181 = vst [vmem:[#allocation53_spill] sm:$0xff] %v11041_v36  ;;  %3811 = vmatpush.msrb.mxu2 %v6296_v54 }
 0x4ab   :  { %v11055_v36 = vpop.f32.mrf.mxu0  ;;  %3845 = vmatpush.msra.mxu3 %v6320_v49  ;;  %v6404_v49 = vld [vmem:[%s13016_s5 + $0x1340] sm:$0xff] }
 0x4ac   :  { %3691 = vmatmul.f32.vlgmr.msra.gmra.mxu1 %v11055_v36  ;;  %3812 = vmatpush.msrb.mxu2 %v6293_v61  ;;  %v6443_v61 = vld [vmem:[%s13016_s5 + $0x1478] sm:$0xff] }
 0x4ad   :  { %3883 = vmatpush.msra.mxu1 %v6458_v56  ;;  %v6407_v56 = vld [vmem:[%s13016_s5 + $0x1358] sm:$0xff]  ;;  %3846 = vmatpush.msra.mxu3 %v6317_v53  ;;  %v6446_v53 = vld [vmem:[%s13016_s5 + $0x1490] sm:$0xff] }
 0x4ae   :  { %3858 = vmatpush.msra.mxu0 %v6407_v56  ;;  %v6398_v56 = vld [vmem:[%s13016_s5 + $0x1310] sm:$0xff] }
 0x4af   :  { %3884 = vmatpush.msra.mxu1 %v6455_v1  ;;  %v6290_v1 = vld [vmem:[%s13016_s5 + $0xfb0] sm:$0xff] }
 0x4b0   :  { %3859 = vmatpush.msra.mxu0 %v6404_v49  ;;  %3813 = vmatpush.msrb.mxu2 %v6290_v1  ;;  %v6284_v49 = vld [vmem:[%s13016_s5 + $0xf80] sm:$0xff]  ;;  %v6395_v1 = vld [vmem:[%s13016_s5 + $0x12f8] sm:$0xff] }
 0x4b1   :  { %3885 = vmatpush.msra.mxu1 %v6452_v35  ;;  %v6287_v35 = vld [vmem:[%s13016_s5 + $0xf98] sm:$0xff] }
 0x4b2   :  { %v11098_v46 = vpop.f32.mrf.mxu2  ;;  %3860 = vmatpush.msra.mxu0 %v6401_v39  ;;  %3814 = vmatpush.msrb.mxu2 %v6287_v35  ;;  %v6281_v39 = vld [vmem:[%s13016_s5 + $0xf68] sm:$0xff] }
 0x4b3   :  { %13184 = vst [vmem:[#allocation21_spill] sm:$0xff] %v11098_v46  ;;  %3886 = vmatpush.msra.mxu1 %v6449_v57  ;;  %v11121_v57 = vpop.f32.mrf.mxu1  ;;  %v6440_v46 = vld [vmem:[%s13016_s5 + $0x1460] sm:$0xff]  ;;  %v6437_v35 = vld [vmem:[%s13016_s5 + $0x1448] sm:$0xff] }
 0x4b4   :  { %v11112_v54 = vpop.f32.mrf.mxu0  ;;  %13185 = vst [vmem:[#allocation22_spill] sm:$0xff] %v11121_v57  ;;  %3861 = vmatpush.msra.mxu0 %v6398_v56  ;;  %v11135_v57 = vpop.f32.mrf.mxu3  ;;  %3815 = vmatpush.msrb.mxu2 %v6284_v49  ;;  %v6278_v56 = vld [vmem:[%s13016_s5 + $0xf50] sm:$0xff] }
 0x4b5   :  { %3694 = vmatmul.f32.gmra.mxu1 %v11112_v54  ;;  %13186 = vst [vmem:[#allocation19_spill] sm:$0xff] %v11135_v57  ;;  %v6434_v49 = vld [vmem:[%s13016_s5 + $0x1430] sm:$0xff] }
 0x4b6   :  { %3887 = vmatpush.msra.mxu1 %v6446_v53  ;;  %v6392_v53 = vld [vmem:[%s13016_s5 + $0x12e0] sm:$0xff]  ;;  %3862 = vmatpush.msra.mxu0 %v6395_v1  ;;  %v6275_v1 = vld [vmem:[%s13016_s5 + $0xf38] sm:$0xff] }
 0x4b7   :  { %3816 = vmatpush.msrb.mxu2 %v6281_v39  ;;  %v6431_v39 = vld [vmem:[%s13016_s5 + $0x1418] sm:$0xff] }
 0x4b8   :  { %3888 = vmatpush.msra.mxu1 %v6443_v61  ;;  %v6389_v61 = vld [vmem:[%s13016_s5 + $0x12c8] sm:$0xff]  ;;  %3863 = vmatpush.msra.mxu0 %v6392_v53 }
 0x4b9   :  { %3817 = vmatpush.msrb.mxu2 %v6278_v56  ;;  %v6383_v56 = vld [vmem:[%s13016_s5 + $0x1298] sm:$0xff] }
 0x4ba   :  { %v11146_v62 = vpop.f32.mrf.mxu2  ;;  %3889 = vmatpush.msra.mxu1 %v6440_v46  ;;  %v6386_v46 = vld [vmem:[%s13016_s5 + $0x12b0] sm:$0xff]  ;;  %3864 = vmatpush.msra.mxu0 %v6389_v61  ;;  %v6269_v61 = vld [vmem:[%s13016_s5 + $0xf08] sm:$0xff] }
 0x4bb   :  { %13187 = vst [vmem:[#allocation20_spill] sm:$0xff] %v11146_v62  ;;  %3818 = vmatpush.msrb.mxu2 %v6275_v1  ;;  %v6428_v62 = vld [vmem:[%s13016_s5 + $0x1400] sm:$0xff]  ;;  %v6425_v1 = vld [vmem:[%s13016_s5 + $0x13e8] sm:$0xff] }
 0x4bc   :  { %v11157_v57 = vpop.f32.mrf.mxu0  ;;  %3890 = vmatpush.msra.mxu1 %v6437_v35  ;;  %v6272_v35 = vld [vmem:[%s13016_s5 + $0xf20] sm:$0xff]  ;;  %3865 = vmatpush.msra.mxu0 %v6386_v46  ;;  %v6315_v46 = vld [vmem:[%s13016_s5 + $0x1078] sm:$0xff] }
 0x4bd   :  { %3697 = vmatmul.f32.gmra.mxu1 %v11157_v57  ;;  %3819 = vmatpush.msrb.mxu2 %v6272_v35  ;;  %v6422_v35 = vld [vmem:[%s13016_s5 + $0x13d0] sm:$0xff] }
 0x4be   :  { %v11166_v53 = vpop.f32.mrf.mxu1  ;;  %3891 = vmatpush.msra.mxu1 %v6434_v49  ;;  %v6380_v49 = vld [vmem:[%s13016_s5 + $0x1280] sm:$0xff]  ;;  %3866 = vmatpush.msra.mxu0 %v6383_v56 }
 0x4bf   :  { %13188 = vst [vmem:[#allocation23_spill] sm:$0xff] %v11166_v53  ;;  %3820 = vmatpush.msrb.mxu2 %v6269_v61  ;;  %v6419_v61 = vld [vmem:[%s13016_s5 + $0x13b8] sm:$0xff] }
 0x4c0   :  { %v11180_v53 = vpop.f32.mrf.mxu3  ;;  %3892 = vmatpush.msra.mxu1 %v6431_v39  ;;  %v6377_v39 = vld [vmem:[%s13016_s5 + $0x1268] sm:$0xff]  ;;  %3867 = vmatpush.msra.mxu0 %v6380_v49 }
 0x4c1   :  { %13189 = vst [vmem:[#allocation24_spill] sm:$0xff] %v11180_v53  ;;  %v6312_v53 = vld [vmem:[%s13016_s5 + $0x1060] sm:$0xff] }
 0x4c2   :  { %v11191_v59 = vpop.f32.mrf.mxu2  ;;  %3893 = vmatpush.msra.mxu1 %v6428_v62  ;;  %v6374_v62 = vld [vmem:[%s13016_s5 + $0x1250] sm:$0xff]  ;;  %3868 = vmatpush.msra.mxu0 %v6377_v39  ;;  %v6413_v39 = vld [vmem:[%s13016_s5 + $0x1388] sm:$0xff] }
 0x4c3   :  { %3743 = vmatmul.f32.vlgmr.msrb.gmra.mxu3 %v11191_v59 }
 0x4c4   :  { %v11203_v56 = vpop.f32.mrf.mxu0  ;;  %3894 = vmatpush.msra.mxu1 %v6425_v1  ;;  %3935 = vmatpush.msrb.mxu3 %v6315_v46  ;;  %v6371_v1 = vld [vmem:[%s13016_s5 + $0x1238] sm:$0xff]  ;;  %v6416_v46 = vld [vmem:[%s13016_s5 + $0x13a0] sm:$0xff] }
 0x4c5   :  { %3795 = vmatmul.f32.vlgmr.msrb.gmra.mxu1 %v11203_v56  ;;  %3869 = vmatpush.msra.mxu0 %v6374_v62  ;;  %v6411_v62 = vld [vmem:[%s13016_s5 + $0x1378] sm:$0xff] }
 0x4c6   :  { %v11215_v49 = vpop.f32.mrf.mxu1  ;;  %3895 = vmatpush.msra.mxu1 %v6422_v35  ;;  %3936 = vmatpush.msrb.mxu3 %v6312_v53  ;;  %v6368_v53 = vld [vmem:[%s13016_s5 + $0x1220] sm:$0xff]  ;;  %v6303_v35 = vld [vmem:[%s13016_s5 + $0x1018] sm:$0xff] }
 0x4c7   :  { %13190 = vst [vmem:[#allocation60_spill] sm:$0xff] %v11215_v49  ;;  %3870 = vmatpush.msra.mxu0 %v6371_v1 }
 0x4c8   :  { %v11226_v13 = vpop.f32.mrf.mxu3  ;;  %3896 = vmatpush.msra.mxu1 %v6419_v61  ;;  %3937 = vmatpush.msrb.mxu3 %v6309_v11  ;;  %v6365_v11 = vld [vmem:[%s13016_s5 + $0x1208] sm:$0xff]  ;;  %v6300_v61 = vld [vmem:[%s13016_s5 + $0x1000] sm:$0xff] }
 0x4c9   :  { %13191 = vst [vmem:[#allocation17_spill] sm:$0xff] %v11226_v13  ;;  %3871 = vmatpush.msra.mxu0 %v6368_v53  ;;  %v6405_v53 = vld [vmem:[%s13016_s5 + $0x1348] sm:$0xff] }
 0x4ca   :  { %v11237_v49 = vpop.f32.mrf.mxu2  ;;  %3897 = vmatpush.msra.mxu1 %v6416_v46  ;;  %3938 = vmatpush.msrb.mxu3 %v6306_v4  ;;  %v6408_v4 = vld [vmem:[%s13016_s5 + $0x1360] sm:$0xff]  ;;  %v6297_v46 = vld [vmem:[%s13016_s5 + $0xfe8] sm:$0xff] }
 0x4cb   :  { %3746 = vmatmul.f32.gmra.mxu3 %v11237_v49  ;;  %3872 = vmatpush.msra.mxu0 %v6365_v11  ;;  %v6402_v11 = vld [vmem:[%s13016_s5 + $0x1330] sm:$0xff] }
 0x4cc   :  { %v11249_v1 = vpop.f32.mrf.mxu0  ;;  %3898 = vmatpush.msra.mxu1 %v6413_v39  ;;  %3939 = vmatpush.msrb.mxu3 %v6303_v35  ;;  %v6294_v39 = vld [vmem:[%s13016_s5 + $0xfd0] sm:$0xff] }
 0x4cd   :  { %3798 = vmatmul.f32.gmra.mxu1 %v11249_v1 }
 0x4ce   :  { %v11258_v13 = vpop.f32.mrf.mxu1  ;;  %3987 = vmatpush.msrb.mxu1 %v6411_v62  ;;  %3940 = vmatpush.msrb.mxu3 %v6300_v61  ;;  %v6291_v62 = vld [vmem:[%s13016_s5 + $0xfb8] sm:$0xff] }
 0x4cf   :  { %13192 = vst [vmem:[#allocation18_spill] sm:$0xff] %v11258_v13 }
 0x4d0   :  { %v11266_v35 = vpop.f32.mrf.mxu3  ;;  %3988 = vmatpush.msrb.mxu1 %v6408_v4  ;;  %3941 = vmatpush.msrb.mxu3 %v6297_v46  ;;  %v6288_v4 = vld [vmem:[%s13016_s5 + $0xfa0] sm:$0xff] }
 0x4d1   :  { %13193 = vst [vmem:[#allocation58_spill] sm:$0xff] %v11266_v35  ;;  %v6399_v35 = vld [vmem:[%s13016_s5 + $0x1318] sm:$0xff] }
 0x4d2   :  { %v11274_v61 = vpop.f32.mrf.mxu2  ;;  %3989 = vmatpush.msrb.mxu1 %v6405_v53  ;;  %3942 = vmatpush.msrb.mxu3 %v6294_v39  ;;  %v6506_v53 = vld [vmem:[%s13016_s5 + $0x1670] sm:$0xff]  ;;  %v6396_v39 = vld [vmem:[%s13016_s5 + $0x1300] sm:$0xff] }
 0x4d3   :  { %3749 = vmatmul.f32.gmra.mxu3 %v11274_v61 }
 0x4d4   :  { %v11283_v46 = vpop.f32.mrf.mxu0  ;;  %3990 = vmatpush.msrb.mxu1 %v6402_v11  ;;  %3943 = vmatpush.msrb.mxu3 %v6291_v62  ;;  %v6503_v11 = vld [vmem:[%s13016_s5 + $0x1658] sm:$0xff]  ;;  %v6393_v62 = vld [vmem:[%s13016_s5 + $0x12e8] sm:$0xff] }
 0x4d5   :  { %3801 = vmatmul.f32.gmra.mxu1 %v11283_v46 }
 0x4d6   :  { %v11292_v13 = vpop.f32.mrf.mxu1  ;;  %3991 = vmatpush.msrb.mxu1 %v6399_v35  ;;  %3944 = vmatpush.msrb.mxu3 %v6288_v4  ;;  %v6363_v35 = vld [vmem:[%s13016_s5 + $0x11f8] sm:$0xff]  ;;  %v6500_v4 = vld [vmem:[%s13016_s5 + $0x1640] sm:$0xff] }
 0x4d7   :  { %3717 = vmatmul.f32.vlgmr.msra.gmra.mxu2 %v11292_v13 }
 0x4d8   :  { %v11304_v27 = vpop.f32.mrf.mxu3  ;;  %3909 = vmatpush.msra.mxu2 %v6506_v53  ;;  %3992 = vmatpush.msrb.mxu1 %v6396_v39  ;;  %v6360_v53 = vld [vmem:[%s13016_s5 + $0x11e0] sm:$0xff]  ;;  %v6497_v39 = vld [vmem:[%s13016_s5 + $0x1628] sm:$0xff] }
 0x4d9   :  { %3769 = vmatmul.f32.vlgmr.msrb.gmra.mxu0 %v11304_v27  ;;  %3945 = vmatpush.msrb.mxu3 %v6285_v16  ;;  %v6390_v16 = vld [vmem:[%s13016_s5 + $0x12d0] sm:$0xff] }
 0x4da   :  { %3910 = vmatpush.msra.mxu2 %v6503_v11  ;;  %3993 = vmatpush.msrb.mxu1 %v6393_v62  ;;  %v6279_v11 = vld [vmem:[%s13016_s5 + $0xf58] sm:$0xff] }
 0x4db   :  { %3847 = vmatmul.f32.vlgmr.msra.gmra.mxu3 %v11292_v13  ;;  %3961 = vmatpush.msrb.mxu0 %v6363_v35  ;;  %v6387_v62 = vld [vmem:[%s13016_s5 + $0x12b8] sm:$0xff]  ;;  %v6384_v35 = vld [vmem:[%s13016_s5 + $0x12a0] sm:$0xff] }
 0x4dc   :  { %3911 = vmatpush.msra.mxu2 %v6500_v4  ;;  %3946 = vmatpush.msrb.mxu3 %v6282_v23  ;;  %v6276_v23 = vld [vmem:[%s13016_s5 + $0xf40] sm:$0xff]  ;;  %v6491_v4 = vld [vmem:[%s13016_s5 + $0x15f8] sm:$0xff] }
 0x4dd   :  { %3899 = vmatmul.f32.vlgmr.msra.gmra.mxu1 %v11304_v27  ;;  %3962 = vmatpush.msrb.mxu0 %v6360_v53 }
 0x4de   :  { %v11336_v22 = vpop.f32.mrf.mxu1  ;;  %3994 = vmatpush.msrb.mxu1 %v6390_v16  ;;  %3912 = vmatpush.msra.mxu2 %v6497_v39  ;;  %v6357_v16 = vld [vmem:[%s13016_s5 + $0x11c8] sm:$0xff] }
 0x4df   :  { %3720 = vmatmul.f32.gmra.mxu2 %v11336_v22  ;;  %3947 = vmatpush.msrb.mxu3 %v6279_v11  ;;  %v6273_v39 = vld [vmem:[%s13016_s5 + $0xf28] sm:$0xff] }
 0x4e0   :  { %v11348_v53 = vpop.f32.mrf.mxu3  ;;  %3995 = vmatpush.msrb.mxu1 %v6387_v62  ;;  %3913 = vmatpush.msra.mxu2 %v6494_v18  ;;  %v6381_v11 = vld [vmem:[%s13016_s5 + $0x1288] sm:$0xff]  ;;  %v6488_v18 = vld [vmem:[%s13016_s5 + $0x15e0] sm:$0xff]  ;;  %v6270_v62 = vld [vmem:[%s13016_s5 + $0xf10] sm:$0xff] }
 0x4e1   :  { %3772 = vmatmul.f32.gmra.mxu0 %v11348_v53  ;;  %3948 = vmatpush.msrb.mxu3 %v6276_v23  ;;  %v6378_v23 = vld [vmem:[%s13016_s5 + $0x1270] sm:$0xff] }
 0x4e2   :  { %3996 = vmatpush.msrb.mxu1 %v6384_v35  ;;  %3914 = vmatpush.msra.mxu2 %v6491_v4  ;;  %v6507_v35 = vld [vmem:[%s13016_s5 + $0x1678] sm:$0xff]  ;;  %v6485_v4 = vld [vmem:[%s13016_s5 + $0x15c8] sm:$0xff] }
 0x4e3   :  { %3850 = vmatmul.f32.gmra.mxu3 %v11336_v22  ;;  %3963 = vmatpush.msrb.mxu0 %v6357_v16  ;;  %v6504_v16 = vld [vmem:[%s13016_s5 + $0x1660] sm:$0xff] }
 0x4e4   :  { %3949 = vmatpush.msrb.mxu3 %v6273_v39  ;;  %3997 = vmatpush.msrb.mxu1 %v6381_v11  ;;  %v6482_v39 = vld [vmem:[%s13016_s5 + $0x15b0] sm:$0xff] }
 0x4e5   :  { %3902 = vmatmul.f32.gmra.mxu1 %v11348_v53  ;;  %3915 = vmatpush.msra.mxu2 %v6488_v18  ;;  %v6354_v11 = vld [vmem:[%s13016_s5 + $0x11b0] sm:$0xff] }
 0x4e6   :  { %v11380_v9 = vpop.f32.mrf.mxu1  ;;  %3950 = vmatpush.msrb.mxu3 %v6270_v62  ;;  %3998 = vmatpush.msrb.mxu1 %v6378_v23  ;;  %v6372_v62 = vld [vmem:[%s13016_s5 + $0x1240] sm:$0xff]  ;;  %v6501_v23 = vld [vmem:[%s13016_s5 + $0x1648] sm:$0xff] }
 0x4e7   :  { %3723 = vmatmul.f32.gmra.mxu2 %v11380_v9  ;;  %3964 = vmatpush.msrb.mxu0 %v6354_v11  ;;  %v6476_v11 = vld [vmem:[%s13016_s5 + $0x1580] sm:$0xff] }
 0x4e8   :  { %4039 = vmatpush.msra.mxu3 %v6507_v35  ;;  %v11392_v18 = vpop.f32.mrf.mxu3  ;;  %3916 = vmatpush.msra.mxu2 %v6485_v4  ;;  %v6479_v35 = vld [vmem:[%s13016_s5 + $0x1598] sm:$0xff]  ;;  %v6369_v4 = vld [vmem:[%s13016_s5 + $0x1228] sm:$0xff] }
 0x4e9   :  { %3999 = vmatpush.msrb.mxu1 %v6375_v2  ;;  %3775 = vmatmul.f32.gmra.mxu0 %v11392_v18  ;;  %v6351_v2 = vld [vmem:[%s13016_s5 + $0x1198] sm:$0xff] }
 0x4ea   :  { %4040 = vmatpush.msra.mxu3 %v6504_v16  ;;  %3917 = vmatpush.msra.mxu2 %v6482_v39  ;;  %v6498_v16 = vld [vmem:[%s13016_s5 + $0x1630] sm:$0xff]  ;;  %v6348_v39 = vld [vmem:[%s13016_s5 + $0x1180] sm:$0xff] }
 0x4eb   :  { %3853 = vmatmul.f32.gmra.mxu3 %v11380_v9  ;;  %4000 = vmatpush.msrb.mxu1 %v6372_v62  ;;  %v6366_v62 = vld [vmem:[%s13016_s5 + $0x1210] sm:$0xff] }
 0x4ec   :  { %4041 = vmatpush.msra.mxu3 %v6501_v23  ;;  %3918 = vmatpush.msra.mxu2 %v6479_v35  ;;  %v6495_v23 = vld [vmem:[%s13016_s5 + $0x1618] sm:$0xff]  ;;  %v6473_v35 = vld [vmem:[%s13016_s5 + $0x1568] sm:$0xff] }
 0x4ed   :  { %3905 = vmatmul.f32.gmra.mxu1 %v11392_v18  ;;  %3965 = vmatpush.msrb.mxu0 %v6351_v2  ;;  %v6345_v2 = vld [vmem:[%s13016_s5 + $0x1168] sm:$0xff] }
 0x4ee   :  { %4001 = vmatpush.msrb.mxu1 %v6369_v4  ;;  %4042 = vmatpush.msra.mxu3 %v6498_v16  ;;  %v6492_v4 = vld [vmem:[%s13016_s5 + $0x1600] sm:$0xff]  ;;  %v6470_v16 = vld [vmem:[%s13016_s5 + $0x1550] sm:$0xff] }
 0x4ef   :  { %3821 = vmatmul.f32.vlgmr.msrb.gmra.mxu2 %v11055_v36  ;;  %3966 = vmatpush.msrb.mxu0 %v6348_v39  ;;  %v6342_v39 = vld [vmem:[%s13016_s5 + $0x1150] sm:$0xff] }
 0x4f0   :  { %3919 = vmatpush.msra.mxu2 %v6476_v11  ;;  %4002 = vmatpush.msrb.mxu1 %v6366_v62  ;;  %v6489_v11 = vld [vmem:[%s13016_s5 + $0x15e8] sm:$0xff]  ;;  %v6467_v62 = vld [vmem:[%s13016_s5 + $0x1538] sm:$0xff] }
 0x4f1   :  { %3873 = vmatmul.f32.vlgmr.msra.gmra.mxu0 %v11191_v59  ;;  %4043 = vmatpush.msra.mxu3 %v6495_v23  ;;  %v6339_v23 = vld [vmem:[%s13016_s5 + $0x1138] sm:$0xff] }
 0x4f2   :  { %3920 = vmatpush.msra.mxu2 %v6473_v35  ;;  %3967 = vmatpush.msrb.mxu0 %v6345_v2  ;;  %v6464_v35 = vld [vmem:[%s13016_s5 + $0x1520] sm:$0xff] }
 0x4f3   :  { %3951 = vmatmul.f32.vlgmr.msrb.gmra.mxu3 %v11055_v36  ;;  %v6486_v36 = vld [vmem:[%s13016_s5 + $0x15d0] sm:$0xff]  ;;  %v6336_v2 = vld [vmem:[%s13016_s5 + $0x1120] sm:$0xff] }
 0x4f4   :  { %4044 = vmatpush.msra.mxu3 %v6492_v4  ;;  %3921 = vmatpush.msra.mxu2 %v6470_v16  ;;  %v6461_v4 = vld [vmem:[%s13016_s5 + $0x1508] sm:$0xff] }
 0x4f5   :  { %4003 = vmatmul.f32.vlgmr.msrb.gmra.mxu1 %v11191_v59  ;;  %3968 = vmatpush.msrb.mxu0 %v6342_v39  ;;  %v6483_v59 = vld [vmem:[%s13016_s5 + $0x15b8] sm:$0xff]  ;;  %v6333_v16 = vld [vmem:[%s13016_s5 + $0x1108] sm:$0xff] }
 0x4f6   :  { %4045 = vmatpush.msra.mxu3 %v6489_v11  ;;  %3922 = vmatpush.msra.mxu2 %v6467_v62  ;;  %v6459_v39 = vld [vmem:[%s13016_s5 + $0x14f8] sm:$0xff]  ;;  %v6480_v11 = vld [vmem:[%s13016_s5 + $0x15a0] sm:$0xff]  ;;  %v6330_v62 = vld [vmem:[%s13016_s5 + $0x10f0] sm:$0xff] }
 0x4f7   :  { %3824 = vmatmul.f32.gmra.mxu2 %v11112_v54  ;;  %3969 = vmatpush.msrb.mxu0 %v6339_v23  ;;  %v6456_v23 = vld [vmem:[%s13016_s5 + $0x14e0] sm:$0xff] }
 0x4f8   :  { %4046 = vmatpush.msra.mxu3 %v6486_v36  ;;  %3923 = vmatpush.msra.mxu2 %v6464_v35  ;;  %v6477_v36 = vld [vmem:[%s13016_s5 + $0x1588] sm:$0xff] }
 0x4f9   :  { %3876 = vmatmul.f32.gmra.mxu0 %v11237_v49  ;;  %v6453_v35 = vld [vmem:[%s13016_s5 + $0x14c8] sm:$0xff] }
 0x4fa   :  { %3970 = vmatpush.msrb.mxu0 %v6336_v2  ;;  %4047 = vmatpush.msra.mxu3 %v6483_v59  ;;  %v6474_v2 = vld [vmem:[%s13016_s5 + $0x1570] sm:$0xff] }
 0x4fb   :  { %3954 = vmatmul.f32.gmra.mxu3 %v11112_v54  ;;  %3924 = vmatpush.msra.mxu2 %v6461_v4  ;;  %v6327_v54 = vld [vmem:[%s13016_s5 + $0x10d8] sm:$0xff]  ;;  %v6450_v59 = vld [vmem:[%s13016_s5 + $0x14b0] sm:$0xff] }
 0x4fc   :  { %3971 = vmatpush.msrb.mxu0 %v6333_v16  ;;  %4048 = vmatpush.msra.mxu3 %v6480_v11  ;;  %v6471_v4 = vld [vmem:[%s13016_s5 + $0x1558] sm:$0xff]  ;;  %v6321_v16 = vld [vmem:[%s13016_s5 + $0x10a8] sm:$0xff]  ;;  %v6468_v11 = vld [vmem:[%s13016_s5 + $0x1540] sm:$0xff] }
 0x4fd   :  { %4013 = vmatpush.msrb.mxu2 %v6459_v39  ;;  %4006 = vmatmul.f32.gmra.mxu1 %v11237_v49  ;;  %v6324_v49 = vld [vmem:[%s13016_s5 + $0x10c0] sm:$0xff]  ;;  %v6447_v39 = vld [vmem:[%s13016_s5 + $0x1498] sm:$0xff] }
 0x4fe   :  { %3972 = vmatpush.msrb.mxu0 %v6330_v62  ;;  %4049 = vmatpush.msra.mxu3 %v6477_v36  ;;  %v6318_v62 = vld [vmem:[%s13016_s5 + $0x1090] sm:$0xff]  ;;  %v6441_v36 = vld [vmem:[%s13016_s5 + $0x1468] sm:$0xff] }
 0x4ff   :  { %4014 = vmatpush.msrb.mxu2 %v6456_v23  ;;  %v6444_v23 = vld [vmem:[%s13016_s5 + $0x1480] sm:$0xff] }
 0x500   :  { %3827 = vmatmul.f32.gmra.mxu2 %v11157_v57  ;;  %3973 = vmatpush.msrb.mxu0 %v6327_v54  ;;  %v6438_v54 = vld [vmem:[%s13016_s5 + $0x1450] sm:$0xff] }
 0x501   :  { %4015 = vmatpush.msrb.mxu2 %v6453_v35  ;;  %3879 = vmatmul.f32.gmra.mxu0 %v11274_v61  ;;  %v6435_v35 = vld [vmem:[%s13016_s5 + $0x1438] sm:$0xff] }
 0x502   :  { %4050 = vmatpush.msra.mxu3 %v6474_v2  ;;  %3974 = vmatpush.msrb.mxu0 %v6324_v49  ;;  %v6432_v2 = vld [vmem:[%s13016_s5 + $0x1420] sm:$0xff]  ;;  %v6423_v49 = vld [vmem:[%s13016_s5 + $0x13d8] sm:$0xff] }
 0x503   :  { %4016 = vmatpush.msrb.mxu2 %v6450_v59  ;;  %3957 = vmatmul.f32.gmra.mxu3 %v11157_v57  ;;  %v6465_v57 = vld [vmem:[%s13016_s5 + $0x1528] sm:$0xff]  ;;  %v6420_v59 = vld [vmem:[%s13016_s5 + $0x13c0] sm:$0xff] }
 0x504   :  { %4051 = vmatpush.msra.mxu3 %v6471_v4  ;;  %3975 = vmatpush.msrb.mxu0 %v6321_v16 }
 0x505   :  { %4009 = vmatmul.f32.gmra.mxu1 %v11274_v61  ;;  %4017 = vmatpush.msrb.mxu2 %v6447_v39  ;;  %v6462_v61 = vld [vmem:[%s13016_s5 + $0x1510] sm:$0xff] }
 0x506   :  { %4052 = vmatpush.msra.mxu3 %v6468_v11  ;;  %3976 = vmatpush.msrb.mxu0 %v6318_v62 }
 0x507   :  { %4018 = vmatpush.msrb.mxu2 %v6444_v23  ;;  %v2555_v23 = vadd.f32 %v10240_v41, %v10092_v58 }
 0x508   :  { %3925 = vmatmul.f32.vlgmr.msra.gmra.mxu2 %v11203_v56  ;;  %4053 = vmatpush.msra.mxu3 %v6465_v57 }
 0x509   :  { %3977 = vmatmul.f32.vlgmr.msrb.gmra.mxu0 %v11292_v13  ;;  %4019 = vmatpush.msrb.mxu2 %v6441_v36  ;;  %v6429_v13 = vld [vmem:[%s13016_s5 + $0x1408] sm:$0xff] }
 0x50a   :  { %4054 = vmatpush.msra.mxu3 %v6462_v61 }
 0x50b   :  { %4055 = vmatmul.f32.vlgmr.msra.gmra.mxu3 %v11203_v56  ;;  %4020 = vmatpush.msrb.mxu2 %v6438_v54  ;;  %v6426_v56 = vld [vmem:[%s13016_s5 + $0x13f0] sm:$0xff] }
 0x50d   :  { %4021 = vmatpush.msrb.mxu2 %v6435_v35 }
 0x50f   :  { %4022 = vmatpush.msrb.mxu2 %v6432_v2 }
 0x510   :  { %3928 = vmatmul.f32.gmra.mxu2 %v11249_v1 }
 0x511   :  { %3980 = vmatmul.f32.gmra.mxu0 %v11336_v22  ;;  %4023 = vmatpush.msrb.mxu2 %v6429_v13  ;;  %v6417_v22 = vld [vmem:[%s13016_s5 + $0x13a8] sm:$0xff] }
 0x513   :  { %4058 = vmatmul.f32.gmra.mxu3 %v11249_v1  ;;  %4024 = vmatpush.msrb.mxu2 %v6426_v56  ;;  %v6414_v1 = vld [vmem:[%s13016_s5 + $0x1390] sm:$0xff] }
 0x515   :  { %4025 = vmatpush.msrb.mxu2 %v6423_v49 }
 0x517   :  { %4026 = vmatpush.msrb.mxu2 %v6420_v59 }
 0x518   :  { %3931 = vmatmul.f32.gmra.mxu2 %v11283_v46 }
 0x519   :  { %3983 = vmatmul.f32.gmra.mxu0 %v11380_v9  ;;  %4027 = vmatpush.msrb.mxu2 %v6417_v22  ;;  %v2558_v9 = vadd.f32 %v10297_v34, %v10151_v6 }
 0x51b   :  { %4061 = vmatmul.f32.gmra.mxu3 %v11283_v46  ;;  %4028 = vmatpush.msrb.mxu2 %v6414_v1  ;;  %v2561_v46 = vadd.f32 %v10358_v7, %v10209_v20 }
 0x51d   :  { %v2587_v54 = vadd.f32 %v10232_v5, %v2561_v46 }
 0x51f   :  { %v2613_v34 = vadd.f32 %v10500_v30, %v2587_v54 }
 0x520   :  { %4029 = vmatmul.f32.vlgmr.msrb.gmra.mxu2 %v11304_v27  ;;  %v2584_v27 = vadd.f32 %v10176_v29, %v2558_v9 }
 0x521   :  { %v2639_v41 = vadd.f32 %v10388_v10, %v2613_v34 }
 0x522   :  { %v2610_v61 = vadd.f32 %v10449_v28, %v2584_v27 }
 0x523   :  { %v2925_v28 = vadd.f32 %v10796_v3, %v2639_v41 }
 0x524   :  { %v2636_v58 = vadd.f32 %v10328_v52, %v2610_v61 }
 0x526   :  { %v2922_v29 = vadd.f32 %v10776_v19, %v2636_v58  ;;  %v2951_v19 = vadd.f32 %v10734_v60, %v2925_v28  ;;  %v11630_v58 = vld [vmem:[%s13018_s7 + $0x10] sm:$0xff] }
 0x528   :  { %4032 = vmatmul.f32.gmra.mxu2 %v11348_v53  ;;  %v2581_v53 = vadd.f32 %v10121_v21, %v2555_v23  ;;  %v2948_v30 = vadd.f32 %v10707_v38, %v2922_v29  ;;  %v2977_v22 = vadd.f32 %v10824_v43, %v2951_v19  ;;  %v11610_v43 = vld [vmem:[%s13017_s6] sm:$0x7]  ;;  %v2688_v29 = vadd.f32 %v10350_v33, %v10468_v15 }
 0x529   :  { %v3692_v4 = vpop.f32.mrf.mxu1  ;;  %v13196_v19 = vld [vmem:[#allocation37_spill] sm:$0xff] }
 0x52a   :  { %v2607_v35 = vadd.f32 %v10397_v40, %v2581_v53  ;;  %v2974_v10 = vadd.f32 %v10786_v37, %v2948_v30  ;;  %v3003_v37 = vadd.f32 %v10743_v47, %v2977_v22 }
 0x52c   :  { %v2633_v20 = vadd.f32 %v10270_v45, %v2607_v35 }
 0x52e   :  { %v2919_v21 = vadd.f32 %v10739_v51, %v2633_v20 }
 0x530   :  { %4035 = vmatmul.f32.gmra.mxu2 %v11392_v18  ;;  %v2945_v52 = vadd.f32 %v10676_v8, %v2919_v21  ;;  %v13194_v21 = vld [vmem:[#allocation33_spill] sm:$0xff] }
 0x532   :  { %v3695_v39 = vpop.f32.mrf.mxu1  ;;  %v2971_v59 = vadd.f32 %v10745_v26, %v2945_v52 }
 0x534   :  { %v2997_v8 = vadd.f32 %v10690_v44, %v2971_v59  ;;  %v13198_v59 = vld [vmem:[#allocation6_spill] sm:$0xff] }
 0x53a   :  { %v3698_v62 = vpop.f32.mrf.mxu1 }
 0x542   :  { %v3796_v6 = vpop.f32.mrf.mxu1 }
 0x546   :  { %v3744_v16 = vpop.f32.mrf.mxu3 }
 0x54a   :  { %v3799_v45 = vpop.f32.mrf.mxu1 }
 0x54e   :  { %v3747_v11 = vpop.f32.mrf.mxu3 }
 0x552   :  { %v3802_v26 = vpop.f32.mrf.mxu1 }
 0x556   :  { %v3770_v57 = vpop.f32.mrf.mxu0  ;;  %v3750_v18 = vpop.f32.mrf.mxu3 }
 0x55a   :  { %v3718_v36 = vpop.f32.mrf.mxu2  ;;  %v3900_v20 = vpop.f32.mrf.mxu1 }
 0x55b   :  { %v3719_v2 = vadd.f32 %v3718_v36, %v3692_v4 }
 0x55d   :  { %v3745_v49 = vadd.f32 %v3744_v16, %v3719_v2 }
 0x55e   :  { %v3773_v5 = vpop.f32.mrf.mxu0  ;;  %v11595_v40 = vpop.f32.mrf.mxu3 }
 0x55f   :  { %v3771_v1 = vadd.f32 %v3770_v57, %v3745_v49 }
 0x561   :  { %v3797_v16 = vadd.f32 %v3796_v6, %v3771_v1  ;;  %v13199_v1 = vld [vmem:[#allocation11_spill] sm:$0xff] }
 0x562   :  { %v3721_v7 = vpop.f32.mrf.mxu2  ;;  %v3903_v52 = vpop.f32.mrf.mxu1 }
 0x563   :  { %v3722_v13 = vadd.f32 %v3721_v7, %v3695_v39  ;;  %v3000_v39 = vadd.f32 %v10716_v50, %v2974_v10  ;;  %v3023_v50 = vadd.f32 %v10834_v31, %v2997_v8  ;;  %v2685_v7 = vadd.f32 %v13194_v21, %v10414_v48  ;;  %v13203_v8 = vld [vmem:[#allocation35_spill] sm:$0xff]  ;;  %v13210_v21 = vld [vmem:[#allocation32_spill] sm:$0xff] }
 0x565   :  { %v3748_v56 = vadd.f32 %v3747_v11, %v3722_v13  ;;  %v3026_v60 = vadd.f32 %v10892_v24, %v3000_v39  ;;  %v4076_v24 = vperm.slane %v11610_v43, 0  ;;  %v2714_v13 = vadd.f32 %v10594_v55, %v2688_v29  ;;  %v13195_v55 = vld [vmem:[#allocation28_spill] sm:$0xff]  ;;  %v13201_v39 = vld [vmem:[#allocation43_spill] sm:$0xff] }
 0x566   :  { %v3776_v11 = vpop.f32.mrf.mxu0  ;;  %v3851_v23 = vpop.f32.mrf.mxu3  ;;  %v2711_v30 = vadd.f32 %v10548_v25, %v2685_v7 }
 0x567   :  { %v3774_v51 = vadd.f32 %v3773_v5, %v3748_v56  ;;  %v2691_v5 = vadd.f32 %v10408_v14, %v10518_v42  ;;  %v11649_v56 = vld [vmem:[%s13018_s7 + $0x18] sm:$0x3]  ;;  %v2740_v48 = vadd.f32 %v10495_v12, %v2714_v13 }
 0x568   :  { %v2737_v15 = vadd.f32 %v10441_v63, %v2711_v30  ;;  %v13212_v30 = vld [vmem:[#allocation29_spill] sm:$0xff] }
 0x569   :  { %v3800_v38 = vadd.f32 %v3799_v45, %v3774_v51  ;;  %v2717_v33 = vadd.f32 %v10635_v32, %v2691_v5  ;;  %v2766_v25 = vadd.f32 %v13195_v55, %v2740_v48  ;;  %v13197_v51 = vld [vmem:[#allocation13_spill] sm:$0xff] }
 0x56a   :  { %v3724_v3 = vpop.f32.mrf.mxu2  ;;  %v2763_v49 = vadd.f32 %v13196_v19, %v2737_v15  ;;  %v13214_v15 = vld [vmem:[#allocation36_spill] sm:$0xff] }
 0x56b   :  { %v3725_v4 = vadd.f32 %v3724_v3, %v3698_v62  ;;  %v3029_v62 = vadd.f32 %v10966_v17, %v3003_v37  ;;  %v4068_v57 = vadd.f32 %v3800_v38, %v3026_v60  ;;  %v2743_v14 = vadd.f32 %v10541_v0, %v2717_v33  ;;  %v13213_v33 = vld [vmem:[#allocation7_spill] sm:$0xff] }
 0x56c   :  { %v3052_v32 = vadd.f32 %v13197_v51, %v2766_v25  ;;  %v3049_v12 = vadd.f32 %v13199_v1, %v2763_v49  ;;  %v2815_v48 = vadd.f32 %v13213_v33, %v13212_v30  ;;  %v13216_v25 = vld [vmem:[#allocation48_spill] sm:$0xff]  ;;  %v13217_v49 = vld [vmem:[#allocation38_spill] sm:$0xff]  ;;  %v13230_v33 = vld [vmem:[#allocation19_spill] sm:$0xff] }
 0x56d   :  { %v3751_v9 = vadd.f32 %v3750_v18, %v3725_v4  ;;  %v4065_v18 = vadd.f32 %v3797_v16, %v3023_v50  ;;  %v4085_v36 = vadd.f32 %v4076_v24, %v4068_v57  ;;  %v2769_v3 = vadd.f32 %v13198_v59, %v2743_v14  ;;  %v13200_v4 = vld [vmem:[#allocation41_spill] sm:$0xff]  ;;  %v13204_v50 = vld [vmem:[#allocation14_spill] sm:$0xff] }
 0x56e   :  { %v3874_v61 = vpop.f32.mrf.mxu0  ;;  %v3854_v6 = vpop.f32.mrf.mxu3  ;;  %v3078_v38 = vadd.f32 %v13201_v39, %v3052_v32  ;;  %v13215_v14 = vld [vmem:[#allocation26_spill] sm:$0xff]  ;;  %v11695_v59 = vld [vmem:[%s13018_s7 + $0x8] sm:$0x3] }
 0x56f   :  { %v3777_v46 = vadd.f32 %v3776_v11, %v3751_v9  ;;  %v4082_v35 = vadd.f32 %v4076_v24, %v4065_v18  ;;  %v11621_v31 = vmax.f32 %v4085_v36, 0.0  ;;  %v3055_v63 = vadd.f32 %v13200_v4, %v2769_v3  ;;  %v13202_v11 = vld [vmem:[#allocation46_spill] sm:$0xff] }
 0x570   :  { %v3075_v9 = vadd.f32 %v13202_v11, %v3049_v12  ;;  %v2821_v55 = vadd.f32 %v13215_v14, %v13214_v15  ;;  %v13231_v14 = vld [vmem:[#allocation50_spill] sm:$0xff] }
 0x571   :  { %v3803_v27 = vadd.f32 %v3802_v26, %v3777_v46  ;;  %v11625_v34 = vmax.f32 %v4082_v35, 0.0  ;;  %v3081_v60 = vadd.f32 %v13203_v8, %v3055_v63  ;;  %v3906_v46 = vpop.f32.mrf.mxu1  ;;  %v13220_v63 = vld [vmem:[#allocation40_spill] sm:$0xff]  ;;  %v4077_v8 = vperm.slane %v11610_v43, 1 }
 0x572   :  { %v3822_v44 = vpop.f32.mrf.mxu2 }
 0x573   :  { %v4071_v53 = vadd.f32 %v3803_v27, %v3029_v62  ;;  %v3849_v0 = vadd.f32 %v11595_v40, %v3822_v44  ;;  %v3104_v62 = vadd.f32 %v13204_v50, %v3078_v38  ;;  %v13205_v40 = vld [vmem:[#allocation12_spill] sm:$0xff]  ;;  %v13206_v44 = vld [vmem:[#allocation47_spill] sm:$0xff]  ;;  %v13221_v38 = vld [vmem:[#allocation42_spill] sm:$0xff] }
 0x574   :  { %v3101_v57 = vadd.f32 %v13205_v40, %v3075_v9  ;;  %v13223_v50 = vld [vmem:[#allocation9_spill] sm:$0xff]  ;;  %v13224_v40 = vld [vmem:[#allocation34_spill] sm:$0xff] }
 0x575   :  { %v4088_v47 = vadd.f32 %v4076_v24, %v4071_v53  ;;  %v3875_v27 = vadd.f32 %v3874_v61, %v3849_v0  ;;  %v3130_v53 = vadd.f32 %v13206_v44, %v3104_v62  ;;  %v13207_v24 = vld [vmem:[#allocation44_spill] sm:$0xff]  ;;  %v13211_v61 = vld [vmem:[#allocation22_spill] sm:$0xff]  ;;  %v2847_v0 = vadd.f32 %v13221_v38, %v2821_v55 }
 0x576   :  { %v3877_v41 = vpop.f32.mrf.mxu0  ;;  %v11640_v28 = vpop.f32.mrf.mxu3  ;;  %v3107_v18 = vadd.f32 %v13207_v24, %v3081_v60  ;;  %v3127_v7 = vadd.f32 %v13210_v21, %v3101_v57  ;;  %v13222_v60 = vld [vmem:[#allocation25_spill] sm:$0xff] }
 0x577   :  { %v11615_v54 = vmax.f32 %v4088_v47, 0.0  ;;  %v3901_v5 = vadd.f32 %v3900_v20, %v3875_v27  ;;  %v13218_v20 = vld [vmem:[#allocation31_spill] sm:$0xff]  ;;  %v2873_v57 = vadd.f32 %v13224_v40, %v2847_v0 }
 0x578   :  { %v3153_v3 = vadd.f32 %v13218_v20, %v3127_v7  ;;  %v13228_v7 = vld [vmem:[#allocation8_spill] sm:$0xff]  ;;  %v13234_v20 = vld [vmem:[#allocation51_spill] sm:$0xff] }
 0x579   :  { %6508 = vmatpush.msk.msra.mxu0 %vm94_vm0, %v11615_v54  ;;  %6519 = vmatpush.msk.msra.mxu2 %vm94_vm0, %v11615_v54  ;;  %v4004_v39 = vpop.f32.mrf.mxu1 }
 0x57a   :  { %v3825_v17 = vpop.f32.mrf.mxu2 }
 0x57b   :  { %4132 = vmatpush.msra.mxu0 %v11621_v31  ;;  %4290 = vmatpush.msra.mxu2 %v11621_v31  ;;  %v3852_v22 = vadd.f32 %v3851_v23, %v3825_v17  ;;  %v11672_v23 = vld [vmem:[%s13018_s7] sm:$0xff]  ;;  %v13209_v17 = vld [vmem:[#allocation10_spill] sm:$0xff] }
 0x57d   :  { %4133 = vmatpush.msra.mxu0 %v11625_v34  ;;  %4291 = vmatpush.msra.mxu2 %v11625_v34  ;;  %v3878_v37 = vadd.f32 %v3877_v41, %v3852_v22  ;;  %v13219_v22 = vld [vmem:[#allocation52_spill] sm:$0xff] }
 0x57e   :  { %6520 = vmatmul.msk.f32.vlgmr.msra.gmra.mxu2 %vm4102_vm3, %v11630_v58  ;;  %v3880_v45 = vpop.f32.mrf.mxu0  ;;  %v11659_v10 = vpop.f32.mrf.mxu3  ;;  %6509 = vmatmul.msk.f32.vlgmr.msra.gmra.mxu0 %vm4102_vm3, %v11672_v23 }
 0x57f   :  { %v3904_v35 = vadd.f32 %v3903_v52, %v3878_v37 }
 0x581   :  { %v4007_v30 = vpop.f32.mrf.mxu1 }
 0x583   :  { %v3828_v2 = vpop.f32.mrf.mxu2 }
 0x584   :  { %v3855_v16 = vadd.f32 %v3854_v6, %v3828_v2  ;;  %v13208_v6 = vld [vmem:[#allocation30_spill] sm:$0xff]  ;;  %v3133_v2 = vadd.f32 %v13211_v61, %v3107_v18  ;;  %v13225_v18 = vld [vmem:[#allocation5_spill] sm:$0xff]  ;;  %v2899_v61 = vadd.f32 %v13228_v7, %v2873_v57  ;;  %v4078_v7 = vperm.slane %v11610_v43, 2  ;;  %v6559_v43 = vld [vmem:[%s13019_s8 + $0x378] sm:$0xff] }
 0x585   :  { %v2818_v29 = vadd.f32 %v13209_v17, %v13208_v6  ;;  %v13226_v6 = vld [vmem:[#allocation27_spill] sm:$0xff] }
 0x586   :  { %6521 = vmatmul.msk.f32.gmra.mxu2 %vm4102_vm3, %v11649_v56  ;;  %v3881_v47 = vadd.f32 %v3880_v45, %v3855_v16  ;;  %v3978_v36 = vpop.f32.mrf.mxu0  ;;  %v11682_v41 = vpop.f32.mrf.mxu3  ;;  %v3156_v45 = vadd.f32 %v13216_v25, %v3130_v53  ;;  %v3159_v1 = vadd.f32 %v13219_v22, %v3133_v2  ;;  %6510 = vmatmul.msk.f32.gmra.mxu0 %vm4102_vm3, %v11695_v59 }
 0x587   :  { %v2844_v51 = vadd.f32 %v13217_v49, %v2818_v29  ;;  %v13227_v29 = vld [vmem:[#allocation45_spill] sm:$0xff]  ;;  %v3979_v25 = vadd.f32 %v3978_v36, %v11640_v28 }
 0x588   :  { %v3907_v19 = vadd.f32 %v3906_v46, %v3881_v47 }
 0x589   :  { %v2870_v37 = vadd.f32 %v13222_v60, %v2844_v51  ;;  %v4005_v38 = vadd.f32 %v4004_v39, %v3979_v25  ;;  %v6590_v25 = vld [vmem:[%s13019_s8 + $0x470] sm:$0xff] }
 0x58a   :  { %4456 = vmatpush.msrb.mxu2 %v6590_v25  ;;  %v4209_v25 = vld [vmem:[%s13019_s8 + $0xb0] sm:$0xff] }
 0x58b   :  { %v3926_v42 = vpop.f32.mrf.mxu2  ;;  %v2896_v47 = vadd.f32 %v13225_v18, %v2870_v37  ;;  %v13239_v37 = vld [vmem:[#allocation20_spill] sm:$0xff]  ;;  %v13242_v18 = vld [vmem:[#allocation58_spill] sm:$0xff] }
 0x58c   :  { %v3927_v52 = vadd.f32 %v3926_v42, %v3901_v5  ;;  %v2841_v42 = vadd.f32 %v13220_v63, %v2815_v48  ;;  %v13229_v5 = vld [vmem:[#allocation49_spill] sm:$0xff]  ;;  %v3185_v48 = vadd.f32 %v13230_v33, %v2899_v61 }
 0x58d   :  { %v3182_v21 = vadd.f32 %v13227_v29, %v2896_v47 }
 0x58e   :  { %v4066_v11 = vadd.f32 %v3927_v52, %v3153_v3  ;;  %v3981_v16 = vpop.f32.mrf.mxu0  ;;  %v2867_v62 = vadd.f32 %v13223_v50, %v2841_v42  ;;  %v4056_v27 = vpop.f32.mrf.mxu3  ;;  %v13232_v52 = vld [vmem:[#allocation39_spill] sm:$0xff]  ;;  %v3211_v3 = vadd.f32 %v13234_v20, %v3185_v48  ;;  %v6557_v48 = vld [vmem:[%s13019_s8 + $0x368] sm:$0xff]  ;;  %v6580_v20 = vld [vmem:[%s13019_s8 + $0x420] sm:$0xff] }
 0x58f   :  { %v3982_v15 = vadd.f32 %v3981_v16, %v11659_v10  ;;  %v3208_v55 = vadd.f32 %v13231_v14, %v3182_v21  ;;  %v13233_v10 = vld [vmem:[#allocation60_spill] sm:$0xff]  ;;  %v6553_v14 = vld [vmem:[%s13019_s8 + $0x348] sm:$0xff] }
 0x590   :  { %v4083_v53 = vadd.f32 %v4077_v8, %v4066_v11  ;;  %v2893_v17 = vadd.f32 %v13226_v6, %v2867_v62  ;;  %v13237_v11 = vld [vmem:[#allocation21_spill] sm:$0xff] }
 0x591   :  { %v4008_v22 = vadd.f32 %v4007_v30, %v3982_v15  ;;  %v6555_v15 = vld [vmem:[%s13019_s8 + $0x358] sm:$0xff] }
 0x592   :  { %v11721_v2 = vmax.f32 %v4083_v53, 0.0  ;;  %v13241_v53 = vld [vmem:[#allocation24_spill] sm:$0xff] }
 0x593   :  { %v3929_v26 = vpop.f32.mrf.mxu2 }
 0x594   :  { %v3930_v13 = vadd.f32 %v3929_v26, %v3904_v35 }
 0x596   :  { %v4069_v12 = vadd.f32 %v3930_v13, %v3156_v45  ;;  %v3179_v13 = vadd.f32 %v13229_v5, %v2893_v17  ;;  %v3984_v45 = vpop.f32.mrf.mxu0  ;;  %v4059_v49 = vpop.f32.mrf.mxu3 }
 0x597   :  { %v3985_v42 = vadd.f32 %v3984_v45, %v11682_v41  ;;  %v13240_v41 = vld [vmem:[#allocation17_spill] sm:$0xff] }
 0x598   :  { %v4086_v26 = vadd.f32 %v4077_v8, %v4069_v12  ;;  %v6588_v45 = vld [vmem:[%s13019_s8 + $0x460] sm:$0xff] }
 0x599   :  { %4457 = vmatpush.msrb.mxu2 %v6588_v45  ;;  %v6596_v45 = vld [vmem:[%s13019_s8 + $0x4a0] sm:$0xff] }
 0x59a   :  { %v11714_v35 = vmax.f32 %v4086_v26, 0.0 }
 0x59b   :  { %v3932_v32 = vpop.f32.mrf.mxu2 }
 0x59c   :  { %v3933_v4 = vadd.f32 %v3932_v32, %v3907_v19  ;;  %v3205_v19 = vadd.f32 %v13232_v52, %v3179_v13  ;;  %v3234_v32 = vadd.f32 %v13233_v10, %v3208_v55  ;;  %v6547_v55 = vld [vmem:[%s13019_s8 + $0x318] sm:$0xff]  ;;  %v6586_v52 = vld [vmem:[%s13019_s8 + $0x450] sm:$0xff] }
 0x59d   :  { %4458 = vmatpush.msrb.mxu2 %v6586_v52  ;;  %v6582_v10 = vld [vmem:[%s13019_s8 + $0x430] sm:$0xff]  ;;  %v4207_v52 = vld [vmem:[%s13019_s8 + $0xa0] sm:$0xff] }
 0x59e   :  { %v4072_v9 = vadd.f32 %v3933_v4, %v3159_v1  ;;  %v13235_v1 = vld [vmem:[#allocation23_spill] sm:$0xff]  ;;  %v13236_v4 = vld [vmem:[#allocation18_spill] sm:$0xff]  ;;  %v3260_v28 = vadd.f32 %v13237_v11, %v3234_v32  ;;  %v4062_v57 = vpop.f32.mrf.mxu3  ;;  %v6572_v11 = vld [vmem:[%s13019_s8 + $0x3e0] sm:$0xff] }
 0x59f   :  { %v3231_v12 = vadd.f32 %v13235_v1, %v3205_v19  ;;  %v3237_v63 = vadd.f32 %v13236_v4, %v3211_v3  ;;  %v6541_v19 = vld [vmem:[%s13019_s8 + $0x2e8] sm:$0xff]  ;;  %v6535_v3 = vld [vmem:[%s13019_s8 + $0x2b8] sm:$0xff] }
 0x5a0   :  { %v4089_v46 = vadd.f32 %v4077_v8, %v4072_v9  ;;  %v4010_v9 = vpop.f32.mrf.mxu1  ;;  %v13238_v8 = vld [vmem:[#allocation53_spill] sm:$0xff]  ;;  %v3286_v39 = vadd.f32 %v13240_v41, %v3260_v28  ;;  %v6531_v4 = vld [vmem:[%s13019_s8 + $0x298] sm:$0xff]  ;;  %v4245_v28 = vld [vmem:[%s13019_s8 + $0x1d0] sm:$0xff] }
 0x5a1   :  { %v3257_v60 = vadd.f32 %v13238_v8, %v3231_v12  ;;  %v3263_v16 = vadd.f32 %v13239_v37, %v3237_v63  ;;  %v4011_v26 = vadd.f32 %v4010_v9, %v3985_v42  ;;  %v6537_v32 = vld [vmem:[%s13019_s8 + $0x2c8] sm:$0xff]  ;;  %v6576_v12 = vld [vmem:[%s13019_s8 + $0x400] sm:$0xff]  ;;  %v6574_v63 = vld [vmem:[%s13019_s8 + $0x3f0] sm:$0xff] }
 0x5a2   :  { %v11707_v44 = vmax.f32 %v4089_v46, 0.0  ;;  %v6533_v1 = vld [vmem:[%s13019_s8 + $0x2a8] sm:$0xff]  ;;  %v6558_v9 = vld [vmem:[%s13019_s8 + $0x370] sm:$0xff]  ;;  %v4243_v8 = vld [vmem:[%s13019_s8 + $0x1c0] sm:$0xff] }
 0x5a3   :  { %v4030_v24 = vpop.f32.mrf.mxu2  ;;  %v3289_v47 = vadd.f32 %v13242_v18, %v3263_v16  ;;  %v6529_v42 = vld [vmem:[%s13019_s8 + $0x288] sm:$0xff]  ;;  %v6556_v37 = vld [vmem:[%s13019_s8 + $0x360] sm:$0xff]  ;;  %v4241_v16 = vld [vmem:[%s13019_s8 + $0x1b0] sm:$0xff] }
 0x5a4   :  { %6511 = vmatpush.msk.msra.mxu1 %vm94_vm0, %v11707_v44  ;;  %6522 = vmatpush.msk.msrb.mxu3 %vm94_vm0, %v11707_v44  ;;  %v4031_v36 = vadd.f32 %v4030_v24, %v4005_v38  ;;  %v3283_v24 = vadd.f32 %v13241_v53, %v3257_v60  ;;  %v4249_v38 = vld [vmem:[%s13019_s8 + $0x1f0] sm:$0xff]  ;;  %v6568_v60 = vld [vmem:[%s13019_s8 + $0x3c0] sm:$0xff] }
 0x5a5   :  { %v6552_v41 = vld [vmem:[%s13019_s8 + $0x340] sm:$0xff] }
 0x5a6   :  { %4155 = vmatpush.msra.mxu1 %v11714_v35  ;;  %4313 = vmatpush.msrb.mxu3 %v11714_v35  ;;  %v4057_v62 = vadd.f32 %v4056_v27, %v4031_v36  ;;  %v6570_v36 = vld [vmem:[%s13019_s8 + $0x3d0] sm:$0xff]  ;;  %v6560_v53 = vld [vmem:[%s13019_s8 + $0x380] sm:$0xff] }
 0x5a7   :  { %v6548_v18 = vld [vmem:[%s13019_s8 + $0x320] sm:$0xff] }
 0x5a8   :  { %4156 = vmatpush.msra.mxu1 %v11721_v2  ;;  %4314 = vmatpush.msrb.mxu3 %v11721_v2  ;;  %v4067_v29 = vadd.f32 %v4057_v62, %v3283_v24  ;;  %v6562_v62 = vld [vmem:[%s13019_s8 + $0x390] sm:$0xff] }
 0x5a9   :  { %6523 = vmatmul.msk.f32.vlgmr.msrb.gmra.mxu3 %vm4102_vm3, %v11630_v58  ;;  %6512 = vmatmul.msk.f32.vlgmr.msra.gmra.mxu1 %vm4102_vm3, %v11672_v23  ;;  %v6606_v24 = vld [vmem:[%s13019_s8 + $0x4f0] sm:$0xff] }
 0x5aa   :  { %v4084_v30 = vadd.f32 %v4078_v7, %v4067_v29  ;;  %4487 = vmatpush.msra.mxu3 %v6606_v24  ;;  %v6546_v29 = vld [vmem:[%s13019_s8 + $0x310] sm:$0xff]  ;;  %v6597_v24 = vld [vmem:[%s13019_s8 + $0x4a8] sm:$0xff] }
 0x5ab   :  { %v4033_v51 = vpop.f32.mrf.mxu2 }
 0x5ac   :  { %v4034_v0 = vadd.f32 %v4033_v51, %v4008_v22  ;;  %v11761_v33 = vmax.f32 %v4084_v30, 0.0  ;;  %v6539_v51 = vld [vmem:[%s13019_s8 + $0x2d8] sm:$0xff]  ;;  %v6578_v22 = vld [vmem:[%s13019_s8 + $0x410] sm:$0xff] }
 0x5ad   :  { %v4213_v30 = vld [vmem:[%s13019_s8 + $0xd0] sm:$0xff] }
 0x5ae   :  { %v4060_v46 = vadd.f32 %v4059_v49, %v4034_v0  ;;  %v6584_v49 = vld [vmem:[%s13019_s8 + $0x440] sm:$0xff] }
 0x5af   :  { %4459 = vmatpush.msrb.mxu2 %v6584_v49  ;;  %v4247_v0 = vld [vmem:[%s13019_s8 + $0x1e0] sm:$0xff]  ;;  %v6594_v49 = vld [vmem:[%s13019_s8 + $0x490] sm:$0xff] }
 0x5b0   :  { %v4070_v6 = vadd.f32 %v4060_v46, %v3286_v39  ;;  %v6566_v46 = vld [vmem:[%s13019_s8 + $0x3b0] sm:$0xff]  ;;  %v4239_v39 = vld [vmem:[%s13019_s8 + $0x1a0] sm:$0xff] }
 0x5b1   :  { %6524 = vmatmul.msk.f32.gmra.mxu3 %vm4102_vm3, %v11649_v56  ;;  %6513 = vmatmul.msk.f32.gmra.mxu1 %vm4102_vm3, %v11695_v59 }
 0x5b2   :  { %v4087_v5 = vadd.f32 %v4078_v7, %v4070_v6  ;;  %4460 = vmatpush.msrb.mxu2 %v6582_v10  ;;  %v4235_v6 = vld [vmem:[%s13019_s8 + $0x180] sm:$0xff]  ;;  %v4205_v10 = vld [vmem:[%s13019_s8 + $0x90] sm:$0xff] }
 0x5b3   :  { %v4036_v50 = vpop.f32.mrf.mxu2 }
 0x5b4   :  { %v4037_v40 = vadd.f32 %v4036_v50, %v4011_v26  ;;  %v11757_v27 = vmax.f32 %v4087_v5, 0.0  ;;  %4461 = vmatpush.msrb.mxu2 %v6580_v20  ;;  %v6554_v26 = vld [vmem:[%s13019_s8 + $0x350] sm:$0xff]  ;;  %v6564_v50 = vld [vmem:[%s13019_s8 + $0x3a0] sm:$0xff] }
 0x5b5   :  { %v6544_v5 = vld [vmem:[%s13019_s8 + $0x300] sm:$0xff] }
 0x5b6   :  { %v4063_v17 = vadd.f32 %v4062_v57, %v4037_v40  ;;  %4462 = vmatpush.msrb.mxu2 %v6578_v22  ;;  %v6550_v40 = vld [vmem:[%s13019_s8 + $0x330] sm:$0xff]  ;;  %v6592_v20 = vld [vmem:[%s13019_s8 + $0x480] sm:$0xff] }
 0x5b7   :  { %v4237_v57 = vld [vmem:[%s13019_s8 + $0x190] sm:$0xff]  ;;  %v4203_v22 = vld [vmem:[%s13019_s8 + $0x80] sm:$0xff] }
 0x5b8   :  { %v4073_v21 = vadd.f32 %v4063_v17, %v3289_v47  ;;  %4463 = vmatpush.msrb.mxu2 %v6576_v12  ;;  %v4217_v47 = vld [vmem:[%s13019_s8 + $0xf0] sm:$0xff]  ;;  %v6604_v17 = vld [vmem:[%s13019_s8 + $0x4e0] sm:$0xff]  ;;  %v6591_v12 = vld [vmem:[%s13019_s8 + $0x478] sm:$0xff] }
 0x5b9   :  { %4488 = vmatpush.msra.mxu3 %v6604_v17  ;;  %v6593_v17 = vld [vmem:[%s13019_s8 + $0x488] sm:$0xff] }
 0x5ba   :  { %v4090_v61 = vadd.f32 %v4078_v7, %v4073_v21  ;;  %4464 = vmatpush.msrb.mxu2 %v6574_v63  ;;  %v4215_v21 = vld [vmem:[%s13019_s8 + $0xe0] sm:$0xff]  ;;  %v4233_v7 = vld [vmem:[%s13019_s8 + $0x170] sm:$0xff] }
 0x5bb   :  { %v4201_v63 = vld [vmem:[%s13019_s8 + $0x70] sm:$0xff] }
 0x5bc   :  { %v11751_v13 = vmax.f32 %v4090_v61, 0.0  ;;  %4465 = vmatpush.msrb.mxu2 %v6572_v11  ;;  %v6602_v61 = vld [vmem:[%s13019_s8 + $0x4d0] sm:$0xff]  ;;  %v4199_v11 = vld [vmem:[%s13019_s8 + $0x60] sm:$0xff] }
 0x5bd   :  { %4489 = vmatpush.msra.mxu3 %v6602_v61  ;;  %v6571_v61 = vld [vmem:[%s13019_s8 + $0x3d8] sm:$0xff] }
 0x5be   :  { %6514 = vmatpush.msk.msrb.mxu0 %vm94_vm0, %v11751_v13  ;;  %6525 = vmatpush.msk.msrb.mxu1 %vm94_vm0, %v11751_v13 }
 0x5bf   :  { %4466 = vmatpush.msrb.mxu2 %v6570_v36  ;;  %v6528_v36 = vld [vmem:[%s13019_s8 + $0x280] sm:$0xff] }
 0x5c0   :  { %4178 = vmatpush.msrb.mxu0 %v11757_v27  ;;  %4336 = vmatpush.msrb.mxu1 %v11757_v27 }
 0x5c1   :  { %4467 = vmatpush.msrb.mxu2 %v6568_v60  ;;  %v6607_v60 = vld [vmem:[%s13019_s8 + $0x4f8] sm:$0xff] }
 0x5c2   :  { %4179 = vmatpush.msrb.mxu0 %v11761_v33  ;;  %4337 = vmatpush.msrb.mxu1 %v11761_v33 }
 0x5c3   :  { %6526 = vmatmul.msk.f32.vlgmr.msrb.gmra.mxu1 %vm4102_vm3, %v11630_v58  ;;  %6515 = vmatmul.msk.f32.vlgmr.msrb.gmra.mxu0 %vm4102_vm3, %v11672_v23  ;;  %v6551_v58 = vld [vmem:[%s13019_s8 + $0x338] sm:$0xff]  ;;  %v6549_v23 = vld [vmem:[%s13019_s8 + $0x328] sm:$0xff] }
 0x5c4   :  { %4502 = vmatpush.msra.mxu1 %v6559_v43  ;;  %4433 = vmatpush.msra.mxu0 %v6558_v9  ;;  %v4231_v43 = vld [vmem:[%s13019_s8 + $0x160] sm:$0xff] }
 0x5c5   :  { %4468 = vmatpush.msrb.mxu2 %v6566_v46  ;;  %v6605_v46 = vld [vmem:[%s13019_s8 + $0x4e8] sm:$0xff] }
 0x5c6   :  { %4503 = vmatpush.msra.mxu1 %v6557_v48  ;;  %4434 = vmatpush.msra.mxu0 %v6556_v37  ;;  %v6600_v48 = vld [vmem:[%s13019_s8 + $0x4c0] sm:$0xff]  ;;  %v6585_v37 = vld [vmem:[%s13019_s8 + $0x448] sm:$0xff] }
 0x5c7   :  { %4469 = vmatpush.msrb.mxu2 %v6564_v50  ;;  %4490 = vmatpush.msra.mxu3 %v6600_v48  ;;  %v6603_v50 = vld [vmem:[%s13019_s8 + $0x4d8] sm:$0xff] }
 0x5c8   :  { %4504 = vmatpush.msra.mxu1 %v6555_v15  ;;  %4435 = vmatpush.msra.mxu0 %v6554_v26  ;;  %v6542_v15 = vld [vmem:[%s13019_s8 + $0x2f0] sm:$0xff]  ;;  %v6583_v26 = vld [vmem:[%s13019_s8 + $0x438] sm:$0xff] }
 0x5c9   :  { %4470 = vmatpush.msrb.mxu2 %v6562_v62  ;;  %v4189_v62 = vld [vmem:[%s13019_s8 + $0x10] sm:$0xff]  ;;  %v6567_v48 = vld [vmem:[%s13019_s8 + $0x3b8] sm:$0xff] }
 0x5ca   :  { %4505 = vmatpush.msra.mxu1 %v6553_v14  ;;  %4436 = vmatpush.msra.mxu0 %v6552_v41  ;;  %v4211_v14 = vld [vmem:[%s13019_s8 + $0xc0] sm:$0xff] }
 0x5cb   :  { %6527 = vmatmul.msk.f32.gmra.mxu1 %vm4102_vm3, %v11649_v56  ;;  %6516 = vmatmul.msk.f32.gmra.mxu0 %vm4102_vm3, %v11695_v59  ;;  %v6545_v56 = vld [vmem:[%s13019_s8 + $0x308] sm:$0xff]  ;;  %v6543_v59 = vld [vmem:[%s13019_s8 + $0x2f8] sm:$0xff]  ;;  %v4191_v41 = vld [vmem:[%s13019_s8 + $0x20] sm:$0xff] }
 0x5cc   :  { %4506 = vmatpush.msra.mxu1 %v6551_v58  ;;  %4437 = vmatpush.msra.mxu0 %v6550_v40  ;;  %v4229_v58 = vld [vmem:[%s13019_s8 + $0x150] sm:$0xff]  ;;  %v6599_v40 = vld [vmem:[%s13019_s8 + $0x4b8] sm:$0xff] }
 0x5cd   :  { %4471 = vmatpush.msrb.mxu2 %v6560_v53  ;;  %v6579_v53 = vld [vmem:[%s13019_s8 + $0x418] sm:$0xff] }
 0x5ce   :  { %4507 = vmatpush.msra.mxu1 %v6549_v23  ;;  %4438 = vmatpush.msra.mxu0 %v6548_v18  ;;  %v6598_v23 = vld [vmem:[%s13019_s8 + $0x4b0] sm:$0xff]  ;;  %v6577_v18 = vld [vmem:[%s13019_s8 + $0x408] sm:$0xff] }
 0x5cf   :  { %4577 = vmatpush.msra.mxu2 %v4217_v47  ;;  %4491 = vmatpush.msra.mxu3 %v6598_v23  ;;  %v6595_v47 = vld [vmem:[%s13019_s8 + $0x498] sm:$0xff] }
 0x5d0   :  { %4508 = vmatpush.msra.mxu1 %v6547_v55  ;;  %4439 = vmatpush.msra.mxu0 %v6546_v29  ;;  %v6540_v55 = vld [vmem:[%s13019_s8 + $0x2e0] sm:$0xff]  ;;  %v4265_v29 = vld [vmem:[%s13019_s8 + $0x270] sm:$0xff]  ;;  %v6563_v23 = vld [vmem:[%s13019_s8 + $0x398] sm:$0xff] }
 0x5d1   :  { %4578 = vmatpush.msra.mxu2 %v4215_v21  ;;  %4492 = vmatpush.msra.mxu3 %v6596_v45  ;;  %v6573_v21 = vld [vmem:[%s13019_s8 + $0x3e8] sm:$0xff] }
 0x5d2   :  { %4509 = vmatpush.msra.mxu1 %v6545_v56  ;;  %4440 = vmatpush.msra.mxu0 %v6544_v5  ;;  %v4227_v56 = vld [vmem:[%s13019_s8 + $0x140] sm:$0xff]  ;;  %v4261_v5 = vld [vmem:[%s13019_s8 + $0x250] sm:$0xff] }
 0x5d3   :  { %4579 = vmatpush.msra.mxu2 %v4213_v30  ;;  %4493 = vmatpush.msra.mxu3 %v6594_v49  ;;  %v6569_v30 = vld [vmem:[%s13019_s8 + $0x3c8] sm:$0xff] }
 0x5d4   :  { %4510 = vmatpush.msra.mxu1 %v6543_v59  ;;  %4441 = vmatpush.msra.mxu0 %v6542_v15  ;;  %v6538_v59 = vld [vmem:[%s13019_s8 + $0x2d0] sm:$0xff] }
 0x5d5   :  { %4580 = vmatpush.msra.mxu2 %v4211_v14  ;;  %4494 = vmatpush.msra.mxu3 %v6592_v20  ;;  %v4257_v15 = vld [vmem:[%s13019_s8 + $0x230] sm:$0xff]  ;;  %v6565_v14 = vld [vmem:[%s13019_s8 + $0x3a8] sm:$0xff] }
 0x5d6   :  { %4511 = vmatpush.msra.mxu1 %v6541_v19  ;;  %v4225_v19 = vld [vmem:[%s13019_s8 + $0x130] sm:$0xff]  ;;  %4442 = vmatpush.msra.mxu0 %v6540_v55 }
 0x5d7   :  { %4581 = vmatpush.msra.mxu2 %v4209_v25  ;;  %4525 = vmatpush.msrb.mxu3 %v6591_v12  ;;  %v4253_v55 = vld [vmem:[%s13019_s8 + $0x210] sm:$0xff]  ;;  %v6561_v25 = vld [vmem:[%s13019_s8 + $0x388] sm:$0xff] }
 0x5d8   :  { %4512 = vmatpush.msra.mxu1 %v6539_v51  ;;  %v6536_v51 = vld [vmem:[%s13019_s8 + $0x2c0] sm:$0xff]  ;;  %4443 = vmatpush.msra.mxu0 %v6538_v59  ;;  %v4266_v59 = vld [vmem:[%s13019_s8 + $0x278] sm:$0xff]  ;;  %v4252_v12 = vld [vmem:[%s13019_s8 + $0x208] sm:$0xff] }
 0x5d9   :  { %4582 = vmatpush.msra.mxu2 %v4207_v52 }
 0x5da   :  { %4513 = vmatpush.msra.mxu1 %v6537_v32  ;;  %v4223_v32 = vld [vmem:[%s13019_s8 + $0x120] sm:$0xff]  ;;  %4444 = vmatpush.msra.mxu0 %v6536_v51  ;;  %v4262_v51 = vld [vmem:[%s13019_s8 + $0x258] sm:$0xff] }
 0x5db   :  { %4583 = vmatpush.msra.mxu2 %v4205_v10  ;;  %v4260_v10 = vld [vmem:[%s13019_s8 + $0x248] sm:$0xff] }
 0x5dc   :  { %4514 = vmatpush.msra.mxu1 %v6535_v3  ;;  %v6534_v3 = vld [vmem:[%s13019_s8 + $0x2b0] sm:$0xff] }
 0x5dd   :  { %4445 = vmatpush.msra.mxu0 %v6534_v3  ;;  %4584 = vmatpush.msra.mxu2 %v4203_v22  ;;  %v4256_v3 = vld [vmem:[%s13019_s8 + $0x228] sm:$0xff]  ;;  %v4254_v22 = vld [vmem:[%s13019_s8 + $0x218] sm:$0xff] }
 0x5de   :  { %4515 = vmatpush.msra.mxu1 %v6533_v1  ;;  %v4221_v1 = vld [vmem:[%s13019_s8 + $0x110] sm:$0xff] }
 0x5df   :  { %4585 = vmatpush.msra.mxu2 %v4201_v63 }
 0x5e0   :  { %4516 = vmatpush.msra.mxu1 %v6531_v4  ;;  %v6532_v4 = vld [vmem:[%s13019_s8 + $0x2a0] sm:$0xff] }
 0x5e1   :  { %4446 = vmatpush.msra.mxu0 %v6532_v4  ;;  %4586 = vmatpush.msra.mxu2 %v4199_v11  ;;  %v4218_v4 = vld [vmem:[%s13019_s8 + $0xf8] sm:$0xff] }
 0x5e2   :  { %4517 = vmatpush.msra.mxu1 %v6529_v42  ;;  %v4219_v42 = vld [vmem:[%s13019_s8 + $0x100] sm:$0xff]  ;;  %v4246_v11 = vld [vmem:[%s13019_s8 + $0x1d8] sm:$0xff] }
 0x5e4   :  { %4600 = vmatpush.msrb.mxu1 %v4249_v38  ;;  %v6589_v38 = vld [vmem:[%s13019_s8 + $0x468] sm:$0xff] }
 0x5e5   :  { %4526 = vmatpush.msrb.mxu3 %v6589_v38 }
 0x5e6   :  { %4601 = vmatpush.msrb.mxu1 %v4247_v0  ;;  %v6530_v0 = vld [vmem:[%s13019_s8 + $0x290] sm:$0xff] }
 0x5e7   :  { %4447 = vmatpush.msra.mxu0 %v6530_v0  ;;  %v4214_v0 = vld [vmem:[%s13019_s8 + $0xd8] sm:$0xff] }
 0x5e8   :  { %4602 = vmatpush.msrb.mxu1 %v4245_v28  ;;  %v6587_v28 = vld [vmem:[%s13019_s8 + $0x458] sm:$0xff] }
 0x5e9   :  { %4527 = vmatpush.msrb.mxu3 %v6587_v28  ;;  %4448 = vmatpush.msra.mxu0 %v6528_v36  ;;  %v4212_v28 = vld [vmem:[%s13019_s8 + $0xc8] sm:$0xff] }
 0x5ea   :  { %4603 = vmatpush.msrb.mxu1 %v4243_v8  ;;  %v4197_v8 = vld [vmem:[%s13019_s8 + $0x50] sm:$0xff]  ;;  %v4244_v36 = vld [vmem:[%s13019_s8 + $0x1c8] sm:$0xff] }
 0x5eb   :  { %4587 = vmatpush.msra.mxu2 %v4197_v8  ;;  %4556 = vmatpush.msrb.mxu0 %v6607_v60  ;;  %v4242_v60 = vld [vmem:[%s13019_s8 + $0x1b8] sm:$0xff] }
 0x5ec   :  { %4604 = vmatpush.msrb.mxu1 %v4241_v16  ;;  %v4195_v16 = vld [vmem:[%s13019_s8 + $0x40] sm:$0xff]  ;;  %4528 = vmatpush.msrb.mxu3 %v6585_v37  ;;  %v4208_v37 = vld [vmem:[%s13019_s8 + $0xa8] sm:$0xff] }
 0x5ed   :  { %4588 = vmatpush.msra.mxu2 %v4195_v16  ;;  %4557 = vmatpush.msrb.mxu0 %v6605_v46  ;;  %v4240_v16 = vld [vmem:[%s13019_s8 + $0x1a8] sm:$0xff] }
 0x5ee   :  { %4605 = vmatpush.msrb.mxu1 %v4239_v39  ;;  %4529 = vmatpush.msrb.mxu3 %v6583_v26  ;;  %v4206_v26 = vld [vmem:[%s13019_s8 + $0x98] sm:$0xff] }
 0x5ef   :  { %4558 = vmatpush.msrb.mxu0 %v6603_v50  ;;  %v4238_v50 = vld [vmem:[%s13019_s8 + $0x198] sm:$0xff] }
 0x5f0   :  { %4606 = vmatpush.msrb.mxu1 %v4237_v57  ;;  %v4187_v57 = vld [vmem:[%s13019_s8] sm:$0xff] }
 0x5f2   :  { %4607 = vmatpush.msrb.mxu1 %v4235_v6  ;;  %v6575_v6 = vld [vmem:[%s13019_s8 + $0x3f8] sm:$0xff] }
 0x5f4   :  { %4608 = vmatpush.msrb.mxu1 %v4233_v7  ;;  %v4263_v7 = vld [vmem:[%s13019_s8 + $0x260] sm:$0xff] }
 0x5f6   :  { %4609 = vmatpush.msrb.mxu1 %v4231_v43  ;;  %v4259_v43 = vld [vmem:[%s13019_s8 + $0x240] sm:$0xff] }
 0x5f8   :  { %4610 = vmatpush.msrb.mxu1 %v4229_v58  ;;  %v4255_v58 = vld [vmem:[%s13019_s8 + $0x220] sm:$0xff] }
 0x5fa   :  { %4611 = vmatpush.msrb.mxu1 %v4227_v56  ;;  %v4251_v56 = vld [vmem:[%s13019_s8 + $0x200] sm:$0xff] }
 0x5fc   :  { %4612 = vmatpush.msrb.mxu1 %v4225_v19  ;;  %v4264_v19 = vld [vmem:[%s13019_s8 + $0x268] sm:$0xff] }
 0x5fe   :  { %4613 = vmatpush.msrb.mxu1 %v4223_v32  ;;  %v4258_v32 = vld [vmem:[%s13019_s8 + $0x238] sm:$0xff] }
 0x600   :  { %4614 = vmatpush.msrb.mxu1 %v4221_v1  ;;  %v12170_v1 = vpop.f32.mrf.mxu0 }
 0x601   :  { %v4293_v9 = vpop.f32.mrf.mxu2 }
 0x602   :  { %4615 = vmatpush.msrb.mxu1 %v4219_v42  ;;  %4449 = vmatmul.f32.vlgmr.msra.gmra.mxu0 %v4293_v9  ;;  %v4250_v42 = vld [vmem:[%s13019_s8 + $0x1f8] sm:$0xff] }
 0x603   :  { %4518 = vmatmul.f32.vlgmr.msra.gmra.mxu1 %v4293_v9  ;;  %v4210_v9 = vld [vmem:[%s13019_s8 + $0xb8] sm:$0xff] }
 0x604   :  { %6618 = vmatpush.msk.msra.mxu1 %vm94_vm0, %v11615_v54  ;;  %v4193_v54 = vld [vmem:[%s13019_s8 + $0x30] sm:$0xff] }
 0x605   :  { %4589 = vmatpush.msra.mxu2 %v4193_v54  ;;  %v6617_v54 = vld [vmem:[%s13018_s7 + $0x28] sm:$0x3] }
 0x606   :  { %4738 = vmatpush.msra.mxu1 %v11621_v31  ;;  %v6601_v31 = vld [vmem:[%s13019_s8 + $0x4c8] sm:$0xff] }
 0x607   :  { %4590 = vmatpush.msra.mxu2 %v4191_v41  ;;  %4559 = vmatpush.msrb.mxu0 %v6601_v31  ;;  %v4204_v41 = vld [vmem:[%s13019_s8 + $0x88] sm:$0xff] }
 0x608   :  { %4739 = vmatpush.msra.mxu1 %v11625_v34  ;;  %v6581_v34 = vld [vmem:[%s13019_s8 + $0x428] sm:$0xff]  ;;  %v12185_v38 = vpop.f32.mrf.mxu0 }
 0x609   :  { %v4296_v39 = vpop.f32.mrf.mxu2  ;;  %4591 = vmatpush.msra.mxu2 %v4189_v62  ;;  %4530 = vmatpush.msrb.mxu3 %v6581_v34  ;;  %v4236_v31 = vld [vmem:[%s13019_s8 + $0x188] sm:$0xff]  ;;  %v4234_v62 = vld [vmem:[%s13019_s8 + $0x178] sm:$0xff] }
 0x60a   :  { %4560 = vmatpush.msrb.mxu0 %v6599_v40  ;;  %v4200_v34 = vld [vmem:[%s13019_s8 + $0x68] sm:$0xff] }
 0x60b   :  { %4521 = vmatmul.f32.gmra.mxu1 %v4296_v39  ;;  %4592 = vmatpush.msra.mxu2 %v4187_v57  ;;  %v4232_v40 = vld [vmem:[%s13019_s8 + $0x168] sm:$0xff]  ;;  %v4198_v57 = vld [vmem:[%s13019_s8 + $0x58] sm:$0xff] }
 0x60c   :  { %4531 = vmatpush.msrb.mxu3 %v6579_v53  ;;  %4561 = vmatpush.msrb.mxu0 %v6597_v24  ;;  %v4230_v53 = vld [vmem:[%s13019_s8 + $0x158] sm:$0xff] }
 0x60d   :  { %4452 = vmatmul.f32.gmra.mxu0 %v4296_v39  ;;  %v4202_v39 = vld [vmem:[%s13019_s8 + $0x78] sm:$0xff] }
 0x60e   :  { %4532 = vmatpush.msrb.mxu3 %v6577_v18  ;;  %4562 = vmatpush.msrb.mxu0 %v6595_v47  ;;  %v4196_v18 = vld [vmem:[%s13019_s8 + $0x48] sm:$0xff] }
 0x60f   :  { %v4228_v47 = vld [vmem:[%s13019_s8 + $0x148] sm:$0xff] }
 0x610   :  { %4533 = vmatpush.msrb.mxu3 %v6575_v6  ;;  %4563 = vmatpush.msrb.mxu0 %v6593_v17  ;;  %v4194_v6 = vld [vmem:[%s13019_s8 + $0x38] sm:$0xff] }
 0x611   :  { %v4226_v17 = vld [vmem:[%s13019_s8 + $0x138] sm:$0xff] }
 0x612   :  { %4631 = vmatpush.msra.mxu0 %v4265_v29  ;;  %4534 = vmatpush.msrb.mxu3 %v6573_v21  ;;  %v4192_v29 = vld [vmem:[%s13019_s8 + $0x28] sm:$0xff] }
 0x613   :  { %v4224_v21 = vld [vmem:[%s13019_s8 + $0x128] sm:$0xff] }
 0x614   :  { %4632 = vmatpush.msra.mxu0 %v4263_v7  ;;  %4535 = vmatpush.msrb.mxu3 %v6571_v61  ;;  %v4190_v7 = vld [vmem:[%s13019_s8 + $0x18] sm:$0xff] }
 0x615   :  { %v4222_v61 = vld [vmem:[%s13019_s8 + $0x118] sm:$0xff] }
 0x616   :  { %4633 = vmatpush.msra.mxu0 %v4261_v5  ;;  %4536 = vmatpush.msrb.mxu3 %v6569_v30  ;;  %v4188_v5 = vld [vmem:[%s13019_s8 + $0x8] sm:$0xff] }
 0x617   :  { %v4220_v30 = vld [vmem:[%s13019_s8 + $0x108] sm:$0xff] }
 0x618   :  { %4634 = vmatpush.msra.mxu0 %v4259_v43  ;;  %4537 = vmatpush.msrb.mxu3 %v6567_v48  ;;  %v6657_v43 = vld [vmem:[%s13019_s8 + $0x5f0] sm:$0xff] }
 0x61a   :  { %4635 = vmatpush.msra.mxu0 %v4257_v15  ;;  %4538 = vmatpush.msrb.mxu3 %v6565_v14  ;;  %v6651_v14 = vld [vmem:[%s13019_s8 + $0x5c0] sm:$0xff] }
 0x61c   :  { %4636 = vmatpush.msra.mxu0 %v4255_v58  ;;  %4539 = vmatpush.msrb.mxu3 %v6563_v23  ;;  %v6649_v58 = vld [vmem:[%s13019_s8 + $0x5b0] sm:$0xff] }
 0x61e   :  { %4637 = vmatpush.msra.mxu0 %v4253_v55  ;;  %4540 = vmatpush.msrb.mxu3 %v6561_v25  ;;  %v6647_v55 = vld [vmem:[%s13019_s8 + $0x5a0] sm:$0xff]  ;;  %v6645_v25 = vld [vmem:[%s13019_s8 + $0x590] sm:$0xff] }
 0x620   :  { %4638 = vmatpush.msra.mxu0 %v4251_v56 }
 0x626   :  { %v12137_v45 = vpop.f32.mrf.mxu1 }
 0x627   :  { %4616 = vmatmul.f32.vlgmr.msrb.gmra.mxu1 %v12137_v45 }
 0x628   :  { %4880 = vmatpush.msrb.mxu1 %v6657_v43  ;;  %v6702_v43 = vld [vmem:[%s13019_s8 + $0x758] sm:$0xff] }
 0x62c   :  { %v12143_v52 = vpop.f32.mrf.mxu3 }
 0x62d   :  { %4472 = vmatmul.f32.vlgmr.msrb.gmra.mxu2 %v12143_v52 }
 0x62e   :  { %4700 = vmatpush.msrb.mxu2 %v4266_v59  ;;  %v12149_v49 = vpop.f32.mrf.mxu1 }
 0x62f   :  { %4619 = vmatmul.f32.gmra.mxu1 %v12149_v49 }
 0x630   :  { %4701 = vmatpush.msrb.mxu2 %v4264_v19  ;;  %v6641_v19 = vld [vmem:[%s13019_s8 + $0x570] sm:$0xff] }
 0x632   :  { %4702 = vmatpush.msrb.mxu2 %v4262_v51 }
 0x634   :  { %v12161_v20 = vpop.f32.mrf.mxu3  ;;  %4703 = vmatpush.msrb.mxu2 %v4260_v10  ;;  %v6639_v10 = vld [vmem:[%s13019_s8 + $0x560] sm:$0xff] }
 0x635   :  { %4475 = vmatmul.f32.gmra.mxu2 %v12161_v20 }
 0x636   :  { %4704 = vmatpush.msrb.mxu2 %v4258_v32  ;;  %v6703_v32 = vld [vmem:[%s13019_s8 + $0x760] sm:$0xff] }
 0x638   :  { %4705 = vmatpush.msrb.mxu2 %v4256_v3  ;;  %v6689_v3 = vld [vmem:[%s13019_s8 + $0x6f0] sm:$0xff] }
 0x63a   :  { %4706 = vmatpush.msrb.mxu2 %v4254_v22  ;;  %v6701_v22 = vld [vmem:[%s13019_s8 + $0x750] sm:$0xff] }
 0x63c   :  { %4707 = vmatpush.msrb.mxu2 %v4252_v12  ;;  %v6687_v12 = vld [vmem:[%s13019_s8 + $0x6e0] sm:$0xff] }
 0x63d   :  { %4593 = vmatmul.f32.vlgmr.msra.gmra.mxu2 %v12170_v1 }
 0x63e   :  { %6621 = vmatpush.msk.msra.mxu2 %vm94_vm0, %v11707_v44  ;;  %v4216_v44 = vld [vmem:[%s13019_s8 + $0xe8] sm:$0xff] }
 0x640   :  { %4761 = vmatpush.msra.mxu2 %v11714_v35  ;;  %v4339_v63 = vpop.f32.mrf.mxu1  ;;  %v4248_v35 = vld [vmem:[%s13019_s8 + $0x1e8] sm:$0xff]  ;;  %v4181_v46 = vpop.f32.mrf.mxu0 }
 0x641   :  { %6608 = vmatmul.msk.f32.vlgmr.msra.gmra.mxu3 %vm4426_vm4, %v4339_v63  ;;  %6610 = vmatmul.msk.f32.vlgmr.msrb.gmra.mxu0 %vm4426_vm4, %v4339_v63  ;;  %v6699_v63 = vld [vmem:[%s13019_s8 + $0x740] sm:$0xff] }
 0x642   :  { %4646 = vmatpush.msra.mxu3 %v4218_v4  ;;  %4762 = vmatpush.msra.mxu2 %v11721_v2  ;;  %v12209_v2 = vld [vmem:[%s13018_s7 + $0x20] sm:$0xff] }
 0x643   :  { %4669 = vmatpush.msrb.mxu0 %v4250_v42  ;;  %6619 = vmatmul.msk.f32.vlgmr.msra.gmra.mxu1 %vm4102_vm3, %v12209_v2 }
 0x644   :  { %4647 = vmatpush.msra.mxu3 %v4216_v44  ;;  %v6685_v44 = vld [vmem:[%s13019_s8 + $0x6d0] sm:$0xff] }
 0x645   :  { %4670 = vmatpush.msrb.mxu0 %v4248_v35  ;;  %4596 = vmatmul.f32.gmra.mxu2 %v12185_v38  ;;  %v6658_v35 = vld [vmem:[%s13019_s8 + $0x5f8] sm:$0xff] }
 0x646   :  { %4648 = vmatpush.msra.mxu3 %v4214_v0  ;;  %v6697_v0 = vld [vmem:[%s13019_s8 + $0x730] sm:$0xff] }
 0x647   :  { %4671 = vmatpush.msrb.mxu0 %v4246_v11  ;;  %v6631_v11 = vld [vmem:[%s13019_s8 + $0x520] sm:$0xff] }
 0x648   :  { %4649 = vmatpush.msra.mxu3 %v4212_v28  ;;  %v4342_v8 = vpop.f32.mrf.mxu1  ;;  %v4184_v24 = vpop.f32.mrf.mxu0  ;;  %v6683_v28 = vld [vmem:[%s13019_s8 + $0x6c0] sm:$0xff] }
 0x649   :  { %4672 = vmatpush.msrb.mxu0 %v4244_v36  ;;  %6609 = vmatmul.msk.f32.gmra.mxu3 %vm4426_vm4, %v4342_v8  ;;  %v6656_v36 = vld [vmem:[%s13019_s8 + $0x5e8] sm:$0xff] }
 0x64a   :  { %6611 = vmatmul.msk.f32.gmra.mxu0 %vm4426_vm4, %v4342_v8  ;;  %4650 = vmatpush.msra.mxu3 %v4210_v9  ;;  %v6695_v9 = vld [vmem:[%s13019_s8 + $0x720] sm:$0xff]  ;;  %v6629_v8 = vld [vmem:[%s13019_s8 + $0x510] sm:$0xff] }
 0x64b   :  { %4673 = vmatpush.msrb.mxu0 %v4242_v60  ;;  %6620 = vmatmul.msk.f32.gmra.mxu1 %vm4102_vm3, %v6617_v54  ;;  %v6681_v60 = vld [vmem:[%s13019_s8 + $0x6b0] sm:$0xff] }
 0x64c   :  { %4651 = vmatpush.msra.mxu3 %v4208_v37  ;;  %v6654_v37 = vld [vmem:[%s13019_s8 + $0x5d8] sm:$0xff] }
 0x64d   :  { %4674 = vmatpush.msrb.mxu0 %v4240_v16  ;;  %6614 = vmatmul.msk.f32.vlgmr.msrb.gmra.mxu2 %vm4426_vm4, %v4181_v46  ;;  %v6693_v16 = vld [vmem:[%s13019_s8 + $0x710] sm:$0xff] }
 0x64e   :  { %4652 = vmatpush.msra.mxu3 %v4206_v26  ;;  %v6627_v26 = vld [vmem:[%s13019_s8 + $0x500] sm:$0xff] }
 0x64f   :  { %4675 = vmatpush.msrb.mxu0 %v4238_v50  ;;  %v6652_v50 = vld [vmem:[%s13019_s8 + $0x5c8] sm:$0xff] }
 0x650   :  { %4653 = vmatpush.msra.mxu3 %v4204_v41 }
 0x651   :  { %4676 = vmatpush.msrb.mxu0 %v4236_v31  ;;  %4541 = vmatmul.f32.vlgmr.msrb.gmra.mxu3 %v12143_v52  ;;  %v6643_v52 = vld [vmem:[%s13019_s8 + $0x580] sm:$0xff] }
 0x652   :  { %6612 = vmatmul.msk.f32.vlgmr.msra.gmra.mxu0 %vm4426_vm4, %v4181_v46  ;;  %4654 = vmatpush.msra.mxu3 %v4202_v39  ;;  %v6691_v39 = vld [vmem:[%s13019_s8 + $0x700] sm:$0xff] }
 0x653   :  { %4677 = vmatpush.msrb.mxu0 %v4234_v62  ;;  %v6677_v62 = vld [vmem:[%s13019_s8 + $0x690] sm:$0xff] }
 0x654   :  { %4655 = vmatpush.msra.mxu3 %v4200_v34  ;;  %v6650_v34 = vld [vmem:[%s13019_s8 + $0x5b8] sm:$0xff] }
 0x655   :  { %4678 = vmatpush.msrb.mxu0 %v4232_v40  ;;  %6615 = vmatmul.msk.f32.gmra.mxu2 %vm4426_vm4, %v4184_v24  ;;  %v6690_v40 = vld [vmem:[%s13019_s8 + $0x6f8] sm:$0xff] }
 0x656   :  { %4656 = vmatpush.msra.mxu3 %v4198_v57 }
 0x657   :  { %4679 = vmatpush.msrb.mxu0 %v4230_v53 }
 0x658   :  { %4657 = vmatpush.msra.mxu3 %v4196_v18 }
 0x659   :  { %4680 = vmatpush.msrb.mxu0 %v4228_v47  ;;  %4544 = vmatmul.f32.gmra.mxu3 %v12161_v20  ;;  %v6637_v20 = vld [vmem:[%s13019_s8 + $0x550] sm:$0xff]  ;;  %v6675_v47 = vld [vmem:[%s13019_s8 + $0x680] sm:$0xff] }
 0x65a   :  { %6613 = vmatmul.msk.f32.gmra.mxu0 %vm4426_vm4, %v4184_v24  ;;  %4658 = vmatpush.msra.mxu3 %v4194_v6  ;;  %v6706_v24 = vld [vmem:[%s13019_s8 + $0x778] sm:$0xff]  ;;  %v6648_v6 = vld [vmem:[%s13019_s8 + $0x5a8] sm:$0xff] }
 0x65b   :  { %4681 = vmatpush.msrb.mxu0 %v4226_v17  ;;  %v6688_v17 = vld [vmem:[%s13019_s8 + $0x6e8] sm:$0xff] }
 0x65c   :  { %4659 = vmatpush.msra.mxu3 %v4192_v29 }
 0x65d   :  { %4682 = vmatpush.msrb.mxu0 %v4224_v21  ;;  %6622 = vmatmul.msk.f32.vlgmr.msra.gmra.mxu2 %vm4102_vm3, %v12209_v2 }
 0x65e   :  { %4660 = vmatpush.msra.mxu3 %v4190_v7  ;;  %v6704_v7 = vld [vmem:[%s13019_s8 + $0x768] sm:$0xff] }
 0x65f   :  { %4683 = vmatpush.msrb.mxu0 %v4222_v61  ;;  %v6673_v61 = vld [vmem:[%s13019_s8 + $0x670] sm:$0xff] }
 0x660   :  { %4661 = vmatpush.msra.mxu3 %v4188_v5  ;;  %v6646_v5 = vld [vmem:[%s13019_s8 + $0x598] sm:$0xff] }
 0x661   :  { %4684 = vmatpush.msrb.mxu0 %v4220_v30  ;;  %4662 = vmatmul.f32.vlgmr.msra.gmra.mxu3 %v12170_v1  ;;  %v6635_v1 = vld [vmem:[%s13019_s8 + $0x540] sm:$0xff]  ;;  %v6686_v30 = vld [vmem:[%s13019_s8 + $0x6d8] sm:$0xff] }
 0x662   :  { %6624 = vmatpush.msk.msrb.mxu3 %vm94_vm0, %v11751_v13  ;;  %4685 = vmatmul.f32.vlgmr.msrb.gmra.mxu0 %v12137_v45 }
 0x663   :  { %4903 = vmatpush.msra.mxu0 %v6689_v3  ;;  %v6696_v3 = vld [vmem:[%s13019_s8 + $0x728] sm:$0xff] }
 0x664   :  { %4784 = vmatpush.msrb.mxu3 %v11757_v27  ;;  %v6655_v27 = vld [vmem:[%s13019_s8 + $0x5e0] sm:$0xff] }
 0x665   :  { %6623 = vmatmul.msk.f32.gmra.mxu2 %vm4102_vm3, %v6617_v54  ;;  %4881 = vmatpush.msrb.mxu1 %v6655_v27 }
 0x666   :  { %4785 = vmatpush.msrb.mxu3 %v11761_v33  ;;  %v6653_v33 = vld [vmem:[%s13019_s8 + $0x5d0] sm:$0xff]  ;;  %4904 = vmatpush.msra.mxu0 %v6687_v12  ;;  %v6678_v12 = vld [vmem:[%s13019_s8 + $0x698] sm:$0xff] }
 0x667   :  { %4882 = vmatpush.msrb.mxu1 %v6653_v33  ;;  %v6671_v33 = vld [vmem:[%s13019_s8 + $0x660] sm:$0xff] }
 0x668   :  { %4905 = vmatpush.msra.mxu0 %v6685_v44  ;;  %4949 = vmatpush.msra.mxu3 %v6658_v35  ;;  %v6636_v44 = vld [vmem:[%s13019_s8 + $0x548] sm:$0xff] }
 0x669   :  { %4665 = vmatmul.f32.gmra.mxu3 %v12185_v38  ;;  %4883 = vmatpush.msrb.mxu1 %v6651_v14  ;;  %v6633_v38 = vld [vmem:[%s13019_s8 + $0x530] sm:$0xff]  ;;  %v6684_v14 = vld [vmem:[%s13019_s8 + $0x6c8] sm:$0xff] }
 0x66a   :  { %4688 = vmatmul.f32.gmra.mxu0 %v12149_v49  ;;  %v6705_v49 = vld [vmem:[%s13019_s8 + $0x770] sm:$0xff]  ;;  %4950 = vmatpush.msra.mxu3 %v6656_v36  ;;  %v6676_v35 = vld [vmem:[%s13019_s8 + $0x688] sm:$0xff] }
 0x66b   :  { %4884 = vmatpush.msrb.mxu1 %v6649_v58  ;;  %4934 = vmatpush.msrb.mxu2 %v6705_v49  ;;  %v6667_v49 = vld [vmem:[%s13019_s8 + $0x640] sm:$0xff] }
 0x66c   :  { %4906 = vmatpush.msra.mxu0 %v6683_v28  ;;  %4951 = vmatpush.msra.mxu3 %v6654_v37  ;;  %v6661_v28 = vld [vmem:[%s13019_s8 + $0x610] sm:$0xff]  ;;  %v6672_v37 = vld [vmem:[%s13019_s8 + $0x668] sm:$0xff] }
 0x66d   :  { %4885 = vmatpush.msrb.mxu1 %v6647_v55  ;;  %4935 = vmatpush.msrb.mxu2 %v6703_v32  ;;  %v6700_v55 = vld [vmem:[%s13019_s8 + $0x748] sm:$0xff] }
 0x66e   :  { %4907 = vmatpush.msra.mxu0 %v6681_v60  ;;  %4952 = vmatpush.msra.mxu3 %v6652_v50  ;;  %v6668_v50 = vld [vmem:[%s13019_s8 + $0x648] sm:$0xff] }
 0x66f   :  { %4886 = vmatpush.msrb.mxu1 %v6645_v25  ;;  %4936 = vmatpush.msrb.mxu2 %v6701_v22  ;;  %v6669_v25 = vld [vmem:[%s13019_s8 + $0x650] sm:$0xff] }
 0x670   :  { %4953 = vmatpush.msra.mxu3 %v6650_v34  ;;  %v6665_v22 = vld [vmem:[%s13019_s8 + $0x630] sm:$0xff]  ;;  %v6664_v34 = vld [vmem:[%s13019_s8 + $0x628] sm:$0xff] }
 0x671   :  { %6625 = vmatmul.msk.f32.vlgmr.msrb.gmra.mxu3 %vm4102_vm3, %v12209_v2  ;;  %4887 = vmatpush.msrb.mxu1 %v6643_v52  ;;  %v6698_v52 = vld [vmem:[%s13019_s8 + $0x738] sm:$0xff] }
 0x672   :  { %4937 = vmatpush.msrb.mxu2 %v6699_v63  ;;  %4954 = vmatpush.msra.mxu3 %v6648_v6 }
 0x673   :  { %4888 = vmatpush.msrb.mxu1 %v6641_v19 }
 0x674   :  { %4938 = vmatpush.msrb.mxu2 %v6697_v0  ;;  %4955 = vmatpush.msra.mxu3 %v6646_v5 }
 0x675   :  { %4889 = vmatpush.msrb.mxu1 %v6639_v10  ;;  %v6680_v10 = vld [vmem:[%s13019_s8 + $0x6a8] sm:$0xff] }
 0x676   :  { %4939 = vmatpush.msrb.mxu2 %v6695_v9  ;;  %v6659_v9 = vld [vmem:[%s13019_s8 + $0x600] sm:$0xff] }
 0x677   :  { %4890 = vmatpush.msrb.mxu1 %v6637_v20 }
 0x678   :  { %4940 = vmatpush.msrb.mxu2 %v6693_v16  ;;  %v6670_v16 = vld [vmem:[%s13019_s8 + $0x658] sm:$0xff] }
 0x679   :  { %6626 = vmatmul.msk.f32.gmra.mxu3 %vm4102_vm3, %v6617_v54  ;;  %4891 = vmatpush.msrb.mxu1 %v6635_v1  ;;  %v6679_v54 = vld [vmem:[%s13019_s8 + $0x6a0] sm:$0xff]  ;;  %v6638_v1 = vld [vmem:[%s13019_s8 + $0x558] sm:$0xff] }
 0x67a   :  { %4908 = vmatpush.msra.mxu0 %v6679_v54  ;;  %4941 = vmatpush.msrb.mxu2 %v6691_v39  ;;  %v6628_v54 = vld [vmem:[%s13019_s8 + $0x508] sm:$0xff]  ;;  %v6666_v39 = vld [vmem:[%s13019_s8 + $0x638] sm:$0xff] }
 0x67b   :  { %4892 = vmatpush.msrb.mxu1 %v6633_v38  ;;  %v6663_v38 = vld [vmem:[%s13019_s8 + $0x620] sm:$0xff] }
 0x67c   :  { %4909 = vmatpush.msra.mxu0 %v6677_v62  ;;  %4972 = vmatpush.msra.mxu2 %v6690_v40  ;;  %v6660_v40 = vld [vmem:[%s13019_s8 + $0x608] sm:$0xff] }
 0x67d   :  { %4893 = vmatpush.msrb.mxu1 %v6631_v11  ;;  %v6692_v11 = vld [vmem:[%s13019_s8 + $0x708] sm:$0xff] }
 0x67e   :  { %4910 = vmatpush.msra.mxu0 %v6675_v47  ;;  %4973 = vmatpush.msra.mxu2 %v6688_v17 }
 0x67f   :  { %v4450_v15 = vpop.f32.mrf.mxu0  ;;  %4894 = vmatpush.msrb.mxu1 %v6629_v8  ;;  %v6632_v8 = vld [vmem:[%s13019_s8 + $0x528] sm:$0xff] }
 0x680   :  { %v12314_v13 = vpop.f32.mrf.mxu1  ;;  %4911 = vmatpush.msra.mxu0 %v6673_v61  ;;  %4974 = vmatpush.msra.mxu2 %v6686_v30 }
 0x681   :  { %4895 = vmatpush.msrb.mxu1 %v6627_v26 }
 0x682   :  { %4912 = vmatpush.msra.mxu0 %v6671_v33  ;;  %4975 = vmatpush.msra.mxu2 %v6684_v14  ;;  %v6734_v33 = vld [vmem:[%s13022_s11 + $0x110] sm:$0xff]  ;;  %v6732_v14 = vld [vmem:[%s13022_s11 + $0x100] sm:$0xff] }
 0x683   :  { %5003 = vmatpush.msra.mxu1 %v6706_v24 }
 0x684   :  { %4913 = vmatpush.msra.mxu0 %v6669_v25  ;;  %v6728_v25 = vld [vmem:[%s13022_s11 + $0xe0] sm:$0xff] }
 0x685   :  { %5004 = vmatpush.msra.mxu1 %v6704_v7 }
 0x686   :  { %4914 = vmatpush.msra.mxu0 %v6667_v49  ;;  %v6724_v49 = vld [vmem:[%s13022_s11 + $0xc0] sm:$0xff] }
 0x687   :  { %5005 = vmatpush.msra.mxu1 %v6702_v43 }
 0x688   :  { %v12325_v48 = vpop.f32.mrf.mxu1  ;;  %4915 = vmatpush.msra.mxu0 %v6665_v22  ;;  %v6721_v22 = vld [vmem:[%s13022_s11 + $0xa8] sm:$0xff] }
 0x689   :  { %5006 = vmatpush.msra.mxu1 %v6700_v55  ;;  %v6729_v55 = vld [vmem:[%s13022_s11 + $0xe8] sm:$0xff] }
 0x68a   :  { %v12341_v59 = vpop.f32.mrf.mxu0  ;;  %4916 = vmatpush.msra.mxu0 %v6663_v38 }
 0x68b   :  { %5007 = vmatpush.msra.mxu1 %v6698_v52  ;;  %v6725_v52 = vld [vmem:[%s13022_s11 + $0xc8] sm:$0xff] }
 0x68c   :  { %4917 = vmatpush.msra.mxu0 %v6661_v28 }
 0x68d   :  { %5008 = vmatpush.msra.mxu1 %v6696_v3 }
 0x68e   :  { %4918 = vmatpush.msra.mxu0 %v6659_v9 }
 0x6a4   :  { %v12339_v45 = vpop.f32.mrf.mxu1 }
 0x6ac   :  { %v12375_v4 = vpop.f32.mrf.mxu1 }
 0x6b0   :  { %v4473_v23 = vpop.f32.mrf.mxu2 }
 0x6b1   :  { %v4474_v56 = vadd.f32 %v4473_v23, %v4450_v15  ;;  %v6644_v15 = vld [vmem:[%s13019_s8 + $0x588] sm:$0xff] }
 0x6b2   :  { %4956 = vmatpush.msra.mxu3 %v6644_v15  ;;  %v6733_v15 = vld [vmem:[%s13022_s11 + $0x108] sm:$0xff] }
 0x6b8   :  { %v12352_v51 = vpop.f32.mrf.mxu2 }
 0x6b9   :  { %v4477_v29 = vadd.f32 %v12352_v51, %v12341_v59  ;;  %v6640_v51 = vld [vmem:[%s13019_s8 + $0x568] sm:$0xff] }
 0x6be   :  { %v12380_v42 = vpop.f32.mrf.mxu0 }
 0x6c0   :  { %v4594_v2 = vpop.f32.mrf.mxu2  ;;  %v12427_v31 = vpop.f32.mrf.mxu1 }
 0x6c1   :  { %4896 = vmatmul.f32.vlgmr.msrb.gmra.mxu1 %v12427_v31 }
 0x6c4   :  { %v4496_v46 = vpop.f32.mrf.mxu3 }
 0x6c5   :  { %v4497_v41 = vadd.f32 %v4496_v46, %v4474_v56  ;;  %v6642_v56 = vld [vmem:[%s13019_s8 + $0x578] sm:$0xff] }
 0x6c6   :  { %4957 = vmatpush.msra.mxu3 %v6642_v56  ;;  %v6727_v56 = vld [vmem:[%s13022_s11 + $0xd8] sm:$0xff] }
 0x6c7   :  { %v12442_v57 = vpop.f32.mrf.mxu0  ;;  %v4595_v53 = vadd.f32 %v4594_v2, %v4497_v41  ;;  %v6634_v2 = vld [vmem:[%s13019_s8 + $0x538] sm:$0xff] }
 0x6c8   :  { %v4597_v18 = vpop.f32.mrf.mxu2  ;;  %v12485_v23 = vpop.f32.mrf.mxu1  ;;  %4958 = vmatpush.msra.mxu3 %v6640_v51  ;;  %v6723_v51 = vld [vmem:[%s13022_s11 + $0xb8] sm:$0xff] }
 0x6c9   :  { %v12459_v21 = vadd.f32 %v12339_v45, %v4595_v53  ;;  %v6682_v45 = vld [vmem:[%s13019_s8 + $0x6b8] sm:$0xff]  ;;  %4899 = vmatmul.f32.gmra.mxu1 %v12485_v23 }
 0x6ca   :  { %4976 = vmatpush.msra.mxu2 %v6682_v45  ;;  %4959 = vmatpush.msra.mxu3 %v6638_v1  ;;  %v6726_v45 = vld [vmem:[%s13022_s11 + $0xd0] sm:$0xff] }
 0x6cc   :  { %v4499_v27 = vpop.f32.mrf.mxu3  ;;  %4977 = vmatpush.msra.mxu2 %v6680_v10  ;;  %4960 = vmatpush.msra.mxu3 %v6636_v44  ;;  %v6722_v10 = vld [vmem:[%s13022_s11 + $0xb0] sm:$0xff] }
 0x6cd   :  { %v4500_v58 = vadd.f32 %v4499_v27, %v4477_v29 }
 0x6ce   :  { %4978 = vmatpush.msra.mxu2 %v6678_v12  ;;  %4961 = vmatpush.msra.mxu3 %v6634_v2  ;;  %v6720_v12 = vld [vmem:[%s13022_s11 + $0xa0] sm:$0xff] }
 0x6cf   :  { %v4598_v59 = vadd.f32 %v4597_v18, %v4500_v58  ;;  %v12514_v32 = vpop.f32.mrf.mxu0  ;;  %v6731_v58 = vld [vmem:[%s13022_s11 + $0xf8] sm:$0xff] }
 0x6d0   :  { %v12502_v19 = vpop.f32.mrf.mxu2  ;;  %4979 = vmatpush.msra.mxu2 %v6676_v35  ;;  %4962 = vmatpush.msra.mxu3 %v6632_v8  ;;  %v5022_v35 = vld [vmem:[%s13020_s9] sm:$0x3] }
 0x6d1   :  { %v12517_v20 = vadd.f32 %v12375_v4, %v4598_v59  ;;  %v6694_v4 = vld [vmem:[%s13019_s8 + $0x718] sm:$0xff] }
 0x6d2   :  { %5009 = vmatpush.msra.mxu1 %v6694_v4 }
 0x6d4   :  { %v4542_v63 = vpop.f32.mrf.mxu3  ;;  %5010 = vmatpush.msra.mxu1 %v6692_v11 }
 0x6d5   :  { %v4543_v0 = vadd.f32 %v4542_v63, %v12314_v13  ;;  %v6674_v13 = vld [vmem:[%s13019_s8 + $0x678] sm:$0xff] }
 0x6d6   :  { %4980 = vmatpush.msra.mxu2 %v6674_v13  ;;  %v5024_v13 = vperm.slane %v5022_v35, 0 }
 0x6d7   :  { %v4566_v36 = vadd.f32 %v12380_v42, %v4543_v0  ;;  %v6630_v42 = vld [vmem:[%s13019_s8 + $0x518] sm:$0xff]  ;;  %v12572_v46 = vpop.f32.mrf.mxu0  ;;  %v4641_v0 = vadd.f32 %v12514_v32, %v12459_v21  ;;  %v5036_v21 = vld [vmem:[%s13021_s10] sm:$0x3] }
 0x6d8   :  { %v4712_v60 = vpop.f32.mrf.mxu2  ;;  %4981 = vmatpush.msra.mxu2 %v6672_v37  ;;  %4963 = vmatpush.msra.mxu3 %v6630_v42  ;;  %v4644_v28 = vadd.f32 %v12572_v46, %v12517_v20 }
 0x6da   :  { %4982 = vmatpush.msra.mxu2 %v6670_v16  ;;  %4964 = vmatpush.msra.mxu3 %v6628_v54 }
 0x6db   :  { %4965 = vmatmul.f32.vlgmr.msra.gmra.mxu3 %v12427_v31 }
 0x6dc   :  { %v4545_v26 = vpop.f32.mrf.mxu3  ;;  %4983 = vmatpush.msra.mxu2 %v6668_v50 }
 0x6dd   :  { %v4546_v41 = vadd.f32 %v4545_v26, %v12325_v48  ;;  %v6662_v48 = vld [vmem:[%s13019_s8 + $0x618] sm:$0xff] }
 0x6de   :  { %4984 = vmatpush.msra.mxu2 %v6666_v39  ;;  %v6715_v39 = vld [vmem:[%s13021_s10 + $0x2] sm:$0x3] }
 0x6df   :  { %v4686_v53 = vpop.f32.mrf.mxu0  ;;  %v4569_v17 = vadd.f32 %v12442_v57, %v4546_v41  ;;  %v6735_v57 = vld [vmem:[%s13022_s11 + $0x118] sm:$0xff] }
 0x6e0   :  { %v4764_v62 = vpop.f32.mrf.mxu2  ;;  %4985 = vmatpush.msra.mxu2 %v6664_v34 }
 0x6e1   :  { %4919 = vmatmul.f32.vlgmr.msra.gmra.mxu0 %v4764_v62 }
 0x6e2   :  { %4986 = vmatpush.msra.mxu2 %v6662_v48  ;;  %v5025_v48 = vperm.slane %v5022_v35, 1  ;;  %v6759_v35 = vld [vmem:[%s13022_s11 + $0x1a0] sm:$0xff] }
 0x6e3   :  { %4968 = vmatmul.f32.gmra.mxu3 %v12485_v23  ;;  %v6730_v23 = vld [vmem:[%s13022_s11 + $0xf0] sm:$0xff] }
 0x6e4   :  { %v4663_v24 = vpop.f32.mrf.mxu3  ;;  %4987 = vmatpush.msra.mxu2 %v6660_v40 }
 0x6e5   :  { %v4664_v31 = vadd.f32 %v4663_v24, %v4566_v36 }
 0x6e7   :  { %v4687_v18 = vadd.f32 %v4686_v53, %v4664_v31  ;;  %v4689_v61 = vpop.f32.mrf.mxu0 }
 0x6e8   :  { %v4767_v47 = vpop.f32.mrf.mxu2 }
 0x6e9   :  { %4922 = vmatmul.f32.gmra.mxu0 %v4767_v47  ;;  %v12596_v6 = vadd.f32 %v12502_v19, %v4687_v18 }
 0x6ec   :  { %v4666_v29 = vpop.f32.mrf.mxu3 }
 0x6ed   :  { %v4667_v7 = vadd.f32 %v4666_v29, %v4569_v17  ;;  %v5107_v17 = vld [vmem:[%s13022_s11 + $0x98] sm:$0xff]  ;;  %v6738_v29 = vld [vmem:[%s13022_s11 + $0x130] sm:$0xff] }
 0x6ef   :  { %v4690_v5 = vadd.f32 %v4689_v61, %v4667_v7  ;;  %v5106_v7 = vld [vmem:[%s13022_s11 + $0x90] sm:$0xff]  ;;  %v6737_v61 = vld [vmem:[%s13022_s11 + $0x128] sm:$0xff] }
 0x6f1   :  { %v12599_v30 = vadd.f32 %v4712_v60, %v4690_v5  ;;  %v5105_v5 = vld [vmem:[%s13022_s11 + $0x88] sm:$0xff] }
 0x6f4   :  { %v4787_v43 = vpop.f32.mrf.mxu3 }
 0x6f5   :  { %6707 = vmatmul.msk.f32.vlgmr.msrb.gmra.mxu2 %vm4426_vm4, %v4787_v43  ;;  %6709 = vmatmul.msk.f32.vlgmr.msra.gmra.mxu1 %vm4426_vm4, %v4787_v43  ;;  %v5104_v43 = vld [vmem:[%s13022_s11 + $0x80] sm:$0xff] }
 0x6f6   :  { %5178 = vmatpush.msrb.mxu2 %v6735_v57  ;;  %v5102_v57 = vld [vmem:[%s13022_s11 + $0x70] sm:$0xff] }
 0x6f8   :  { %5179 = vmatpush.msrb.mxu2 %v6734_v33  ;;  %v5101_v33 = vld [vmem:[%s13022_s11 + $0x68] sm:$0xff] }
 0x6fa   :  { %5180 = vmatpush.msrb.mxu2 %v6733_v15  ;;  %v5100_v15 = vld [vmem:[%s13022_s11 + $0x60] sm:$0xff] }
 0x6fc   :  { %v4790_v27 = vpop.f32.mrf.mxu3  ;;  %5181 = vmatpush.msrb.mxu2 %v6732_v14  ;;  %v5099_v14 = vld [vmem:[%s13022_s11 + $0x58] sm:$0xff] }
 0x6fd   :  { %6708 = vmatmul.msk.f32.gmra.mxu2 %vm4426_vm4, %v4790_v27  ;;  %6710 = vmatmul.msk.f32.gmra.mxu1 %vm4426_vm4, %v4790_v27  ;;  %v5103_v27 = vld [vmem:[%s13022_s11 + $0x78] sm:$0xff] }
 0x6fe   :  { %5182 = vmatpush.msrb.mxu2 %v6731_v58  ;;  %v5098_v58 = vld [vmem:[%s13022_s11 + $0x50] sm:$0xff] }
 0x700   :  { %5183 = vmatpush.msrb.mxu2 %v6730_v23  ;;  %v5097_v23 = vld [vmem:[%s13022_s11 + $0x48] sm:$0xff] }
 0x702   :  { %5184 = vmatpush.msrb.mxu2 %v6729_v55  ;;  %v5096_v55 = vld [vmem:[%s13022_s11 + $0x40] sm:$0xff] }
 0x704   :  { %5185 = vmatpush.msrb.mxu2 %v6728_v25  ;;  %v5095_v25 = vld [vmem:[%s13022_s11 + $0x38] sm:$0xff] }
 0x705   :  { %4988 = vmatmul.f32.vlgmr.msra.gmra.mxu2 %v4764_v62 }
 0x706   :  { %5186 = vmatpush.msrb.mxu2 %v6727_v56  ;;  %v5094_v56 = vld [vmem:[%s13022_s11 + $0x30] sm:$0xff] }
 0x708   :  { %5187 = vmatpush.msrb.mxu2 %v6726_v45  ;;  %v5093_v45 = vld [vmem:[%s13022_s11 + $0x28] sm:$0xff] }
 0x70a   :  { %5188 = vmatpush.msrb.mxu2 %v6725_v52  ;;  %v5091_v52 = vld [vmem:[%s13022_s11 + $0x18] sm:$0xff] }
 0x70c   :  { %5189 = vmatpush.msrb.mxu2 %v6724_v49  ;;  %v5089_v49 = vld [vmem:[%s13022_s11 + $0x8] sm:$0xff] }
 0x70d   :  { %4991 = vmatmul.f32.gmra.mxu2 %v4767_v47 }
 0x70e   :  { %5190 = vmatpush.msrb.mxu2 %v6723_v51  ;;  %v5088_v51 = vld [vmem:[%s13022_s11] sm:$0xff] }
 0x710   :  { %5191 = vmatpush.msrb.mxu2 %v6722_v10 }
 0x712   :  { %5192 = vmatpush.msrb.mxu2 %v6721_v22  ;;  %v12779_v22 = vld [vmem:[%s13021_s10 + $0x6] sm:$0x3] }
 0x714   :  { %5193 = vmatpush.msrb.mxu2 %v6720_v12 }
 0x73e   :  { %v4897_v19 = vpop.f32.mrf.mxu1 }
 0x746   :  { %v4900_v63 = vpop.f32.mrf.mxu1 }
 0x75e   :  { %v4920_v59 = vpop.f32.mrf.mxu0  ;;  %v4966_v37 = vpop.f32.mrf.mxu3 }
 0x75f   :  { %v4921_v1 = vadd.f32 %v4920_v59, %v4897_v19  ;;  %v5092_v59 = vld [vmem:[%s13022_s11 + $0x20] sm:$0xff]  ;;  %v5090_v19 = vld [vmem:[%s13022_s11 + $0x10] sm:$0xff] }
 0x766   :  { %v4923_v4 = vpop.f32.mrf.mxu0  ;;  %v4969_v46 = vpop.f32.mrf.mxu3 }
 0x767   :  { %v4924_v44 = vadd.f32 %v4923_v4, %v4900_v63  ;;  %v6761_v4 = vld [vmem:[%s13022_s11 + $0x1b0] sm:$0xff]  ;;  %v6760_v63 = vld [vmem:[%s13022_s11 + $0x1a8] sm:$0xff] }
 0x772   :  { %v5012_v16 = vpop.f32.mrf.mxu1 }
 0x778   :  { %v4943_v3 = vpop.f32.mrf.mxu2 }
 0x779   :  { %v4944_v38 = vadd.f32 %v4943_v3, %v4921_v1  ;;  %v6762_v1 = vld [vmem:[%s13022_s11 + $0x1b8] sm:$0xff] }
 0x77a   :  { %v5015_v62 = vpop.f32.mrf.mxu1 }
 0x77b   :  { %v5018_v2 = vadd.f32 %v4944_v38, %v4641_v0  ;;  %v6766_v38 = vld [vmem:[%s13022_s11 + $0x1d8] sm:$0xff]  ;;  %v6742_v0 = vld [vmem:[%s13021_s10 + $0x4] sm:$0x3] }
 0x77d   :  { %v5028_v8 = vadd.f32 %v5024_v13, %v5018_v2  ;;  %v6764_v2 = vld [vmem:[%s13022_s11 + $0x1c8] sm:$0xff] }
 0x77f   :  { %v12662_v54 = vmax.f32 %v5028_v8, 0.0  ;;  %v6755_v8 = vld [vmem:[%s13022_s11 + $0x180] sm:$0xff] }
 0x780   :  { %v4946_v11 = vpop.f32.mrf.mxu2 }
 0x781   :  { %v4947_v36 = vadd.f32 %v4946_v11, %v4924_v44  ;;  %v6765_v11 = vld [vmem:[%s13022_s11 + $0x1d0] sm:$0xff] }
 0x783   :  { %v5020_v9 = vadd.f32 %v4947_v36, %v4644_v28  ;;  %v6758_v28 = vld [vmem:[%s13022_s11 + $0x198] sm:$0xff]  ;;  %v6763_v36 = vld [vmem:[%s13022_s11 + $0x1c0] sm:$0xff] }
 0x785   :  { %v5030_v60 = vadd.f32 %v5024_v13, %v5020_v9  ;;  %v6757_v13 = vld [vmem:[%s13022_s11 + $0x190] sm:$0xff]  ;;  %v6756_v9 = vld [vmem:[%s13022_s11 + $0x188] sm:$0xff] }
 0x787   :  { %v12660_v42 = vmax.f32 %v5030_v60, 0.0  ;;  %v6754_v60 = vld [vmem:[%s13022_s11 + $0x178] sm:$0xff] }
 0x788   :  { %v4989_v26 = vpop.f32.mrf.mxu2 }
 0x789   :  { %6711 = vmatpush.msk.msrb.mxu0 %vm5041_vm5, %v12660_v42  ;;  %v4990_v32 = vadd.f32 %v4989_v26, %v4966_v37  ;;  %v6753_v37 = vld [vmem:[%s13022_s11 + $0x170] sm:$0xff]  ;;  %v6750_v26 = vld [vmem:[%s13022_s11 + $0x158] sm:$0xff] }
 0x78b   :  { %5063 = vmatpush.msrb.mxu0 %v12662_v54  ;;  %v5013_v20 = vadd.f32 %v5012_v16, %v4990_v32  ;;  %v6752_v16 = vld [vmem:[%s13022_s11 + $0x168] sm:$0xff]  ;;  %v6747_v32 = vld [vmem:[%s13022_s11 + $0x140] sm:$0xff] }
 0x78c   :  { %6712 = vmatmul.msk.f32.vlgmr.msrb.gmra.mxu0 %vm5037_vm6, %v5036_v21 }
 0x78d   :  { %6716 = vmatpush.msk.msra.mxu0 %vm5041_vm5, %v12660_v42  ;;  %v5019_v34 = vadd.f32 %v5013_v20, %v12596_v6  ;;  %v6739_v6 = vld [vmem:[%s13022_s11 + $0x138] sm:$0xff]  ;;  %v6794_v20 = vld [vmem:[%s13021_s10 + $0x8] sm:$0x3] }
 0x78f   :  { %5128 = vmatpush.msra.mxu0 %v12662_v54  ;;  %v5029_v24 = vadd.f32 %v5025_v48, %v5019_v34  ;;  %v6787_v34 = vld [vmem:[%s13022_s11 + $0x250] sm:$0xff] }
 0x790   :  { %v4992_v50 = vpop.f32.mrf.mxu2 }
 0x791   :  { %v4993_v41 = vadd.f32 %v4992_v50, %v4969_v46  ;;  %v12682_v47 = vmax.f32 %v5029_v24, 0.0  ;;  %5221 = vmatpush.msrb.mxu0 %v5103_v27  ;;  %v6814_v24 = vld [vmem:[%s13022_s11 + $0x2f8] sm:$0xff]  ;;  %v6783_v27 = vld [vmem:[%s13022_s11 + $0x230] sm:$0xff] }
 0x793   :  { %v5016_v40 = vadd.f32 %v5015_v62, %v4993_v41  ;;  %5222 = vmatpush.msrb.mxu0 %v5102_v57  ;;  %v6788_v62 = vld [vmem:[%s13022_s11 + $0x258] sm:$0xff]  ;;  %v6790_v57 = vld [vmem:[%s13022_s11 + $0x268] sm:$0xff] }
 0x794   :  { %6717 = vmatmul.msk.f32.vlgmr.msra.gmra.mxu0 %vm5037_vm6, %v6715_v39 }
 0x795   :  { %v5021_v53 = vadd.f32 %v5016_v40, %v12599_v30  ;;  %v6736_v30 = vld [vmem:[%s13022_s11 + $0x120] sm:$0xff]  ;;  %5223 = vmatpush.msrb.mxu0 %v5101_v33  ;;  %v6786_v40 = vld [vmem:[%s13022_s11 + $0x248] sm:$0xff] }
 0x796   :  { %v6782_v33 = vld [vmem:[%s13022_s11 + $0x228] sm:$0xff] }
 0x797   :  { %v5031_v31 = vadd.f32 %v5025_v48, %v5021_v53  ;;  %5224 = vmatpush.msrb.mxu0 %v5100_v15  ;;  %v6789_v15 = vld [vmem:[%s13022_s11 + $0x260] sm:$0xff] }
 0x799   :  { %v12680_v18 = vmax.f32 %v5031_v31, 0.0  ;;  %5225 = vmatpush.msrb.mxu0 %v5099_v14  ;;  %v6813_v31 = vld [vmem:[%s13022_s11 + $0x2f0] sm:$0xff]  ;;  %v6781_v14 = vld [vmem:[%s13022_s11 + $0x220] sm:$0xff] }
 0x79b   :  { %6713 = vmatpush.msk.msrb.mxu3 %vm5041_vm5, %v12680_v18  ;;  %6718 = vmatpush.msk.msrb.mxu1 %vm5041_vm5, %v12680_v18 }
 0x79c   :  { %6771 = vmatpush.msk.msra.mxu2 %vm5041_vm5, %v12680_v18  ;;  %5226 = vmatpush.msrb.mxu0 %v5098_v58  ;;  %v6780_v58 = vld [vmem:[%s13022_s11 + $0x218] sm:$0xff] }
 0x79d   :  { %5083 = vmatpush.msrb.mxu3 %v12682_v47  ;;  %5148 = vmatpush.msrb.mxu1 %v12682_v47 }
 0x79e   :  { %5411 = vmatpush.msra.mxu2 %v12682_v47  ;;  %6714 = vmatmul.msk.f32.vlgmr.msrb.gmra.mxu3 %vm5037_vm6, %v5036_v21  ;;  %v6748_v21 = vld [vmem:[%s13022_s11 + $0x148] sm:$0xff] }
 0x79f   :  { %6719 = vmatmul.msk.f32.vlgmr.msrb.gmra.mxu1 %vm5037_vm6, %v6715_v39  ;;  %5210 = vmatpush.msra.mxu3 %v6739_v6  ;;  %v6785_v6 = vld [vmem:[%s13022_s11 + $0x240] sm:$0xff] }
 0x7a0   :  { %5253 = vmatpush.msra.mxu1 %v5107_v17  ;;  %5227 = vmatpush.msrb.mxu0 %v5097_v23  ;;  %v6779_v23 = vld [vmem:[%s13022_s11 + $0x210] sm:$0xff] }
 0x7a1   :  { %5211 = vmatpush.msra.mxu3 %v6738_v29  ;;  %v6812_v29 = vld [vmem:[%s13022_s11 + $0x2e8] sm:$0xff] }
 0x7a2   :  { %5254 = vmatpush.msra.mxu1 %v5106_v7  ;;  %5228 = vmatpush.msrb.mxu0 %v5096_v55  ;;  %v6792_v7 = vld [vmem:[%s13022_s11 + $0x278] sm:$0xff]  ;;  %v6778_v55 = vld [vmem:[%s13022_s11 + $0x208] sm:$0xff] }
 0x7a3   :  { %5212 = vmatpush.msra.mxu3 %v6737_v61 }
 0x7a4   :  { %5255 = vmatpush.msra.mxu1 %v5105_v5  ;;  %5229 = vmatpush.msrb.mxu0 %v5095_v25  ;;  %v6784_v5 = vld [vmem:[%s13022_s11 + $0x238] sm:$0xff] }
 0x7a5   :  { %5213 = vmatpush.msra.mxu3 %v6736_v30 }
 0x7a6   :  { %5256 = vmatpush.msra.mxu1 %v5104_v43  ;;  %5230 = vmatpush.msrb.mxu0 %v5094_v56  ;;  %v6791_v43 = vld [vmem:[%s13022_s11 + $0x270] sm:$0xff]  ;;  %v6811_v56 = vld [vmem:[%s13022_s11 + $0x2e0] sm:$0xff] }
 0x7a7   :  { %6743 = vmatpush.msk.msrb.mxu3 %vm5041_vm5, %v12660_v42 }
 0x7a8   :  { %6745 = vmatpush.msk.msrb.mxu1 %vm5041_vm5, %v12680_v18  ;;  %5231 = vmatpush.msrb.mxu0 %v5093_v45  ;;  %v6810_v45 = vld [vmem:[%s13022_s11 + $0x2d8] sm:$0xff] }
 0x7a9   :  { %5281 = vmatpush.msrb.mxu3 %v12662_v54 }
 0x7aa   :  { %5301 = vmatpush.msrb.mxu1 %v12682_v47  ;;  %5232 = vmatpush.msrb.mxu0 %v5092_v59  ;;  %v6775_v59 = vld [vmem:[%s13022_s11 + $0x1f0] sm:$0xff] }
 0x7ac   :  { %5233 = vmatpush.msrb.mxu0 %v5091_v52  ;;  %v6809_v52 = vld [vmem:[%s13022_s11 + $0x2d0] sm:$0xff] }
 0x7ae   :  { %5234 = vmatpush.msrb.mxu0 %v5090_v19  ;;  %v6774_v19 = vld [vmem:[%s13022_s11 + $0x1e8] sm:$0xff] }
 0x7b0   :  { %5235 = vmatpush.msrb.mxu0 %v5089_v49  ;;  %v6808_v49 = vld [vmem:[%s13022_s11 + $0x2c8] sm:$0xff] }
 0x7b2   :  { %5236 = vmatpush.msrb.mxu0 %v5088_v51  ;;  %v6773_v51 = vld [vmem:[%s13022_s11 + $0x1e0] sm:$0xff] }
 0x7b4   :  { %5440 = vmatpush.msra.mxu0 %v6788_v62  ;;  %v6838_v62 = vld [vmem:[%s13023_s12] ss:$0 sm:$0xff] }
 0x7b6   :  { %5441 = vmatpush.msra.mxu0 %v6787_v34 }
 0x7b8   :  { %5442 = vmatpush.msra.mxu0 %v6786_v40 }
 0x7ba   :  { %5443 = vmatpush.msra.mxu0 %v6785_v6 }
 0x7bc   :  { %5444 = vmatpush.msra.mxu0 %v6784_v5 }
 0x7be   :  { %5445 = vmatpush.msra.mxu0 %v6783_v27 }
 0x7c0   :  { %5446 = vmatpush.msra.mxu0 %v6782_v33 }
 0x7c2   :  { %5447 = vmatpush.msra.mxu0 %v6781_v14 }
 0x7c4   :  { %5448 = vmatpush.msra.mxu0 %v6780_v58 }
 0x7c6   :  { %5449 = vmatpush.msra.mxu0 %v6779_v23 }
 0x7c8   :  { %5450 = vmatpush.msra.mxu0 %v6778_v55 }
 0x809   :  { %v5065_v10 = vpop.f32.mrf.mxu0 }
 0x80a   :  { %5237 = vmatmul.f32.vlgmr.msrb.gmra.mxu0 %v5065_v10  ;;  %v6807_v10 = vld [vmem:[%s13022_s11 + $0x2c0] sm:$0xff] }
 0x811   :  { %v5130_v3 = vpop.f32.mrf.mxu0 }
 0x812   :  { %5194 = vmatmul.f32.vlgmr.msrb.gmra.mxu2 %v5130_v3  ;;  %v6806_v3 = vld [vmem:[%s13022_s11 + $0x2b8] sm:$0xff] }
 0x813   :  { %6795 = vmatpush.msk.msrb.mxu2 %vm5041_vm5, %v12660_v42 }
 0x815   :  { %5501 = vmatpush.msrb.mxu2 %v12662_v54 }
 0x81a   :  { %6772 = vmatmul.msk.f32.vlgmr.msra.gmra.mxu2 %vm5037_vm6, %v12779_v22 }
 0x81b   :  { %5550 = vmatpush.msra.mxu2 %v6814_v24 }
 0x81c   :  { %v5150_v12 = vpop.f32.mrf.mxu1 }
 0x81d   :  { %6740 = vmatmul.msk.f32.vlgmr.msra.gmra.mxu3 %vm5174_vm7, %v5150_v12  ;;  %5551 = vmatpush.msra.mxu2 %v6813_v31  ;;  %v6803_v12 = vld [vmem:[%s13022_s11 + $0x2a0] sm:$0xff] }
 0x81e   :  { %5330 = vmatpush.msra.mxu3 %v6762_v1  ;;  %v6804_v1 = vld [vmem:[%s13022_s11 + $0x2a8] sm:$0xff] }
 0x81f   :  { %5552 = vmatpush.msra.mxu2 %v6812_v29 }
 0x820   :  { %5331 = vmatpush.msra.mxu3 %v6761_v4  ;;  %v6818_v4 = vld [vmem:[%s13022_s11 + $0x318] sm:$0xff] }
 0x821   :  { %v5085_v44 = vpop.f32.mrf.mxu3  ;;  %5553 = vmatpush.msra.mxu2 %v6811_v56 }
 0x822   :  { %6741 = vmatmul.msk.f32.vlgmr.msra.gmra.mxu1 %vm5174_vm7, %v5085_v44  ;;  %5332 = vmatpush.msra.mxu3 %v6760_v63  ;;  %v6802_v63 = vld [vmem:[%s13022_s11 + $0x298] sm:$0xff]  ;;  %v6816_v44 = vld [vmem:[%s13022_s11 + $0x308] sm:$0xff] }
 0x823   :  { %5362 = vmatpush.msra.mxu1 %v6766_v38  ;;  %6796 = vmatmul.msk.f32.vlgmr.msrb.gmra.mxu2 %vm5037_vm6, %v6794_v20  ;;  %v6817_v38 = vld [vmem:[%s13022_s11 + $0x310] sm:$0xff] }
 0x824   :  { %5333 = vmatpush.msra.mxu3 %v6759_v35  ;;  %5554 = vmatpush.msra.mxu2 %v6810_v45  ;;  %v6801_v35 = vld [vmem:[%s13022_s11 + $0x290] sm:$0xff] }
 0x825   :  { %6744 = vmatmul.msk.f32.vlgmr.msrb.gmra.mxu3 %vm5037_vm6, %v6742_v0  ;;  %5363 = vmatpush.msra.mxu1 %v6765_v11 }
 0x826   :  { %5334 = vmatpush.msra.mxu3 %v6758_v28  ;;  %5555 = vmatpush.msra.mxu2 %v6809_v52  ;;  %v6799_v28 = vld [vmem:[%s13022_s11 + $0x280] sm:$0xff] }
 0x827   :  { %5364 = vmatpush.msra.mxu1 %v6764_v2  ;;  %v6815_v2 = vld [vmem:[%s13022_s11 + $0x300] sm:$0xff] }
 0x828   :  { %5335 = vmatpush.msra.mxu3 %v6757_v13  ;;  %5556 = vmatpush.msra.mxu2 %v6808_v49 }
 0x829   :  { %5365 = vmatpush.msra.mxu1 %v6763_v36 }
 0x82a   :  { %6746 = vmatmul.msk.f32.vlgmr.msrb.gmra.mxu1 %vm5037_vm6, %v6742_v0  ;;  %5336 = vmatpush.msra.mxu3 %v6756_v9  ;;  %v6800_v0 = vld [vmem:[%s13022_s11 + $0x288] sm:$0xff] }
 0x82b   :  { %6769 = vmatpush.msk.msrb.mxu1 %vm5041_vm5, %v12660_v42  ;;  %v6751_v42 = vld [vmem:[%s13022_s11 + $0x160] sm:$0xff]  ;;  %5557 = vmatpush.msra.mxu2 %v6807_v10 }
 0x82c   :  { %5337 = vmatpush.msra.mxu3 %v6755_v8 }
 0x82d   :  { %5391 = vmatpush.msrb.mxu1 %v12662_v54  ;;  %v6749_v54 = vld [vmem:[%s13022_s11 + $0x150] sm:$0xff]  ;;  %5558 = vmatpush.msra.mxu2 %v6806_v3 }
 0x82e   :  { %5338 = vmatpush.msra.mxu3 %v6754_v60 }
 0x830   :  { %5339 = vmatpush.msra.mxu3 %v6753_v37 }
 0x832   :  { %5340 = vmatpush.msra.mxu3 %v6752_v16 }
 0x834   :  { %5341 = vmatpush.msra.mxu3 %v6751_v42  ;;  %v5600_v42 = vld [vmem:[%s13024_s13 + $0x18] sm:$0xff] }
 0x836   :  { %5342 = vmatpush.msra.mxu3 %v6750_v26  ;;  %v5599_v26 = vld [vmem:[%s13024_s13 + $0x10] sm:$0xff] }
 0x838   :  { %5343 = vmatpush.msra.mxu3 %v6749_v54  ;;  %v5598_v54 = vld [vmem:[%s13024_s13 + $0x8] sm:$0xff] }
 0x83a   :  { %5344 = vmatpush.msra.mxu3 %v6748_v21  ;;  %v5597_v21 = vld [vmem:[%s13024_s13] sm:$0xff]  ;;  %s6888_s13 = smov [#allocation2]  }
 0x83b   :  { %s5635_s24 = sshll.u32 %s6888_s13, 4  ;;  %s5636_s24 = int_to_ptr.vmem [resolvable:$true] %s5635_s24 }
 0x83c   :  { %5345 = vmatpush.msra.mxu3 %v6747_v32 }
 0x83e   :  { %5582 = vmatpush.msrb.mxu3 %v6818_v4 }
 0x840   :  { %5583 = vmatpush.msrb.mxu3 %v6817_v38 }
 0x842   :  { %5584 = vmatpush.msrb.mxu3 %v6816_v44 }
 0x844   :  { %5585 = vmatpush.msrb.mxu3 %v6815_v2 }
 0x887   :  { %v5238_v39 = vpop.f32.mrf.mxu0 }
 0x895   :  { %v5195_v46 = vpop.f32.mrf.mxu2 }
 0x89d   :  { %v5413_v25 = vpop.f32.mrf.mxu2 }
 0x89f   :  { %v5258_v50 = vpop.f32.mrf.mxu1 }
 0x8a0   :  { %v5215_v41 = vpop.f32.mrf.mxu3 }
 0x8a1   :  { %v5216_v48 = vadd.f32 %v5215_v41, %v5195_v46 }
 0x8a3   :  { %v5239_v53 = vadd.f32 %v5238_v39, %v5216_v48 }
 0x8a5   :  { %v12875_v17 = vadd.f32 %v5258_v50, %v5239_v53  ;;  %v6839_v53 = vld [vmem:[%s13025_s14] ss:$0 sm:$0xff] }
 0x8a6   :  { %v5503_v11 = vpop.f32.mrf.mxu2 }
 0x8a7   :  { %v5303_v61 = vpop.f32.mrf.mxu1 }
 0x8a8   :  { %v5283_v30 = vpop.f32.mrf.mxu3  ;;  %6767 = vmatmul.msk.f32.vlgmr.msra.gmra.mxu1 %vm5174_vm7, %v5303_v61 }
 0x8a9   :  { %5346 = vmatmul.f32.vlgmr.msra.gmra.mxu3 %v5283_v30  ;;  %5472 = vmatpush.msra.mxu1 %v6792_v7 }
 0x8ab   :  { %5473 = vmatpush.msra.mxu1 %v6791_v43 }
 0x8ad   :  { %5474 = vmatpush.msra.mxu1 %v6790_v57 }
 0x8af   :  { %5475 = vmatpush.msra.mxu1 %v6789_v15 }
 0x8b0   :  { %6770 = vmatmul.msk.f32.vlgmr.msrb.gmra.mxu1 %vm5037_vm6, %v12779_v22  ;;  %v6805_v22 = vld [vmem:[%s13022_s11 + $0x2b0] sm:$0xff] }
 0x8b1   :  { %6797 = vmatpush.msk.msrb.mxu1 %vm5041_vm5, %v12680_v18  ;;  %v6777_v18 = vld [vmem:[%s13022_s11 + $0x200] sm:$0xff]  ;;  %5559 = vmatpush.msra.mxu2 %v6805_v22 }
 0x8b2   :  { %5451 = vmatpush.msra.mxu0 %v6777_v18 }
 0x8b3   :  { %5521 = vmatpush.msrb.mxu1 %v12682_v47  ;;  %v6776_v47 = vld [vmem:[%s13022_s11 + $0x1f8] sm:$0xff]  ;;  %5560 = vmatpush.msra.mxu2 %v6804_v1 }
 0x8b4   :  { %5452 = vmatpush.msra.mxu0 %v6776_v47 }
 0x8b5   :  { %5561 = vmatpush.msra.mxu2 %v6803_v12 }
 0x8b6   :  { %5453 = vmatpush.msra.mxu0 %v6775_v59 }
 0x8b7   :  { %5562 = vmatpush.msra.mxu2 %v6802_v63 }
 0x8b8   :  { %6793 = vmatmul.msk.f32.vlgmr.msra.gmra.mxu1 %vm5174_vm7, %v5413_v25  ;;  %5454 = vmatpush.msra.mxu0 %v6774_v19 }
 0x8b9   :  { %5563 = vmatpush.msra.mxu2 %v6801_v35  ;;  %5620 = vmatpush.msra.mxu1 %v5600_v42 }
 0x8ba   :  { %5455 = vmatpush.msra.mxu0 %v6773_v51 }
 0x8bb   :  { %5564 = vmatpush.msra.mxu2 %v6800_v0  ;;  %5621 = vmatpush.msra.mxu1 %v5599_v26 }
 0x8bd   :  { %5565 = vmatpush.msra.mxu2 %v6799_v28  ;;  %5622 = vmatpush.msra.mxu1 %v5598_v54 }
 0x8be   :  { %5566 = vmatmul.f32.vlgmr.msra.gmra.mxu2 %v5503_v11 }
 0x8bf   :  { %5623 = vmatpush.msra.mxu1 %v5597_v21 }
 0x8c0   :  { %6798 = vmatmul.msk.f32.vlgmr.msrb.gmra.mxu1 %vm5037_vm6, %v6794_v20 }
 0x925   :  { %v5367_v13 = vpop.f32.mrf.mxu1 }
 0x92c   :  { %v5347_v36 = vpop.f32.mrf.mxu3 }
 0x92d   :  { %v5368_v9 = vadd.f32 %v5367_v13, %v5347_v36  ;;  %v5393_v8 = vpop.f32.mrf.mxu1 }
 0x92e   :  { %5456 = vmatmul.f32.vlgmr.msra.gmra.mxu0 %v5393_v8 }
 0x92f   :  { %v5370_v60 = vadd.f32 %v5368_v9, %v12875_v17 }
 0x935   :  { %v5477_v37 = vpop.f32.mrf.mxu1 }
 0x93d   :  { %v5523_v16 = vpop.f32.mrf.mxu1 }
 0x93e   :  { %6819 = vmatmul.msk.f32.vlgmr.msrb.gmra.mxu3 %vm5174_vm7, %v5523_v16 }
 0x941   :  { %v5567_v46 = vpop.f32.mrf.mxu2 }
 0x9ab   :  { %v5457_v32 = vpop.f32.mrf.mxu0 }
 0x9ac   :  { %v5478_v20 = vadd.f32 %v5477_v37, %v5457_v32 }
 0x9ae   :  { %v5480_v41 = vadd.f32 %v5478_v20, %v5370_v60 }
 0x9c1   :  { %v5587_v50 = vpop.f32.mrf.mxu3 }
 0x9c2   :  { %v5588_v39 = vadd.f32 %v5587_v50, %v5567_v46 }
 0x9c4   :  { %v5590_v34 = vadd.f32 %v5588_v39, %v5480_v41 }
 0x9c6   :  { %v5595_v48 = vadd.f32 %v6838_v62, %v5590_v34 }
 0x9c8   :  { %v5596_v40 = vmax.f32 %v5595_v48, 0.0 }
 0x9ca   :  { %6820 = vmatmul.msk.f32.vlgmr.msra.gmra.mxu1 %vm5174_vm7, %v5596_v40 }
 0xa47   :  { %v5625_v24 = vpop.f32.mrf.mxu1 }
 0xa48   :  { %v5626_v31 = vadd.f32 %v6839_v53, %v5625_v24 }
 0xa4a   :  { %5629 = vst.msk [vmem:[#allocation2] sm:$0x3] %vm5628_vm8, %v5626_v31 }
 0xa4b   :  { %5640 = dma.vmem_to_hbm [thread:$0]  %s5636_s24, 32, %s5638_s27, [#allocation3]  }
 0xa4c   :  { %6886 = dma.done.wait [#allocation3], 32  }
 0xa4d   :  { %6887 = vsyncadd [#allocation3], 4294967264 }
 0xa4e   :  { %5645 = vsyncpa [#allocation3], 1 }

</bundles_post_ra>
